<compile_context>
chip_gen: v7x
topology: tpu7x:2x2x1
jax: 0.10.0
libtpu: 0.0.40
codegen_flags: <defaults>
</compile_context>

<pallas_src>
import jax
import jax.numpy as jnp
from jax import lax
from jax.experimental import pallas as pl
from jax.experimental.pallas import tpu as pltpu

LN_EPS = 1e-5


def _layernorm(h, g, b):
    # Two-pass (centered) statistics — numerically safer than E[x^2]-E[x]^2.
    mu = jnp.mean(h, axis=-1, keepdims=True)
    d = h - mu
    var = jnp.mean(d * d, axis=-1, keepdims=True)
    return d * lax.rsqrt(var + LN_EPS) * g + b


def predictor_kernel(
    x1_ref, x2_ref,
    # feature extractor params
    w1_ref, b1_ref, g1_ref, be1_ref,
    w2_ref, b2_ref, g2_ref, be2_ref,
    w3_ref, b3_ref, g3_ref, be3_ref,
    # comparison head params (first Linear split into two halves for the concat)
    cw1a_ref, cw1b_ref, cb1_ref, cg1_ref, cbe1_ref,
    cw2_ref, cb2_ref, cg2_ref, cbe2_ref,
    cw3_ref, cb3_ref,
    out_ref,
):
    tm = x1_ref.shape[0]

    def lin(h, w_ref, b_ref):
        # bf16 operands, f32 MXU accumulation (astype is a no-op when h is
        # already bf16, e.g. layer 1).
        return (jnp.dot(h.astype(w_ref.dtype), w_ref[...],
                        preferred_element_type=jnp.float32)
                + b_ref[...])

    # Single Siamese pass: stack x1/x2 along the sublane (batch) axis.
    # Cast to bf16 BEFORE the concat: halves the temp / vst traffic.
    x = jnp.concatenate(
        [x1_ref[...].astype(jnp.bfloat16), x2_ref[...].astype(jnp.bfloat16)],
        axis=0)                                                   # [2*TM, code_dim] bf16

    h = jnp.maximum(_layernorm(lin(x, w1_ref, b1_ref), g1_ref[...], be1_ref[...]), 0.0)
    # Dropout(0.1) -> identity in eval mode
    h = jnp.maximum(_layernorm(lin(h, w2_ref, b2_ref), g2_ref[...], be2_ref[...]), 0.0)
    # Dropout(0.1) -> identity in eval mode
    h = jnp.maximum(_layernorm(lin(h, w3_ref, b3_ref), g3_ref[...], be3_ref[...]), 0.0)

    f1 = h[:tm]                                                   # [TM, 192]
    f2 = h[tm:]                                                   # [TM, 192]

    # comparison( cat([f1, f2], dim=1) ) — concat folded into a split matmul.
    c = (jnp.dot(f1.astype(cw1a_ref.dtype), cw1a_ref[...],
                 preferred_element_type=jnp.float32)
         + jnp.dot(f2.astype(cw1b_ref.dtype), cw1b_ref[...],
                   preferred_element_type=jnp.float32)
         + cb1_ref[...])
    c = jnp.maximum(_layernorm(c, cg1_ref[...], cbe1_ref[...]), 0.0)
    # Dropout(0.1) -> identity in eval mode
    c = jnp.maximum(_layernorm(lin(c, cw2_ref, cb2_ref), cg2_ref[...], cbe2_ref[...]), 0.0)

    # Final [*, 64] x [64, 1] projection as VPU mul + lane reduce (skip the MXU).
    logit = jnp.sum(c * cw3_ref[...], axis=-1, keepdims=True) + cb3_ref[...]
    out_ref[...] = jnp.tanh(logit)


def init_linear(key, fan_in, fan_out):
    """PyTorch nn.Linear default init (uniform +/- 1/sqrt(fan_in)), W as [in,out]."""
    kw, kb = jax.random.split(key)
    bound = 1.0 / (float(fan_in) ** 0.5)
    w = jax.random.uniform(kw, (fan_in, fan_out), jnp.float32, -bound, bound)
    b = jax.random.uniform(kb, (1, fan_out), jnp.float32, -bound, bound)
    return w, b


def init_layernorm(dim):
    return jnp.ones((1, dim), jnp.float32), jnp.zeros((1, dim), jnp.float32)


def make_params(key, code_dim=1536):
    keys = jax.random.split(key, 6)
    w1, b1 = init_linear(keys[0], code_dim, 768)
    g1, be1 = init_layernorm(768)
    w2, b2 = init_linear(keys[1], 768, 384)
    g2, be2 = init_layernorm(384)
    w3, b3 = init_linear(keys[2], 384, 192)
    g3, be3 = init_layernorm(192)

    cw1, cb1 = init_linear(keys[3], 384, 192)   # acts on cat([f1, f2]) of size 384
    cg1, cbe1 = init_layernorm(192)
    cw2, cb2 = init_linear(keys[4], 192, 64)
    cg2, cbe2 = init_layernorm(64)
    cw3, cb3 = init_linear(keys[5], 64, 1)

    # Split first comparison weight so the kernel avoids an explicit lane concat.
    cw1a, cw1b = cw1[:192, :], cw1[192:, :]

    bf16 = jnp.bfloat16
    fe = (w1.astype(bf16), b1, g1, be1,
          w2.astype(bf16), b2, g2, be2,
          w3.astype(bf16), b3, g3, be3)
    cmp_ = (cw1a.astype(bf16), cw1b.astype(bf16), cb1, cg1, cbe1,
            cw2.astype(bf16), cb2, cg2, cbe2,
            cw3.T, cb3)                         # cw3 as [1, 64] f32 row (VPU path)
    return dict(fe=fe, cmp=cmp_)


def _round_up(x, m):
    return -(-x // m) * m


def _hw_config():
    """Generation-aware tile size / VMEM cap."""
    try:
        vmem = pltpu.get_tpu_info().vmem_capacity_bytes
    except Exception:
        vmem = 64 << 20                          # conservative (v7x-like) default
    if vmem >= (100 << 20):                      # v5e / v6e: 128 MiB physical VMEM
        return 512, 96 << 20, False
    return 256, 48 << 20, True                   # v7x: 64 MiB per TensorCore


def performance_predictor(x1, x2, params, block_m=None):
    B, D = x1.shape
    default_tm, vmem_limit, small_vmem = _hw_config()
    if block_m is None:
        block_m = default_tm

    TM = min(block_m, _round_up(B, 8))
    grid_b = -(-B // TM)
    # v7x has 2 TensorCores: ensure the "parallel" batch axis has >=2 tiles
    # (when the batch is big enough) so both cores get work.
    if small_vmem and grid_b == 1 and B >= 16:
        TM = _round_up(-(-B // 2), 8)
        grid_b = -(-B // TM)

    B_pad = grid_b * TM
    if B_pad != B:
        pad = B_pad - B
        x1 = jnp.pad(x1, ((0, pad), (0, 0)))
        x2 = jnp.pad(x2, ((0, pad), (0, 0)))

    param_list = list(params["fe"]) + list(params["cmp"])

    def build_in_specs(single_buffer_params):
        specs = [
            pl.BlockSpec((TM, D), lambda i: (i, 0)),      # x1 tile (double-buffered)
            pl.BlockSpec((TM, D), lambda i: (i, 0)),      # x2 tile (double-buffered)
        ]
        for p in param_list:
            # Weights / biases / LN params: constant block index -> DMA'd once,
            # VMEM-resident across all grid steps.
            if single_buffer_params:
                specs.append(pl.BlockSpec(p.shape, lambda i: (0, 0),
                                          pipeline_mode=pl.Buffered(1)))
            else:
                specs.append(pl.BlockSpec(p.shape, lambda i: (0, 0)))
        return specs

    out_specs = pl.BlockSpec((TM, 1), lambda i: (i, 0))
    out_shape = jax.ShapeDtypeStruct((B_pad, 1), jnp.float32)

    def run(single_buffer_params):
        return pl.pallas_call(
            predictor_kernel,
            out_shape=out_shape,
            grid=(grid_b,),
            in_specs=build_in_specs(single_buffer_params),
            out_specs=out_specs,
            compiler_params=pltpu.CompilerParams(
                dimension_semantics=("parallel",),        # v7x: shard batch over 2 TCs
                vmem_limit_bytes=vmem_limit,
            ),
        )(x1, x2, *param_list)

    try:
        out = run(True)          # single-buffered constant params (saves ~3 MiB VMEM)
    except Exception:
        out = run(False)         # fallback if this build rejects Buffered(1)
    return out[:B]


def reference(x1, x2, params):
    """Pure-JAX reference mirroring the kernel's mixed-precision recipe
    (bf16 matmul operands, f32 accumulation, f32 LN/ReLU/Tanh)."""
    (w1, b1, g1, be1, w2, b2, g2, be2, w3, b3, g3, be3) = params["fe"]
    (cw1a, cw1b, cb1, cg1, cbe1, cw2, cb2, cg2, cbe2, cw3_row, cb3) = params["cmp"]

    def ln(h, g, b):
        mu = jnp.mean(h, axis=-1, keepdims=True)
        var = jnp.mean((h - mu) ** 2, axis=-1, keepdims=True)
        return (h - mu) / jnp.sqrt(var + LN_EPS) * g + b

    def mm(h, w):
        return jnp.dot(h.astype(w.dtype), w, preferred_element_type=jnp.float32)

    def feat(x):
        h = jnp.maximum(ln(mm(x, w1) + b1, g1, be1), 0.0)
        h = jnp.maximum(ln(mm(h, w2) + b2, g2, be2), 0.0)
        h = jnp.maximum(ln(mm(h, w3) + b3, g3, be3), 0.0)
        return h

    f1, f2 = feat(x1), feat(x2)
    h = jnp.maximum(ln(mm(f1, cw1a) + mm(f2, cw1b) + cb1, cg1, cbe1), 0.0)
    h = jnp.maximum(ln(mm(h, cw2) + cb2, cg2, cbe2), 0.0)
    return jnp.tanh(h @ cw3_row.T + cb3)


if __name__ == "__main__":
    B, CODE_DIM = 8, 1536
    key = jax.random.PRNGKey(0)
    kx1, kx2, kp = jax.random.split(key, 3)
    x1 = jax.random.normal(kx1, (B, CODE_DIM), jnp.float32)
    x2 = jax.random.normal(kx2, (B, CODE_DIM), jnp.float32)
    params = make_params(kp, CODE_DIM)

    out = performance_predictor(x1, x2, params)
    out = jax.block_until_ready(out)

    ref = reference(x1, x2, params)
    assert out.shape == (B, 1)
    assert bool(jnp.all(jnp.isfinite(out)))
    assert float(jnp.max(jnp.abs(out - ref))) < 5e-3, "mismatch vs reference"
    print("KERNEL_OK")
</pallas_src>

<mosaic_0001>
module attributes {stable_mosaic.version = 11 : i64} {
  func.func @predictor_kernel(%arg0: i32, %arg1: memref<8x1536xf32, #tpu.memory_space<vmem>>, %arg2: memref<8x1536xf32, #tpu.memory_space<vmem>>, %arg3: memref<1536x768xbf16, #tpu.memory_space<vmem>>, %arg4: memref<1x768xf32, #tpu.memory_space<vmem>>, %arg5: memref<1x768xf32, #tpu.memory_space<vmem>>, %arg6: memref<1x768xf32, #tpu.memory_space<vmem>>, %arg7: memref<768x384xbf16, #tpu.memory_space<vmem>>, %arg8: memref<1x384xf32, #tpu.memory_space<vmem>>, %arg9: memref<1x384xf32, #tpu.memory_space<vmem>>, %arg10: memref<1x384xf32, #tpu.memory_space<vmem>>, %arg11: memref<384x192xbf16, #tpu.memory_space<vmem>>, %arg12: memref<1x192xf32, #tpu.memory_space<vmem>>, %arg13: memref<1x192xf32, #tpu.memory_space<vmem>>, %arg14: memref<1x192xf32, #tpu.memory_space<vmem>>, %arg15: memref<192x192xbf16, #tpu.memory_space<vmem>>, %arg16: memref<192x192xbf16, #tpu.memory_space<vmem>>, %arg17: memref<1x192xf32, #tpu.memory_space<vmem>>, %arg18: memref<1x192xf32, #tpu.memory_space<vmem>>, %arg19: memref<1x192xf32, #tpu.memory_space<vmem>>, %arg20: memref<192x64xbf16, #tpu.memory_space<vmem>>, %arg21: memref<1x64xf32, #tpu.memory_space<vmem>>, %arg22: memref<1x64xf32, #tpu.memory_space<vmem>>, %arg23: memref<1x64xf32, #tpu.memory_space<vmem>>, %arg24: memref<1x64xf32, #tpu.memory_space<vmem>>, %arg25: memref<1x1xf32, #tpu.memory_space<vmem>>, %arg26: memref<8x1xf32, #tpu.memory_space<vmem>>) attributes {dimension_semantics = [#tpu.dimension_semantics<parallel>], iteration_bounds = array<i64: 1>, scalar_prefetch = 0 : i64, scratch_operands = 0 : i64, tpu.core_type = #tpu.core_type<tc>, window_params = [{transform_indices = @transform_0, window_bounds = array<i64: 8, 1536>}, {transform_indices = @transform_1, window_bounds = array<i64: 8, 1536>}, {pipeline_mode = #tpu.pipeline_mode<synchronous>, transform_indices = @transform_2, window_bounds = array<i64: 1536, 768>}, {pipeline_mode = #tpu.pipeline_mode<synchronous>, transform_indices = @transform_3, window_bounds = array<i64: 1, 768>}, {pipeline_mode = #tpu.pipeline_mode<synchronous>, transform_indices = @transform_4, window_bounds = array<i64: 1, 768>}, {pipeline_mode = #tpu.pipeline_mode<synchronous>, transform_indices = @transform_5, window_bounds = array<i64: 1, 768>}, {pipeline_mode = #tpu.pipeline_mode<synchronous>, transform_indices = @transform_6, window_bounds = array<i64: 768, 384>}, {pipeline_mode = #tpu.pipeline_mode<synchronous>, transform_indices = @transform_7, window_bounds = array<i64: 1, 384>}, {pipeline_mode = #tpu.pipeline_mode<synchronous>, transform_indices = @transform_8, window_bounds = array<i64: 1, 384>}, {pipeline_mode = #tpu.pipeline_mode<synchronous>, transform_indices = @transform_9, window_bounds = array<i64: 1, 384>}, {pipeline_mode = #tpu.pipeline_mode<synchronous>, transform_indices = @transform_10, window_bounds = array<i64: 384, 192>}, {pipeline_mode = #tpu.pipeline_mode<synchronous>, transform_indices = @transform_11, window_bounds = array<i64: 1, 192>}, {pipeline_mode = #tpu.pipeline_mode<synchronous>, transform_indices = @transform_12, window_bounds = array<i64: 1, 192>}, {pipeline_mode = #tpu.pipeline_mode<synchronous>, transform_indices = @transform_13, window_bounds = array<i64: 1, 192>}, {pipeline_mode = #tpu.pipeline_mode<synchronous>, transform_indices = @transform_14, window_bounds = array<i64: 192, 192>}, {pipeline_mode = #tpu.pipeline_mode<synchronous>, transform_indices = @transform_15, window_bounds = array<i64: 192, 192>}, {pipeline_mode = #tpu.pipeline_mode<synchronous>, transform_indices = @transform_16, window_bounds = array<i64: 1, 192>}, {pipeline_mode = #tpu.pipeline_mode<synchronous>, transform_indices = @transform_17, window_bounds = array<i64: 1, 192>}, {pipeline_mode = #tpu.pipeline_mode<synchronous>, transform_indices = @transform_18, window_bounds = array<i64: 1, 192>}, {pipeline_mode = #tpu.pipeline_mode<synchronous>, transform_indices = @transform_19, window_bounds = array<i64: 192, 64>}, {pipeline_mode = #tpu.pipeline_mode<synchronous>, transform_indices = @transform_20, window_bounds = array<i64: 1, 64>}, {pipeline_mode = #tpu.pipeline_mode<synchronous>, transform_indices = @transform_21, window_bounds = array<i64: 1, 64>}, {pipeline_mode = #tpu.pipeline_mode<synchronous>, transform_indices = @transform_22, window_bounds = array<i64: 1, 64>}, {pipeline_mode = #tpu.pipeline_mode<synchronous>, transform_indices = @transform_23, window_bounds = array<i64: 1, 64>}, {pipeline_mode = #tpu.pipeline_mode<synchronous>, transform_indices = @transform_24, window_bounds = array<i64: 1, 1>}, {transform_indices = @transform_25, window_bounds = array<i64: 8, 1>}]} {
    %c0 = arith.constant 0 : index
    %c0_0 = arith.constant 0 : index
    %0 = vector.load %arg1[%c0, %c0_0] : memref<8x1536xf32, #tpu.memory_space<vmem>>, vector<8x1536xf32>
    %1 = arith.truncf %0 : vector<8x1536xf32> to vector<8x1536xbf16>
    %c0_1 = arith.constant 0 : index
    %c0_2 = arith.constant 0 : index
    %2 = vector.load %arg2[%c0_1, %c0_2] : memref<8x1536xf32, #tpu.memory_space<vmem>>, vector<8x1536xf32>
    %3 = arith.truncf %2 : vector<8x1536xf32> to vector<8x1536xbf16>
    %4 = tpu.concatenate %1, %3 in 0 : vector<8x1536xbf16>, vector<8x1536xbf16> -> vector<16x1536xbf16>
    %c0_3 = arith.constant 0 : index
    %c0_4 = arith.constant 0 : index
    %5 = vector.load %arg3[%c0_3, %c0_4] : memref<1536x768xbf16, #tpu.memory_space<vmem>>, vector<1536x768xbf16>
    %cst = arith.constant dense<0.000000e+00> : vector<16x768xf32>
    %6 = tpu.matmul %4, %5, %cst {dimension_numbers = #tpu.dot_dimension_numbers<[1], [0], [0], [1], [0, 0, 1, 1], [], []>} : vector<16x1536xbf16>, vector<1536x768xbf16>, vector<16x768xf32> -> vector<16x768xf32>
    %c0_5 = arith.constant 0 : index
    %c0_6 = arith.constant 0 : index
    %7 = vector.load %arg4[%c0_5, %c0_6] : memref<1x768xf32, #tpu.memory_space<vmem>>, vector<1x768xf32>
    %8 = vector.broadcast %7 : vector<1x768xf32> to vector<16x768xf32>
    %9 = arith.addf %6, %8 : vector<16x768xf32>
    %c0_7 = arith.constant 0 : index
    %c0_8 = arith.constant 0 : index
    %10 = vector.load %arg5[%c0_7, %c0_8] : memref<1x768xf32, #tpu.memory_space<vmem>>, vector<1x768xf32>
    %c0_9 = arith.constant 0 : index
    %c0_10 = arith.constant 0 : index
    %11 = vector.load %arg6[%c0_9, %c0_10] : memref<1x768xf32, #tpu.memory_space<vmem>>, vector<1x768xf32>
    %cst_11 = arith.constant dense<0.000000e+00> : vector<16xf32>
    %12 = vector.multi_reduction <add>, %9, %cst_11 [1] : vector<16x768xf32> to vector<16xf32>
    %13 = vector.shape_cast %12 : vector<16xf32> to vector<16x1xf32>
    %cst_12 = arith.constant 7.680000e+02 : f32
    %14 = vector.broadcast %cst_12 : f32 to vector<16x1xf32>
    %15 = arith.divf %13, %14 : vector<16x1xf32>
    %16 = vector.broadcast %15 : vector<16x1xf32> to vector<16x768xf32>
    %17 = arith.subf %9, %16 : vector<16x768xf32>
    %18 = arith.mulf %17, %17 : vector<16x768xf32>
    %cst_13 = arith.constant dense<0.000000e+00> : vector<16xf32>
    %19 = vector.multi_reduction <add>, %18, %cst_13 [1] : vector<16x768xf32> to vector<16xf32>
    %20 = vector.shape_cast %19 : vector<16xf32> to vector<16x1xf32>
    %cst_14 = arith.constant 7.680000e+02 : f32
    %21 = vector.broadcast %cst_14 : f32 to vector<16x1xf32>
    %22 = arith.divf %20, %21 : vector<16x1xf32>
    %cst_15 = arith.constant 9.99999974E-6 : f32
    %23 = vector.broadcast %cst_15 : f32 to vector<16x1xf32>
    %24 = arith.addf %22, %23 : vector<16x1xf32>
    %25 = math.rsqrt %24 : vector<16x1xf32>
    %26 = vector.broadcast %25 : vector<16x1xf32> to vector<16x768xf32>
    %27 = arith.mulf %17, %26 : vector<16x768xf32>
    %28 = vector.broadcast %10 : vector<1x768xf32> to vector<16x768xf32>
    %29 = arith.mulf %27, %28 : vector<16x768xf32>
    %30 = vector.broadcast %11 : vector<1x768xf32> to vector<16x768xf32>
    %31 = arith.addf %29, %30 : vector<16x768xf32>
    %cst_16 = arith.constant 0.000000e+00 : f32
    %32 = vector.broadcast %cst_16 : f32 to vector<16x768xf32>
    %33 = arith.maximumf %31, %32 : vector<16x768xf32>
    %34 = arith.truncf %33 : vector<16x768xf32> to vector<16x768xbf16>
    %c0_17 = arith.constant 0 : index
    %c0_18 = arith.constant 0 : index
    %35 = vector.load %arg7[%c0_17, %c0_18] : memref<768x384xbf16, #tpu.memory_space<vmem>>, vector<768x384xbf16>
    %cst_19 = arith.constant dense<0.000000e+00> : vector<16x384xf32>
    %36 = tpu.matmul %34, %35, %cst_19 {dimension_numbers = #tpu.dot_dimension_numbers<[1], [0], [0], [1], [0, 0, 1, 1], [], []>} : vector<16x768xbf16>, vector<768x384xbf16>, vector<16x384xf32> -> vector<16x384xf32>
    %c0_20 = arith.constant 0 : index
    %c0_21 = arith.constant 0 : index
    %37 = vector.load %arg8[%c0_20, %c0_21] : memref<1x384xf32, #tpu.memory_space<vmem>>, vector<1x384xf32>
    %38 = vector.broadcast %37 : vector<1x384xf32> to vector<16x384xf32>
    %39 = arith.addf %36, %38 : vector<16x384xf32>
    %c0_22 = arith.constant 0 : index
    %c0_23 = arith.constant 0 : index
    %40 = vector.load %arg9[%c0_22, %c0_23] : memref<1x384xf32, #tpu.memory_space<vmem>>, vector<1x384xf32>
    %c0_24 = arith.constant 0 : index
    %c0_25 = arith.constant 0 : index
    %41 = vector.load %arg10[%c0_24, %c0_25] : memref<1x384xf32, #tpu.memory_space<vmem>>, vector<1x384xf32>
    %cst_26 = arith.constant dense<0.000000e+00> : vector<16xf32>
    %42 = vector.multi_reduction <add>, %39, %cst_26 [1] : vector<16x384xf32> to vector<16xf32>
    %43 = vector.shape_cast %42 : vector<16xf32> to vector<16x1xf32>
    %cst_27 = arith.constant 3.840000e+02 : f32
    %44 = vector.broadcast %cst_27 : f32 to vector<16x1xf32>
    %45 = arith.divf %43, %44 : vector<16x1xf32>
    %46 = vector.broadcast %45 : vector<16x1xf32> to vector<16x384xf32>
    %47 = arith.subf %39, %46 : vector<16x384xf32>
    %48 = arith.mulf %47, %47 : vector<16x384xf32>
    %cst_28 = arith.constant dense<0.000000e+00> : vector<16xf32>
    %49 = vector.multi_reduction <add>, %48, %cst_28 [1] : vector<16x384xf32> to vector<16xf32>
    %50 = vector.shape_cast %49 : vector<16xf32> to vector<16x1xf32>
    %cst_29 = arith.constant 3.840000e+02 : f32
    %51 = vector.broadcast %cst_29 : f32 to vector<16x1xf32>
    %52 = arith.divf %50, %51 : vector<16x1xf32>
    %cst_30 = arith.constant 9.99999974E-6 : f32
    %53 = vector.broadcast %cst_30 : f32 to vector<16x1xf32>
    %54 = arith.addf %52, %53 : vector<16x1xf32>
    %55 = math.rsqrt %54 : vector<16x1xf32>
    %56 = vector.broadcast %55 : vector<16x1xf32> to vector<16x384xf32>
    %57 = arith.mulf %47, %56 : vector<16x384xf32>
    %58 = vector.broadcast %40 : vector<1x384xf32> to vector<16x384xf32>
    %59 = arith.mulf %57, %58 : vector<16x384xf32>
    %60 = vector.broadcast %41 : vector<1x384xf32> to vector<16x384xf32>
    %61 = arith.addf %59, %60 : vector<16x384xf32>
    %cst_31 = arith.constant 0.000000e+00 : f32
    %62 = vector.broadcast %cst_31 : f32 to vector<16x384xf32>
    %63 = arith.maximumf %61, %62 : vector<16x384xf32>
    %64 = arith.truncf %63 : vector<16x384xf32> to vector<16x384xbf16>
    %c0_32 = arith.constant 0 : index
    %c0_33 = arith.constant 0 : index
    %65 = vector.load %arg11[%c0_32, %c0_33] : memref<384x192xbf16, #tpu.memory_space<vmem>>, vector<384x192xbf16>
    %cst_34 = arith.constant dense<0.000000e+00> : vector<16x192xf32>
    %66 = tpu.matmul %64, %65, %cst_34 {dimension_numbers = #tpu.dot_dimension_numbers<[1], [0], [0], [1], [0, 0, 1, 1], [], []>} : vector<16x384xbf16>, vector<384x192xbf16>, vector<16x192xf32> -> vector<16x192xf32>
    %c0_35 = arith.constant 0 : index
    %c0_36 = arith.constant 0 : index
    %67 = vector.load %arg12[%c0_35, %c0_36] : memref<1x192xf32, #tpu.memory_space<vmem>>, vector<1x192xf32>
    %68 = vector.broadcast %67 : vector<1x192xf32> to vector<16x192xf32>
    %69 = arith.addf %66, %68 : vector<16x192xf32>
    %c0_37 = arith.constant 0 : index
    %c0_38 = arith.constant 0 : index
    %70 = vector.load %arg13[%c0_37, %c0_38] : memref<1x192xf32, #tpu.memory_space<vmem>>, vector<1x192xf32>
    %c0_39 = arith.constant 0 : index
    %c0_40 = arith.constant 0 : index
    %71 = vector.load %arg14[%c0_39, %c0_40] : memref<1x192xf32, #tpu.memory_space<vmem>>, vector<1x192xf32>
    %cst_41 = arith.constant dense<0.000000e+00> : vector<16xf32>
    %72 = vector.multi_reduction <add>, %69, %cst_41 [1] : vector<16x192xf32> to vector<16xf32>
    %73 = vector.shape_cast %72 : vector<16xf32> to vector<16x1xf32>
    %cst_42 = arith.constant 1.920000e+02 : f32
    %74 = vector.broadcast %cst_42 : f32 to vector<16x1xf32>
    %75 = arith.divf %73, %74 : vector<16x1xf32>
    %76 = vector.broadcast %75 : vector<16x1xf32> to vector<16x192xf32>
    %77 = arith.subf %69, %76 : vector<16x192xf32>
    %78 = arith.mulf %77, %77 : vector<16x192xf32>
    %cst_43 = arith.constant dense<0.000000e+00> : vector<16xf32>
    %79 = vector.multi_reduction <add>, %78, %cst_43 [1] : vector<16x192xf32> to vector<16xf32>
    %80 = vector.shape_cast %79 : vector<16xf32> to vector<16x1xf32>
    %cst_44 = arith.constant 1.920000e+02 : f32
    %81 = vector.broadcast %cst_44 : f32 to vector<16x1xf32>
    %82 = arith.divf %80, %81 : vector<16x1xf32>
    %cst_45 = arith.constant 9.99999974E-6 : f32
    %83 = vector.broadcast %cst_45 : f32 to vector<16x1xf32>
    %84 = arith.addf %82, %83 : vector<16x1xf32>
    %85 = math.rsqrt %84 : vector<16x1xf32>
    %86 = vector.broadcast %85 : vector<16x1xf32> to vector<16x192xf32>
    %87 = arith.mulf %77, %86 : vector<16x192xf32>
    %88 = vector.broadcast %70 : vector<1x192xf32> to vector<16x192xf32>
    %89 = arith.mulf %87, %88 : vector<16x192xf32>
    %90 = vector.broadcast %71 : vector<1x192xf32> to vector<16x192xf32>
    %91 = arith.addf %89, %90 : vector<16x192xf32>
    %cst_46 = arith.constant 0.000000e+00 : f32
    %92 = vector.broadcast %cst_46 : f32 to vector<16x192xf32>
    %93 = arith.maximumf %91, %92 : vector<16x192xf32>
    %94 = vector.extract_strided_slice %93 {offsets = [0, 0], sizes = [8, 192], strides = [1, 1]} : vector<16x192xf32> to vector<8x192xf32>
    %95 = vector.extract_strided_slice %93 {offsets = [8, 0], sizes = [8, 192], strides = [1, 1]} : vector<16x192xf32> to vector<8x192xf32>
    %96 = arith.truncf %94 : vector<8x192xf32> to vector<8x192xbf16>
    %c0_47 = arith.constant 0 : index
    %c0_48 = arith.constant 0 : index
    %97 = vector.load %arg15[%c0_47, %c0_48] : memref<192x192xbf16, #tpu.memory_space<vmem>>, vector<192x192xbf16>
    %cst_49 = arith.constant dense<0.000000e+00> : vector<8x192xf32>
    %98 = tpu.matmul %96, %97, %cst_49 {dimension_numbers = #tpu.dot_dimension_numbers<[1], [0], [0], [1], [0, 0, 1, 1], [], []>} : vector<8x192xbf16>, vector<192x192xbf16>, vector<8x192xf32> -> vector<8x192xf32>
    %99 = arith.truncf %95 : vector<8x192xf32> to vector<8x192xbf16>
    %c0_50 = arith.constant 0 : index
    %c0_51 = arith.constant 0 : index
    %100 = vector.load %arg16[%c0_50, %c0_51] : memref<192x192xbf16, #tpu.memory_space<vmem>>, vector<192x192xbf16>
    %cst_52 = arith.constant dense<0.000000e+00> : vector<8x192xf32>
    %101 = tpu.matmul %99, %100, %cst_52 {dimension_numbers = #tpu.dot_dimension_numbers<[1], [0], [0], [1], [0, 0, 1, 1], [], []>} : vector<8x192xbf16>, vector<192x192xbf16>, vector<8x192xf32> -> vector<8x192xf32>
    %102 = arith.addf %98, %101 : vector<8x192xf32>
    %c0_53 = arith.constant 0 : index
    %c0_54 = arith.constant 0 : index
    %103 = vector.load %arg17[%c0_53, %c0_54] : memref<1x192xf32, #tpu.memory_space<vmem>>, vector<1x192xf32>
    %104 = vector.broadcast %103 : vector<1x192xf32> to vector<8x192xf32>
    %105 = arith.addf %102, %104 : vector<8x192xf32>
    %c0_55 = arith.constant 0 : index
    %c0_56 = arith.constant 0 : index
    %106 = vector.load %arg18[%c0_55, %c0_56] : memref<1x192xf32, #tpu.memory_space<vmem>>, vector<1x192xf32>
    %c0_57 = arith.constant 0 : index
    %c0_58 = arith.constant 0 : index
    %107 = vector.load %arg19[%c0_57, %c0_58] : memref<1x192xf32, #tpu.memory_space<vmem>>, vector<1x192xf32>
    %cst_59 = arith.constant dense<0.000000e+00> : vector<8xf32>
    %108 = vector.multi_reduction <add>, %105, %cst_59 [1] : vector<8x192xf32> to vector<8xf32>
    %109 = vector.shape_cast %108 : vector<8xf32> to vector<8x1xf32>
    %cst_60 = arith.constant 1.920000e+02 : f32
    %110 = vector.broadcast %cst_60 : f32 to vector<8x1xf32>
    %111 = arith.divf %109, %110 : vector<8x1xf32>
    %112 = vector.broadcast %111 : vector<8x1xf32> to vector<8x192xf32>
    %113 = arith.subf %105, %112 : vector<8x192xf32>
    %114 = arith.mulf %113, %113 : vector<8x192xf32>
    %cst_61 = arith.constant dense<0.000000e+00> : vector<8xf32>
    %115 = vector.multi_reduction <add>, %114, %cst_61 [1] : vector<8x192xf32> to vector<8xf32>
    %116 = vector.shape_cast %115 : vector<8xf32> to vector<8x1xf32>
    %cst_62 = arith.constant 1.920000e+02 : f32
    %117 = vector.broadcast %cst_62 : f32 to vector<8x1xf32>
    %118 = arith.divf %116, %117 : vector<8x1xf32>
    %cst_63 = arith.constant 9.99999974E-6 : f32
    %119 = vector.broadcast %cst_63 : f32 to vector<8x1xf32>
    %120 = arith.addf %118, %119 : vector<8x1xf32>
    %121 = math.rsqrt %120 : vector<8x1xf32>
    %122 = vector.broadcast %121 : vector<8x1xf32> to vector<8x192xf32>
    %123 = arith.mulf %113, %122 : vector<8x192xf32>
    %124 = vector.broadcast %106 : vector<1x192xf32> to vector<8x192xf32>
    %125 = arith.mulf %123, %124 : vector<8x192xf32>
    %126 = vector.broadcast %107 : vector<1x192xf32> to vector<8x192xf32>
    %127 = arith.addf %125, %126 : vector<8x192xf32>
    %cst_64 = arith.constant 0.000000e+00 : f32
    %128 = vector.broadcast %cst_64 : f32 to vector<8x192xf32>
    %129 = arith.maximumf %127, %128 : vector<8x192xf32>
    %130 = arith.truncf %129 : vector<8x192xf32> to vector<8x192xbf16>
    %c0_65 = arith.constant 0 : index
    %c0_66 = arith.constant 0 : index
    %131 = vector.load %arg20[%c0_65, %c0_66] : memref<192x64xbf16, #tpu.memory_space<vmem>>, vector<192x64xbf16>
    %cst_67 = arith.constant dense<0.000000e+00> : vector<8x64xf32>
    %132 = tpu.matmul %130, %131, %cst_67 {dimension_numbers = #tpu.dot_dimension_numbers<[1], [0], [0], [1], [0, 0, 1, 1], [], []>} : vector<8x192xbf16>, vector<192x64xbf16>, vector<8x64xf32> -> vector<8x64xf32>
    %c0_68 = arith.constant 0 : index
    %c0_69 = arith.constant 0 : index
    %133 = vector.load %arg21[%c0_68, %c0_69] : memref<1x64xf32, #tpu.memory_space<vmem>>, vector<1x64xf32>
    %134 = vector.broadcast %133 : vector<1x64xf32> to vector<8x64xf32>
    %135 = arith.addf %132, %134 : vector<8x64xf32>
    %c0_70 = arith.constant 0 : index
    %c0_71 = arith.constant 0 : index
    %136 = vector.load %arg22[%c0_70, %c0_71] : memref<1x64xf32, #tpu.memory_space<vmem>>, vector<1x64xf32>
    %c0_72 = arith.constant 0 : index
    %c0_73 = arith.constant 0 : index
    %137 = vector.load %arg23[%c0_72, %c0_73] : memref<1x64xf32, #tpu.memory_space<vmem>>, vector<1x64xf32>
    %cst_74 = arith.constant dense<0.000000e+00> : vector<8xf32>
    %138 = vector.multi_reduction <add>, %135, %cst_74 [1] : vector<8x64xf32> to vector<8xf32>
    %139 = vector.shape_cast %138 : vector<8xf32> to vector<8x1xf32>
    %cst_75 = arith.constant 6.400000e+01 : f32
    %140 = vector.broadcast %cst_75 : f32 to vector<8x1xf32>
    %141 = arith.divf %139, %140 : vector<8x1xf32>
    %142 = vector.broadcast %141 : vector<8x1xf32> to vector<8x64xf32>
    %143 = arith.subf %135, %142 : vector<8x64xf32>
    %144 = arith.mulf %143, %143 : vector<8x64xf32>
    %cst_76 = arith.constant dense<0.000000e+00> : vector<8xf32>
    %145 = vector.multi_reduction <add>, %144, %cst_76 [1] : vector<8x64xf32> to vector<8xf32>
    %146 = vector.shape_cast %145 : vector<8xf32> to vector<8x1xf32>
    %cst_77 = arith.constant 6.400000e+01 : f32
    %147 = vector.broadcast %cst_77 : f32 to vector<8x1xf32>
    %148 = arith.divf %146, %147 : vector<8x1xf32>
    %cst_78 = arith.constant 9.99999974E-6 : f32
    %149 = vector.broadcast %cst_78 : f32 to vector<8x1xf32>
    %150 = arith.addf %148, %149 : vector<8x1xf32>
    %151 = math.rsqrt %150 : vector<8x1xf32>
    %152 = vector.broadcast %151 : vector<8x1xf32> to vector<8x64xf32>
    %153 = arith.mulf %143, %152 : vector<8x64xf32>
    %154 = vector.broadcast %136 : vector<1x64xf32> to vector<8x64xf32>
    %155 = arith.mulf %153, %154 : vector<8x64xf32>
    %156 = vector.broadcast %137 : vector<1x64xf32> to vector<8x64xf32>
    %157 = arith.addf %155, %156 : vector<8x64xf32>
    %cst_79 = arith.constant 0.000000e+00 : f32
    %158 = vector.broadcast %cst_79 : f32 to vector<8x64xf32>
    %159 = arith.maximumf %157, %158 : vector<8x64xf32>
    %c0_80 = arith.constant 0 : index
    %c0_81 = arith.constant 0 : index
    %160 = vector.load %arg24[%c0_80, %c0_81] : memref<1x64xf32, #tpu.memory_space<vmem>>, vector<1x64xf32>
    %161 = vector.broadcast %160 : vector<1x64xf32> to vector<8x64xf32>
    %162 = arith.mulf %159, %161 : vector<8x64xf32>
    %cst_82 = arith.constant dense<0.000000e+00> : vector<8xf32>
    %163 = vector.multi_reduction <add>, %162, %cst_82 [1] : vector<8x64xf32> to vector<8xf32>
    %164 = vector.shape_cast %163 : vector<8xf32> to vector<8x1xf32>
    %c0_83 = arith.constant 0 : index
    %c0_84 = arith.constant 0 : index
    %165 = vector.load %arg25[%c0_83, %c0_84] : memref<1x1xf32, #tpu.memory_space<vmem>>, vector<1x1xf32>
    %166 = vector.broadcast %165 : vector<1x1xf32> to vector<8x1xf32>
    %167 = arith.addf %164, %166 : vector<8x1xf32>
    %168 = math.tanh %167 : vector<8x1xf32>
    %c0_85 = arith.constant 0 : index
    %c0_86 = arith.constant 0 : index
    %169 = vector.load %arg26[%c0_85, %c0_86] : memref<8x1xf32, #tpu.memory_space<vmem>>, vector<8x1xf32>
    tpu.vector_store %arg26[%c0_85, %c0_86], %168 {strides = array<i32>} : memref<8x1xf32, #tpu.memory_space<vmem>>, vector<8x1xf32>,
    return
  }
  func.func @transform_0(%arg0: i32) -> (i32, i32) {
    %c0_i32 = arith.constant 0 : i32
    %c0_i32_0 = arith.constant 0 : i32
    return %arg0, %c0_i32 : i32, i32
  }
  func.func @transform_1(%arg0: i32) -> (i32, i32) {
    %c0_i32 = arith.constant 0 : i32
    %c0_i32_0 = arith.constant 0 : i32
    return %arg0, %c0_i32 : i32, i32
  }
  func.func @transform_2(%arg0: i32) -> (i32, i32) {
    %c0_i32 = arith.constant 0 : i32
    %c0_i32_0 = arith.constant 0 : i32
    %c0_i32_1 = arith.constant 0 : i32
    return %c0_i32, %c0_i32_0 : i32, i32
  }
  func.func @transform_3(%arg0: i32) -> (i32, i32) {
    %c0_i32 = arith.constant 0 : i32
    %c0_i32_0 = arith.constant 0 : i32
    %c0_i32_1 = arith.constant 0 : i32
    return %c0_i32, %c0_i32_0 : i32, i32
  }
  func.func @transform_4(%arg0: i32) -> (i32, i32) {
    %c0_i32 = arith.constant 0 : i32
    %c0_i32_0 = arith.constant 0 : i32
    %c0_i32_1 = arith.constant 0 : i32
    return %c0_i32, %c0_i32_0 : i32, i32
  }
  func.func @transform_5(%arg0: i32) -> (i32, i32) {
    %c0_i32 = arith.constant 0 : i32
    %c0_i32_0 = arith.constant 0 : i32
    %c0_i32_1 = arith.constant 0 : i32
    return %c0_i32, %c0_i32_0 : i32, i32
  }
  func.func @transform_6(%arg0: i32) -> (i32, i32) {
    %c0_i32 = arith.constant 0 : i32
    %c0_i32_0 = arith.constant 0 : i32
    %c0_i32_1 = arith.constant 0 : i32
    return %c0_i32, %c0_i32_0 : i32, i32
  }
  func.func @transform_7(%arg0: i32) -> (i32, i32) {
    %c0_i32 = arith.constant 0 : i32
    %c0_i32_0 = arith.constant 0 : i32
    %c0_i32_1 = arith.constant 0 : i32
    return %c0_i32, %c0_i32_0 : i32, i32
  }
  func.func @transform_8(%arg0: i32) -> (i32, i32) {
    %c0_i32 = arith.constant 0 : i32
    %c0_i32_0 = arith.constant 0 : i32
    %c0_i32_1 = arith.constant 0 : i32
    return %c0_i32, %c0_i32_0 : i32, i32
  }
  func.func @transform_9(%arg0: i32) -> (i32, i32) {
    %c0_i32 = arith.constant 0 : i32
    %c0_i32_0 = arith.constant 0 : i32
    %c0_i32_1 = arith.constant 0 : i32
    return %c0_i32, %c0_i32_0 : i32, i32
  }
  func.func @transform_10(%arg0: i32) -> (i32, i32) {
    %c0_i32 = arith.constant 0 : i32
    %c0_i32_0 = arith.constant 0 : i32
    %c0_i32_1 = arith.constant 0 : i32
    return %c0_i32, %c0_i32_0 : i32, i32
  }
  func.func @transform_11(%arg0: i32) -> (i32, i32) {
    %c0_i32 = arith.constant 0 : i32
    %c0_i32_0 = arith.constant 0 : i32
    %c0_i32_1 = arith.constant 0 : i32
    return %c0_i32, %c0_i32_0 : i32, i32
  }
  func.func @transform_12(%arg0: i32) -> (i32, i32) {
    %c0_i32 = arith.constant 0 : i32
    %c0_i32_0 = arith.constant 0 : i32
    %c0_i32_1 = arith.constant 0 : i32
    return %c0_i32, %c0_i32_0 : i32, i32
  }
  func.func @transform_13(%arg0: i32) -> (i32, i32) {
    %c0_i32 = arith.constant 0 : i32
    %c0_i32_0 = arith.constant 0 : i32
    %c0_i32_1 = arith.constant 0 : i32
    return %c0_i32, %c0_i32_0 : i32, i32
  }
  func.func @transform_14(%arg0: i32) -> (i32, i32) {
    %c0_i32 = arith.constant 0 : i32
    %c0_i32_0 = arith.constant 0 : i32
    %c0_i32_1 = arith.constant 0 : i32
    return %c0_i32, %c0_i32_0 : i32, i32
  }
  func.func @transform_15(%arg0: i32) -> (i32, i32) {
    %c0_i32 = arith.constant 0 : i32
    %c0_i32_0 = arith.constant 0 : i32
    %c0_i32_1 = arith.constant 0 : i32
    return %c0_i32, %c0_i32_0 : i32, i32
  }
  func.func @transform_16(%arg0: i32) -> (i32, i32) {
    %c0_i32 = arith.constant 0 : i32
    %c0_i32_0 = arith.constant 0 : i32
    %c0_i32_1 = arith.constant 0 : i32
    return %c0_i32, %c0_i32_0 : i32, i32
  }
  func.func @transform_17(%arg0: i32) -> (i32, i32) {
    %c0_i32 = arith.constant 0 : i32
    %c0_i32_0 = arith.constant 0 : i32
    %c0_i32_1 = arith.constant 0 : i32
    return %c0_i32, %c0_i32_0 : i32, i32
  }
  func.func @transform_18(%arg0: i32) -> (i32, i32) {
    %c0_i32 = arith.constant 0 : i32
    %c0_i32_0 = arith.constant 0 : i32
    %c0_i32_1 = arith.constant 0 : i32
    return %c0_i32, %c0_i32_0 : i32, i32
  }
  func.func @transform_19(%arg0: i32) -> (i32, i32) {
    %c0_i32 = arith.constant 0 : i32
    %c0_i32_0 = arith.constant 0 : i32
    %c0_i32_1 = arith.constant 0 : i32
    return %c0_i32, %c0_i32_0 : i32, i32
  }
  func.func @transform_20(%arg0: i32) -> (i32, i32) {
    %c0_i32 = arith.constant 0 : i32
    %c0_i32_0 = arith.constant 0 : i32
    %c0_i32_1 = arith.constant 0 : i32
    return %c0_i32, %c0_i32_0 : i32, i32
  }
  func.func @transform_21(%arg0: i32) -> (i32, i32) {
    %c0_i32 = arith.constant 0 : i32
    %c0_i32_0 = arith.constant 0 : i32
    %c0_i32_1 = arith.constant 0 : i32
    return %c0_i32, %c0_i32_0 : i32, i32
  }
  func.func @transform_22(%arg0: i32) -> (i32, i32) {
    %c0_i32 = arith.constant 0 : i32
    %c0_i32_0 = arith.constant 0 : i32
    %c0_i32_1 = arith.constant 0 : i32
    return %c0_i32, %c0_i32_0 : i32, i32
  }
  func.func @transform_23(%arg0: i32) -> (i32, i32) {
    %c0_i32 = arith.constant 0 : i32
    %c0_i32_0 = arith.constant 0 : i32
    %c0_i32_1 = arith.constant 0 : i32
    return %c0_i32, %c0_i32_0 : i32, i32
  }
  func.func @transform_24(%arg0: i32) -> (i32, i32) {
    %c0_i32 = arith.constant 0 : i32
    %c0_i32_0 = arith.constant 0 : i32
    %c0_i32_1 = arith.constant 0 : i32
    return %c0_i32, %c0_i32_0 : i32, i32
  }
  func.func @transform_25(%arg0: i32) -> (i32, i32) {
    %c0_i32 = arith.constant 0 : i32
    %c0_i32_0 = arith.constant 0 : i32
    return %arg0, %c0_i32 : i32, i32
  }
}

module attributes {stable_mosaic.version = 11 : i64} {
  func.func @predictor_kernel(%arg0: i32, %arg1: memref<8x1536xf32, #tpu.memory_space<vmem>>, %arg2: memref<8x1536xf32, #tpu.memory_space<vmem>>, %arg3: memref<1536x768xbf16, #tpu.memory_space<vmem>>, %arg4: memref<1x768xf32, #tpu.memory_space<vmem>>, %arg5: memref<1x768xf32, #tpu.memory_space<vmem>>, %arg6: memref<1x768xf32, #tpu.memory_space<vmem>>, %arg7: memref<768x384xbf16, #tpu.memory_space<vmem>>, %arg8: memref<1x384xf32, #tpu.memory_space<vmem>>, %arg9: memref<1x384xf32, #tpu.memory_space<vmem>>, %arg10: memref<1x384xf32, #tpu.memory_space<vmem>>, %arg11: memref<384x192xbf16, #tpu.memory_space<vmem>>, %arg12: memref<1x192xf32, #tpu.memory_space<vmem>>, %arg13: memref<1x192xf32, #tpu.memory_space<vmem>>, %arg14: memref<1x192xf32, #tpu.memory_space<vmem>>, %arg15: memref<192x192xbf16, #tpu.memory_space<vmem>>, %arg16: memref<192x192xbf16, #tpu.memory_space<vmem>>, %arg17: memref<1x192xf32, #tpu.memory_space<vmem>>, %arg18: memref<1x192xf32, #tpu.memory_space<vmem>>, %arg19: memref<1x192xf32, #tpu.memory_space<vmem>>, %arg20: memref<192x64xbf16, #tpu.memory_space<vmem>>, %arg21: memref<1x64xf32, #tpu.memory_space<vmem>>, %arg22: memref<1x64xf32, #tpu.memory_space<vmem>>, %arg23: memref<1x64xf32, #tpu.memory_space<vmem>>, %arg24: memref<1x64xf32, #tpu.memory_space<vmem>>, %arg25: memref<1x1xf32, #tpu.memory_space<vmem>>, %arg26: memref<8x1xf32, #tpu.memory_space<vmem>>) attributes {dimension_semantics = [#tpu.dimension_semantics<parallel>], iteration_bounds = array<i64: 1>, scalar_prefetch = 0 : i64, scratch_operands = 0 : i64, tpu.core_type = #tpu.core_type<tc>, window_params = [{transform_indices = @transform_0, window_bounds = array<i64: 8, 1536>}, {transform_indices = @transform_1, window_bounds = array<i64: 8, 1536>}, {pipeline_mode = #tpu.pipeline_mode<synchronous>, transform_indices = @transform_2, window_bounds = array<i64: 1536, 768>}, {pipeline_mode = #tpu.pipeline_mode<synchronous>, transform_indices = @transform_3, window_bounds = array<i64: 1, 768>}, {pipeline_mode = #tpu.pipeline_mode<synchronous>, transform_indices = @transform_4, window_bounds = array<i64: 1, 768>}, {pipeline_mode = #tpu.pipeline_mode<synchronous>, transform_indices = @transform_5, window_bounds = array<i64: 1, 768>}, {pipeline_mode = #tpu.pipeline_mode<synchronous>, transform_indices = @transform_6, window_bounds = array<i64: 768, 384>}, {pipeline_mode = #tpu.pipeline_mode<synchronous>, transform_indices = @transform_7, window_bounds = array<i64: 1, 384>}, {pipeline_mode = #tpu.pipeline_mode<synchronous>, transform_indices = @transform_8, window_bounds = array<i64: 1, 384>}, {pipeline_mode = #tpu.pipeline_mode<synchronous>, transform_indices = @transform_9, window_bounds = array<i64: 1, 384>}, {pipeline_mode = #tpu.pipeline_mode<synchronous>, transform_indices = @transform_10, window_bounds = array<i64: 384, 192>}, {pipeline_mode = #tpu.pipeline_mode<synchronous>, transform_indices = @transform_11, window_bounds = array<i64: 1, 192>}, {pipeline_mode = #tpu.pipeline_mode<synchronous>, transform_indices = @transform_12, window_bounds = array<i64: 1, 192>}, {pipeline_mode = #tpu.pipeline_mode<synchronous>, transform_indices = @transform_13, window_bounds = array<i64: 1, 192>}, {pipeline_mode = #tpu.pipeline_mode<synchronous>, transform_indices = @transform_14, window_bounds = array<i64: 192, 192>}, {pipeline_mode = #tpu.pipeline_mode<synchronous>, transform_indices = @transform_15, window_bounds = array<i64: 192, 192>}, {pipeline_mode = #tpu.pipeline_mode<synchronous>, transform_indices = @transform_16, window_bounds = array<i64: 1, 192>}, {pipeline_mode = #tpu.pipeline_mode<synchronous>, transform_indices = @transform_17, window_bounds = array<i64: 1, 192>}, {pipeline_mode = #tpu.pipeline_mode<synchronous>, transform_indices = @transform_18, window_bounds = array<i64: 1, 192>}, {pipeline_mode = #tpu.pipeline_mode<synchronous>, transform_indices = @transform_19, window_bounds = array<i64: 192, 64>}, {pipeline_mode = #tpu.pipeline_mode<synchronous>, transform_indices = @transform_20, window_bounds = array<i64: 1, 64>}, {pipeline_mode = #tpu.pipeline_mode<synchronous>, transform_indices = @transform_21, window_bounds = array<i64: 1, 64>}, {pipeline_mode = #tpu.pipeline_mode<synchronous>, transform_indices = @transform_22, window_bounds = array<i64: 1, 64>}, {pipeline_mode = #tpu.pipeline_mode<synchronous>, transform_indices = @transform_23, window_bounds = array<i64: 1, 64>}, {pipeline_mode = #tpu.pipeline_mode<synchronous>, transform_indices = @transform_24, window_bounds = array<i64: 1, 1>}, {transform_indices = @transform_25, window_bounds = array<i64: 8, 1>}]} {
    %c0 = arith.constant 0 : index
    %c0_0 = arith.constant 0 : index
    %0 = vector.load %arg1[%c0, %c0_0] : memref<8x1536xf32, #tpu.memory_space<vmem>>, vector<8x1536xf32>
    %1 = arith.truncf %0 : vector<8x1536xf32> to vector<8x1536xbf16>
    %c0_1 = arith.constant 0 : index
    %c0_2 = arith.constant 0 : index
    %2 = vector.load %arg2[%c0_1, %c0_2] : memref<8x1536xf32, #tpu.memory_space<vmem>>, vector<8x1536xf32>
    %3 = arith.truncf %2 : vector<8x1536xf32> to vector<8x1536xbf16>
    %4 = tpu.concatenate %1, %3 in 0 : vector<8x1536xbf16>, vector<8x1536xbf16> -> vector<16x1536xbf16>
    %c0_3 = arith.constant 0 : index
    %c0_4 = arith.constant 0 : index
    %5 = vector.load %arg3[%c0_3, %c0_4] : memref<1536x768xbf16, #tpu.memory_space<vmem>>, vector<1536x768xbf16>
    %cst = arith.constant dense<0.000000e+00> : vector<16x768xf32>
    %6 = tpu.matmul %4, %5, %cst {dimension_numbers = #tpu.dot_dimension_numbers<[1], [0], [0], [1], [0, 0, 1, 1], [], []>} : vector<16x1536xbf16>, vector<1536x768xbf16>, vector<16x768xf32> -> vector<16x768xf32>
    %c0_5 = arith.constant 0 : index
    %c0_6 = arith.constant 0 : index
    %7 = vector.load %arg4[%c0_5, %c0_6] : memref<1x768xf32, #tpu.memory_space<vmem>>, vector<1x768xf32>
    %8 = vector.broadcast %7 : vector<1x768xf32> to vector<16x768xf32>
    %9 = arith.addf %6, %8 : vector<16x768xf32>
    %c0_7 = arith.constant 0 : index
    %c0_8 = arith.constant 0 : index
    %10 = vector.load %arg5[%c0_7, %c0_8] : memref<1x768xf32, #tpu.memory_space<vmem>>, vector<1x768xf32>
    %c0_9 = arith.constant 0 : index
    %c0_10 = arith.constant 0 : index
    %11 = vector.load %arg6[%c0_9, %c0_10] : memref<1x768xf32, #tpu.memory_space<vmem>>, vector<1x768xf32>
    %cst_11 = arith.constant dense<0.000000e+00> : vector<16xf32>
    %12 = vector.multi_reduction <add>, %9, %cst_11 [1] : vector<16x768xf32> to vector<16xf32>
    %13 = vector.shape_cast %12 : vector<16xf32> to vector<16x1xf32>
    %cst_12 = arith.constant 7.680000e+02 : f32
    %14 = vector.broadcast %cst_12 : f32 to vector<16x1xf32>
    %15 = arith.divf %13, %14 : vector<16x1xf32>
    %16 = vector.broadcast %15 : vector<16x1xf32> to vector<16x768xf32>
    %17 = arith.subf %9, %16 : vector<16x768xf32>
    %18 = arith.mulf %17, %17 : vector<16x768xf32>
    %cst_13 = arith.constant dense<0.000000e+00> : vector<16xf32>
    %19 = vector.multi_reduction <add>, %18, %cst_13 [1] : vector<16x768xf32> to vector<16xf32>
    %20 = vector.shape_cast %19 : vector<16xf32> to vector<16x1xf32>
    %cst_14 = arith.constant 7.680000e+02 : f32
    %21 = vector.broadcast %cst_14 : f32 to vector<16x1xf32>
    %22 = arith.divf %20, %21 : vector<16x1xf32>
    %cst_15 = arith.constant 9.99999974E-6 : f32
    %23 = vector.broadcast %cst_15 : f32 to vector<16x1xf32>
    %24 = arith.addf %22, %23 : vector<16x1xf32>
    %25 = math.rsqrt %24 : vector<16x1xf32>
    %26 = vector.broadcast %25 : vector<16x1xf32> to vector<16x768xf32>
    %27 = arith.mulf %17, %26 : vector<16x768xf32>
    %28 = vector.broadcast %10 : vector<1x768xf32> to vector<16x768xf32>
    %29 = arith.mulf %27, %28 : vector<16x768xf32>
    %30 = vector.broadcast %11 : vector<1x768xf32> to vector<16x768xf32>
    %31 = arith.addf %29, %30 : vector<16x768xf32>
    %cst_16 = arith.constant 0.000000e+00 : f32
    %32 = vector.broadcast %cst_16 : f32 to vector<16x768xf32>
    %33 = arith.maximumf %31, %32 : vector<16x768xf32>
    %34 = arith.truncf %33 : vector<16x768xf32> to vector<16x768xbf16>
    %c0_17 = arith.constant 0 : index
    %c0_18 = arith.constant 0 : index
    %35 = vector.load %arg7[%c0_17, %c0_18] : memref<768x384xbf16, #tpu.memory_space<vmem>>, vector<768x384xbf16>
    %cst_19 = arith.constant dense<0.000000e+00> : vector<16x384xf32>
    %36 = tpu.matmul %34, %35, %cst_19 {dimension_numbers = #tpu.dot_dimension_numbers<[1], [0], [0], [1], [0, 0, 1, 1], [], []>} : vector<16x768xbf16>, vector<768x384xbf16>, vector<16x384xf32> -> vector<16x384xf32>
    %c0_20 = arith.constant 0 : index
    %c0_21 = arith.constant 0 : index
    %37 = vector.load %arg8[%c0_20, %c0_21] : memref<1x384xf32, #tpu.memory_space<vmem>>, vector<1x384xf32>
    %38 = vector.broadcast %37 : vector<1x384xf32> to vector<16x384xf32>
    %39 = arith.addf %36, %38 : vector<16x384xf32>
    %c0_22 = arith.constant 0 : index
    %c0_23 = arith.constant 0 : index
    %40 = vector.load %arg9[%c0_22, %c0_23] : memref<1x384xf32, #tpu.memory_space<vmem>>, vector<1x384xf32>
    %c0_24 = arith.constant 0 : index
    %c0_25 = arith.constant 0 : index
    %41 = vector.load %arg10[%c0_24, %c0_25] : memref<1x384xf32, #tpu.memory_space<vmem>>, vector<1x384xf32>
    %cst_26 = arith.constant dense<0.000000e+00> : vector<16xf32>
    %42 = vector.multi_reduction <add>, %39, %cst_26 [1] : vector<16x384xf32> to vector<16xf32>
    %43 = vector.shape_cast %42 : vector<16xf32> to vector<16x1xf32>
    %cst_27 = arith.constant 3.840000e+02 : f32
    %44 = vector.broadcast %cst_27 : f32 to vector<16x1xf32>
    %45 = arith.divf %43, %44 : vector<16x1xf32>
    %46 = vector.broadcast %45 : vector<16x1xf32> to vector<16x384xf32>
    %47 = arith.subf %39, %46 : vector<16x384xf32>
    %48 = arith.mulf %47, %47 : vector<16x384xf32>
    %cst_28 = arith.constant dense<0.000000e+00> : vector<16xf32>
    %49 = vector.multi_reduction <add>, %48, %cst_28 [1] : vector<16x384xf32> to vector<16xf32>
    %50 = vector.shape_cast %49 : vector<16xf32> to vector<16x1xf32>
    %cst_29 = arith.constant 3.840000e+02 : f32
    %51 = vector.broadcast %cst_29 : f32 to vector<16x1xf32>
    %52 = arith.divf %50, %51 : vector<16x1xf32>
    %cst_30 = arith.constant 9.99999974E-6 : f32
    %53 = vector.broadcast %cst_30 : f32 to vector<16x1xf32>
    %54 = arith.addf %52, %53 : vector<16x1xf32>
    %55 = math.rsqrt %54 : vector<16x1xf32>
    %56 = vector.broadcast %55 : vector<16x1xf32> to vector<16x384xf32>
    %57 = arith.mulf %47, %56 : vector<16x384xf32>
    %58 = vector.broadcast %40 : vector<1x384xf32> to vector<16x384xf32>
    %59 = arith.mulf %57, %58 : vector<16x384xf32>
    %60 = vector.broadcast %41 : vector<1x384xf32> to vector<16x384xf32>
    %61 = arith.addf %59, %60 : vector<16x384xf32>
    %cst_31 = arith.constant 0.000000e+00 : f32
    %62 = vector.broadcast %cst_31 : f32 to vector<16x384xf32>
    %63 = arith.maximumf %61, %62 : vector<16x384xf32>
    %64 = arith.truncf %63 : vector<16x384xf32> to vector<16x384xbf16>
    %c0_32 = arith.constant 0 : index
    %c0_33 = arith.constant 0 : index
    %65 = vector.load %arg11[%c0_32, %c0_33] : memref<384x192xbf16, #tpu.memory_space<vmem>>, vector<384x192xbf16>
    %cst_34 = arith.constant dense<0.000000e+00> : vector<16x192xf32>
    %66 = tpu.matmul %64, %65, %cst_34 {dimension_numbers = #tpu.dot_dimension_numbers<[1], [0], [0], [1], [0, 0, 1, 1], [], []>} : vector<16x384xbf16>, vector<384x192xbf16>, vector<16x192xf32> -> vector<16x192xf32>
    %c0_35 = arith.constant 0 : index
    %c0_36 = arith.constant 0 : index
    %67 = vector.load %arg12[%c0_35, %c0_36] : memref<1x192xf32, #tpu.memory_space<vmem>>, vector<1x192xf32>
    %68 = vector.broadcast %67 : vector<1x192xf32> to vector<16x192xf32>
    %69 = arith.addf %66, %68 : vector<16x192xf32>
    %c0_37 = arith.constant 0 : index
    %c0_38 = arith.constant 0 : index
    %70 = vector.load %arg13[%c0_37, %c0_38] : memref<1x192xf32, #tpu.memory_space<vmem>>, vector<1x192xf32>
    %c0_39 = arith.constant 0 : index
    %c0_40 = arith.constant 0 : index
    %71 = vector.load %arg14[%c0_39, %c0_40] : memref<1x192xf32, #tpu.memory_space<vmem>>, vector<1x192xf32>
    %cst_41 = arith.constant dense<0.000000e+00> : vector<16xf32>
    %72 = vector.multi_reduction <add>, %69, %cst_41 [1] : vector<16x192xf32> to vector<16xf32>
    %73 = vector.shape_cast %72 : vector<16xf32> to vector<16x1xf32>
    %cst_42 = arith.constant 1.920000e+02 : f32
    %74 = vector.broadcast %cst_42 : f32 to vector<16x1xf32>
    %75 = arith.divf %73, %74 : vector<16x1xf32>
    %76 = vector.broadcast %75 : vector<16x1xf32> to vector<16x192xf32>
    %77 = arith.subf %69, %76 : vector<16x192xf32>
    %78 = arith.mulf %77, %77 : vector<16x192xf32>
    %cst_43 = arith.constant dense<0.000000e+00> : vector<16xf32>
    %79 = vector.multi_reduction <add>, %78, %cst_43 [1] : vector<16x192xf32> to vector<16xf32>
    %80 = vector.shape_cast %79 : vector<16xf32> to vector<16x1xf32>
    %cst_44 = arith.constant 1.920000e+02 : f32
    %81 = vector.broadcast %cst_44 : f32 to vector<16x1xf32>
    %82 = arith.divf %80, %81 : vector<16x1xf32>
    %cst_45 = arith.constant 9.99999974E-6 : f32
    %83 = vector.broadcast %cst_45 : f32 to vector<16x1xf32>
    %84 = arith.addf %82, %83 : vector<16x1xf32>
    %85 = math.rsqrt %84 : vector<16x1xf32>
    %86 = vector.broadcast %85 : vector<16x1xf32> to vector<16x192xf32>
    %87 = arith.mulf %77, %86 : vector<16x192xf32>
    %88 = vector.broadcast %70 : vector<1x192xf32> to vector<16x192xf32>
    %89 = arith.mulf %87, %88 : vector<16x192xf32>
    %90 = vector.broadcast %71 : vector<1x192xf32> to vector<16x192xf32>
    %91 = arith.addf %89, %90 : vector<16x192xf32>
    %cst_46 = arith.constant 0.000000e+00 : f32
    %92 = vector.broadcast %cst_46 : f32 to vector<16x192xf32>
    %93 = arith.maximumf %91, %92 : vector<16x192xf32>
    %94 = vector.extract_strided_slice %93 {offsets = [0, 0], sizes = [8, 192], strides = [1, 1]} : vector<16x192xf32> to vector<8x192xf32>
    %95 = vector.extract_strided_slice %93 {offsets = [8, 0], sizes = [8, 192], strides = [1, 1]} : vector<16x192xf32> to vector<8x192xf32>
    %96 = arith.truncf %94 : vector<8x192xf32> to vector<8x192xbf16>
    %c0_47 = arith.constant 0 : index
    %c0_48 = arith.constant 0 : index
    %97 = vector.load %arg15[%c0_47, %c0_48] : memref<192x192xbf16, #tpu.memory_space<vmem>>, vector<192x192xbf16>
    %cst_49 = arith.constant dense<0.000000e+00> : vector<8x192xf32>
    %98 = tpu.matmul %96, %97, %cst_49 {dimension_numbers = #tpu.dot_dimension_numbers<[1], [0], [0], [1], [0, 0, 1, 1], [], []>} : vector<8x192xbf16>, vector<192x192xbf16>, vector<8x192xf32> -> vector<8x192xf32>
    %99 = arith.truncf %95 : vector<8x192xf32> to vector<8x192xbf16>
    %c0_50 = arith.constant 0 : index
    %c0_51 = arith.constant 0 : index
    %100 = vector.load %arg16[%c0_50, %c0_51] : memref<192x192xbf16, #tpu.memory_space<vmem>>, vector<192x192xbf16>
    %cst_52 = arith.constant dense<0.000000e+00> : vector<8x192xf32>
    %101 = tpu.matmul %99, %100, %cst_52 {dimension_numbers = #tpu.dot_dimension_numbers<[1], [0], [0], [1], [0, 0, 1, 1], [], []>} : vector<8x192xbf16>, vector<192x192xbf16>, vector<8x192xf32> -> vector<8x192xf32>
    %102 = arith.addf %98, %101 : vector<8x192xf32>
    %c0_53 = arith.constant 0 : index
    %c0_54 = arith.constant 0 : index
    %103 = vector.load %arg17[%c0_53, %c0_54] : memref<1x192xf32, #tpu.memory_space<vmem>>, vector<1x192xf32>
    %104 = vector.broadcast %103 : vector<1x192xf32> to vector<8x192xf32>
    %105 = arith.addf %102, %104 : vector<8x192xf32>
    %c0_55 = arith.constant 0 : index
    %c0_56 = arith.constant 0 : index
    %106 = vector.load %arg18[%c0_55, %c0_56] : memref<1x192xf32, #tpu.memory_space<vmem>>, vector<1x192xf32>
    %c0_57 = arith.constant 0 : index
    %c0_58 = arith.constant 0 : index
    %107 = vector.load %arg19[%c0_57, %c0_58] : memref<1x192xf32, #tpu.memory_space<vmem>>, vector<1x192xf32>
    %cst_59 = arith.constant dense<0.000000e+00> : vector<8xf32>
    %108 = vector.multi_reduction <add>, %105, %cst_59 [1] : vector<8x192xf32> to vector<8xf32>
    %109 = vector.shape_cast %108 : vector<8xf32> to vector<8x1xf32>
    %cst_60 = arith.constant 1.920000e+02 : f32
    %110 = vector.broadcast %cst_60 : f32 to vector<8x1xf32>
    %111 = arith.divf %109, %110 : vector<8x1xf32>
    %112 = vector.broadcast %111 : vector<8x1xf32> to vector<8x192xf32>
    %113 = arith.subf %105, %112 : vector<8x192xf32>
    %114 = arith.mulf %113, %113 : vector<8x192xf32>
    %cst_61 = arith.constant dense<0.000000e+00> : vector<8xf32>
    %115 = vector.multi_reduction <add>, %114, %cst_61 [1] : vector<8x192xf32> to vector<8xf32>
    %116 = vector.shape_cast %115 : vector<8xf32> to vector<8x1xf32>
    %cst_62 = arith.constant 1.920000e+02 : f32
    %117 = vector.broadcast %cst_62 : f32 to vector<8x1xf32>
    %118 = arith.divf %116, %117 : vector<8x1xf32>
    %cst_63 = arith.constant 9.99999974E-6 : f32
    %119 = vector.broadcast %cst_63 : f32 to vector<8x1xf32>
    %120 = arith.addf %118, %119 : vector<8x1xf32>
    %121 = math.rsqrt %120 : vector<8x1xf32>
    %122 = vector.broadcast %121 : vector<8x1xf32> to vector<8x192xf32>
    %123 = arith.mulf %113, %122 : vector<8x192xf32>
    %124 = vector.broadcast %106 : vector<1x192xf32> to vector<8x192xf32>
    %125 = arith.mulf %123, %124 : vector<8x192xf32>
    %126 = vector.broadcast %107 : vector<1x192xf32> to vector<8x192xf32>
    %127 = arith.addf %125, %126 : vector<8x192xf32>
    %cst_64 = arith.constant 0.000000e+00 : f32
    %128 = vector.broadcast %cst_64 : f32 to vector<8x192xf32>
    %129 = arith.maximumf %127, %128 : vector<8x192xf32>
    %130 = arith.truncf %129 : vector<8x192xf32> to vector<8x192xbf16>
    %c0_65 = arith.constant 0 : index
    %c0_66 = arith.constant 0 : index
    %131 = vector.load %arg20[%c0_65, %c0_66] : memref<192x64xbf16, #tpu.memory_space<vmem>>, vector<192x64xbf16>
    %cst_67 = arith.constant dense<0.000000e+00> : vector<8x64xf32>
    %132 = tpu.matmul %130, %131, %cst_67 {dimension_numbers = #tpu.dot_dimension_numbers<[1], [0], [0], [1], [0, 0, 1, 1], [], []>} : vector<8x192xbf16>, vector<192x64xbf16>, vector<8x64xf32> -> vector<8x64xf32>
    %c0_68 = arith.constant 0 : index
    %c0_69 = arith.constant 0 : index
    %133 = vector.load %arg21[%c0_68, %c0_69] : memref<1x64xf32, #tpu.memory_space<vmem>>, vector<1x64xf32>
    %134 = vector.broadcast %133 : vector<1x64xf32> to vector<8x64xf32>
    %135 = arith.addf %132, %134 : vector<8x64xf32>
    %c0_70 = arith.constant 0 : index
    %c0_71 = arith.constant 0 : index
    %136 = vector.load %arg22[%c0_70, %c0_71] : memref<1x64xf32, #tpu.memory_space<vmem>>, vector<1x64xf32>
    %c0_72 = arith.constant 0 : index
    %c0_73 = arith.constant 0 : index
    %137 = vector.load %arg23[%c0_72, %c0_73] : memref<1x64xf32, #tpu.memory_space<vmem>>, vector<1x64xf32>
    %cst_74 = arith.constant dense<0.000000e+00> : vector<8xf32>
    %138 = vector.multi_reduction <add>, %135, %cst_74 [1] : vector<8x64xf32> to vector<8xf32>
    %139 = vector.shape_cast %138 : vector<8xf32> to vector<8x1xf32>
    %cst_75 = arith.constant 6.400000e+01 : f32
    %140 = vector.broadcast %cst_75 : f32 to vector<8x1xf32>
    %141 = arith.divf %139, %140 : vector<8x1xf32>
    %142 = vector.broadcast %141 : vector<8x1xf32> to vector<8x64xf32>
    %143 = arith.subf %135, %142 : vector<8x64xf32>
    %144 = arith.mulf %143, %143 : vector<8x64xf32>
    %cst_76 = arith.constant dense<0.000000e+00> : vector<8xf32>
    %145 = vector.multi_reduction <add>, %144, %cst_76 [1] : vector<8x64xf32> to vector<8xf32>
    %146 = vector.shape_cast %145 : vector<8xf32> to vector<8x1xf32>
    %cst_77 = arith.constant 6.400000e+01 : f32
    %147 = vector.broadcast %cst_77 : f32 to vector<8x1xf32>
    %148 = arith.divf %146, %147 : vector<8x1xf32>
    %cst_78 = arith.constant 9.99999974E-6 : f32
    %149 = vector.broadcast %cst_78 : f32 to vector<8x1xf32>
    %150 = arith.addf %148, %149 : vector<8x1xf32>
    %151 = math.rsqrt %150 : vector<8x1xf32>
    %152 = vector.broadcast %151 : vector<8x1xf32> to vector<8x64xf32>
    %153 = arith.mulf %143, %152 : vector<8x64xf32>
    %154 = vector.broadcast %136 : vector<1x64xf32> to vector<8x64xf32>
    %155 = arith.mulf %153, %154 : vector<8x64xf32>
    %156 = vector.broadcast %137 : vector<1x64xf32> to vector<8x64xf32>
    %157 = arith.addf %155, %156 : vector<8x64xf32>
    %cst_79 = arith.constant 0.000000e+00 : f32
    %158 = vector.broadcast %cst_79 : f32 to vector<8x64xf32>
    %159 = arith.maximumf %157, %158 : vector<8x64xf32>
    %c0_80 = arith.constant 0 : index
    %c0_81 = arith.constant 0 : index
    %160 = vector.load %arg24[%c0_80, %c0_81] : memref<1x64xf32, #tpu.memory_space<vmem>>, vector<1x64xf32>
    %161 = vector.broadcast %160 : vector<1x64xf32> to vector<8x64xf32>
    %162 = arith.mulf %159, %161 : vector<8x64xf32>
    %cst_82 = arith.constant dense<0.000000e+00> : vector<8xf32>
    %163 = vector.multi_reduction <add>, %162, %cst_82 [1] : vector<8x64xf32> to vector<8xf32>
    %164 = vector.shape_cast %163 : vector<8xf32> to vector<8x1xf32>
    %c0_83 = arith.constant 0 : index
    %c0_84 = arith.constant 0 : index
    %165 = vector.load %arg25[%c0_83, %c0_84] : memref<1x1xf32, #tpu.memory_space<vmem>>, vector<1x1xf32>
    %166 = vector.broadcast %165 : vector<1x1xf32> to vector<8x1xf32>
    %167 = arith.addf %164, %166 : vector<8x1xf32>
    %168 = math.tanh %167 : vector<8x1xf32>
    %c0_85 = arith.constant 0 : index
    %c0_86 = arith.constant 0 : index
    %169 = vector.load %arg26[%c0_85, %c0_86] : memref<8x1xf32, #tpu.memory_space<vmem>>, vector<8x1xf32>
    tpu.vector_store %arg26[%c0_85, %c0_86], %168 {strides = array<i32>} : memref<8x1xf32, #tpu.memory_space<vmem>>, vector<8x1xf32>,
    return
  }
  func.func @transform_0(%arg0: i32) -> (i32, i32) {
    %c0_i32 = arith.constant 0 : i32
    %c0_i32_0 = arith.constant 0 : i32
    return %arg0, %c0_i32 : i32, i32
  }
  func.func @transform_1(%arg0: i32) -> (i32, i32) {
    %c0_i32 = arith.constant 0 : i32
    %c0_i32_0 = arith.constant 0 : i32
    return %arg0, %c0_i32 : i32, i32
  }
  func.func @transform_2(%arg0: i32) -> (i32, i32) {
    %c0_i32 = arith.constant 0 : i32
    %c0_i32_0 = arith.constant 0 : i32
    %c0_i32_1 = arith.constant 0 : i32
    return %c0_i32, %c0_i32_0 : i32, i32
  }
  func.func @transform_3(%arg0: i32) -> (i32, i32) {
    %c0_i32 = arith.constant 0 : i32
    %c0_i32_0 = arith.constant 0 : i32
    %c0_i32_1 = arith.constant 0 : i32
    return %c0_i32, %c0_i32_0 : i32, i32
  }
  func.func @transform_4(%arg0: i32) -> (i32, i32) {
    %c0_i32 = arith.constant 0 : i32
    %c0_i32_0 = arith.constant 0 : i32
    %c0_i32_1 = arith.constant 0 : i32
    return %c0_i32, %c0_i32_0 : i32, i32
  }
  func.func @transform_5(%arg0: i32) -> (i32, i32) {
    %c0_i32 = arith.constant 0 : i32
    %c0_i32_0 = arith.constant 0 : i32
    %c0_i32_1 = arith.constant 0 : i32
    return %c0_i32, %c0_i32_0 : i32, i32
  }
  func.func @transform_6(%arg0: i32) -> (i32, i32) {
    %c0_i32 = arith.constant 0 : i32
    %c0_i32_0 = arith.constant 0 : i32
    %c0_i32_1 = arith.constant 0 : i32
    return %c0_i32, %c0_i32_0 : i32, i32
  }
  func.func @transform_7(%arg0: i32) -> (i32, i32) {
    %c0_i32 = arith.constant 0 : i32
    %c0_i32_0 = arith.constant 0 : i32
    %c0_i32_1 = arith.constant 0 : i32
    return %c0_i32, %c0_i32_0 : i32, i32
  }
  func.func @transform_8(%arg0: i32) -> (i32, i32) {
    %c0_i32 = arith.constant 0 : i32
    %c0_i32_0 = arith.constant 0 : i32
    %c0_i32_1 = arith.constant 0 : i32
    return %c0_i32, %c0_i32_0 : i32, i32
  }
  func.func @transform_9(%arg0: i32) -> (i32, i32) {
    %c0_i32 = arith.constant 0 : i32
    %c0_i32_0 = arith.constant 0 : i32
    %c0_i32_1 = arith.constant 0 : i32
    return %c0_i32, %c0_i32_0 : i32, i32
  }
  func.func @transform_10(%arg0: i32) -> (i32, i32) {
    %c0_i32 = arith.constant 0 : i32
    %c0_i32_0 = arith.constant 0 : i32
    %c0_i32_1 = arith.constant 0 : i32
    return %c0_i32, %c0_i32_0 : i32, i32
  }
  func.func @transform_11(%arg0: i32) -> (i32, i32) {
    %c0_i32 = arith.constant 0 : i32
    %c0_i32_0 = arith.constant 0 : i32
    %c0_i32_1 = arith.constant 0 : i32
    return %c0_i32, %c0_i32_0 : i32, i32
  }
  func.func @transform_12(%arg0: i32) -> (i32, i32) {
    %c0_i32 = arith.constant 0 : i32
    %c0_i32_0 = arith.constant 0 : i32
    %c0_i32_1 = arith.constant 0 : i32
    return %c0_i32, %c0_i32_0 : i32, i32
  }
  func.func @transform_13(%arg0: i32) -> (i32, i32) {
    %c0_i32 = arith.constant 0 : i32
    %c0_i32_0 = arith.constant 0 : i32
    %c0_i32_1 = arith.constant 0 : i32
    return %c0_i32, %c0_i32_0 : i32, i32
  }
  func.func @transform_14(%arg0: i32) -> (i32, i32) {
    %c0_i32 = arith.constant 0 : i32
    %c0_i32_0 = arith.constant 0 : i32
    %c0_i32_1 = arith.constant 0 : i32
    return %c0_i32, %c0_i32_0 : i32, i32
  }
  func.func @transform_15(%arg0: i32) -> (i32, i32) {
    %c0_i32 = arith.constant 0 : i32
    %c0_i32_0 = arith.constant 0 : i32
    %c0_i32_1 = arith.constant 0 : i32
    return %c0_i32, %c0_i32_0 : i32, i32
  }
  func.func @transform_16(%arg0: i32) -> (i32, i32) {
    %c0_i32 = arith.constant 0 : i32
    %c0_i32_0 = arith.constant 0 : i32
    %c0_i32_1 = arith.constant 0 : i32
    return %c0_i32, %c0_i32_0 : i32, i32
  }
  func.func @transform_17(%arg0: i32) -> (i32, i32) {
    %c0_i32 = arith.constant 0 : i32
    %c0_i32_0 = arith.constant 0 : i32
    %c0_i32_1 = arith.constant 0 : i32
    return %c0_i32, %c0_i32_0 : i32, i32
  }
  func.func @transform_18(%arg0: i32) -> (i32, i32) {
    %c0_i32 = arith.constant 0 : i32
    %c0_i32_0 = arith.constant 0 : i32
    %c0_i32_1 = arith.constant 0 : i32
    return %c0_i32, %c0_i32_0 : i32, i32
  }
  func.func @transform_19(%arg0: i32) -> (i32, i32) {
    %c0_i32 = arith.constant 0 : i32
    %c0_i32_0 = arith.constant 0 : i32
    %c0_i32_1 = arith.constant 0 : i32
    return %c0_i32, %c0_i32_0 : i32, i32
  }
  func.func @transform_20(%arg0: i32) -> (i32, i32) {
    %c0_i32 = arith.constant 0 : i32
    %c0_i32_0 = arith.constant 0 : i32
    %c0_i32_1 = arith.constant 0 : i32
    return %c0_i32, %c0_i32_0 : i32, i32
  }
  func.func @transform_21(%arg0: i32) -> (i32, i32) {
    %c0_i32 = arith.constant 0 : i32
    %c0_i32_0 = arith.constant 0 : i32
    %c0_i32_1 = arith.constant 0 : i32
    return %c0_i32, %c0_i32_0 : i32, i32
  }
  func.func @transform_22(%arg0: i32) -> (i32, i32) {
    %c0_i32 = arith.constant 0 : i32
    %c0_i32_0 = arith.constant 0 : i32
    %c0_i32_1 = arith.constant 0 : i32
    return %c0_i32, %c0_i32_0 : i32, i32
  }
  func.func @transform_23(%arg0: i32) -> (i32, i32) {
    %c0_i32 = arith.constant 0 : i32
    %c0_i32_0 = arith.constant 0 : i32
    %c0_i32_1 = arith.constant 0 : i32
    return %c0_i32, %c0_i32_0 : i32, i32
  }
  func.func @transform_24(%arg0: i32) -> (i32, i32) {
    %c0_i32 = arith.constant 0 : i32
    %c0_i32_0 = arith.constant 0 : i32
    %c0_i32_1 = arith.constant 0 : i32
    return %c0_i32, %c0_i32_0 : i32, i32
  }
  func.func @transform_25(%arg0: i32) -> (i32, i32) {
    %c0_i32 = arith.constant 0 : i32
    %c0_i32_0 = arith.constant 0 : i32
    return %arg0, %c0_i32 : i32, i32
  }
}

</mosaic_0001>

<bundles_post_ra>
// kernel: tpu_custom_call.1
= control target key start
LH: loop header
LB: loop body
LE: loop exit
PB: predicated region body
PF: predicated region fallthrough
CT: control target
= control target key end

     0   :  { %s11073_s0 = inlined_call_operand.hbm [shape: f32[8,1536], index: 0, kind: input, shape index: {}]   ;;  %s11074_s1 = inlined_call_operand.hbm [shape: f32[8,1536], index: 1, kind: input, shape index: {}]   ;;  %s11075_s2 = inlined_call_operand.hbm [shape: bf16[1536,768], index: 2, kind: input, shape index: {}]   ;;  %s11076_s3 = inlined_call_operand.hbm [shape: f32[1,768], index: 3, kind: input, shape index: {}]   ;;  %s11077_s4 = inlined_call_operand.hbm [shape: f32[1,768], index: 4, kind: input, shape index: {}]   ;;  %s11078_s5 = inlined_call_operand.hbm [shape: f32[1,768], index: 5, kind: input, shape index: {}]   ;;  %s11079_s6 = inlined_call_operand.hbm [shape: bf16[768,384], index: 6, kind: input, shape index: {}]   ;;  %s11080_s7 = inlined_call_operand.hbm [shape: f32[1,384], index: 7, kind: input, shape index: {}]   ;;  %s11081_s8 = inlined_call_operand.hbm [shape: f32[1,384], index: 8, kind: input, shape index: {}]   ;;  %s11082_s9 = inlined_call_operand.hbm [shape: f32[1,384], index: 9, kind: input, shape index: {}]   ;;  %s11083_s10 = inlined_call_operand.vmem [shape: bf16[384,192], index: 10, kind: input, shape index: {}]   ;;  %s11084_s11 = inlined_call_operand.hbm [shape: f32[1,192], index: 11, kind: input, shape index: {}]   ;;  %s11085_s12 = inlined_call_operand.hbm [shape: f32[1,192], index: 12, kind: input, shape index: {}]   ;;  %s11086_s13 = inlined_call_operand.hbm [shape: f32[1,192], index: 13, kind: input, shape index: {}]   ;;  %s11087_s14 = inlined_call_operand.hbm [shape: bf16[192,192], index: 14, kind: input, shape index: {}]   ;;  %s11088_s15 = inlined_call_operand.hbm [shape: bf16[192,192], index: 15, kind: input, shape index: {}]   ;;  %s11089_s16 = inlined_call_operand.hbm [shape: f32[1,192], index: 16, kind: input, shape index: {}]   ;;  %s11090_s17 = inlined_call_operand.hbm [shape: f32[1,192], index: 17, kind: input, shape index: {}]   ;;  %s11091_s18 = inlined_call_operand.hbm [shape: f32[1,192], index: 18, kind: input, shape index: {}]   ;;  %s11092_s19 = inlined_call_operand.vmem [shape: bf16[192,64], index: 19, kind: input, shape index: {}]   ;;  %s11093_s20 = inlined_call_operand.hbm [shape: f32[1,64], index: 20, kind: input, shape index: {}]   ;;  %s11094_s21 = inlined_call_operand.hbm [shape: f32[1,64], index: 21, kind: input, shape index: {}]   ;;  %s11095_s22 = inlined_call_operand.hbm [shape: f32[1,64], index: 22, kind: input, shape index: {}]   ;;  %s11096_s23 = inlined_call_operand.hbm [shape: f32[1,64], index: 23, kind: input, shape index: {}]   ;;  %s11097_s24 = inlined_call_operand.<no memory space> [shape: f32[1,1], index: 24, kind: input, shape index: {}]   ;;  %s11098_s25 = inlined_call_operand.vmem [shape: f32[8,1], index: 25, kind: output, shape index: {}]  }
   0x1   :  { %11109 = sst [smem:[#allocation49_spill]] %s11073_s0  ;;  %v30_v0 = vstv %s11097_s24 }
   0x2   :  { %11110 = sst [smem:[#allocation50_spill]] %s11074_s1  ;;  %31 = vst [vmem:[#allocation2] sm:$0x1] %v30_v0 }
   0x3   :  { %11111 = sst [smem:[#allocation51_spill]] %s11075_s2 }
   0x4   :  { %11112 = sst [smem:[#allocation52_spill]] %s11076_s3 }
   0x5   :  { %11113 = sst [smem:[#allocation53_spill]] %s11077_s4 }
   0x6   :  { %11114 = sst [smem:[#allocation54_spill]] %s11078_s5 }
   0x7   :  { %11115 = sst [smem:[#allocation55_spill]] %s11079_s6 }
   0x8   :  { %11116 = sst [smem:[#allocation56_spill]] %s11080_s7 }
   0x9   :  { %11117 = sst [smem:[#allocation57_spill]] %s11081_s8 }
   0xa   :  { %11118 = sst [smem:[#allocation58_spill]] %s11082_s9 }
   0xb   :  { %32 = vsyncpa [#allocation4], 0 }
   0xc   :  { %33 = vsyncpa [#allocation6], 0 }
   0xd   :  { %34 = vsyncpa [#allocation9], 0 }
   0xe   :  { %35 = vsyncpa [#allocation12], 0 }
   0xf   :  { %36 = vsyncpa [#allocation15], 0 }
  0x10   :  { %37 = vsyncpa [#allocation18], 0 }
  0x11   :  { %38 = vsyncpa [#allocation21], 0 }
  0x12   :  { %39 = vsyncpa [#allocation24], 0 }
  0x13   :  { %40 = vsyncpa [#allocation27], 0 }
  0x14   :  { %41 = vsyncpa [#allocation30], 0 }
  0x15   :  { %42 = vsyncpa [#allocation33], 0 }
  0x16   :  { %43 = vsyncpa [#allocation36], 0  ;;  %s10114_s6 = smov [#allocation5]   ;;  %s10115_s7 = smov [#allocation8]  }
  0x17   :  { %s60_s30 = sshll.u32 %s10114_s6, 4  ;;  %s82_s3 = sshll.u32 %s10115_s7, 4  ;;  %s61_s30 = int_to_ptr.vmem [resolvable:$true] %s60_s30  ;;  %s83_s3 = int_to_ptr.vmem [resolvable:$true] %s82_s3 }
  0x18   :  { %s11119_s1 = sld [smem:[#allocation50_spill]] }
  0x1e   :  { %s9606_s8 = scalar_lea.hbm %s11119_s1, 1536 }
  0x1f   :  { %p9607_p0 = scmp.ne.s32.totalorder %s11119_s1, %s9606_s8  ;;  %p9610_p1 = scmp.lt.u32.totalorder %s9606_s8, %s11119_s1 }
  0x21   :  { %p9612_p2 = pnand %p9610_p1, %p9607_p0 }
  0x23   :  { %9615 = shalt.err (!%p9612_p2)
}
  0x24   :  { %s9616_s5 = scalar_lea.vmem %s61_s30, 1536  ;;  %p9621_p4 = scmp.lt.s32.totalorder %s61_s30, %s61_s30 }
  0x25   :  { %p9617_p3 = scmp.ne.s32.totalorder %s61_s30, %s9616_s5  ;;  %p9622_p5 = scmp.lt.s32.totalorder %s9616_s5, %s9616_s5 }
  0x27   :  { %p9623_p6 = por %p9622_p5, %p9621_p4 }
  0x29   :  { %p9624_p7 = pnand %p9623_p6, %p9617_p3 }
  0x2b   :  { %9627 = shalt.err (!%p9624_p7)
}
  0x2c   :  { %63 = dma.hbm_to_vmem [thread:$0]  %s11119_s1, 1536, %s61_s30, [#allocation6]  }
  0x2d   :  { %s11120_s7 = sld [smem:[#allocation52_spill]] }
  0x33   :  { %s9628_s24 = scalar_lea.hbm %s11120_s7, 96 }
  0x34   :  { %p9629_p8 = scmp.ne.s32.totalorder %s11120_s7, %s9628_s24  ;;  %p9632_p9 = scmp.lt.u32.totalorder %s9628_s24, %s11120_s7 }
  0x36   :  { %p9634_p10 = pnand %p9632_p9, %p9629_p8 }
  0x38   :  { %9637 = shalt.err (!%p9634_p10)
}
  0x39   :  { %s9638_s28 = scalar_lea.vmem %s83_s3, 96  ;;  %p9643_p12 = scmp.lt.s32.totalorder %s83_s3, %s83_s3 }
  0x3a   :  { %p9639_p11 = scmp.ne.s32.totalorder %s83_s3, %s9638_s28  ;;  %p9644_p13 = scmp.lt.s32.totalorder %s9638_s28, %s9638_s28 }
  0x3c   :  { %p9645_p0 = por %p9644_p13, %p9643_p12 }
  0x3e   :  { %p9646_p1 = pnand %p9645_p0, %p9639_p11 }
  0x40   :  { %9649 = shalt.err (!%p9646_p1)
}
  0x41   :  { %85 = dma.hbm_to_vmem [thread:$0]  %s11120_s7, 96, %s83_s3, [#allocation9]  }
  0x42   :  { %s10116_s9 = smov [#allocation11]   ;;  %s10117_s0 = smov [#allocation14]  }
  0x43   :  { %s102_s5 = sshll.u32 %s10116_s9, 4  ;;  %s124_s29 = sshll.u32 %s10117_s0, 4  ;;  %s103_s5 = int_to_ptr.vmem [resolvable:$true] %s102_s5  ;;  %s125_s29 = int_to_ptr.vmem [resolvable:$true] %s124_s29 }
  0x44   :  { %s11121_s24 = sld [smem:[#allocation54_spill]] }
  0x4a   :  { %s9650_s26 = scalar_lea.hbm %s11121_s24, 96 }
  0x4b   :  { %p9651_p2 = scmp.ne.s32.totalorder %s11121_s24, %s9650_s26  ;;  %p9654_p3 = scmp.lt.u32.totalorder %s9650_s26, %s11121_s24 }
  0x4d   :  { %p9656_p4 = pnand %p9654_p3, %p9651_p2 }
  0x4f   :  { %9659 = shalt.err (!%p9656_p4)
}
  0x50   :  { %s9660_s3 = scalar_lea.vmem %s103_s5, 96  ;;  %p9665_p6 = scmp.lt.s32.totalorder %s103_s5, %s103_s5 }
  0x51   :  { %p9661_p5 = scmp.ne.s32.totalorder %s103_s5, %s9660_s3  ;;  %p9666_p7 = scmp.lt.s32.totalorder %s9660_s3, %s9660_s3 }
  0x53   :  { %p9667_p8 = por %p9666_p7, %p9665_p6 }
  0x55   :  { %p9668_p9 = pnand %p9667_p8, %p9661_p5 }
  0x57   :  { %9671 = shalt.err (!%p9668_p9)
}
  0x58   :  { %105 = dma.hbm_to_vmem [thread:$0]  %s11121_s24, 96, %s103_s5, [#allocation12]  }
  0x59   :  { %s11122_s0 = sld [smem:[#allocation56_spill]] }
  0x5f   :  { %s9672_s2 = scalar_lea.hbm %s11122_s0, 48 }
  0x60   :  { %p9673_p10 = scmp.ne.s32.totalorder %s11122_s0, %s9672_s2  ;;  %p9676_p11 = scmp.lt.u32.totalorder %s9672_s2, %s11122_s0 }
  0x62   :  { %p9678_p12 = pnand %p9676_p11, %p9673_p10 }
  0x64   :  { %9681 = shalt.err (!%p9678_p12)
}
  0x65   :  { %s9682_s4 = scalar_lea.vmem %s125_s29, 48  ;;  %s9686_s28 = scalar_lea.vmem %s125_s29, 64 }
  0x66   :  { %p9683_p13 = scmp.ne.s32.totalorder %s125_s29, %s9682_s4  ;;  %p9687_p0 = scmp.lt.s32.totalorder %s125_s29, %s125_s29 }
  0x67   :  { %p9688_p1 = scmp.lt.s32.totalorder %s9686_s28, %s9682_s4 }
  0x69   :  { %p9689_p2 = por %p9688_p1, %p9687_p0 }
  0x6b   :  { %p9690_p3 = pnand %p9689_p2, %p9683_p13 }
  0x6d   :  { %9693 = shalt.err (!%p9690_p3)
}
  0x6e   :  { %127 = dma.hbm_to_vmem [thread:$0]  %s11122_s0, 48, %s125_s29, [#allocation15]  }
  0x6f   :  { %s10118_s3 = smov [#allocation17]   ;;  %s10119_s30 = smov [#allocation20]  }
  0x70   :  { %s144_s7 = sshll.u32 %s10118_s3, 4  ;;  %s166_s1 = sshll.u32 %s10119_s30, 4  ;;  %s145_s7 = int_to_ptr.vmem [resolvable:$true] %s144_s7  ;;  %s167_s1 = int_to_ptr.vmem [resolvable:$true] %s166_s1 }
  0x71   :  { %s11123_s6 = sld [smem:[#allocation58_spill]] }
  0x77   :  { %s9694_s27 = scalar_lea.hbm %s11123_s6, 48 }
  0x78   :  { %p9695_p4 = scmp.ne.s32.totalorder %s11123_s6, %s9694_s27  ;;  %p9698_p5 = scmp.lt.u32.totalorder %s9694_s27, %s11123_s6 }
  0x7a   :  { %p9700_p6 = pnand %p9698_p5, %p9695_p4 }
  0x7c   :  { %9703 = shalt.err (!%p9700_p6)
}
  0x7d   :  { %s9704_s29 = scalar_lea.vmem %s145_s7, 48  ;;  %s9708_s0 = scalar_lea.vmem %s145_s7, 64 }
  0x7e   :  { %p9705_p7 = scmp.ne.s32.totalorder %s145_s7, %s9704_s29  ;;  %p9709_p8 = scmp.lt.s32.totalorder %s145_s7, %s145_s7 }
  0x7f   :  { %p9710_p9 = scmp.lt.s32.totalorder %s9708_s0, %s9704_s29 }
  0x81   :  { %p9711_p10 = por %p9710_p9, %p9709_p8 }
  0x83   :  { %p9712_p11 = pnand %p9711_p10, %p9705_p7 }
  0x85   :  { %9715 = shalt.err (!%p9712_p11)
}
  0x86   :  { %147 = dma.hbm_to_vmem [thread:$0]  %s11123_s6, 48, %s145_s7, [#allocation18]  }
  0x87   :  { %s9716_s9 = scalar_lea.hbm %s11085_s12, 32 }
  0x88   :  { %p9717_p12 = scmp.ne.s32.totalorder %s11085_s12, %s9716_s9  ;;  %p9720_p13 = scmp.lt.u32.totalorder %s9716_s9, %s11085_s12 }
  0x8a   :  { %p9722_p0 = pnand %p9720_p13, %p9717_p12 }
  0x8c   :  { %9725 = shalt.err (!%p9722_p0)
}
  0x8d   :  { %s9726_s4 = scalar_lea.vmem %s167_s1, 32  ;;  %p9731_p2 = scmp.lt.s32.totalorder %s167_s1, %s167_s1 }
  0x8e   :  { %p9727_p1 = scmp.ne.s32.totalorder %s167_s1, %s9726_s4  ;;  %p9732_p3 = scmp.lt.s32.totalorder %s9726_s4, %s9726_s4 }
  0x90   :  { %p9733_p4 = por %p9732_p3, %p9731_p2 }
  0x92   :  { %p9734_p5 = pnand %p9733_p4, %p9727_p1 }
  0x94   :  { %9737 = shalt.err (!%p9734_p5)
}
  0x95   :  { %169 = dma.hbm_to_vmem [thread:$0]  %s11085_s12, 32, %s167_s1, [#allocation21]  }
  0x96   :  { %s10120_s28 = smov [#allocation23]   ;;  %s9738_s24 = scalar_lea.hbm %s11087_s14, 3072 }
  0x97   :  { %s185_s29 = sshll.u32 %s10120_s28, 4  ;;  %p9739_p6 = scmp.ne.s32.totalorder %s11087_s14, %s9738_s24  ;;  %s186_s29 = int_to_ptr.vmem [resolvable:$true] %s185_s29 }
  0x98   :  { %p9742_p7 = scmp.lt.u32.totalorder %s9738_s24, %s11087_s14 }
  0x9a   :  { %p9744_p8 = pnand %p9742_p7, %p9739_p6 }
  0x9c   :  { %9747 = shalt.err (!%p9744_p8)
}
  0x9d   :  { %s9748_s27 = scalar_lea.vmem %s186_s29, 3072  ;;  %p9753_p10 = scmp.lt.s32.totalorder %s186_s29, %s186_s29 }
  0x9e   :  { %p9749_p9 = scmp.ne.s32.totalorder %s186_s29, %s9748_s27  ;;  %p9754_p11 = scmp.lt.s32.totalorder %s9748_s27, %s9748_s27 }
  0xa0   :  { %p9755_p12 = por %p9754_p11, %p9753_p10 }
  0xa2   :  { %p9756_p13 = pnand %p9755_p12, %p9749_p9 }
  0xa4   :  { %9759 = shalt.err (!%p9756_p13)
}
  0xa5   :  { %s10121_s12 = smov 128   ;;  %s10122_s1 = smov 8  }
  0xa6   :  { %191 = dma.hbm_to_vmem [thread:$0]  %s11087_s14, 3072, %s186_s29, [#allocation24], %s10121_s12, %s10121_s12, %s10122_s1  }
  0xa7   :  { %s10123_s4 = smov [#allocation26]   ;;  %s10124_s6 = smov [#allocation29]  }
  0xa8   :  { %s210_s7 = sshll.u32 %s10123_s4, 4  ;;  %s230_s28 = sshll.u32 %s10124_s6, 4  ;;  %s211_s7 = int_to_ptr.vmem [resolvable:$true] %s210_s7  ;;  %s231_s28 = int_to_ptr.vmem [resolvable:$true] %s230_s28 }
  0xa9   :  { %s9760_s24 = scalar_lea.hbm %s11089_s16, 32 }
  0xaa   :  { %p9761_p0 = scmp.ne.s32.totalorder %s11089_s16, %s9760_s24  ;;  %p9764_p1 = scmp.lt.u32.totalorder %s9760_s24, %s11089_s16 }
  0xac   :  { %p9766_p2 = pnand %p9764_p1, %p9761_p0 }
  0xae   :  { %9769 = shalt.err (!%p9766_p2)
}
  0xaf   :  { %s9770_s14 = scalar_lea.vmem %s211_s7, 32  ;;  %p9775_p4 = scmp.lt.s32.totalorder %s211_s7, %s211_s7 }
  0xb0   :  { %p9771_p3 = scmp.ne.s32.totalorder %s211_s7, %s9770_s14  ;;  %p9776_p5 = scmp.lt.s32.totalorder %s9770_s14, %s9770_s14 }
  0xb2   :  { %p9777_p6 = por %p9776_p5, %p9775_p4 }
  0xb4   :  { %p9778_p7 = pnand %p9777_p6, %p9771_p3 }
  0xb6   :  { %9781 = shalt.err (!%p9778_p7)
}
  0xb7   :  { %213 = dma.hbm_to_vmem [thread:$0]  %s11089_s16, 32, %s211_s7, [#allocation27]  }
  0xb8   :  { %s9782_s4 = scalar_lea.hbm %s11091_s18, 32 }
  0xb9   :  { %p9783_p8 = scmp.ne.s32.totalorder %s11091_s18, %s9782_s4  ;;  %p9786_p9 = scmp.lt.u32.totalorder %s9782_s4, %s11091_s18 }
  0xbb   :  { %p9788_p10 = pnand %p9786_p9, %p9783_p8 }
  0xbd   :  { %9791 = shalt.err (!%p9788_p10)
}
  0xbe   :  { %s9792_s3 = scalar_lea.vmem %s231_s28, 32  ;;  %p9797_p12 = scmp.lt.s32.totalorder %s231_s28, %s231_s28 }
  0xbf   :  { %p9793_p11 = scmp.ne.s32.totalorder %s231_s28, %s9792_s3  ;;  %p9798_p13 = scmp.lt.s32.totalorder %s9792_s3, %s9792_s3 }
  0xc1   :  { %p9799_p0 = por %p9798_p13, %p9797_p12 }
  0xc3   :  { %p9800_p1 = pnand %p9799_p0, %p9793_p11 }
  0xc5   :  { %9803 = shalt.err (!%p9800_p1)
}
  0xc6   :  { %233 = dma.hbm_to_vmem [thread:$0]  %s11091_s18, 32, %s231_s28, [#allocation30]  }
  0xc7   :  { %s10125_s30 = smov [#allocation32]   ;;  %s10126_s2 = smov [#allocation3]  }
  0xc8   :  { %s252_s9 = sshll.u32 %s10125_s30, 4  ;;  %s50_s14 = sshll.u32 %s10126_s2, 4  ;;  %s253_s9 = int_to_ptr.vmem [resolvable:$true] %s252_s9  ;;  %s51_s14 = int_to_ptr.vmem [resolvable:$true] %s50_s14 }
  0xc9   :  { %s9804_s26 = scalar_lea.hbm %s11094_s21, 16 }
  0xca   :  { %p9805_p2 = scmp.ne.s32.totalorder %s11094_s21, %s9804_s26  ;;  %p9808_p3 = scmp.lt.u32.totalorder %s9804_s26, %s11094_s21 }
  0xcc   :  { %p9810_p4 = pnand %p9808_p3, %p9805_p2 }
  0xce   :  { %9813 = shalt.err (!%p9810_p4)
}
  0xcf   :  { %s9814_s18 = scalar_lea.vmem %s253_s9, 16  ;;  %s9818_s28 = scalar_lea.vmem %s253_s9, 32 }
  0xd0   :  { %p9815_p5 = scmp.ne.s32.totalorder %s253_s9, %s9814_s18  ;;  %p9819_p6 = scmp.lt.s32.totalorder %s253_s9, %s253_s9 }
  0xd1   :  { %p9820_p7 = scmp.lt.s32.totalorder %s9818_s28, %s9814_s18 }
  0xd3   :  { %p9821_p8 = por %p9820_p7, %p9819_p6 }
  0xd5   :  { %p9822_p9 = pnand %p9821_p8, %p9815_p5 }
  0xd7   :  { %9825 = shalt.err (!%p9822_p9)
}
  0xd8   :  { %255 = dma.hbm_to_vmem [thread:$0]  %s11094_s21, 16, %s253_s9, [#allocation33]  }
  0xd9   :  { %s11124_s7 = sld [smem:[#allocation49_spill]] }
  0xdf   :  { %s9826_s30 = scalar_lea.hbm %s11124_s7, 1536 }
  0xe0   :  { %p9827_p10 = scmp.ne.s32.totalorder %s11124_s7, %s9826_s30  ;;  %p9830_p11 = scmp.lt.u32.totalorder %s9826_s30, %s11124_s7 }
  0xe2   :  { %p9832_p12 = pnand %p9830_p11, %p9827_p10 }
  0xe4   :  { %9835 = shalt.err (!%p9832_p12)
}
  0xe5   :  { %s9836_s8 = scalar_lea.vmem %s51_s14, 1536  ;;  %p9841_p0 = scmp.lt.s32.totalorder %s51_s14, %s51_s14 }
  0xe6   :  { %p9837_p13 = scmp.ne.s32.totalorder %s51_s14, %s9836_s8  ;;  %p9842_p1 = scmp.lt.s32.totalorder %s9836_s8, %s9836_s8 }
  0xe8   :  { %p9843_p2 = por %p9842_p1, %p9841_p0 }
  0xea   :  { %p9844_p3 = pnand %p9843_p2, %p9837_p13 }
  0xec   :  { %9847 = shalt.err (!%p9844_p3)
}
  0xed   :  { %53 = dma.hbm_to_vmem [thread:$0]  %s11124_s7, 1536, %s51_s14, [#allocation4]  }
  0xee   :  { %s10127_s4 = smov [#allocation7]   ;;  %s11125_s28 = sld [smem:[#allocation51_spill]] }
  0xef   :  { %s69_s6 = sshll.u32 %s10127_s4, 4  ;;  %s70_s6 = int_to_ptr.vmem [resolvable:$true] %s69_s6 }
  0xf4   :  { %s9848_s5 = scalar_lea.hbm %s11125_s28, 73728 }
  0xf5   :  { %p9849_p4 = scmp.ne.s32.totalorder %s11125_s28, %s9848_s5  ;;  %p9852_p5 = scmp.lt.u32.totalorder %s9848_s5, %s11125_s28 }
  0xf7   :  { %p9854_p6 = pnand %p9852_p5, %p9849_p4 }
  0xf9   :  { %9857 = shalt.err (!%p9854_p6)
}
  0xfa   :  { %s9858_s2 = scalar_lea.vmem %s70_s6, 73728  ;;  %p9863_p8 = scmp.lt.s32.totalorder %s70_s6, %s70_s6 }
  0xfb   :  { %p9859_p7 = scmp.ne.s32.totalorder %s70_s6, %s9858_s2  ;;  %p9864_p9 = scmp.lt.s32.totalorder %s9858_s2, %s9858_s2 }
  0xfd   :  { %p9865_p10 = por %p9864_p9, %p9863_p8 }
  0xff   :  { %p9866_p11 = pnand %p9865_p10, %p9859_p7 }
 0x101   :  { %9869 = shalt.err (!%p9866_p11)
}
 0x102   :  { %s10128_s14 = smov 384   ;;  %s10129_s7 = smov 24  }
 0x103   :  { %75 = dma.hbm_to_vmem [thread:$0]  %s11125_s28, 73728, %s70_s6, [#allocation6], %s10128_s14, %s10128_s14, %s10129_s7  }
 0x104   :  { %s10130_s26 = smov [#allocation10]   ;;  %s10131_s21 = smov [#allocation13]  }
 0x105   :  { %s92_s8 = sshll.u32 %s10130_s26, 4  ;;  %s111_s9 = sshll.u32 %s10131_s21, 4  ;;  %s93_s8 = int_to_ptr.vmem [resolvable:$true] %s92_s8  ;;  %s10423_s9 = int_to_ptr.vmem [resolvable:$true] %s111_s9 }
 0x106   :  { %s11126_s18 = sld [smem:[#allocation53_spill]] }
 0x10c   :  { %s9870_s5 = scalar_lea.hbm %s11126_s18, 96 }
 0x10d   :  { %p9871_p12 = scmp.ne.s32.totalorder %s11126_s18, %s9870_s5  ;;  %p9874_p13 = scmp.lt.u32.totalorder %s9870_s5, %s11126_s18 }
 0x10f   :  { %p9876_p0 = pnand %p9874_p13, %p9871_p12 }
 0x111   :  { %9879 = shalt.err (!%p9876_p0)
}
 0x112   :  { %s9880_s6 = scalar_lea.vmem %s93_s8, 96  ;;  %p9885_p2 = scmp.lt.s32.totalorder %s93_s8, %s93_s8 }
 0x113   :  { %p9881_p1 = scmp.ne.s32.totalorder %s93_s8, %s9880_s6  ;;  %p9886_p3 = scmp.lt.s32.totalorder %s9880_s6, %s9880_s6 }
 0x115   :  { %p9887_p4 = por %p9886_p3, %p9885_p2 }
 0x117   :  { %p9888_p5 = pnand %p9887_p4, %p9881_p1 }
 0x119   :  { %9891 = shalt.err (!%p9888_p5)
}
 0x11a   :  { %95 = dma.hbm_to_vmem [thread:$0]  %s11126_s18, 96, %s93_s8, [#allocation9]  }
 0x11b   :  { %s11127_s29 = sld [smem:[#allocation55_spill]] }
 0x121   :  { %s9892_s27 = scalar_lea.hbm %s11127_s29, 18432 }
 0x122   :  { %p9893_p6 = scmp.ne.s32.totalorder %s11127_s29, %s9892_s27  ;;  %p9896_p7 = scmp.lt.u32.totalorder %s9892_s27, %s11127_s29 }
 0x124   :  { %p9898_p8 = pnand %p9896_p7, %p9893_p6 }
 0x126   :  { %9901 = shalt.err (!%p9898_p8)
}
 0x127   :  { %s9902_s5 = scalar_lea.vmem %s10423_s9, 18432  ;;  %p9907_p10 = scmp.lt.s32.totalorder %s10423_s9, %s10423_s9 }
 0x128   :  { %p9903_p9 = scmp.ne.s32.totalorder %s10423_s9, %s9902_s5  ;;  %p9908_p11 = scmp.lt.s32.totalorder %s9902_s5, %s9902_s5 }
 0x12a   :  { %p9909_p12 = por %p9908_p11, %p9907_p10 }
 0x12c   :  { %p9910_p13 = pnand %p9909_p12, %p9903_p9 }
 0x12e   :  { %9913 = shalt.err (!%p9910_p13)
}
 0x12f   :  { %s10132_s8 = smov 192   ;;  %s10133_s18 = smov 12  }
 0x130   :  { %117 = dma.hbm_to_vmem [thread:$0]  %s11127_s29, 18432, %s10423_s9, [#allocation12], %s10132_s8, %s10132_s8, %s10133_s18  }
 0x131   :  { %s10134_s16 = smov [#allocation16]   ;;  %s10135_s6 = smov [#allocation19]  }
 0x132   :  { %s134_s30 = sshll.u32 %s10134_s16, 4  ;;  %s156_s28 = sshll.u32 %s10135_s6, 4  ;;  %s135_s30 = int_to_ptr.vmem [resolvable:$true] %s134_s30  ;;  %s157_s28 = int_to_ptr.vmem [resolvable:$true] %s156_s28 }
 0x133   :  { %s11128_s7 = sld [smem:[#allocation57_spill]] }
 0x139   :  { %s9914_s27 = scalar_lea.hbm %s11128_s7, 48 }
 0x13a   :  { %p9915_p0 = scmp.ne.s32.totalorder %s11128_s7, %s9914_s27  ;;  %p9918_p1 = scmp.lt.u32.totalorder %s9914_s27, %s11128_s7 }
 0x13c   :  { %p9920_p2 = pnand %p9918_p1, %p9915_p0 }
 0x13e   :  { %9923 = shalt.err (!%p9920_p2)
}
 0x13f   :  { %s9924_s9 = scalar_lea.vmem %s135_s30, 48  ;;  %s9928_s29 = scalar_lea.vmem %s135_s30, 64 }
 0x140   :  { %p9925_p3 = scmp.ne.s32.totalorder %s135_s30, %s9924_s9  ;;  %p9929_p4 = scmp.lt.s32.totalorder %s135_s30, %s135_s30 }
 0x141   :  { %p9930_p5 = scmp.lt.s32.totalorder %s9928_s29, %s9924_s9 }
 0x143   :  { %p9931_p6 = por %p9930_p5, %p9929_p4 }
 0x145   :  { %p9932_p7 = pnand %p9931_p6, %p9925_p3 }
 0x147   :  { %9935 = shalt.err (!%p9932_p7)
}
 0x148   :  { %137 = dma.hbm_to_vmem [thread:$0]  %s11128_s7, 48, %s135_s30, [#allocation15]  }
 0x149   :  { %s9936_s3 = scalar_lea.hbm %s11084_s11, 32 }
 0x14a   :  { %p9937_p8 = scmp.ne.s32.totalorder %s11084_s11, %s9936_s3  ;;  %p9940_p9 = scmp.lt.u32.totalorder %s9936_s3, %s11084_s11 }
 0x14c   :  { %p9942_p10 = pnand %p9940_p9, %p9937_p8 }
 0x14e   :  { %9945 = shalt.err (!%p9942_p10)
}
 0x14f   :  { %s9946_s27 = scalar_lea.vmem %s157_s28, 32  ;;  %p9951_p12 = scmp.lt.s32.totalorder %s157_s28, %s157_s28 }
 0x150   :  { %p9947_p11 = scmp.ne.s32.totalorder %s157_s28, %s9946_s27  ;;  %p9952_p13 = scmp.lt.s32.totalorder %s9946_s27, %s9946_s27 }
 0x152   :  { %p9953_p0 = por %p9952_p13, %p9951_p12 }
 0x154   :  { %p9954_p1 = pnand %p9953_p0, %p9947_p11 }
 0x156   :  { %9957 = shalt.err (!%p9954_p1)
}
 0x157   :  { %159 = dma.hbm_to_vmem [thread:$0]  %s11084_s11, 32, %s157_s28, [#allocation18]  }
 0x158   :  { %s10136_s26 = smov [#allocation22]   ;;  %s10137_s4 = smov [#allocation25]  }
 0x159   :  { %s176_s21 = sshll.u32 %s10136_s26, 4  ;;  %s197_s0 = sshll.u32 %s10137_s4, 4  ;;  %s177_s21 = int_to_ptr.vmem [resolvable:$true] %s176_s21  ;;  %s10478_s0 = int_to_ptr.vmem [resolvable:$true] %s197_s0 }
 0x15a   :  { %s9958_s5 = scalar_lea.hbm %s11086_s13, 32 }
 0x15b   :  { %p9959_p2 = scmp.ne.s32.totalorder %s11086_s13, %s9958_s5  ;;  %p9962_p3 = scmp.lt.u32.totalorder %s9958_s5, %s11086_s13 }
 0x15d   :  { %p9964_p4 = pnand %p9962_p3, %p9959_p2 }
 0x15f   :  { %9967 = shalt.err (!%p9964_p4)
}
 0x160   :  { %s9968_s11 = scalar_lea.vmem %s177_s21, 32  ;;  %p9973_p6 = scmp.lt.s32.totalorder %s177_s21, %s177_s21 }
 0x161   :  { %p9969_p5 = scmp.ne.s32.totalorder %s177_s21, %s9968_s11  ;;  %p9974_p7 = scmp.lt.s32.totalorder %s9968_s11, %s9968_s11 }
 0x163   :  { %p9975_p8 = por %p9974_p7, %p9973_p6 }
 0x165   :  { %p9976_p9 = pnand %p9975_p8, %p9969_p5 }
 0x167   :  { %9979 = shalt.err (!%p9976_p9)
}
 0x168   :  { %179 = dma.hbm_to_vmem [thread:$0]  %s11086_s13, 32, %s177_s21, [#allocation21]  }
 0x169   :  { %s9980_s14 = scalar_lea.hbm %s11088_s15, 3072 }
 0x16a   :  { %p9981_p10 = scmp.ne.s32.totalorder %s11088_s15, %s9980_s14  ;;  %p9984_p11 = scmp.lt.u32.totalorder %s9980_s14, %s11088_s15 }
 0x16c   :  { %p9986_p12 = pnand %p9984_p11, %p9981_p10 }
 0x16e   :  { %9989 = shalt.err (!%p9986_p12)
}
 0x16f   :  { %s9990_s4 = scalar_lea.vmem %s10478_s0, 3072  ;;  %p9995_p0 = scmp.lt.s32.totalorder %s10478_s0, %s10478_s0 }
 0x170   :  { %p9991_p13 = scmp.ne.s32.totalorder %s10478_s0, %s9990_s4  ;;  %p9996_p1 = scmp.lt.s32.totalorder %s9990_s4, %s9990_s4 }
 0x172   :  { %p9997_p2 = por %p9996_p1, %p9995_p0 }
 0x174   :  { %p9998_p3 = pnand %p9997_p2, %p9991_p13 }
 0x176   :  { %10001 = shalt.err (!%p9998_p3)
}
 0x177   :  { %203 = dma.hbm_to_vmem [thread:$0]  %s11088_s15, 3072, %s10478_s0, [#allocation24], %s10121_s12, %s10121_s12, %s10122_s1  }
 0x178   :  { %s10138_s9 = smov [#allocation28]   ;;  %s10139_s5 = smov [#allocation31]  }
 0x179   :  { %s220_s29 = sshll.u32 %s10138_s9, 4  ;;  %s242_s8 = sshll.u32 %s10139_s5, 4  ;;  %s221_s29 = int_to_ptr.vmem [resolvable:$true] %s220_s29  ;;  %s243_s8 = int_to_ptr.vmem [resolvable:$true] %s242_s8 }
 0x17a   :  { %s10002_s3 = scalar_lea.hbm %s11090_s17, 32 }
 0x17b   :  { %p10003_p4 = scmp.ne.s32.totalorder %s11090_s17, %s10002_s3  ;;  %p10006_p5 = scmp.lt.u32.totalorder %s10002_s3, %s11090_s17 }
 0x17d   :  { %p10008_p6 = pnand %p10006_p5, %p10003_p4 }
 0x17f   :  { %10011 = shalt.err (!%p10008_p6)
}
 0x180   :  { %s10012_s15 = scalar_lea.vmem %s221_s29, 32  ;;  %p10017_p8 = scmp.lt.s32.totalorder %s221_s29, %s221_s29 }
 0x181   :  { %p10013_p7 = scmp.ne.s32.totalorder %s221_s29, %s10012_s15  ;;  %p10018_p9 = scmp.lt.s32.totalorder %s10012_s15, %s10012_s15 }
 0x183   :  { %p10019_p10 = por %p10018_p9, %p10017_p8 }
 0x185   :  { %p10020_p11 = pnand %p10019_p10, %p10013_p7 }
 0x187   :  { %10023 = shalt.err (!%p10020_p11)
}
 0x188   :  { %223 = dma.hbm_to_vmem [thread:$0]  %s11090_s17, 32, %s221_s29, [#allocation27]  }
 0x189   :  { %s10024_s14 = scalar_lea.hbm %s11093_s20, 16 }
 0x18a   :  { %p10025_p12 = scmp.ne.s32.totalorder %s11093_s20, %s10024_s14  ;;  %p10028_p13 = scmp.lt.u32.totalorder %s10024_s14, %s11093_s20 }
 0x18c   :  { %p10030_p0 = pnand %p10028_p13, %p10025_p12 }
 0x18e   :  { %10033 = shalt.err (!%p10030_p0)
}
 0x18f   :  { %s10034_s4 = scalar_lea.vmem %s243_s8, 16  ;;  %s10038_s13 = scalar_lea.vmem %s243_s8, 32 }
 0x190   :  { %p10035_p1 = scmp.ne.s32.totalorder %s243_s8, %s10034_s4  ;;  %p10039_p2 = scmp.lt.s32.totalorder %s243_s8, %s243_s8 }
 0x191   :  { %p10040_p3 = scmp.lt.s32.totalorder %s10038_s13, %s10034_s4 }
 0x193   :  { %p10041_p4 = por %p10040_p3, %p10039_p2 }
 0x195   :  { %p10042_p5 = pnand %p10041_p4, %p10035_p1 }
 0x197   :  { %10045 = shalt.err (!%p10042_p5)
}
 0x198   :  { %245 = dma.hbm_to_vmem [thread:$0]  %s11093_s20, 16, %s243_s8, [#allocation30]  }
 0x199   :  { %s10140_s9 = smov [#allocation34]   ;;  %s10141_s5 = smov [#allocation35]  }
 0x19a   :  { %s262_s29 = sshll.u32 %s10140_s9, 4  ;;  %s272_s18 = sshll.u32 %s10141_s5, 4  ;;  %s263_s29 = int_to_ptr.vmem [resolvable:$true] %s262_s29  ;;  %s273_s18 = int_to_ptr.vmem [resolvable:$true] %s272_s18 }
 0x19b   :  { %s10046_s11 = scalar_lea.hbm %s11095_s22, 16 }
 0x19c   :  { %p10047_p6 = scmp.ne.s32.totalorder %s11095_s22, %s10046_s11  ;;  %p10050_p7 = scmp.lt.u32.totalorder %s10046_s11, %s11095_s22 }
 0x19e   :  { %p10052_p8 = pnand %p10050_p7, %p10047_p6 }
 0x1a0   :  { %10055 = shalt.err (!%p10052_p8)
}
 0x1a1   :  { %s10056_s20 = scalar_lea.vmem %s263_s29, 16  ;;  %s10060_s8 = scalar_lea.vmem %s263_s29, 32 }
 0x1a2   :  { %p10057_p9 = scmp.ne.s32.totalorder %s263_s29, %s10056_s20  ;;  %p10061_p10 = scmp.lt.s32.totalorder %s263_s29, %s263_s29 }
 0x1a3   :  { %p10062_p11 = scmp.lt.s32.totalorder %s10060_s8, %s10056_s20 }
 0x1a5   :  { %p10063_p12 = por %p10062_p11, %p10061_p10 }
 0x1a7   :  { %p10064_p13 = pnand %p10063_p12, %p10057_p9 }
 0x1a9   :  { %10067 = shalt.err (!%p10064_p13)
}
 0x1aa   :  { %265 = dma.hbm_to_vmem [thread:$0]  %s11095_s22, 16, %s263_s29, [#allocation33]  }
 0x1ab   :  { %s10068_s14 = scalar_lea.hbm %s11096_s23, 16 }
 0x1ac   :  { %p10069_p0 = scmp.ne.s32.totalorder %s11096_s23, %s10068_s14  ;;  %p10072_p1 = scmp.lt.u32.totalorder %s10068_s14, %s11096_s23 }
 0x1ae   :  { %p10074_p2 = pnand %p10072_p1, %p10069_p0 }
 0x1b0   :  { %10077 = shalt.err (!%p10074_p2)
}
 0x1b1   :  { %s10078_s4 = scalar_lea.vmem %s273_s18, 16  ;;  %s10082_s13 = scalar_lea.vmem %s273_s18, 32 }
 0x1b2   :  { %p10079_p3 = scmp.ne.s32.totalorder %s273_s18, %s10078_s4  ;;  %p10083_p4 = scmp.lt.s32.totalorder %s273_s18, %s273_s18 }
 0x1b3   :  { %p10084_p5 = scmp.lt.s32.totalorder %s10082_s13, %s10078_s4 }
 0x1b5   :  { %p10085_p6 = por %p10084_p5, %p10083_p4 }
 0x1b7   :  { %p10086_p7 = pnand %p10085_p6, %p10079_p3 }
 0x1b9   :  { %10089 = shalt.err (!%p10086_p7)
}
 0x1ba   :  { %275 = dma.hbm_to_vmem [thread:$0]  %s11096_s23, 16, %s273_s18, [#allocation36]  }
 0x1bb   :  { %10090 = dma.done.wait [#allocation4], 1536  }
 0x1bc   :  { %10091 = vsyncadd [#allocation4], 4294965760 }
 0x1bd   :  { %10092 = dma.done.wait [#allocation6], 75264  }
 0x1be   :  { %10093 = vsyncadd [#allocation6], 4294892032 }
 0x1bf   :  { %10094 = dma.done.wait [#allocation9], 192  }
 0x1c0   :  { %10095 = vsyncadd [#allocation9], 4294967104 }
 0x1c1   :  { %10096 = dma.done.wait [#allocation12], 18528  }
 0x1c2   :  { %10097 = vsyncadd [#allocation12], 4294948768 }
 0x1c3   :  { %10098 = dma.done.wait [#allocation15], 96  }
 0x1c4   :  { %10099 = vsyncadd [#allocation15], 4294967200 }
 0x1c5   :  { %10100 = dma.done.wait [#allocation18], 80  }
 0x1c6   :  { %10101 = vsyncadd [#allocation18], 4294967216 }
 0x1c7   :  { %10102 = dma.done.wait [#allocation21], 64  }
 0x1c8   :  { %10103 = vsyncadd [#allocation21], 4294967232 }
 0x1c9   :  { %10104 = dma.done.wait [#allocation24], 6144  }
 0x1ca   :  { %10105 = vsyncadd [#allocation24], 4294961152 }
 0x1cb   :  { %10106 = dma.done.wait [#allocation27], 64  }
 0x1cc   :  { %10107 = vsyncadd [#allocation27], 4294967232 }
 0x1cd   :  { %10108 = dma.done.wait [#allocation30], 48  }
 0x1ce   :  { %10109 = vsyncadd [#allocation30], 4294967248 }
 0x1cf   :  { %10110 = dma.done.wait [#allocation33], 32  }
 0x1d0   :  { %10111 = vsyncadd [#allocation33], 4294967264 }
 0x1d1   :  { %10112 = dma.done.wait [#allocation36], 16  }
 0x1d2   :  { %10113 = vsyncadd [#allocation36], 4294967280  ;;  %v8376_v1 = vld [vmem:[#allocation7 + $0x4] ss:$24 sps:$4 sm:$0xff]   ;;  %v8378_v2 = vld [vmem:[#allocation7] ss:$24 sps:$4 sm:$0xff]  }
 0x1d3   :  { %3954 = vmatprep.subr.bf16.mxu0 %v8376_v1  ;;  %v8379_v3 = vld [vmem:[#allocation7 + $0xc] ss:$24 sps:$4 sm:$0xff]   ;;  %v8383_v5 = vld [vmem:[#allocation7 + $0x8] ss:$24 sps:$4 sm:$0xff]   ;;  %v8385_v7 = vld [vmem:[#allocation7 + $0x3c] ss:$24 sps:$4 sm:$0xff]  }
 0x1d4   :  { %3955 = vmatpush1.bf16.msra.mxu0 %v8378_v2  ;;  %v8381_v4 = vld [vmem:[#allocation7 + $0x34] ss:$24 sps:$4 sm:$0xff]   ;;  %v8384_v6 = vld [vmem:[#allocation7 + $0x30] ss:$24 sps:$4 sm:$0xff]   ;;  %4212 = vmatprep.subr.bf16.mxu1 %v8379_v3  ;;  %v8387_v8 = vld [vmem:[#allocation7 + $0x64] ss:$24 sps:$4 sm:$0xff]  }
 0x1d5   :  { %3956 = vmatprep.subr.bf16.mxu0 %v8381_v4  ;;  %4213 = vmatpush1.bf16.msra.mxu1 %v8383_v5  ;;  %v8389_v9 = vld [vmem:[#allocation7 + $0x38] ss:$24 sps:$4 sm:$0xff]   ;;  %v8391_v11 = vld [vmem:[#allocation7 + $0x6c] ss:$24 sps:$4 sm:$0xff]   ;;  %v8395_v13 = vld [vmem:[#allocation7 + $0x68] ss:$24 sps:$4 sm:$0xff]  }
 0x1d6   :  { %4214 = vmatprep.subr.bf16.mxu1 %v8385_v7  ;;  %v8390_v10 = vld [vmem:[#allocation7 + $0x60] ss:$24 sps:$4 sm:$0xff]   ;;  %v8393_v12 = vld [vmem:[#allocation7 + $0x94] ss:$24 sps:$4 sm:$0xff]   ;;  %v8396_v15 = vld [vmem:[#allocation7 + $0x90] ss:$24 sps:$4 sm:$0xff]  }
 0x1d7   :  { %v8397_v14 = vld [vmem:[#allocation7 + $0x9c] ss:$24 sps:$4 sm:$0xff]   ;;  %v8401_v17 = vld [vmem:[#allocation7 + $0x98] ss:$24 sps:$4 sm:$0xff]   ;;  %v8403_v18 = vld [vmem:[#allocation7 + $0xcc] ss:$24 sps:$4 sm:$0xff]  }
 0x1d8   :  { %3957 = vmatpush1.bf16.msra.mxu0 %v8384_v6  ;;  %v8399_v16 = vld [vmem:[#allocation7 + $0xc4] ss:$24 sps:$4 sm:$0xff]   ;;  %v8402_v19 = vld [vmem:[#allocation7 + $0xc0] ss:$24 sps:$4 sm:$0xff]   ;;  %v8405_v20 = vld [vmem:[#allocation7 + $0xf4] ss:$24 sps:$4 sm:$0xff]  }
 0x1d9   :  { %3958 = vmatprep.subr.bf16.mxu0 %v8387_v8  ;;  %4215 = vmatpush1.bf16.msra.mxu1 %v8389_v9  ;;  %v8407_v21 = vld [vmem:[#allocation7 + $0xc8] ss:$24 sps:$4 sm:$0xff]   ;;  %v8409_v22 = vld [vmem:[#allocation7 + $0xfc] ss:$24 sps:$4 sm:$0xff]   ;;  %v8413_v25 = vld [vmem:[#allocation7 + $0xf8] ss:$24 sps:$4 sm:$0xff]  }
 0x1da   :  { %4216 = vmatprep.subr.bf16.mxu1 %v8391_v11  ;;  %v8408_v23 = vld [vmem:[#allocation7 + $0xf0] ss:$24 sps:$4 sm:$0xff]   ;;  %v8411_v24 = vld [vmem:[#allocation7 + $0x124] ss:$24 sps:$4 sm:$0xff]   ;;  %v8414_v27 = vld [vmem:[#allocation7 + $0x120] ss:$24 sps:$4 sm:$0xff]  }
 0x1db   :  { %v8415_v26 = vld [vmem:[#allocation7 + $0x12c] ss:$24 sps:$4 sm:$0xff]   ;;  %v8419_v29 = vld [vmem:[#allocation7 + $0x128] ss:$24 sps:$4 sm:$0xff]   ;;  %v8421_v30 = vld [vmem:[#allocation7 + $0x15c] ss:$24 sps:$4 sm:$0xff]  }
 0x1dc   :  { %3959 = vmatpush1.bf16.msra.mxu0 %v8390_v10  ;;  %v8417_v28 = vld [vmem:[#allocation7 + $0x154] ss:$24 sps:$4 sm:$0xff]   ;;  %v8420_v31 = vld [vmem:[#allocation7 + $0x150] ss:$24 sps:$4 sm:$0xff]   ;;  %v8423_v32 = vld [vmem:[#allocation7 + $0x184] ss:$24 sps:$4 sm:$0xff]  }
 0x1dd   :  { %3960 = vmatprep.subr.bf16.mxu0 %v8393_v12  ;;  %4217 = vmatpush1.bf16.msra.mxu1 %v8395_v13  ;;  %v8425_v33 = vld [vmem:[#allocation7 + $0x158] ss:$24 sps:$4 sm:$0xff]   ;;  %v8427_v34 = vld [vmem:[#allocation7 + $0x18c] ss:$24 sps:$4 sm:$0xff]   ;;  %v8431_v37 = vld [vmem:[#allocation7 + $0x188] ss:$24 sps:$4 sm:$0xff]  }
 0x1de   :  { %4218 = vmatprep.subr.bf16.mxu1 %v8397_v14  ;;  %v8426_v35 = vld [vmem:[#allocation7 + $0x180] ss:$24 sps:$4 sm:$0xff]   ;;  %v8429_v36 = vld [vmem:[#allocation7 + $0x1b4] ss:$24 sps:$4 sm:$0xff]   ;;  %v8432_v39 = vld [vmem:[#allocation7 + $0x1b0] ss:$24 sps:$4 sm:$0xff]  }
 0x1df   :  { %v8433_v38 = vld [vmem:[#allocation7 + $0x1bc] ss:$24 sps:$4 sm:$0xff]   ;;  %v8437_v41 = vld [vmem:[#allocation7 + $0x1b8] ss:$24 sps:$4 sm:$0xff]   ;;  %v8439_v42 = vld [vmem:[#allocation7 + $0x1ec] ss:$24 sps:$4 sm:$0xff]  }
 0x1e0   :  { %3961 = vmatpush1.bf16.msra.mxu0 %v8396_v15  ;;  %v8435_v40 = vld [vmem:[#allocation7 + $0x1e4] ss:$24 sps:$4 sm:$0xff]   ;;  %v8438_v43 = vld [vmem:[#allocation7 + $0x1e0] ss:$24 sps:$4 sm:$0xff]   ;;  %v8441_v44 = vld [vmem:[#allocation7 + $0x214] ss:$24 sps:$4 sm:$0xff]  }
 0x1e1   :  { %3962 = vmatprep.subr.bf16.mxu0 %v8399_v16  ;;  %4219 = vmatpush1.bf16.msra.mxu1 %v8401_v17  ;;  %v8443_v45 = vld [vmem:[#allocation7 + $0x1e8] ss:$24 sps:$4 sm:$0xff]   ;;  %v8445_v46 = vld [vmem:[#allocation7 + $0x21c] ss:$24 sps:$4 sm:$0xff]   ;;  %vm417_vm0 = vcmask 1043456   ;;  %vm6622_vm1 = vcmask 523264  }
 0x1e2   :  { %4220 = vmatprep.subr.bf16.mxu1 %v8403_v18  ;;  %v346_v47 = vld [vmem:[#allocation3 + $0x8] sm:$0xff]  ;;  %v8447_v52 = vld [vmem:[#allocation7 + $0x244] ss:$24 sps:$4 sm:$0xff]   ;;  %v8449_v53 = vld [vmem:[#allocation7 + $0x218] ss:$24 sps:$4 sm:$0xff]   ;;  %vm7335_vm2 = vcmask 7168  }
 0x1e3   :  { %v370_v48 = vld [vmem:[#allocation5 + $0x8] sm:$0xff]  ;;  %v358_v50 = vpack.c.bf16 %v346_v47, %v346_v47  ;;  %v8450_v56 = vld [vmem:[#allocation7 + $0x240] ss:$24 sps:$4 sm:$0xff]   ;;  %v8457_v60 = vld [vmem:[#allocation7 + $0x27c] ss:$24 sps:$4 sm:$0xff]  }
 0x1e4   :  { %3963 = vmatpush1.bf16.msra.mxu0 %v8402_v19  ;;  %v8444_v49 = vld [vmem:[#allocation7 + $0x210] ss:$24 sps:$4 sm:$0xff]   ;;  %v382_v51 = vpack.c.bf16 %v370_v48, %v370_v48  ;;  %v8451_v55 = vld [vmem:[#allocation7 + $0x24c] ss:$24 sps:$4 sm:$0xff]   ;;  %v8462_v2 = vld [vmem:[#allocation7 + $0x2a0] ss:$24 sps:$4 sm:$0xff]  }
 0x1e5   :  { %3964 = vmatprep.subr.bf16.mxu0 %v8405_v20  ;;  %4221 = vmatpush1.bf16.msra.mxu1 %v8407_v21  ;;  %v8453_v58 = vld [vmem:[#allocation7 + $0x274] ss:$24 sps:$4 sm:$0xff]   ;;  %v8455_v59 = vld [vmem:[#allocation7 + $0x248] ss:$24 sps:$4 sm:$0xff]   ;;  %v8459_v62 = vld [vmem:[#allocation7 + $0x2a4] ss:$24 sps:$4 sm:$0xff]  }
 0x1e6   :  { %4222 = vmatprep.subr.bf16.mxu1 %v8409_v22  ;;  %v406_v54 = vrot.slane %v382_v51, 4  ;;  %v8456_v61 = vld [vmem:[#allocation7 + $0x270] ss:$24 sps:$4 sm:$0xff]   ;;  %v369_v63 = vld [vmem:[#allocation5] sm:$0xff]  ;;  %v8465_v3 = vld [vmem:[#allocation7 + $0x2d4] ss:$24 sps:$4 sm:$0xff]  }
 0x1e7   :  { %v8461_v0 = vld [vmem:[#allocation7 + $0x278] ss:$24 sps:$4 sm:$0xff]   ;;  %v8463_v1 = vld [vmem:[#allocation7 + $0x2ac] ss:$24 sps:$4 sm:$0xff]   ;;  %v381_v4 = vpack.c.bf16 %v369_v63, %v369_v63  ;;  %v8467_v6 = vld [vmem:[#allocation7 + $0x2a8] ss:$24 sps:$4 sm:$0xff]  }
 0x1e8   :  { %3965 = vmatpush1.bf16.msra.mxu0 %v8408_v23  ;;  %v10561_v57 = vsel %vm417_vm0, %v358_v50, %v406_v54  ;;  %v345_v5 = vld [vmem:[#allocation3] sm:$0xff]  ;;  %v8469_v7 = vld [vmem:[#allocation7 + $0x2dc] ss:$24 sps:$4 sm:$0xff]   ;;  %v8468_v8 = vld [vmem:[#allocation7 + $0x2d0] ss:$24 sps:$4 sm:$0xff]  }
 0x1e9   :  { %3966 = vmatprep.subr.bf16.mxu0 %v8411_v24  ;;  %4223 = vmatpush1.bf16.msra.mxu1 %v8413_v25  ;;  %v357_v9 = vpack.c.bf16 %v345_v5, %v345_v5  ;;  %v405_v10 = vrot.slane %v381_v4, 4  ;;  %v8473_v11 = vld [vmem:[#allocation7 + $0x304] ss:$24 sps:$4 sm:$0xff]   ;;  %v8474_v12 = vld [vmem:[#allocation7 + $0x2d8] ss:$24 sps:$4 sm:$0xff]  }
 0x1ea   :  { %4224 = vmatprep.subr.bf16.mxu1 %v8415_v26  ;;  %3986 = vmatprep.mubr.bf16.mxu0 %v10561_v57  ;;  %v8477_v13 = vld [vmem:[#allocation7 + $0x30c] ss:$24 sps:$4 sm:$0xff]   ;;  %v8471_v14 = vld [vmem:[#allocation7 + $0x300] ss:$24 sps:$4 sm:$0xff]   ;;  %v8483_v18 = vld [vmem:[#allocation7 + $0x33c] ss:$24 sps:$4 sm:$0xff]  }
 0x1eb   :  { %4244 = vmatprep.mubr.bf16.mxu1 %v10561_v57  ;;  %v10566_v15 = vsel %vm417_vm0, %v357_v9, %v405_v10  ;;  %v8480_v16 = vld [vmem:[#allocation7 + $0x334] ss:$24 sps:$4 sm:$0xff]   ;;  %v8475_v17 = vld [vmem:[#allocation7 + $0x308] ss:$24 sps:$4 sm:$0xff]   ;;  %v8486_v20 = vld [vmem:[#allocation7 + $0x364] ss:$24 sps:$4 sm:$0xff]  }
 0x1ec   :  { %3967 = vmatpush1.bf16.msra.mxu0 %v8414_v27  ;;  %v8478_v19 = vld [vmem:[#allocation7 + $0x330] ss:$24 sps:$4 sm:$0xff]   ;;  %v8489_v22 = vld [vmem:[#allocation7 + $0x36c] ss:$24 sps:$4 sm:$0xff]   ;;  %v8484_v23 = vld [vmem:[#allocation7 + $0x360] ss:$24 sps:$4 sm:$0xff]  }
 0x1ed   :  { %3968 = vmatprep.subr.bf16.mxu0 %v8417_v28  ;;  %4225 = vmatpush1.bf16.msra.mxu1 %v8419_v29  ;;  %v8481_v21 = vld [vmem:[#allocation7 + $0x338] ss:$24 sps:$4 sm:$0xff]   ;;  %v8492_v24 = vld [vmem:[#allocation7 + $0x394] ss:$24 sps:$4 sm:$0xff]   ;;  %v8487_v25 = vld [vmem:[#allocation7 + $0x368] ss:$24 sps:$4 sm:$0xff]  }
 0x1ee   :  { %4226 = vmatprep.subr.bf16.mxu1 %v8421_v30  ;;  %v8495_v26 = vld [vmem:[#allocation7 + $0x39c] ss:$24 sps:$4 sm:$0xff]   ;;  %v8490_v27 = vld [vmem:[#allocation7 + $0x390] ss:$24 sps:$4 sm:$0xff]   ;;  %v8501_v30 = vld [vmem:[#allocation7 + $0x3cc] ss:$24 sps:$4 sm:$0xff]  }
 0x1ef   :  { %v8498_v28 = vld [vmem:[#allocation7 + $0x3c4] ss:$24 sps:$4 sm:$0xff]   ;;  %v8493_v29 = vld [vmem:[#allocation7 + $0x398] ss:$24 sps:$4 sm:$0xff]   ;;  %v8528_v54 = vld [vmem:[#allocation7 + $0x4b4] ss:$24 sps:$4 sm:$0xff]  }
 0x1f0   :  { %3969 = vmatpush1.bf16.msra.mxu0 %v8420_v31  ;;  %v8496_v31 = vld [vmem:[#allocation7 + $0x3c0] ss:$24 sps:$4 sm:$0xff]   ;;  %v8514_v48 = vld [vmem:[#allocation7 + $0x450] ss:$24 sps:$4 sm:$0xff]   ;;  %v8540_v63 = vld [vmem:[#allocation7 + $0x514] ss:$24 sps:$4 sm:$0xff]  }
 0x1f1   :  { %3970 = vmatprep.subr.bf16.mxu0 %v8423_v32  ;;  %4227 = vmatpush1.bf16.msra.mxu1 %v8425_v33  ;;  %v8504_v32 = vld [vmem:[#allocation7 + $0x3f4] ss:$24 sps:$4 sm:$0xff]   ;;  %v8499_v33 = vld [vmem:[#allocation7 + $0x3c8] ss:$24 sps:$4 sm:$0xff]   ;;  %v8517_v51 = vld [vmem:[#allocation7 + $0x458] ss:$24 sps:$4 sm:$0xff]  }
 0x1f2   :  { %4228 = vmatprep.subr.bf16.mxu1 %v8427_v34  ;;  %v8507_v34 = vld [vmem:[#allocation7 + $0x3fc] ss:$24 sps:$4 sm:$0xff]   ;;  %v8541_v4 = vld [vmem:[#allocation7 + $0x518] ss:$24 sps:$4 sm:$0xff]   ;;  %v8549_v5 = vld [vmem:[#allocation7 + $0x54c] ss:$24 sps:$4 sm:$0xff]  }
 0x1f3   :  { %v8555_v9 = vld [vmem:[#allocation7 + $0x57c] ss:$24 sps:$4 sm:$0xff]   ;;  %v8550_v10 = vld [vmem:[#allocation7 + $0x570] ss:$24 sps:$4 sm:$0xff]  }
 0x1f4   :  { %3971 = vmatpush1.bf16.msra.mxu0 %v8426_v35  ;;  %v8502_v35 = vld [vmem:[#allocation7 + $0x3f0] ss:$24 sps:$4 sm:$0xff]  }
 0x1f5   :  { %3972 = vmatprep.subr.bf16.mxu0 %v8429_v36  ;;  %4229 = vmatpush1.bf16.msra.mxu1 %v8431_v37  ;;  %v8510_v36 = vld [vmem:[#allocation7 + $0x424] ss:$24 sps:$4 sm:$0xff]   ;;  %v8505_v37 = vld [vmem:[#allocation7 + $0x3f8] ss:$24 sps:$4 sm:$0xff]  }
 0x1f6   :  { %4230 = vmatprep.subr.bf16.mxu1 %v8433_v38  ;;  %v8508_v38 = vld [vmem:[#allocation7 + $0x420] ss:$24 sps:$4 sm:$0xff]  }
 0x1f8   :  { %3973 = vmatpush1.bf16.msra.mxu0 %v8432_v39  ;;  %v8513_v39 = vld [vmem:[#allocation7 + $0x42c] ss:$24 sps:$4 sm:$0xff]  }
 0x1f9   :  { %3974 = vmatprep.subr.bf16.mxu0 %v8435_v40  ;;  %4231 = vmatpush1.bf16.msra.mxu1 %v8437_v41  ;;  %v348_v40 = vld [vmem:[#allocation3 + $0x18] sm:$0xff] }
 0x1fa   :  { %4232 = vmatprep.subr.bf16.mxu1 %v8439_v42  ;;  %v372_v41 = vld [vmem:[#allocation5 + $0x18] sm:$0xff]  ;;  %v8516_v42 = vld [vmem:[#allocation7 + $0x454] ss:$24 sps:$4 sm:$0xff]  }
 0x1fc   :  { %3975 = vmatpush1.bf16.msra.mxu0 %v8438_v43  ;;  %v360_v43 = vpack.c.bf16 %v348_v40, %v348_v40  ;;  %v8585_v40 = vld [vmem:[#allocation7 + $0x66c] ss:$24 sps:$4 sm:$0xff]  }
 0x1fd   :  { %3976 = vmatprep.subr.bf16.mxu0 %v8441_v44  ;;  %4233 = vmatpush1.bf16.msra.mxu1 %v8443_v45  ;;  %v384_v44 = vpack.c.bf16 %v372_v41, %v372_v41  ;;  %v8511_v45 = vld [vmem:[#allocation7 + $0x428] ss:$24 sps:$4 sm:$0xff]  }
 0x1fe   :  { %4234 = vmatprep.subr.bf16.mxu1 %v8445_v46  ;;  %v8519_v46 = vld [vmem:[#allocation7 + $0x45c] ss:$24 sps:$4 sm:$0xff]  }
 0x1ff   :  { %v408_v47 = vrot.slane %v384_v44, 4 }
 0x200   :  { %3977 = vmatpush1.bf16.msra.mxu0 %v8444_v49  ;;  %v8522_v49 = vld [vmem:[#allocation7 + $0x484] ss:$24 sps:$4 sm:$0xff]  }
 0x201   :  { %3978 = vmatprep.subr.bf16.mxu0 %v8447_v52  ;;  %4235 = vmatpush1.bf16.msra.mxu1 %v8449_v53  ;;  %v10571_v50 = vsel %vm417_vm0, %v360_v43, %v408_v47  ;;  %v8525_v52 = vld [vmem:[#allocation7 + $0x48c] ss:$24 sps:$4 sm:$0xff]   ;;  %v8520_v53 = vld [vmem:[#allocation7 + $0x480] ss:$24 sps:$4 sm:$0xff]   ;;  %v8586_v47 = vld [vmem:[#allocation7 + $0x690] ss:$24 sps:$4 sm:$0xff]  }
 0x202   :  { %4236 = vmatprep.subr.bf16.mxu1 %v8451_v55  ;;  %v8523_v55 = vld [vmem:[#allocation7 + $0x488] ss:$24 sps:$4 sm:$0xff]   ;;  %v8588_v43 = vld [vmem:[#allocation7 + $0x694] ss:$24 sps:$4 sm:$0xff]  }
 0x204   :  { %3979 = vmatpush1.bf16.msra.mxu0 %v8450_v56  ;;  %v8531_v56 = vld [vmem:[#allocation7 + $0x4bc] ss:$24 sps:$4 sm:$0xff]  }
 0x205   :  { %3980 = vmatprep.subr.bf16.mxu0 %v8453_v58  ;;  %4237 = vmatpush1.bf16.msra.mxu1 %v8455_v59  ;;  %v8526_v58 = vld [vmem:[#allocation7 + $0x4b0] ss:$24 sps:$4 sm:$0xff]   ;;  %v8534_v59 = vld [vmem:[#allocation7 + $0x4e4] ss:$24 sps:$4 sm:$0xff]  }
 0x206   :  { %4238 = vmatprep.subr.bf16.mxu1 %v8457_v60  ;;  %v8529_v60 = vld [vmem:[#allocation7 + $0x4b8] ss:$24 sps:$4 sm:$0xff]  }
 0x208   :  { %3981 = vmatpush1.bf16.msra.mxu0 %v8456_v61  ;;  %v8537_v61 = vld [vmem:[#allocation7 + $0x4ec] ss:$24 sps:$4 sm:$0xff]  }
 0x209   :  { %3982 = vmatprep.subr.bf16.mxu0 %v8459_v62  ;;  %4239 = vmatpush1.bf16.msra.mxu1 %v8461_v0  ;;  %v8532_v62 = vld [vmem:[#allocation7 + $0x4e0] ss:$24 sps:$4 sm:$0xff]  }
 0x20a   :  { %4240 = vmatprep.subr.bf16.mxu1 %v8463_v1  ;;  %v8535_v0 = vld [vmem:[#allocation7 + $0x4e8] ss:$24 sps:$4 sm:$0xff]   ;;  %v8543_v1 = vld [vmem:[#allocation7 + $0x51c] ss:$24 sps:$4 sm:$0xff]  }
 0x20c   :  { %3983 = vmatpush1.bf16.msra.mxu0 %v8462_v2  ;;  %v8538_v2 = vld [vmem:[#allocation7 + $0x510] ss:$24 sps:$4 sm:$0xff]  }
 0x20d   :  { %3984 = vmatprep.subr.bf16.mxu0 %v8465_v3  ;;  %4241 = vmatpush1.bf16.msra.mxu1 %v8467_v6  ;;  %v8546_v3 = vld [vmem:[#allocation7 + $0x544] ss:$24 sps:$4 sm:$0xff]   ;;  %v8544_v6 = vld [vmem:[#allocation7 + $0x540] ss:$24 sps:$4 sm:$0xff]  }
 0x20e   :  { %4242 = vmatprep.subr.bf16.mxu1 %v8469_v7  ;;  %v8552_v7 = vld [vmem:[#allocation7 + $0x574] ss:$24 sps:$4 sm:$0xff]  }
 0x210   :  { %3985 = vmatpush1.bf16.msra.mxu0 %v8468_v8  ;;  %v8547_v8 = vld [vmem:[#allocation7 + $0x548] ss:$24 sps:$4 sm:$0xff]  }
 0x211   :  { %3997 = vmatprep.subr.bf16.mxu0 %v8473_v11  ;;  %4243 = vmatpush1.bf16.msra.mxu1 %v8474_v12  ;;  %v8558_v11 = vld [vmem:[#allocation7 + $0x5a4] ss:$24 sps:$4 sm:$0xff]   ;;  %v371_v12 = vld [vmem:[#allocation5 + $0x10] sm:$0xff] }
 0x212   :  { %4255 = vmatprep.subr.bf16.mxu1 %v8477_v13  ;;  %v8553_v13 = vld [vmem:[#allocation7 + $0x578] ss:$24 sps:$4 sm:$0xff]  }
 0x213   :  { %3987 = vmatmul.mubr.bf16.vlgmr.msra.gmra.mrb[0].mxu0 %v10566_v15 }
 0x214   :  { %3998 = vmatpush1.bf16.msra.mxu0 %v8471_v14  ;;  %4245 = vmatmul.mubr.bf16.vlgmr.msra.gmra.mrb[0].mxu1 %v10566_v15  ;;  %v8561_v14 = vld [vmem:[#allocation7 + $0x5ac] ss:$24 sps:$4 sm:$0xff]  }
 0x215   :  { %3999 = vmatprep.subr.bf16.mxu0 %v8480_v16  ;;  %4256 = vmatpush1.bf16.msra.mxu1 %v8475_v17  ;;  %v8556_v16 = vld [vmem:[#allocation7 + $0x5a0] ss:$24 sps:$4 sm:$0xff]   ;;  %v8564_v17 = vld [vmem:[#allocation7 + $0x5d4] ss:$24 sps:$4 sm:$0xff]  }
 0x216   :  { %4257 = vmatprep.subr.bf16.mxu1 %v8483_v18  ;;  %4029 = vmatprep.mubr.bf16.mxu0 %v10571_v50  ;;  %v383_v18 = vpack.c.bf16 %v371_v12, %v371_v12  ;;  %v8633_v12 = vld [vmem:[#allocation7 + $0x7ec] ss:$24 sps:$4 sm:$0xff]  }
 0x217   :  { %4287 = vmatprep.mubr.bf16.mxu1 %v10571_v50 }
 0x218   :  { %4000 = vmatpush1.bf16.msra.mxu0 %v8478_v19  ;;  %v347_v19 = vld [vmem:[#allocation3 + $0x10] sm:$0xff] }
 0x219   :  { %4001 = vmatprep.subr.bf16.mxu0 %v8486_v20  ;;  %4258 = vmatpush1.bf16.msra.mxu1 %v8481_v21  ;;  %v8559_v20 = vld [vmem:[#allocation7 + $0x5a8] ss:$24 sps:$4 sm:$0xff]   ;;  %v8567_v21 = vld [vmem:[#allocation7 + $0x5dc] ss:$24 sps:$4 sm:$0xff]  }
 0x21a   :  { %4259 = vmatprep.subr.bf16.mxu1 %v8489_v22  ;;  %v8562_v22 = vld [vmem:[#allocation7 + $0x5d0] ss:$24 sps:$4 sm:$0xff]  }
 0x21c   :  { %4002 = vmatpush1.bf16.msra.mxu0 %v8484_v23  ;;  %v359_v23 = vpack.c.bf16 %v347_v19, %v347_v19  ;;  %v8642_v19 = vld [vmem:[#allocation7 + $0x844] ss:$24 sps:$4 sm:$0xff]  }
 0x21d   :  { %4003 = vmatprep.subr.bf16.mxu0 %v8492_v24  ;;  %4260 = vmatpush1.bf16.msra.mxu1 %v8487_v25  ;;  %v407_v24 = vrot.slane %v383_v18, 4  ;;  %v8570_v25 = vld [vmem:[#allocation7 + $0x604] ss:$24 sps:$4 sm:$0xff]   ;;  %v8634_v18 = vld [vmem:[#allocation7 + $0x810] ss:$24 sps:$4 sm:$0xff]  }
 0x21e   :  { %4261 = vmatprep.subr.bf16.mxu1 %v8495_v26  ;;  %v8565_v26 = vld [vmem:[#allocation7 + $0x5d8] ss:$24 sps:$4 sm:$0xff]  }
 0x220   :  { %4004 = vmatpush1.bf16.msra.mxu0 %v8490_v27  ;;  %v8573_v27 = vld [vmem:[#allocation7 + $0x60c] ss:$24 sps:$4 sm:$0xff]  }
 0x221   :  { %4005 = vmatprep.subr.bf16.mxu0 %v8498_v28  ;;  %4262 = vmatpush1.bf16.msra.mxu1 %v8493_v29  ;;  %v8568_v28 = vld [vmem:[#allocation7 + $0x600] ss:$24 sps:$4 sm:$0xff]   ;;  %v10576_v29 = vsel %vm417_vm0, %v359_v23, %v407_v24  ;;  %v8648_v23 = vld [vmem:[#allocation7 + $0x874] ss:$24 sps:$4 sm:$0xff]  }
 0x222   :  { %4263 = vmatprep.subr.bf16.mxu1 %v8501_v30  ;;  %v8576_v30 = vld [vmem:[#allocation7 + $0x634] ss:$24 sps:$4 sm:$0xff]   ;;  %v8643_v24 = vld [vmem:[#allocation7 + $0x848] ss:$24 sps:$4 sm:$0xff]  }
 0x224   :  { %4006 = vmatpush1.bf16.msra.mxu0 %v8496_v31  ;;  %v8571_v31 = vld [vmem:[#allocation7 + $0x608] ss:$24 sps:$4 sm:$0xff]  }
 0x225   :  { %4007 = vmatprep.subr.bf16.mxu0 %v8504_v32  ;;  %4264 = vmatpush1.bf16.msra.mxu1 %v8499_v33  ;;  %v8574_v32 = vld [vmem:[#allocation7 + $0x630] ss:$24 sps:$4 sm:$0xff]   ;;  %v8579_v33 = vld [vmem:[#allocation7 + $0x63c] ss:$24 sps:$4 sm:$0xff]  }
 0x226   :  { %4265 = vmatprep.subr.bf16.mxu1 %v8507_v34  ;;  %v350_v34 = vld [vmem:[#allocation3 + $0x28] sm:$0xff] }
 0x228   :  { %4008 = vmatpush1.bf16.msra.mxu0 %v8502_v35  ;;  %v374_v35 = vld [vmem:[#allocation5 + $0x28] sm:$0xff] }
 0x229   :  { %4009 = vmatprep.subr.bf16.mxu0 %v8510_v36  ;;  %4266 = vmatpush1.bf16.msra.mxu1 %v8505_v37  ;;  %v8582_v36 = vld [vmem:[#allocation7 + $0x664] ss:$24 sps:$4 sm:$0xff]   ;;  %v362_v37 = vpack.c.bf16 %v350_v34, %v350_v34  ;;  %v8655_v34 = vld [vmem:[#allocation7 + $0x8a8] ss:$24 sps:$4 sm:$0xff]  }
 0x22a   :  { %4267 = vmatprep.subr.bf16.mxu1 %v8513_v39  ;;  %v8577_v39 = vld [vmem:[#allocation7 + $0x638] ss:$24 sps:$4 sm:$0xff]  }
 0x22c   :  { %4010 = vmatpush1.bf16.msra.mxu0 %v8508_v38  ;;  %v386_v38 = vpack.c.bf16 %v374_v35, %v374_v35  ;;  %v8660_v35 = vld [vmem:[#allocation7 + $0x8d4] ss:$24 sps:$4 sm:$0xff]  }
 0x22d   :  { %4011 = vmatprep.subr.bf16.mxu0 %v8516_v42  ;;  %4268 = vmatpush1.bf16.msra.mxu1 %v8511_v45  ;;  %v8580_v42 = vld [vmem:[#allocation7 + $0x660] ss:$24 sps:$4 sm:$0xff]  }
 0x22e   :  { %4269 = vmatprep.subr.bf16.mxu1 %v8519_v46  ;;  %v410_v41 = vrot.slane %v386_v38, 4  ;;  %v8583_v45 = vld [vmem:[#allocation7 + $0x668] ss:$24 sps:$4 sm:$0xff]   ;;  %v8591_v46 = vld [vmem:[#allocation7 + $0x69c] ss:$24 sps:$4 sm:$0xff]  }
 0x230   :  { %4012 = vmatpush1.bf16.msra.mxu0 %v8514_v48  ;;  %v10581_v44 = vsel %vm417_vm0, %v362_v37, %v410_v41  ;;  %v8594_v48 = vld [vmem:[#allocation7 + $0x6c4] ss:$24 sps:$4 sm:$0xff]   ;;  %v8658_v41 = vld [vmem:[#allocation7 + $0x8d0] ss:$24 sps:$4 sm:$0xff]  }
 0x231   :  { %4013 = vmatprep.subr.bf16.mxu0 %v8522_v49  ;;  %4270 = vmatpush1.bf16.msra.mxu1 %v8517_v51  ;;  %v8589_v49 = vld [vmem:[#allocation7 + $0x698] ss:$24 sps:$4 sm:$0xff]   ;;  %v8597_v51 = vld [vmem:[#allocation7 + $0x6cc] ss:$24 sps:$4 sm:$0xff]  }
 0x232   :  { %4271 = vmatprep.subr.bf16.mxu1 %v8525_v52  ;;  %v8592_v52 = vld [vmem:[#allocation7 + $0x6c0] ss:$24 sps:$4 sm:$0xff]  }
 0x233   :  { %v349_v37 = vld [vmem:[#allocation3 + $0x20] sm:$0xff] }
 0x234   :  { %4014 = vmatpush1.bf16.msra.mxu0 %v8520_v53  ;;  %v8600_v53 = vld [vmem:[#allocation7 + $0x6f4] ss:$24 sps:$4 sm:$0xff]  }
 0x235   :  { %4015 = vmatprep.subr.bf16.mxu0 %v8528_v54  ;;  %4272 = vmatpush1.bf16.msra.mxu1 %v8523_v55  ;;  %v8595_v54 = vld [vmem:[#allocation7 + $0x6c8] ss:$24 sps:$4 sm:$0xff]   ;;  %v8603_v55 = vld [vmem:[#allocation7 + $0x6fc] ss:$24 sps:$4 sm:$0xff]  }
 0x236   :  { %4273 = vmatprep.subr.bf16.mxu1 %v8531_v56  ;;  %v8598_v56 = vld [vmem:[#allocation7 + $0x6f0] ss:$24 sps:$4 sm:$0xff]  }
 0x238   :  { %4016 = vmatpush1.bf16.msra.mxu0 %v8526_v58  ;;  %v8606_v58 = vld [vmem:[#allocation7 + $0x724] ss:$24 sps:$4 sm:$0xff]  }
 0x239   :  { %4017 = vmatprep.subr.bf16.mxu0 %v8534_v59  ;;  %4274 = vmatpush1.bf16.msra.mxu1 %v8529_v60  ;;  %v8601_v59 = vld [vmem:[#allocation7 + $0x6f8] ss:$24 sps:$4 sm:$0xff]   ;;  %v8609_v60 = vld [vmem:[#allocation7 + $0x72c] ss:$24 sps:$4 sm:$0xff]  }
 0x23a   :  { %4275 = vmatprep.subr.bf16.mxu1 %v8537_v61  ;;  %v8604_v61 = vld [vmem:[#allocation7 + $0x720] ss:$24 sps:$4 sm:$0xff]  }
 0x23c   :  { %4018 = vmatpush1.bf16.msra.mxu0 %v8532_v62  ;;  %v8612_v62 = vld [vmem:[#allocation7 + $0x754] ss:$24 sps:$4 sm:$0xff]  }
 0x23d   :  { %4019 = vmatprep.subr.bf16.mxu0 %v8540_v63  ;;  %4276 = vmatpush1.bf16.msra.mxu1 %v8535_v0  ;;  %v8607_v63 = vld [vmem:[#allocation7 + $0x728] ss:$24 sps:$4 sm:$0xff]   ;;  %v8615_v0 = vld [vmem:[#allocation7 + $0x75c] ss:$24 sps:$4 sm:$0xff]  }
 0x23e   :  { %4277 = vmatprep.subr.bf16.mxu1 %v8543_v1  ;;  %v8610_v1 = vld [vmem:[#allocation7 + $0x750] ss:$24 sps:$4 sm:$0xff]  }
 0x240   :  { %4020 = vmatpush1.bf16.msra.mxu0 %v8538_v2  ;;  %v8618_v2 = vld [vmem:[#allocation7 + $0x784] ss:$24 sps:$4 sm:$0xff]  }
 0x241   :  { %4021 = vmatprep.subr.bf16.mxu0 %v8546_v3  ;;  %4278 = vmatpush1.bf16.msra.mxu1 %v8541_v4  ;;  %v8613_v3 = vld [vmem:[#allocation7 + $0x758] ss:$24 sps:$4 sm:$0xff]   ;;  %v8621_v4 = vld [vmem:[#allocation7 + $0x78c] ss:$24 sps:$4 sm:$0xff]  }
 0x242   :  { %4279 = vmatprep.subr.bf16.mxu1 %v8549_v5  ;;  %v8616_v5 = vld [vmem:[#allocation7 + $0x780] ss:$24 sps:$4 sm:$0xff]  }
 0x244   :  { %4022 = vmatpush1.bf16.msra.mxu0 %v8544_v6  ;;  %v8624_v6 = vld [vmem:[#allocation7 + $0x7b4] ss:$24 sps:$4 sm:$0xff]  }
 0x245   :  { %4023 = vmatprep.subr.bf16.mxu0 %v8552_v7  ;;  %4280 = vmatpush1.bf16.msra.mxu1 %v8547_v8  ;;  %v8619_v7 = vld [vmem:[#allocation7 + $0x788] ss:$24 sps:$4 sm:$0xff]   ;;  %v8627_v8 = vld [vmem:[#allocation7 + $0x7bc] ss:$24 sps:$4 sm:$0xff]  }
 0x246   :  { %4281 = vmatprep.subr.bf16.mxu1 %v8555_v9  ;;  %v8622_v9 = vld [vmem:[#allocation7 + $0x7b0] ss:$24 sps:$4 sm:$0xff]  }
 0x248   :  { %4024 = vmatpush1.bf16.msra.mxu0 %v8550_v10  ;;  %v8630_v10 = vld [vmem:[#allocation7 + $0x7e4] ss:$24 sps:$4 sm:$0xff]  }
 0x249   :  { %4025 = vmatprep.subr.bf16.mxu0 %v8558_v11  ;;  %4282 = vmatpush1.bf16.msra.mxu1 %v8553_v13  ;;  %v8625_v11 = vld [vmem:[#allocation7 + $0x7b8] ss:$24 sps:$4 sm:$0xff]  }
 0x24a   :  { %4283 = vmatprep.subr.bf16.mxu1 %v8561_v14  ;;  %v8628_v13 = vld [vmem:[#allocation7 + $0x7e0] ss:$24 sps:$4 sm:$0xff]   ;;  %v8636_v14 = vld [vmem:[#allocation7 + $0x814] ss:$24 sps:$4 sm:$0xff]  }
 0x24c   :  { %4026 = vmatpush1.bf16.msra.mxu0 %v8556_v16  ;;  %v8631_v16 = vld [vmem:[#allocation7 + $0x7e8] ss:$24 sps:$4 sm:$0xff]  }
 0x24d   :  { %4027 = vmatprep.subr.bf16.mxu0 %v8564_v17  ;;  %4284 = vmatpush1.bf16.msra.mxu1 %v8559_v20  ;;  %v8639_v17 = vld [vmem:[#allocation7 + $0x81c] ss:$24 sps:$4 sm:$0xff]   ;;  %v8637_v20 = vld [vmem:[#allocation7 + $0x818] ss:$24 sps:$4 sm:$0xff]  }
 0x24e   :  { %4285 = vmatprep.subr.bf16.mxu1 %v8567_v21  ;;  %v8645_v21 = vld [vmem:[#allocation7 + $0x84c] ss:$24 sps:$4 sm:$0xff]  }
 0x250   :  { %4028 = vmatpush1.bf16.msra.mxu0 %v8562_v22  ;;  %v8640_v22 = vld [vmem:[#allocation7 + $0x840] ss:$24 sps:$4 sm:$0xff]  }
 0x251   :  { %4040 = vmatprep.subr.bf16.mxu0 %v8570_v25  ;;  %4286 = vmatpush1.bf16.msra.mxu1 %v8565_v26  ;;  %v8646_v25 = vld [vmem:[#allocation7 + $0x870] ss:$24 sps:$4 sm:$0xff]   ;;  %v8651_v26 = vld [vmem:[#allocation7 + $0x87c] ss:$24 sps:$4 sm:$0xff]  }
 0x252   :  { %4298 = vmatprep.subr.bf16.mxu1 %v8573_v27  ;;  %v8649_v27 = vld [vmem:[#allocation7 + $0x878] ss:$24 sps:$4 sm:$0xff]  }
 0x253   :  { %4030 = vmatmul.mubr.bf16.vlgmr.msra.gmra.mrb[0].mxu0 %v10576_v29 }
 0x254   :  { %4041 = vmatpush1.bf16.msra.mxu0 %v8568_v28  ;;  %4288 = vmatmul.mubr.bf16.vlgmr.msra.gmra.mrb[0].mxu1 %v10576_v29  ;;  %v8654_v28 = vld [vmem:[#allocation7 + $0x8a4] ss:$24 sps:$4 sm:$0xff]  }
 0x255   :  { %4042 = vmatprep.subr.bf16.mxu0 %v8576_v30  ;;  %4299 = vmatpush1.bf16.msra.mxu1 %v8571_v31  ;;  %v373_v30 = vld [vmem:[#allocation5 + $0x20] sm:$0xff]  ;;  %v376_v31 = vld [vmem:[#allocation5 + $0x38] sm:$0xff] }
 0x256   :  { %4300 = vmatprep.subr.bf16.mxu1 %v8579_v33  ;;  %4072 = vmatprep.mubr.bf16.mxu0 %v10581_v44  ;;  %v8657_v33 = vld [vmem:[#allocation7 + $0x8ac] ss:$24 sps:$4 sm:$0xff]   ;;  %v388_v38 = vpack.c.bf16 %v376_v31, %v376_v31 }
 0x257   :  { %4330 = vmatprep.mubr.bf16.mxu1 %v10581_v44  ;;  %v8729_v31 = vld [vmem:[#allocation7 + $0xaec] ss:$24 sps:$4 sm:$0xff]  }
 0x258   :  { %4043 = vmatpush1.bf16.msra.mxu0 %v8574_v32  ;;  %v8652_v32 = vld [vmem:[#allocation7 + $0x8a0] ss:$24 sps:$4 sm:$0xff]  }
 0x259   :  { %4044 = vmatprep.subr.bf16.mxu0 %v8582_v36  ;;  %4301 = vmatpush1.bf16.msra.mxu1 %v8577_v39  ;;  %v385_v36 = vpack.c.bf16 %v373_v30, %v373_v30  ;;  %v352_v39 = vld [vmem:[#allocation3 + $0x38] sm:$0xff] }
 0x25a   :  { %4302 = vmatprep.subr.bf16.mxu1 %v8585_v40  ;;  %v8663_v40 = vld [vmem:[#allocation7 + $0x8dc] ss:$24 sps:$4 sm:$0xff]   ;;  %v8721_v30 = vld [vmem:[#allocation7 + $0xab8] ss:$24 sps:$4 sm:$0xff]  }
 0x25c   :  { %4045 = vmatpush1.bf16.msra.mxu0 %v8580_v42  ;;  %v361_v42 = vpack.c.bf16 %v349_v37, %v349_v37  ;;  %v8738_v37 = vld [vmem:[#allocation7 + $0xb44] ss:$24 sps:$4 sm:$0xff]  }
 0x25d   :  { %4046 = vmatprep.subr.bf16.mxu0 %v8588_v43  ;;  %4303 = vmatpush1.bf16.msra.mxu1 %v8583_v45  ;;  %v409_v43 = vrot.slane %v385_v36, 4  ;;  %v8666_v45 = vld [vmem:[#allocation7 + $0x904] ss:$24 sps:$4 sm:$0xff]   ;;  %v8730_v36 = vld [vmem:[#allocation7 + $0xb10] ss:$24 sps:$4 sm:$0xff]  }
 0x25e   :  { %4304 = vmatprep.subr.bf16.mxu1 %v8591_v46  ;;  %v364_v46 = vpack.c.bf16 %v352_v39, %v352_v39  ;;  %v8741_v39 = vld [vmem:[#allocation7 + $0xb4c] ss:$24 sps:$4 sm:$0xff]  }
 0x260   :  { %4047 = vmatpush1.bf16.msra.mxu0 %v8586_v47  ;;  %v412_v47 = vrot.slane %v388_v38, 4  ;;  %v8733_v38 = vld [vmem:[#allocation7 + $0xb18] ss:$24 sps:$4 sm:$0xff]  }
 0x261   :  { %4048 = vmatprep.subr.bf16.mxu0 %v8594_v48  ;;  %4305 = vmatpush1.bf16.msra.mxu1 %v8589_v49  ;;  %v8661_v48 = vld [vmem:[#allocation7 + $0x8d8] ss:$24 sps:$4 sm:$0xff]   ;;  %v8669_v49 = vld [vmem:[#allocation7 + $0x90c] ss:$24 sps:$4 sm:$0xff]  }
 0x262   :  { %4306 = vmatprep.subr.bf16.mxu1 %v8597_v51  ;;  %v8664_v51 = vld [vmem:[#allocation7 + $0x900] ss:$24 sps:$4 sm:$0xff]  }
 0x264   :  { %4049 = vmatpush1.bf16.msra.mxu0 %v8592_v52  ;;  %v10586_v52 = vsel %vm417_vm0, %v361_v42, %v409_v43  ;;  %v8739_v42 = vld [vmem:[#allocation7 + $0xb48] ss:$24 sps:$4 sm:$0xff]  }
 0x265   :  { %4050 = vmatprep.subr.bf16.mxu0 %v8600_v53  ;;  %4307 = vmatpush1.bf16.msra.mxu1 %v8595_v54  ;;  %v8672_v53 = vld [vmem:[#allocation7 + $0x934] ss:$24 sps:$4 sm:$0xff]   ;;  %v10589_v54 = vsel %vm417_vm0, %v364_v46, %v412_v47  ;;  %v8742_v43 = vld [vmem:[#allocation7 + $0xb70] ss:$24 sps:$4 sm:$0xff]   ;;  %v8750_v47 = vld [vmem:[#allocation7 + $0xba4] ss:$24 sps:$4 sm:$0xff]  }
 0x266   :  { %4308 = vmatprep.subr.bf16.mxu1 %v8603_v55  ;;  %v8667_v55 = vld [vmem:[#allocation7 + $0x908] ss:$24 sps:$4 sm:$0xff]   ;;  %v8745_v46 = vld [vmem:[#allocation7 + $0xb78] ss:$24 sps:$4 sm:$0xff]  }
 0x268   :  { %4051 = vmatpush1.bf16.msra.mxu0 %v8598_v56  ;;  %v8675_v56 = vld [vmem:[#allocation7 + $0x93c] ss:$24 sps:$4 sm:$0xff]  }
 0x269   :  { %4052 = vmatprep.subr.bf16.mxu0 %v8606_v58  ;;  %4309 = vmatpush1.bf16.msra.mxu1 %v8601_v59  ;;  %v8670_v58 = vld [vmem:[#allocation7 + $0x930] ss:$24 sps:$4 sm:$0xff]   ;;  %v8678_v59 = vld [vmem:[#allocation7 + $0x964] ss:$24 sps:$4 sm:$0xff]  }
 0x26a   :  { %4310 = vmatprep.subr.bf16.mxu1 %v8609_v60  ;;  %v8673_v60 = vld [vmem:[#allocation7 + $0x938] ss:$24 sps:$4 sm:$0xff]  }
 0x26c   :  { %4053 = vmatpush1.bf16.msra.mxu0 %v8604_v61  ;;  %v8681_v61 = vld [vmem:[#allocation7 + $0x96c] ss:$24 sps:$4 sm:$0xff]  }
 0x26d   :  { %4054 = vmatprep.subr.bf16.mxu0 %v8612_v62  ;;  %4311 = vmatpush1.bf16.msra.mxu1 %v8607_v63  ;;  %v8676_v62 = vld [vmem:[#allocation7 + $0x960] ss:$24 sps:$4 sm:$0xff]   ;;  %v8684_v63 = vld [vmem:[#allocation7 + $0x994] ss:$24 sps:$4 sm:$0xff]  }
 0x26e   :  { %4312 = vmatprep.subr.bf16.mxu1 %v8615_v0  ;;  %v8679_v0 = vld [vmem:[#allocation7 + $0x968] ss:$24 sps:$4 sm:$0xff]  }
 0x270   :  { %4055 = vmatpush1.bf16.msra.mxu0 %v8610_v1  ;;  %v8687_v1 = vld [vmem:[#allocation7 + $0x99c] ss:$24 sps:$4 sm:$0xff]  }
 0x271   :  { %4056 = vmatprep.subr.bf16.mxu0 %v8618_v2  ;;  %4313 = vmatpush1.bf16.msra.mxu1 %v8613_v3  ;;  %v8682_v2 = vld [vmem:[#allocation7 + $0x990] ss:$24 sps:$4 sm:$0xff]   ;;  %v8690_v3 = vld [vmem:[#allocation7 + $0x9c4] ss:$24 sps:$4 sm:$0xff]  }
 0x272   :  { %4314 = vmatprep.subr.bf16.mxu1 %v8621_v4  ;;  %v8685_v4 = vld [vmem:[#allocation7 + $0x998] ss:$24 sps:$4 sm:$0xff]  }
 0x274   :  { %4057 = vmatpush1.bf16.msra.mxu0 %v8616_v5  ;;  %v8693_v5 = vld [vmem:[#allocation7 + $0x9cc] ss:$24 sps:$4 sm:$0xff]  }
 0x275   :  { %4058 = vmatprep.subr.bf16.mxu0 %v8624_v6  ;;  %4315 = vmatpush1.bf16.msra.mxu1 %v8619_v7  ;;  %v8688_v6 = vld [vmem:[#allocation7 + $0x9c0] ss:$24 sps:$4 sm:$0xff]   ;;  %v8696_v7 = vld [vmem:[#allocation7 + $0x9f4] ss:$24 sps:$4 sm:$0xff]  }
 0x276   :  { %4316 = vmatprep.subr.bf16.mxu1 %v8627_v8  ;;  %v8691_v8 = vld [vmem:[#allocation7 + $0x9c8] ss:$24 sps:$4 sm:$0xff]  }
 0x278   :  { %4059 = vmatpush1.bf16.msra.mxu0 %v8622_v9  ;;  %v8699_v9 = vld [vmem:[#allocation7 + $0x9fc] ss:$24 sps:$4 sm:$0xff]  }
 0x279   :  { %4060 = vmatprep.subr.bf16.mxu0 %v8630_v10  ;;  %4317 = vmatpush1.bf16.msra.mxu1 %v8625_v11  ;;  %v8694_v10 = vld [vmem:[#allocation7 + $0x9f0] ss:$24 sps:$4 sm:$0xff]   ;;  %v8702_v11 = vld [vmem:[#allocation7 + $0xa24] ss:$24 sps:$4 sm:$0xff]  }
 0x27a   :  { %4318 = vmatprep.subr.bf16.mxu1 %v8633_v12  ;;  %v8697_v12 = vld [vmem:[#allocation7 + $0x9f8] ss:$24 sps:$4 sm:$0xff]  }
 0x27c   :  { %4061 = vmatpush1.bf16.msra.mxu0 %v8628_v13  ;;  %v8705_v13 = vld [vmem:[#allocation7 + $0xa2c] ss:$24 sps:$4 sm:$0xff]  }
 0x27d   :  { %4062 = vmatprep.subr.bf16.mxu0 %v8636_v14  ;;  %4319 = vmatpush1.bf16.msra.mxu1 %v8631_v16  ;;  %v8700_v14 = vld [vmem:[#allocation7 + $0xa20] ss:$24 sps:$4 sm:$0xff]   ;;  %v8708_v16 = vld [vmem:[#allocation7 + $0xa54] ss:$24 sps:$4 sm:$0xff]  }
 0x27e   :  { %4320 = vmatprep.subr.bf16.mxu1 %v8639_v17  ;;  %v8703_v17 = vld [vmem:[#allocation7 + $0xa28] ss:$24 sps:$4 sm:$0xff]  }
 0x280   :  { %4063 = vmatpush1.bf16.msra.mxu0 %v8634_v18  ;;  %v8711_v18 = vld [vmem:[#allocation7 + $0xa5c] ss:$24 sps:$4 sm:$0xff]  }
 0x281   :  { %4064 = vmatprep.subr.bf16.mxu0 %v8642_v19  ;;  %4321 = vmatpush1.bf16.msra.mxu1 %v8637_v20  ;;  %v8706_v19 = vld [vmem:[#allocation7 + $0xa50] ss:$24 sps:$4 sm:$0xff]   ;;  %v8714_v20 = vld [vmem:[#allocation7 + $0xa84] ss:$24 sps:$4 sm:$0xff]  }
 0x282   :  { %4322 = vmatprep.subr.bf16.mxu1 %v8645_v21  ;;  %v8709_v21 = vld [vmem:[#allocation7 + $0xa58] ss:$24 sps:$4 sm:$0xff]  }
 0x284   :  { %4065 = vmatpush1.bf16.msra.mxu0 %v8640_v22  ;;  %v8717_v22 = vld [vmem:[#allocation7 + $0xa8c] ss:$24 sps:$4 sm:$0xff]  }
 0x285   :  { %4066 = vmatprep.subr.bf16.mxu0 %v8648_v23  ;;  %4323 = vmatpush1.bf16.msra.mxu1 %v8643_v24  ;;  %v8712_v23 = vld [vmem:[#allocation7 + $0xa80] ss:$24 sps:$4 sm:$0xff]   ;;  %v8720_v24 = vld [vmem:[#allocation7 + $0xab4] ss:$24 sps:$4 sm:$0xff]  }
 0x286   :  { %4324 = vmatprep.subr.bf16.mxu1 %v8651_v26  ;;  %v8723_v26 = vld [vmem:[#allocation7 + $0xabc] ss:$24 sps:$4 sm:$0xff]  }
 0x288   :  { %4067 = vmatpush1.bf16.msra.mxu0 %v8646_v25  ;;  %v8715_v25 = vld [vmem:[#allocation7 + $0xa88] ss:$24 sps:$4 sm:$0xff]  }
 0x289   :  { %4068 = vmatprep.subr.bf16.mxu0 %v8654_v28  ;;  %4325 = vmatpush1.bf16.msra.mxu1 %v8649_v27  ;;  %v8718_v27 = vld [vmem:[#allocation7 + $0xab0] ss:$24 sps:$4 sm:$0xff]   ;;  %v8726_v28 = vld [vmem:[#allocation7 + $0xae4] ss:$24 sps:$4 sm:$0xff]  }
 0x28a   :  { %4326 = vmatprep.subr.bf16.mxu1 %v8657_v33  ;;  %v8732_v33 = vld [vmem:[#allocation7 + $0xb14] ss:$24 sps:$4 sm:$0xff]  }
 0x28c   :  { %4069 = vmatpush1.bf16.msra.mxu0 %v8652_v32  ;;  %v8724_v32 = vld [vmem:[#allocation7 + $0xae0] ss:$24 sps:$4 sm:$0xff]  }
 0x28d   :  { %4070 = vmatprep.subr.bf16.mxu0 %v8660_v35  ;;  %4327 = vmatpush1.bf16.msra.mxu1 %v8655_v34  ;;  %v8727_v34 = vld [vmem:[#allocation7 + $0xae8] ss:$24 sps:$4 sm:$0xff]   ;;  %v8735_v35 = vld [vmem:[#allocation7 + $0xb1c] ss:$24 sps:$4 sm:$0xff]  }
 0x28e   :  { %4328 = vmatprep.subr.bf16.mxu1 %v8663_v40  ;;  %v8736_v40 = vld [vmem:[#allocation7 + $0xb40] ss:$24 sps:$4 sm:$0xff]  }
 0x290   :  { %4071 = vmatpush1.bf16.msra.mxu0 %v8658_v41  ;;  %v8744_v41 = vld [vmem:[#allocation7 + $0xb74] ss:$24 sps:$4 sm:$0xff]  }
 0x291   :  { %4083 = vmatprep.subr.bf16.mxu0 %v8666_v45  ;;  %4329 = vmatpush1.bf16.msra.mxu1 %v8661_v48  ;;  %v8747_v45 = vld [vmem:[#allocation7 + $0xb7c] ss:$24 sps:$4 sm:$0xff]  }
 0x292   :  { %4341 = vmatprep.subr.bf16.mxu1 %v8669_v49  ;;  %v375_v48 = vld [vmem:[#allocation5 + $0x30] sm:$0xff]  ;;  %v378_v49 = vld [vmem:[#allocation5 + $0x48] sm:$0xff] }
 0x293   :  { %4073 = vmatmul.mubr.bf16.vlgmr.msra.gmra.mrb[0].mxu0 %v10586_v52 }
 0x294   :  { %4084 = vmatpush1.bf16.msra.mxu0 %v8664_v51  ;;  %4115 = vmatprep.mubr.bf16.mxu0 %v10589_v54  ;;  %v8748_v51 = vld [vmem:[#allocation7 + $0xba0] ss:$24 sps:$4 sm:$0xff]  }
 0x295   :  { %4085 = vmatprep.subr.bf16.mxu0 %v8672_v53  ;;  %4331 = vmatmul.mubr.bf16.vlgmr.msra.gmra.mrb[0].mxu1 %v10586_v52  ;;  %v8753_v53 = vld [vmem:[#allocation7 + $0xbac] ss:$24 sps:$4 sm:$0xff]  }
 0x296   :  { %4342 = vmatpush1.bf16.msra.mxu1 %v8667_v55  ;;  %4373 = vmatprep.mubr.bf16.mxu1 %v10589_v54  ;;  %v8751_v55 = vld [vmem:[#allocation7 + $0xba8] ss:$24 sps:$4 sm:$0xff]  }
 0x297   :  { %4343 = vmatprep.subr.bf16.mxu1 %v8675_v56  ;;  %v8756_v56 = vld [vmem:[#allocation7 + $0xbd4] ss:$24 sps:$4 sm:$0xff]  }
 0x298   :  { %4086 = vmatpush1.bf16.msra.mxu0 %v8670_v58  ;;  %v387_v58 = vpack.c.bf16 %v375_v48, %v375_v48  ;;  %v8814_v48 = vld [vmem:[#allocation7 + $0xdb0] ss:$24 sps:$4 sm:$0xff]  }
 0x299   :  { %4087 = vmatprep.subr.bf16.mxu0 %v8678_v59  ;;  %v351_v59 = vld [vmem:[#allocation3 + $0x30] sm:$0xff] }
 0x29a   :  { %4344 = vmatpush1.bf16.msra.mxu1 %v8673_v60  ;;  %v390_v60 = vpack.c.bf16 %v378_v49, %v378_v49  ;;  %v8817_v49 = vld [vmem:[#allocation7 + $0xdb8] ss:$24 sps:$4 sm:$0xff]  }
 0x29b   :  { %4345 = vmatprep.subr.bf16.mxu1 %v8681_v61  ;;  %v354_v61 = vld [vmem:[#allocation3 + $0x48] sm:$0xff] }
 0x29c   :  { %4088 = vmatpush1.bf16.msra.mxu0 %v8676_v62  ;;  %v8759_v62 = vld [vmem:[#allocation7 + $0xbdc] ss:$24 sps:$4 sm:$0xff]  }
 0x29d   :  { %4089 = vmatprep.subr.bf16.mxu0 %v8684_v63  ;;  %v8754_v63 = vld [vmem:[#allocation7 + $0xbd0] ss:$24 sps:$4 sm:$0xff]  }
 0x29e   :  { %4346 = vmatpush1.bf16.msra.mxu1 %v8679_v0  ;;  %v363_v0 = vpack.c.bf16 %v351_v59, %v351_v59  ;;  %v8831_v59 = vld [vmem:[#allocation7 + $0xe1c] ss:$24 sps:$4 sm:$0xff]  }
 0x29f   :  { %4347 = vmatprep.subr.bf16.mxu1 %v8687_v1  ;;  %v411_v1 = vrot.slane %v387_v58, 4  ;;  %v8828_v58 = vld [vmem:[#allocation7 + $0xe14] ss:$24 sps:$4 sm:$0xff]  }
 0x2a0   :  { %4090 = vmatpush1.bf16.msra.mxu0 %v8682_v2  ;;  %v8762_v2 = vld [vmem:[#allocation7 + $0xc04] ss:$24 sps:$4 sm:$0xff]  }
 0x2a1   :  { %4091 = vmatprep.subr.bf16.mxu0 %v8690_v3  ;;  %v366_v3 = vpack.c.bf16 %v354_v61, %v354_v61  ;;  %v8829_v61 = vld [vmem:[#allocation7 + $0xe18] ss:$24 sps:$4 sm:$0xff]  }
 0x2a2   :  { %4348 = vmatpush1.bf16.msra.mxu1 %v8685_v4  ;;  %v414_v4 = vrot.slane %v390_v60, 4  ;;  %v8826_v60 = vld [vmem:[#allocation7 + $0xe10] ss:$24 sps:$4 sm:$0xff]  }
 0x2a3   :  { %4349 = vmatprep.subr.bf16.mxu1 %v8693_v5  ;;  %v8757_v5 = vld [vmem:[#allocation7 + $0xbd8] ss:$24 sps:$4 sm:$0xff]  }
 0x2a4   :  { %4092 = vmatpush1.bf16.msra.mxu0 %v8688_v6  ;;  %v8765_v6 = vld [vmem:[#allocation7 + $0xc0c] ss:$24 sps:$4 sm:$0xff]  }
 0x2a5   :  { %4093 = vmatprep.subr.bf16.mxu0 %v8696_v7  ;;  %v8760_v7 = vld [vmem:[#allocation7 + $0xc00] ss:$24 sps:$4 sm:$0xff]  }
 0x2a6   :  { %4350 = vmatpush1.bf16.msra.mxu1 %v8691_v8  ;;  %v10596_v8 = vsel %vm417_vm0, %v363_v0, %v411_v1  ;;  %v8832_v0 = vld [vmem:[#allocation7 + $0xe40] ss:$24 sps:$4 sm:$0xff]  }
 0x2a7   :  { %4351 = vmatprep.subr.bf16.mxu1 %v8699_v9  ;;  %v8768_v9 = vld [vmem:[#allocation7 + $0xc34] ss:$24 sps:$4 sm:$0xff]   ;;  %v8835_v1 = vld [vmem:[#allocation7 + $0xe48] ss:$24 sps:$4 sm:$0xff]  }
 0x2a8   :  { %4094 = vmatpush1.bf16.msra.mxu0 %v8694_v10  ;;  %v10599_v10 = vsel %vm417_vm0, %v366_v3, %v414_v4  ;;  %v8843_v3 = vld [vmem:[#allocation7 + $0xe7c] ss:$24 sps:$4 sm:$0xff]   ;;  %v8838_v4 = vld [vmem:[#allocation7 + $0xe70] ss:$24 sps:$4 sm:$0xff]  }
 0x2a9   :  { %4095 = vmatprep.subr.bf16.mxu0 %v8702_v11  ;;  %v8763_v11 = vld [vmem:[#allocation7 + $0xc08] ss:$24 sps:$4 sm:$0xff]  }
 0x2aa   :  { %4352 = vmatpush1.bf16.msra.mxu1 %v8697_v12  ;;  %v8771_v12 = vld [vmem:[#allocation7 + $0xc3c] ss:$24 sps:$4 sm:$0xff]  }
 0x2ab   :  { %4353 = vmatprep.subr.bf16.mxu1 %v8705_v13  ;;  %v8766_v13 = vld [vmem:[#allocation7 + $0xc30] ss:$24 sps:$4 sm:$0xff]  }
 0x2ac   :  { %4096 = vmatpush1.bf16.msra.mxu0 %v8700_v14  ;;  %v8774_v14 = vld [vmem:[#allocation7 + $0xc64] ss:$24 sps:$4 sm:$0xff]  }
 0x2ad   :  { %4097 = vmatprep.subr.bf16.mxu0 %v8708_v16  ;;  %v8769_v16 = vld [vmem:[#allocation7 + $0xc38] ss:$24 sps:$4 sm:$0xff]  }
 0x2ae   :  { %4354 = vmatpush1.bf16.msra.mxu1 %v8703_v17  ;;  %v8777_v17 = vld [vmem:[#allocation7 + $0xc6c] ss:$24 sps:$4 sm:$0xff]  }
 0x2af   :  { %4355 = vmatprep.subr.bf16.mxu1 %v8711_v18  ;;  %v8772_v18 = vld [vmem:[#allocation7 + $0xc60] ss:$24 sps:$4 sm:$0xff]  }
 0x2b0   :  { %4098 = vmatpush1.bf16.msra.mxu0 %v8706_v19  ;;  %v8780_v19 = vld [vmem:[#allocation7 + $0xc94] ss:$24 sps:$4 sm:$0xff]  }
 0x2b1   :  { %4099 = vmatprep.subr.bf16.mxu0 %v8714_v20  ;;  %v8775_v20 = vld [vmem:[#allocation7 + $0xc68] ss:$24 sps:$4 sm:$0xff]  }
 0x2b2   :  { %4356 = vmatpush1.bf16.msra.mxu1 %v8709_v21  ;;  %v8783_v21 = vld [vmem:[#allocation7 + $0xc9c] ss:$24 sps:$4 sm:$0xff]  }
 0x2b3   :  { %4357 = vmatprep.subr.bf16.mxu1 %v8717_v22  ;;  %v8778_v22 = vld [vmem:[#allocation7 + $0xc90] ss:$24 sps:$4 sm:$0xff]  }
 0x2b4   :  { %4100 = vmatpush1.bf16.msra.mxu0 %v8712_v23  ;;  %v8781_v23 = vld [vmem:[#allocation7 + $0xc98] ss:$24 sps:$4 sm:$0xff]  }
 0x2b5   :  { %4101 = vmatprep.subr.bf16.mxu0 %v8720_v24  ;;  %v8786_v24 = vld [vmem:[#allocation7 + $0xcc4] ss:$24 sps:$4 sm:$0xff]  }
 0x2b6   :  { %4358 = vmatpush1.bf16.msra.mxu1 %v8715_v25  ;;  %v8784_v25 = vld [vmem:[#allocation7 + $0xcc0] ss:$24 sps:$4 sm:$0xff]  }
 0x2b7   :  { %4359 = vmatprep.subr.bf16.mxu1 %v8723_v26  ;;  %v8789_v26 = vld [vmem:[#allocation7 + $0xccc] ss:$24 sps:$4 sm:$0xff]  }
 0x2b8   :  { %4102 = vmatpush1.bf16.msra.mxu0 %v8718_v27  ;;  %v8787_v27 = vld [vmem:[#allocation7 + $0xcc8] ss:$24 sps:$4 sm:$0xff]  }
 0x2b9   :  { %4103 = vmatprep.subr.bf16.mxu0 %v8726_v28  ;;  %v8792_v28 = vld [vmem:[#allocation7 + $0xcf4] ss:$24 sps:$4 sm:$0xff]  }
 0x2ba   :  { %4360 = vmatpush1.bf16.msra.mxu1 %v8721_v30  ;;  %v8795_v30 = vld [vmem:[#allocation7 + $0xcfc] ss:$24 sps:$4 sm:$0xff]  }
 0x2bb   :  { %4361 = vmatprep.subr.bf16.mxu1 %v8729_v31  ;;  %v8790_v31 = vld [vmem:[#allocation7 + $0xcf0] ss:$24 sps:$4 sm:$0xff]  }
 0x2bc   :  { %4104 = vmatpush1.bf16.msra.mxu0 %v8724_v32  ;;  %v8793_v32 = vld [vmem:[#allocation7 + $0xcf8] ss:$24 sps:$4 sm:$0xff]  }
 0x2bd   :  { %4105 = vmatprep.subr.bf16.mxu0 %v8732_v33  ;;  %v8798_v33 = vld [vmem:[#allocation7 + $0xd24] ss:$24 sps:$4 sm:$0xff]  }
 0x2be   :  { %4362 = vmatpush1.bf16.msra.mxu1 %v8727_v34  ;;  %v8801_v34 = vld [vmem:[#allocation7 + $0xd2c] ss:$24 sps:$4 sm:$0xff]  }
 0x2bf   :  { %4363 = vmatprep.subr.bf16.mxu1 %v8735_v35  ;;  %v8796_v35 = vld [vmem:[#allocation7 + $0xd20] ss:$24 sps:$4 sm:$0xff]  }
 0x2c0   :  { %4106 = vmatpush1.bf16.msra.mxu0 %v8730_v36  ;;  %v8799_v36 = vld [vmem:[#allocation7 + $0xd28] ss:$24 sps:$4 sm:$0xff]  }
 0x2c1   :  { %4107 = vmatprep.subr.bf16.mxu0 %v8738_v37  ;;  %v8804_v37 = vld [vmem:[#allocation7 + $0xd54] ss:$24 sps:$4 sm:$0xff]  }
 0x2c2   :  { %4364 = vmatpush1.bf16.msra.mxu1 %v8733_v38  ;;  %v8807_v38 = vld [vmem:[#allocation7 + $0xd5c] ss:$24 sps:$4 sm:$0xff]  }
 0x2c3   :  { %4365 = vmatprep.subr.bf16.mxu1 %v8741_v39  ;;  %v8802_v39 = vld [vmem:[#allocation7 + $0xd50] ss:$24 sps:$4 sm:$0xff]  }
 0x2c4   :  { %4108 = vmatpush1.bf16.msra.mxu0 %v8736_v40  ;;  %v8805_v40 = vld [vmem:[#allocation7 + $0xd58] ss:$24 sps:$4 sm:$0xff]  }
 0x2c5   :  { %4109 = vmatprep.subr.bf16.mxu0 %v8744_v41  ;;  %v8810_v41 = vld [vmem:[#allocation7 + $0xd84] ss:$24 sps:$4 sm:$0xff]  }
 0x2c6   :  { %4366 = vmatpush1.bf16.msra.mxu1 %v8739_v42  ;;  %v8813_v42 = vld [vmem:[#allocation7 + $0xd8c] ss:$24 sps:$4 sm:$0xff]  }
 0x2c7   :  { %4367 = vmatprep.subr.bf16.mxu1 %v8747_v45  ;;  %v8811_v45 = vld [vmem:[#allocation7 + $0xd88] ss:$24 sps:$4 sm:$0xff]  }
 0x2c8   :  { %4110 = vmatpush1.bf16.msra.mxu0 %v8742_v43  ;;  %v8808_v43 = vld [vmem:[#allocation7 + $0xd80] ss:$24 sps:$4 sm:$0xff]  }
 0x2c9   :  { %4111 = vmatprep.subr.bf16.mxu0 %v8750_v47  ;;  %v8819_v47 = vld [vmem:[#allocation7 + $0xdbc] ss:$24 sps:$4 sm:$0xff]  }
 0x2ca   :  { %4368 = vmatpush1.bf16.msra.mxu1 %v8745_v46  ;;  %v8816_v46 = vld [vmem:[#allocation7 + $0xdb4] ss:$24 sps:$4 sm:$0xff]  }
 0x2cb   :  { %4369 = vmatprep.subr.bf16.mxu1 %v8753_v53  ;;  %v8825_v53 = vld [vmem:[#allocation7 + $0xdec] ss:$24 sps:$4 sm:$0xff]  }
 0x2cc   :  { %4112 = vmatpush1.bf16.msra.mxu0 %v8748_v51  ;;  %v8822_v51 = vld [vmem:[#allocation7 + $0xde4] ss:$24 sps:$4 sm:$0xff]  }
 0x2cd   :  { %4113 = vmatprep.subr.bf16.mxu0 %v8756_v56  ;;  %v8823_v56 = vld [vmem:[#allocation7 + $0xde8] ss:$24 sps:$4 sm:$0xff]  }
 0x2ce   :  { %4370 = vmatpush1.bf16.msra.mxu1 %v8751_v55  ;;  %v8820_v55 = vld [vmem:[#allocation7 + $0xde0] ss:$24 sps:$4 sm:$0xff]  }
 0x2cf   :  { %4371 = vmatprep.subr.bf16.mxu1 %v8759_v62  ;;  %v8834_v62 = vld [vmem:[#allocation7 + $0xe44] ss:$24 sps:$4 sm:$0xff]  }
 0x2d0   :  { %4114 = vmatpush1.bf16.msra.mxu0 %v8754_v63  ;;  %v8837_v63 = vld [vmem:[#allocation7 + $0xe4c] ss:$24 sps:$4 sm:$0xff]  }
 0x2d1   :  { %4126 = vmatprep.subr.bf16.mxu0 %v8762_v2  ;;  %v8840_v2 = vld [vmem:[#allocation7 + $0xe74] ss:$24 sps:$4 sm:$0xff]  }
 0x2d2   :  { %4372 = vmatpush1.bf16.msra.mxu1 %v8757_v5  ;;  %v8846_v5 = vld [vmem:[#allocation7 + $0xea4] ss:$24 sps:$4 sm:$0xff]  }
 0x2d3   :  { %4116 = vmatmul.mubr.bf16.vlgmr.msra.gmra.mrb[0].mxu0 %v10596_v8  ;;  %4384 = vmatprep.subr.bf16.mxu1 %v8765_v6  ;;  %v8841_v6 = vld [vmem:[#allocation7 + $0xe78] ss:$24 sps:$4 sm:$0xff]  }
 0x2d4   :  { %4127 = vmatpush1.bf16.msra.mxu0 %v8760_v7  ;;  %4158 = vmatprep.mubr.bf16.mxu0 %v10599_v10  ;;  %v377_v7 = vld [vmem:[#allocation5 + $0x40] sm:$0xff] }
 0x2d5   :  { %4128 = vmatprep.subr.bf16.mxu0 %v8768_v9  ;;  %4374 = vmatmul.mubr.bf16.vlgmr.msra.gmra.mrb[0].mxu1 %v10596_v8  ;;  %v380_v9 = vld [vmem:[#allocation5 + $0x58] sm:$0xff] }
 0x2d6   :  { %4385 = vmatpush1.bf16.msra.mxu1 %v8763_v11  ;;  %4416 = vmatprep.mubr.bf16.mxu1 %v10599_v10  ;;  %v8849_v11 = vld [vmem:[#allocation7 + $0xeac] ss:$24 sps:$4 sm:$0xff]  }
 0x2d7   :  { %4386 = vmatprep.subr.bf16.mxu1 %v8771_v12  ;;  %v8844_v12 = vld [vmem:[#allocation7 + $0xea0] ss:$24 sps:$4 sm:$0xff]  }
 0x2d8   :  { %4129 = vmatpush1.bf16.msra.mxu0 %v8766_v13  ;;  %v8852_v13 = vld [vmem:[#allocation7 + $0xed4] ss:$24 sps:$4 sm:$0xff]  }
 0x2d9   :  { %4130 = vmatprep.subr.bf16.mxu0 %v8774_v14  ;;  %v8847_v14 = vld [vmem:[#allocation7 + $0xea8] ss:$24 sps:$4 sm:$0xff]  }
 0x2da   :  { %4387 = vmatpush1.bf16.msra.mxu1 %v8769_v16  ;;  %v353_v16 = vld [vmem:[#allocation3 + $0x40] sm:$0xff] }
 0x2db   :  { %4388 = vmatprep.subr.bf16.mxu1 %v8777_v17  ;;  %v389_v17 = vpack.c.bf16 %v377_v7, %v377_v7  ;;  %v8912_v7 = vld [vmem:[#allocation7 + $0x10b4] ss:$24 sps:$4 sm:$0xff]  }
 0x2dc   :  { %4131 = vmatpush1.bf16.msra.mxu0 %v8772_v18  ;;  %v356_v18 = vld [vmem:[#allocation3 + $0x58] sm:$0xff] }
 0x2dd   :  { %4132 = vmatprep.subr.bf16.mxu0 %v8780_v19  ;;  %v8855_v19 = vld [vmem:[#allocation7 + $0xedc] ss:$24 sps:$4 sm:$0xff]  }
 0x2de   :  { %4389 = vmatpush1.bf16.msra.mxu1 %v8775_v20  ;;  %v392_v20 = vpack.c.bf16 %v380_v9, %v380_v9  ;;  %v8915_v9 = vld [vmem:[#allocation7 + $0x10bc] ss:$24 sps:$4 sm:$0xff]  }
 0x2df   :  { %4390 = vmatprep.subr.bf16.mxu1 %v8783_v21  ;;  %v8850_v21 = vld [vmem:[#allocation7 + $0xed0] ss:$24 sps:$4 sm:$0xff]  }
 0x2e0   :  { %4133 = vmatpush1.bf16.msra.mxu0 %v8778_v22  ;;  %v8853_v22 = vld [vmem:[#allocation7 + $0xed8] ss:$24 sps:$4 sm:$0xff]  }
 0x2e1   :  { %4134 = vmatprep.subr.bf16.mxu0 %v8786_v24  ;;  %v365_v24 = vpack.c.bf16 %v353_v16, %v353_v16  ;;  %v8916_v16 = vld [vmem:[#allocation7 + $0x10e0] ss:$24 sps:$4 sm:$0xff]  }
 0x2e2   :  { %4391 = vmatpush1.bf16.msra.mxu1 %v8781_v23  ;;  %v8858_v23 = vld [vmem:[#allocation7 + $0xf04] ss:$24 sps:$4 sm:$0xff]  }
 0x2e3   :  { %4392 = vmatprep.subr.bf16.mxu1 %v8789_v26  ;;  %v8861_v26 = vld [vmem:[#allocation7 + $0xf0c] ss:$24 sps:$4 sm:$0xff]  }
 0x2e4   :  { %4135 = vmatpush1.bf16.msra.mxu0 %v8784_v25  ;;  %v413_v25 = vrot.slane %v389_v17, 4  ;;  %v8919_v17 = vld [vmem:[#allocation7 + $0x10e8] ss:$24 sps:$4 sm:$0xff]  }
 0x2e5   :  { %4136 = vmatprep.subr.bf16.mxu0 %v8792_v28  ;;  %v416_v28 = vrot.slane %v392_v20, 4  ;;  %v8922_v20 = vld [vmem:[#allocation7 + $0x1110] ss:$24 sps:$4 sm:$0xff]  }
 0x2e6   :  { %4393 = vmatpush1.bf16.msra.mxu1 %v8787_v27  ;;  %v368_v27 = vpack.c.bf16 %v356_v18, %v356_v18  ;;  %v8924_v18 = vld [vmem:[#allocation7 + $0x1114] ss:$24 sps:$4 sm:$0xff]  }
 0x2e7   :  { %4394 = vmatprep.subr.bf16.mxu1 %v8795_v30  ;;  %v8856_v30 = vld [vmem:[#allocation7 + $0xf00] ss:$24 sps:$4 sm:$0xff]  }
 0x2e8   :  { %4137 = vmatpush1.bf16.msra.mxu0 %v8790_v31  ;;  %v10606_v31 = vsel %vm417_vm0, %v365_v24, %v413_v25  ;;  %v8928_v24 = vld [vmem:[#allocation7 + $0x1140] ss:$24 sps:$4 sm:$0xff]  }
 0x2e9   :  { %4138 = vmatprep.subr.bf16.mxu0 %v8798_v33  ;;  %v8864_v33 = vld [vmem:[#allocation7 + $0xf34] ss:$24 sps:$4 sm:$0xff]   ;;  %v8931_v25 = vld [vmem:[#allocation7 + $0x1148] ss:$24 sps:$4 sm:$0xff]  }
 0x2ea   :  { %4395 = vmatpush1.bf16.msra.mxu1 %v8793_v32  ;;  %v8859_v32 = vld [vmem:[#allocation7 + $0xf08] ss:$24 sps:$4 sm:$0xff]  }
 0x2eb   :  { %4396 = vmatprep.subr.bf16.mxu1 %v8801_v34  ;;  %v8867_v34 = vld [vmem:[#allocation7 + $0xf3c] ss:$24 sps:$4 sm:$0xff]  }
 0x2ec   :  { %4139 = vmatpush1.bf16.msra.mxu0 %v8796_v35  ;;  %v10609_v35 = vsel %vm417_vm0, %v368_v27, %v416_v28  ;;  %v8939_v27 = vld [vmem:[#allocation7 + $0x117c] ss:$24 sps:$4 sm:$0xff]   ;;  %v8934_v28 = vld [vmem:[#allocation7 + $0x1170] ss:$24 sps:$4 sm:$0xff]  }
 0x2ed   :  { %4140 = vmatprep.subr.bf16.mxu0 %v8804_v37  ;;  %v8865_v37 = vld [vmem:[#allocation7 + $0xf38] ss:$24 sps:$4 sm:$0xff]  }
 0x2ee   :  { %4397 = vmatpush1.bf16.msra.mxu1 %v8799_v36  ;;  %v8862_v36 = vld [vmem:[#allocation7 + $0xf30] ss:$24 sps:$4 sm:$0xff]  }
 0x2ef   :  { %4398 = vmatprep.subr.bf16.mxu1 %v8807_v38  ;;  %v8870_v38 = vld [vmem:[#allocation7 + $0xf64] ss:$24 sps:$4 sm:$0xff]  }
 0x2f0   :  { %4141 = vmatpush1.bf16.msra.mxu0 %v8802_v39  ;;  %v8873_v39 = vld [vmem:[#allocation7 + $0xf6c] ss:$24 sps:$4 sm:$0xff]  }
 0x2f1   :  { %4142 = vmatprep.subr.bf16.mxu0 %v8810_v41  ;;  %v8871_v41 = vld [vmem:[#allocation7 + $0xf68] ss:$24 sps:$4 sm:$0xff]  }
 0x2f2   :  { %4399 = vmatpush1.bf16.msra.mxu1 %v8805_v40  ;;  %v8868_v40 = vld [vmem:[#allocation7 + $0xf60] ss:$24 sps:$4 sm:$0xff]  }
 0x2f3   :  { %4400 = vmatprep.subr.bf16.mxu1 %v8813_v42  ;;  %v8876_v42 = vld [vmem:[#allocation7 + $0xf94] ss:$24 sps:$4 sm:$0xff]  }
 0x2f4   :  { %4143 = vmatpush1.bf16.msra.mxu0 %v8808_v43  ;;  %v8879_v43 = vld [vmem:[#allocation7 + $0xf9c] ss:$24 sps:$4 sm:$0xff]  }
 0x2f5   :  { %4144 = vmatprep.subr.bf16.mxu0 %v8816_v46  ;;  %v8877_v46 = vld [vmem:[#allocation7 + $0xf98] ss:$24 sps:$4 sm:$0xff]  }
 0x2f6   :  { %4401 = vmatpush1.bf16.msra.mxu1 %v8811_v45  ;;  %v8874_v45 = vld [vmem:[#allocation7 + $0xf90] ss:$24 sps:$4 sm:$0xff]  }
 0x2f7   :  { %4402 = vmatprep.subr.bf16.mxu1 %v8819_v47  ;;  %v8882_v47 = vld [vmem:[#allocation7 + $0xfc4] ss:$24 sps:$4 sm:$0xff]  }
 0x2f8   :  { %4145 = vmatpush1.bf16.msra.mxu0 %v8814_v48  ;;  %v8885_v48 = vld [vmem:[#allocation7 + $0xfcc] ss:$24 sps:$4 sm:$0xff]  }
 0x2f9   :  { %4146 = vmatprep.subr.bf16.mxu0 %v8822_v51  ;;  %v8883_v51 = vld [vmem:[#allocation7 + $0xfc8] ss:$24 sps:$4 sm:$0xff]  }
 0x2fa   :  { %4403 = vmatpush1.bf16.msra.mxu1 %v8817_v49  ;;  %v8880_v49 = vld [vmem:[#allocation7 + $0xfc0] ss:$24 sps:$4 sm:$0xff]  }
 0x2fb   :  { %4404 = vmatprep.subr.bf16.mxu1 %v8825_v53  ;;  %v8888_v53 = vld [vmem:[#allocation7 + $0xff4] ss:$24 sps:$4 sm:$0xff]  }
 0x2fc   :  { %4147 = vmatpush1.bf16.msra.mxu0 %v8820_v55  ;;  %v8891_v55 = vld [vmem:[#allocation7 + $0xffc] ss:$24 sps:$4 sm:$0xff]  }
 0x2fd   :  { %4148 = vmatprep.subr.bf16.mxu0 %v8828_v58  ;;  %v8889_v58 = vld [vmem:[#allocation7 + $0xff8] ss:$24 sps:$4 sm:$0xff]  }
 0x2fe   :  { %4405 = vmatpush1.bf16.msra.mxu1 %v8823_v56  ;;  %v8886_v56 = vld [vmem:[#allocation7 + $0xff0] ss:$24 sps:$4 sm:$0xff]  }
 0x2ff   :  { %4406 = vmatprep.subr.bf16.mxu1 %v8831_v59  ;;  %v8894_v59 = vld [vmem:[#allocation7 + $0x1024] ss:$24 sps:$4 sm:$0xff]  }
 0x300   :  { %4149 = vmatpush1.bf16.msra.mxu0 %v8826_v60  ;;  %v8897_v60 = vld [vmem:[#allocation7 + $0x102c] ss:$24 sps:$4 sm:$0xff]  }
 0x301   :  { %4150 = vmatprep.subr.bf16.mxu0 %v8834_v62  ;;  %v8895_v62 = vld [vmem:[#allocation7 + $0x1028] ss:$24 sps:$4 sm:$0xff]  }
 0x302   :  { %4407 = vmatpush1.bf16.msra.mxu1 %v8829_v61  ;;  %v8892_v61 = vld [vmem:[#allocation7 + $0x1020] ss:$24 sps:$4 sm:$0xff]  }
 0x303   :  { %4408 = vmatprep.subr.bf16.mxu1 %v8837_v63  ;;  %v8900_v63 = vld [vmem:[#allocation7 + $0x1054] ss:$24 sps:$4 sm:$0xff]  }
 0x304   :  { %4151 = vmatpush1.bf16.msra.mxu0 %v8832_v0  ;;  %v8903_v0 = vld [vmem:[#allocation7 + $0x105c] ss:$24 sps:$4 sm:$0xff]  }
 0x305   :  { %4152 = vmatprep.subr.bf16.mxu0 %v8840_v2  ;;  %v8901_v2 = vld [vmem:[#allocation7 + $0x1058] ss:$24 sps:$4 sm:$0xff]  }
 0x306   :  { %4409 = vmatpush1.bf16.msra.mxu1 %v8835_v1  ;;  %v8898_v1 = vld [vmem:[#allocation7 + $0x1050] ss:$24 sps:$4 sm:$0xff]  }
 0x307   :  { %4410 = vmatprep.subr.bf16.mxu1 %v8843_v3  ;;  %v8906_v3 = vld [vmem:[#allocation7 + $0x1084] ss:$24 sps:$4 sm:$0xff]  }
 0x308   :  { %4153 = vmatpush1.bf16.msra.mxu0 %v8838_v4  ;;  %v8909_v4 = vld [vmem:[#allocation7 + $0x108c] ss:$24 sps:$4 sm:$0xff]  }
 0x309   :  { %4154 = vmatprep.subr.bf16.mxu0 %v8846_v5  ;;  %v8904_v5 = vld [vmem:[#allocation7 + $0x1080] ss:$24 sps:$4 sm:$0xff]  }
 0x30a   :  { %4411 = vmatpush1.bf16.msra.mxu1 %v8841_v6  ;;  %v8907_v6 = vld [vmem:[#allocation7 + $0x1088] ss:$24 sps:$4 sm:$0xff]  }
 0x30b   :  { %4412 = vmatprep.subr.bf16.mxu1 %v8849_v11  ;;  %v8910_v11 = vld [vmem:[#allocation7 + $0x10b0] ss:$24 sps:$4 sm:$0xff]  }
 0x30c   :  { %4155 = vmatpush1.bf16.msra.mxu0 %v8844_v12  ;;  %v8913_v12 = vld [vmem:[#allocation7 + $0x10b8] ss:$24 sps:$4 sm:$0xff]  }
 0x30d   :  { %4156 = vmatprep.subr.bf16.mxu0 %v8852_v13  ;;  %v8918_v13 = vld [vmem:[#allocation7 + $0x10e4] ss:$24 sps:$4 sm:$0xff]  }
 0x30e   :  { %4413 = vmatpush1.bf16.msra.mxu1 %v8847_v14  ;;  %v8921_v14 = vld [vmem:[#allocation7 + $0x10ec] ss:$24 sps:$4 sm:$0xff]  }
 0x30f   :  { %4414 = vmatprep.subr.bf16.mxu1 %v8855_v19  ;;  %v8927_v19 = vld [vmem:[#allocation7 + $0x111c] ss:$24 sps:$4 sm:$0xff]  }
 0x310   :  { %4157 = vmatpush1.bf16.msra.mxu0 %v8850_v21  ;;  %v8925_v21 = vld [vmem:[#allocation7 + $0x1118] ss:$24 sps:$4 sm:$0xff]  }
 0x311   :  { %4169 = vmatprep.subr.bf16.mxu0 %v8858_v23  ;;  %v8933_v23 = vld [vmem:[#allocation7 + $0x114c] ss:$24 sps:$4 sm:$0xff]  }
 0x312   :  { %4415 = vmatpush1.bf16.msra.mxu1 %v8853_v22  ;;  %v8930_v22 = vld [vmem:[#allocation7 + $0x1144] ss:$24 sps:$4 sm:$0xff]  }
 0x313   :  { %4159 = vmatmul.mubr.bf16.vlgmr.msra.gmra.mrb[0].mxu0 %v10606_v31  ;;  %4427 = vmatprep.subr.bf16.mxu1 %v8861_v26  ;;  %v8936_v26 = vld [vmem:[#allocation7 + $0x1174] ss:$24 sps:$4 sm:$0xff]  }
 0x314   :  { %4170 = vmatpush1.bf16.msra.mxu0 %v8856_v30  ;;  %4201 = vmatprep.mubr.bf16.mxu0 %v10609_v35  ;;  %v8937_v30 = vld [vmem:[#allocation7 + $0x1178] ss:$24 sps:$4 sm:$0xff]  }
 0x315   :  { %4171 = vmatprep.subr.bf16.mxu0 %v8864_v33  ;;  %4417 = vmatmul.mubr.bf16.vlgmr.msra.gmra.mrb[0].mxu1 %v10606_v31  ;;  %v379_v33 = vld [vmem:[#allocation5 + $0x50] sm:$0xff] }
 0x316   :  { %4428 = vmatpush1.bf16.msra.mxu1 %v8859_v32  ;;  %4459 = vmatprep.mubr.bf16.mxu1 %v10609_v35  ;;  %v8942_v32 = vld [vmem:[#allocation7 + $0x11a4] ss:$24 sps:$4 sm:$0xff]  }
 0x317   :  { %4429 = vmatprep.subr.bf16.mxu1 %v8867_v34  ;;  %v8945_v34 = vld [vmem:[#allocation7 + $0x11ac] ss:$24 sps:$4 sm:$0xff]  }
 0x318   :  { %4172 = vmatpush1.bf16.msra.mxu0 %v8862_v36  ;;  %v8940_v36 = vld [vmem:[#allocation7 + $0x11a0] ss:$24 sps:$4 sm:$0xff]  }
 0x319   :  { %4173 = vmatprep.subr.bf16.mxu0 %v8870_v38  ;;  %v8948_v38 = vld [vmem:[#allocation7 + $0x11d4] ss:$24 sps:$4 sm:$0xff]  }
 0x31a   :  { %4430 = vmatpush1.bf16.msra.mxu1 %v8865_v37  ;;  %v8943_v37 = vld [vmem:[#allocation7 + $0x11a8] ss:$24 sps:$4 sm:$0xff]  }
 0x31b   :  { %4431 = vmatprep.subr.bf16.mxu1 %v8873_v39  ;;  %v355_v39 = vld [vmem:[#allocation3 + $0x50] sm:$0xff] }
 0x31c   :  { %4174 = vmatpush1.bf16.msra.mxu0 %v8868_v40  ;;  %v391_v40 = vpack.c.bf16 %v379_v33, %v379_v33  ;;  %v9012_v33 = vld [vmem:[#allocation7 + $0x3d0] ss:$24 sps:$4 sm:$0xff]  }
 0x31d   :  { %4175 = vmatprep.subr.bf16.mxu0 %v8876_v42  ;;  %v8946_v42 = vld [vmem:[#allocation7 + $0x11d0] ss:$24 sps:$4 sm:$0xff]  }
 0x31e   :  { %4432 = vmatpush1.bf16.msra.mxu1 %v8871_v41  ;;  %v8951_v41 = vld [vmem:[#allocation7 + $0x11dc] ss:$24 sps:$4 sm:$0xff]  }
 0x31f   :  { %4433 = vmatprep.subr.bf16.mxu1 %v8879_v43  ;;  %v8949_v43 = vld [vmem:[#allocation7 + $0x11d8] ss:$24 sps:$4 sm:$0xff]  }
 0x320   :  { %4176 = vmatpush1.bf16.msra.mxu0 %v8874_v45  ;;  %v367_v45 = vpack.c.bf16 %v355_v39, %v355_v39  ;;  %v9026_v39 = vld [vmem:[#allocation7 + $0x494] ss:$24 sps:$4 sm:$0xff]  }
 0x321   :  { %4177 = vmatprep.subr.bf16.mxu0 %v8882_v47  ;;  %v8954_v47 = vld [vmem:[#allocation7 + $0x14] ss:$24 sps:$4 sm:$0xff]  }
 0x322   :  { %4434 = vmatpush1.bf16.msra.mxu1 %v8877_v46  ;;  %v415_v46 = vrot.slane %v391_v40, 4  ;;  %v9024_v40 = vld [vmem:[#allocation7 + $0x490] ss:$24 sps:$4 sm:$0xff]  }
 0x323   :  { %4435 = vmatprep.subr.bf16.mxu1 %v8885_v48 }
 0x324   :  { %4178 = vmatpush1.bf16.msra.mxu0 %v8880_v49  ;;  %v10616_v48 = vsel %vm417_vm0, %v367_v45, %v415_v46  ;;  %v8952_v49 = vld [vmem:[#allocation7 + $0x10] ss:$24 sps:$4 sm:$0xff]   ;;  %v9035_v46 = vld [vmem:[#allocation7 + $0x524] ss:$24 sps:$4 sm:$0xff]  }
 0x325   :  { %4179 = vmatprep.subr.bf16.mxu0 %v8888_v53  ;;  %v8955_v53 = vld [vmem:[#allocation7 + $0x40] ss:$24 sps:$4 sm:$0xff]   ;;  %v9030_v45 = vld [vmem:[#allocation7 + $0x4f0] ss:$24 sps:$4 sm:$0xff]  }
 0x326   :  { %4436 = vmatpush1.bf16.msra.mxu1 %v8883_v51  ;;  %v8957_v51 = vld [vmem:[#allocation7 + $0x44] ss:$24 sps:$4 sm:$0xff]  }
 0x327   :  { %4437 = vmatprep.subr.bf16.mxu1 %v8891_v55  ;;  %v8960_v55 = vld [vmem:[#allocation7 + $0x74] ss:$24 sps:$4 sm:$0xff]  }
 0x328   :  { %4180 = vmatpush1.bf16.msra.mxu0 %v8886_v56  ;;  %v8958_v56 = vld [vmem:[#allocation7 + $0x70] ss:$24 sps:$4 sm:$0xff]  }
 0x329   :  { %4181 = vmatprep.subr.bf16.mxu0 %v8894_v59  ;;  %v8961_v59 = vld [vmem:[#allocation7 + $0xa0] ss:$24 sps:$4 sm:$0xff]  }
 0x32a   :  { %4438 = vmatpush1.bf16.msra.mxu1 %v8889_v58  ;;  %v8963_v58 = vld [vmem:[#allocation7 + $0xa4] ss:$24 sps:$4 sm:$0xff]  }
 0x32b   :  { %4439 = vmatprep.subr.bf16.mxu1 %v8897_v60  ;;  %v8966_v60 = vld [vmem:[#allocation7 + $0xd4] ss:$24 sps:$4 sm:$0xff]  }
 0x32c   :  { %4182 = vmatpush1.bf16.msra.mxu0 %v8892_v61  ;;  %v8964_v61 = vld [vmem:[#allocation7 + $0xd0] ss:$24 sps:$4 sm:$0xff]  }
 0x32d   :  { %4183 = vmatprep.subr.bf16.mxu0 %v8900_v63  ;;  %v8967_v63 = vld [vmem:[#allocation7 + $0x100] ss:$24 sps:$4 sm:$0xff]  }
 0x32e   :  { %4440 = vmatpush1.bf16.msra.mxu1 %v8895_v62  ;;  %v8969_v62 = vld [vmem:[#allocation7 + $0x104] ss:$24 sps:$4 sm:$0xff]  }
 0x32f   :  { %4441 = vmatprep.subr.bf16.mxu1 %v8903_v0  ;;  %v8972_v0 = vld [vmem:[#allocation7 + $0x134] ss:$24 sps:$4 sm:$0xff]  }
 0x330   :  { %4184 = vmatpush1.bf16.msra.mxu0 %v8898_v1  ;;  %v8975_v1 = vld [vmem:[#allocation7 + $0x164] ss:$24 sps:$4 sm:$0xff]  }
 0x331   :  { %4185 = vmatprep.subr.bf16.mxu0 %v8906_v3  ;;  %v8978_v3 = vld [vmem:[#allocation7 + $0x194] ss:$24 sps:$4 sm:$0xff]  }
 0x332   :  { %4442 = vmatpush1.bf16.msra.mxu1 %v8901_v2  ;;  %v8973_v2 = vld [vmem:[#allocation7 + $0x160] ss:$24 sps:$4 sm:$0xff]  }
 0x333   :  { %4443 = vmatprep.subr.bf16.mxu1 %v8909_v4  ;;  %v8976_v4 = vld [vmem:[#allocation7 + $0x190] ss:$24 sps:$4 sm:$0xff]  }
 0x334   :  { %4186 = vmatpush1.bf16.msra.mxu0 %v8904_v5  ;;  %v8981_v5 = vld [vmem:[#allocation7 + $0x1c4] ss:$24 sps:$4 sm:$0xff]  }
 0x335   :  { %4187 = vmatprep.subr.bf16.mxu0 %v8912_v7  ;;  %v8984_v7 = vld [vmem:[#allocation7 + $0x1f4] ss:$24 sps:$4 sm:$0xff]  }
 0x336   :  { %4444 = vmatpush1.bf16.msra.mxu1 %v8907_v6  ;;  %v8979_v6 = vld [vmem:[#allocation7 + $0x1c0] ss:$24 sps:$4 sm:$0xff]  }
 0x337   :  { %4445 = vmatprep.subr.bf16.mxu1 %v8915_v9  ;;  %v8982_v9 = vld [vmem:[#allocation7 + $0x1f0] ss:$24 sps:$4 sm:$0xff]  }
 0x338   :  { %4188 = vmatpush1.bf16.msra.mxu0 %v8910_v11  ;;  %v8987_v11 = vld [vmem:[#allocation7 + $0x224] ss:$24 sps:$4 sm:$0xff]  }
 0x339   :  { %4189 = vmatprep.subr.bf16.mxu0 %v8918_v13  ;;  %v8990_v13 = vld [vmem:[#allocation7 + $0x254] ss:$24 sps:$4 sm:$0xff]  }
 0x33a   :  { %4446 = vmatpush1.bf16.msra.mxu1 %v8913_v12  ;;  %v8985_v12 = vld [vmem:[#allocation7 + $0x220] ss:$24 sps:$4 sm:$0xff]  }
 0x33b   :  { %4447 = vmatprep.subr.bf16.mxu1 %v8921_v14  ;;  %v8988_v14 = vld [vmem:[#allocation7 + $0x250] ss:$24 sps:$4 sm:$0xff]  }
 0x33c   :  { %4190 = vmatpush1.bf16.msra.mxu0 %v8916_v16  ;;  %v8993_v16 = vld [vmem:[#allocation7 + $0x284] ss:$24 sps:$4 sm:$0xff]  }
 0x33d   :  { %4191 = vmatprep.subr.bf16.mxu0 %v8924_v18  ;;  %v8996_v18 = vld [vmem:[#allocation7 + $0x2b4] ss:$24 sps:$4 sm:$0xff]  }
 0x33e   :  { %4448 = vmatpush1.bf16.msra.mxu1 %v8919_v17  ;;  %v8991_v17 = vld [vmem:[#allocation7 + $0x280] ss:$24 sps:$4 sm:$0xff]  }
 0x33f   :  { %4449 = vmatprep.subr.bf16.mxu1 %v8927_v19  ;;  %v8994_v19 = vld [vmem:[#allocation7 + $0x2b0] ss:$24 sps:$4 sm:$0xff]  }
 0x340   :  { %4192 = vmatpush1.bf16.msra.mxu0 %v8922_v20  ;;  %v8999_v20 = vld [vmem:[#allocation7 + $0x2e4] ss:$24 sps:$4 sm:$0xff]  }
 0x341   :  { %4193 = vmatprep.subr.bf16.mxu0 %v8930_v22  ;;  %v9002_v22 = vld [vmem:[#allocation7 + $0x314] ss:$24 sps:$4 sm:$0xff]  }
 0x342   :  { %4450 = vmatpush1.bf16.msra.mxu1 %v8925_v21  ;;  %v8997_v21 = vld [vmem:[#allocation7 + $0x2e0] ss:$24 sps:$4 sm:$0xff]  }
 0x343   :  { %4451 = vmatprep.subr.bf16.mxu1 %v8933_v23  ;;  %v9000_v23 = vld [vmem:[#allocation7 + $0x310] ss:$24 sps:$4 sm:$0xff]  }
 0x344   :  { %4194 = vmatpush1.bf16.msra.mxu0 %v8928_v24  ;;  %v9005_v24 = vld [vmem:[#allocation7 + $0x344] ss:$24 sps:$4 sm:$0xff]  }
 0x345   :  { %4195 = vmatprep.subr.bf16.mxu0 %v8936_v26  ;;  %v9008_v26 = vld [vmem:[#allocation7 + $0x374] ss:$24 sps:$4 sm:$0xff]  }
 0x346   :  { %4452 = vmatpush1.bf16.msra.mxu1 %v8931_v25  ;;  %v9003_v25 = vld [vmem:[#allocation7 + $0x340] ss:$24 sps:$4 sm:$0xff]  }
 0x347   :  { %4453 = vmatprep.subr.bf16.mxu1 %v8939_v27  ;;  %v9006_v27 = vld [vmem:[#allocation7 + $0x370] ss:$24 sps:$4 sm:$0xff]  }
 0x348   :  { %4196 = vmatpush1.bf16.msra.mxu0 %v8934_v28  ;;  %v9011_v28 = vld [vmem:[#allocation7 + $0x3a4] ss:$24 sps:$4 sm:$0xff]  }
 0x349   :  { %4197 = vmatprep.subr.bf16.mxu0 %v8942_v32  ;;  %v9014_v32 = vld [vmem:[#allocation7 + $0x3d4] ss:$24 sps:$4 sm:$0xff]  }
 0x34a   :  { %4454 = vmatpush1.bf16.msra.mxu1 %v8937_v30  ;;  %v9009_v30 = vld [vmem:[#allocation7 + $0x3a0] ss:$24 sps:$4 sm:$0xff]  }
 0x34b   :  { %4455 = vmatprep.subr.bf16.mxu1 %v8945_v34  ;;  %v9017_v34 = vld [vmem:[#allocation7 + $0x404] ss:$24 sps:$4 sm:$0xff]  }
 0x34c   :  { %4198 = vmatpush1.bf16.msra.mxu0 %v8940_v36  ;;  %v9020_v36 = vld [vmem:[#allocation7 + $0x434] ss:$24 sps:$4 sm:$0xff]  }
 0x34d   :  { %4199 = vmatprep.subr.bf16.mxu0 %v8948_v38  ;;  %v9021_v38 = vld [vmem:[#allocation7 + $0x460] ss:$24 sps:$4 sm:$0xff]  }
 0x34e   :  { %4456 = vmatpush1.bf16.msra.mxu1 %v8943_v37  ;;  %v9018_v37 = vld [vmem:[#allocation7 + $0x430] ss:$24 sps:$4 sm:$0xff]  }
 0x34f   :  { %4457 = vmatprep.subr.bf16.mxu1 %v8951_v41  ;;  %v9029_v41 = vld [vmem:[#allocation7 + $0x4c4] ss:$24 sps:$4 sm:$0xff]  }
 0x350   :  { %4200 = vmatpush1.bf16.msra.mxu0 %v8946_v42  ;;  %v9027_v42 = vld [vmem:[#allocation7 + $0x4c0] ss:$24 sps:$4 sm:$0xff]  }
 0x351   :  { %4470 = vmatprep.subr.bf16.mxu0 %v8954_v47  ;;  %v9033_v47 = vld [vmem:[#allocation7 + $0x520] ss:$24 sps:$4 sm:$0xff]  }
 0x352   :  { %4458 = vmatpush1.bf16.msra.mxu1 %v8949_v43  ;;  %v9032_v43 = vld [vmem:[#allocation7 + $0x4f4] ss:$24 sps:$4 sm:$0xff]  }
 0x353   :  { %4202 = vmatmul.mubr.bf16.vlgmr.msra.gmra.mrb[0].mxu0 %v10616_v48 }
 0x354   :  { %4471 = vmatpush1.bf16.msra.mxu0 %v8952_v49  ;;  %4502 = vmatprep.mubr.bf16.mxu0 %v10561_v57  ;;  %v8970_v57 = vld [vmem:[#allocation7 + $0x130] ss:$24 sps:$4 sm:$0xff]   ;;  %v9038_v49 = vld [vmem:[#allocation7 + $0x554] ss:$24 sps:$4 sm:$0xff]  }
 0x355   :  { %4460 = vmatmul.mubr.bf16.vlgmr.msra.gmra.mrb[0].mxu1 %v10616_v48  ;;  %4472 = vmatprep.subr.bf16.mxu0 %v8957_v51  ;;  %v9036_v51 = vld [vmem:[#allocation7 + $0x550] ss:$24 sps:$4 sm:$0xff]  }
 0x358   :  { %4473 = vmatpush1.bf16.msra.mxu0 %v8955_v53  ;;  %v9041_v53 = vld [vmem:[#allocation7 + $0x584] ss:$24 sps:$4 sm:$0xff]  }
 0x359   :  { %4474 = vmatprep.subr.bf16.mxu0 %v8960_v55  ;;  %v9039_v55 = vld [vmem:[#allocation7 + $0x580] ss:$24 sps:$4 sm:$0xff]  }
 0x35c   :  { %4475 = vmatpush1.bf16.msra.mxu0 %v8958_v56  ;;  %v9044_v56 = vld [vmem:[#allocation7 + $0x5b4] ss:$24 sps:$4 sm:$0xff]  }
 0x35d   :  { %4476 = vmatprep.subr.bf16.mxu0 %v8963_v58  ;;  %v9042_v58 = vld [vmem:[#allocation7 + $0x5b0] ss:$24 sps:$4 sm:$0xff]  }
 0x360   :  { %4477 = vmatpush1.bf16.msra.mxu0 %v8961_v59  ;;  %v9047_v59 = vld [vmem:[#allocation7 + $0x5e4] ss:$24 sps:$4 sm:$0xff]  }
 0x361   :  { %4478 = vmatprep.subr.bf16.mxu0 %v8966_v60  ;;  %v9045_v60 = vld [vmem:[#allocation7 + $0x5e0] ss:$24 sps:$4 sm:$0xff]  }
 0x364   :  { %4479 = vmatpush1.bf16.msra.mxu0 %v8964_v61  ;;  %v9050_v61 = vld [vmem:[#allocation7 + $0x614] ss:$24 sps:$4 sm:$0xff]  }
 0x365   :  { %4480 = vmatprep.subr.bf16.mxu0 %v8969_v62  ;;  %v9048_v62 = vld [vmem:[#allocation7 + $0x610] ss:$24 sps:$4 sm:$0xff]  }
 0x368   :  { %4481 = vmatpush1.bf16.msra.mxu0 %v8967_v63  ;;  %v9053_v63 = vld [vmem:[#allocation7 + $0x644] ss:$24 sps:$4 sm:$0xff]  }
 0x369   :  { %4482 = vmatprep.subr.bf16.mxu0 %v8972_v0  ;;  %v9051_v0 = vld [vmem:[#allocation7 + $0x640] ss:$24 sps:$4 sm:$0xff]  }
 0x36c   :  { %4483 = vmatpush1.bf16.msra.mxu0 %v8970_v57  ;;  %v9056_v57 = vld [vmem:[#allocation7 + $0x674] ss:$24 sps:$4 sm:$0xff]  }
 0x36d   :  { %4484 = vmatprep.subr.bf16.mxu0 %v8975_v1  ;;  %v9054_v1 = vld [vmem:[#allocation7 + $0x670] ss:$24 sps:$4 sm:$0xff]  }
 0x370   :  { %4485 = vmatpush1.bf16.msra.mxu0 %v8973_v2  ;;  %v9059_v2 = vld [vmem:[#allocation7 + $0x6a4] ss:$24 sps:$4 sm:$0xff]  }
 0x371   :  { %4486 = vmatprep.subr.bf16.mxu0 %v8978_v3  ;;  %v9057_v3 = vld [vmem:[#allocation7 + $0x6a0] ss:$24 sps:$4 sm:$0xff]  }
 0x374   :  { %4487 = vmatpush1.bf16.msra.mxu0 %v8976_v4  ;;  %v9062_v4 = vld [vmem:[#allocation7 + $0x6d4] ss:$24 sps:$4 sm:$0xff]  }
 0x375   :  { %4488 = vmatprep.subr.bf16.mxu0 %v8981_v5  ;;  %v9060_v5 = vld [vmem:[#allocation7 + $0x6d0] ss:$24 sps:$4 sm:$0xff]  }
 0x378   :  { %4489 = vmatpush1.bf16.msra.mxu0 %v8979_v6  ;;  %v9065_v6 = vld [vmem:[#allocation7 + $0x704] ss:$24 sps:$4 sm:$0xff]  }
 0x379   :  { %4490 = vmatprep.subr.bf16.mxu0 %v8984_v7  ;;  %v9068_v7 = vld [vmem:[#allocation7 + $0x734] ss:$24 sps:$4 sm:$0xff]  }
 0x37c   :  { %4491 = vmatpush1.bf16.msra.mxu0 %v8982_v9  ;;  %v9071_v9 = vld [vmem:[#allocation7 + $0x764] ss:$24 sps:$4 sm:$0xff]  }
 0x37d   :  { %4492 = vmatprep.subr.bf16.mxu0 %v8987_v11  ;;  %v9069_v11 = vld [vmem:[#allocation7 + $0x760] ss:$24 sps:$4 sm:$0xff]  }
 0x380   :  { %4493 = vmatpush1.bf16.msra.mxu0 %v8985_v12  ;;  %v9074_v12 = vld [vmem:[#allocation7 + $0x794] ss:$24 sps:$4 sm:$0xff]  }
 0x381   :  { %4494 = vmatprep.subr.bf16.mxu0 %v8990_v13  ;;  %v9072_v13 = vld [vmem:[#allocation7 + $0x790] ss:$24 sps:$4 sm:$0xff]  }
 0x384   :  { %4495 = vmatpush1.bf16.msra.mxu0 %v8988_v14  ;;  %v9077_v14 = vld [vmem:[#allocation7 + $0x7c4] ss:$24 sps:$4 sm:$0xff]  }
 0x385   :  { %4496 = vmatprep.subr.bf16.mxu0 %v8993_v16  ;;  %v9075_v16 = vld [vmem:[#allocation7 + $0x7c0] ss:$24 sps:$4 sm:$0xff]  }
 0x388   :  { %4497 = vmatpush1.bf16.msra.mxu0 %v8991_v17  ;;  %v9080_v17 = vld [vmem:[#allocation7 + $0x7f4] ss:$24 sps:$4 sm:$0xff]  }
 0x389   :  { %4498 = vmatprep.subr.bf16.mxu0 %v8996_v18  ;;  %v9078_v18 = vld [vmem:[#allocation7 + $0x7f0] ss:$24 sps:$4 sm:$0xff]  }
 0x38c   :  { %4499 = vmatpush1.bf16.msra.mxu0 %v8994_v19  ;;  %v9083_v19 = vld [vmem:[#allocation7 + $0x824] ss:$24 sps:$4 sm:$0xff]  }
 0x38d   :  { %4500 = vmatprep.subr.bf16.mxu0 %v8999_v20  ;;  %v9081_v20 = vld [vmem:[#allocation7 + $0x820] ss:$24 sps:$4 sm:$0xff]  }
 0x390   :  { %4501 = vmatpush1.bf16.msra.mxu0 %v8997_v21  ;;  %v9086_v21 = vld [vmem:[#allocation7 + $0x854] ss:$24 sps:$4 sm:$0xff]  }
 0x391   :  { %4513 = vmatprep.subr.bf16.mxu0 %v9002_v22  ;;  %v9084_v22 = vld [vmem:[#allocation7 + $0x850] ss:$24 sps:$4 sm:$0xff]  }
 0x393   :  { %4503 = vmatmul.mubr.bf16.vlgmr.msra.gmra.mrb[4].mxu0 %v10566_v15  ;;  %v9015_v15 = vld [vmem:[#allocation7 + $0x400] ss:$24 sps:$4 sm:$0xff]  }
 0x394   :  { %4514 = vmatpush1.bf16.msra.mxu0 %v9000_v23  ;;  %4545 = vmatprep.mubr.bf16.mxu0 %v10571_v50  ;;  %v9023_v50 = vld [vmem:[#allocation7 + $0x464] ss:$24 sps:$4 sm:$0xff]  }
 0x395   :  { %4515 = vmatprep.subr.bf16.mxu0 %v9005_v24  ;;  %v9089_v23 = vld [vmem:[#allocation7 + $0x884] ss:$24 sps:$4 sm:$0xff]   ;;  %v9087_v24 = vld [vmem:[#allocation7 + $0x880] ss:$24 sps:$4 sm:$0xff]  }
 0x398   :  { %4516 = vmatpush1.bf16.msra.mxu0 %v9003_v25  ;;  %v9092_v25 = vld [vmem:[#allocation7 + $0x8b4] ss:$24 sps:$4 sm:$0xff]  }
 0x399   :  { %4517 = vmatprep.subr.bf16.mxu0 %v9008_v26  ;;  %v9090_v26 = vld [vmem:[#allocation7 + $0x8b0] ss:$24 sps:$4 sm:$0xff]  }
 0x39c   :  { %4518 = vmatpush1.bf16.msra.mxu0 %v9006_v27  ;;  %v9095_v27 = vld [vmem:[#allocation7 + $0x8e4] ss:$24 sps:$4 sm:$0xff]  }
 0x39d   :  { %4519 = vmatprep.subr.bf16.mxu0 %v9011_v28  ;;  %v9093_v28 = vld [vmem:[#allocation7 + $0x8e0] ss:$24 sps:$4 sm:$0xff]  }
 0x3a0   :  { %4520 = vmatpush1.bf16.msra.mxu0 %v9009_v30  ;;  %v9098_v30 = vld [vmem:[#allocation7 + $0x914] ss:$24 sps:$4 sm:$0xff]  }
 0x3a1   :  { %4521 = vmatprep.subr.bf16.mxu0 %v9014_v32  ;;  %v9096_v32 = vld [vmem:[#allocation7 + $0x910] ss:$24 sps:$4 sm:$0xff]  }
 0x3a4   :  { %4522 = vmatpush1.bf16.msra.mxu0 %v9012_v33  ;;  %v9101_v33 = vld [vmem:[#allocation7 + $0x944] ss:$24 sps:$4 sm:$0xff]  }
 0x3a5   :  { %4523 = vmatprep.subr.bf16.mxu0 %v9017_v34  ;;  %v9099_v34 = vld [vmem:[#allocation7 + $0x940] ss:$24 sps:$4 sm:$0xff]  }
 0x3a8   :  { %4524 = vmatpush1.bf16.msra.mxu0 %v9015_v15  ;;  %v9104_v15 = vld [vmem:[#allocation7 + $0x974] ss:$24 sps:$4 sm:$0xff]  }
 0x3a9   :  { %4525 = vmatprep.subr.bf16.mxu0 %v9020_v36  ;;  %v9102_v36 = vld [vmem:[#allocation7 + $0x970] ss:$24 sps:$4 sm:$0xff]  }
 0x3ac   :  { %4526 = vmatpush1.bf16.msra.mxu0 %v9018_v37  ;;  %v9107_v37 = vld [vmem:[#allocation7 + $0x9a4] ss:$24 sps:$4 sm:$0xff]  }
 0x3ad   :  { %4527 = vmatprep.subr.bf16.mxu0 %v9023_v50  ;;  %v9105_v50 = vld [vmem:[#allocation7 + $0x9a0] ss:$24 sps:$4 sm:$0xff]  }
 0x3b0   :  { %4528 = vmatpush1.bf16.msra.mxu0 %v9021_v38  ;;  %v9110_v38 = vld [vmem:[#allocation7 + $0x9d4] ss:$24 sps:$4 sm:$0xff]  }
 0x3b1   :  { %4529 = vmatprep.subr.bf16.mxu0 %v9026_v39  ;;  %v9108_v39 = vld [vmem:[#allocation7 + $0x9d0] ss:$24 sps:$4 sm:$0xff]  }
 0x3b4   :  { %4530 = vmatpush1.bf16.msra.mxu0 %v9024_v40  ;;  %v9113_v40 = vld [vmem:[#allocation7 + $0xa04] ss:$24 sps:$4 sm:$0xff]  }
 0x3b5   :  { %4531 = vmatprep.subr.bf16.mxu0 %v9029_v41  ;;  %v9116_v41 = vld [vmem:[#allocation7 + $0xa34] ss:$24 sps:$4 sm:$0xff]  }
 0x3b8   :  { %4532 = vmatpush1.bf16.msra.mxu0 %v9027_v42 }
 0x3b9   :  { %4533 = vmatprep.subr.bf16.mxu0 %v9032_v43 }
 0x3bc   :  { %4534 = vmatpush1.bf16.msra.mxu0 %v9030_v45 }
 0x3bd   :  { %4535 = vmatprep.subr.bf16.mxu0 %v9035_v46  ;;  %v9114_v46 = vld [vmem:[#allocation7 + $0xa30] ss:$24 sps:$4 sm:$0xff]  }
 0x3c0   :  { %4536 = vmatpush1.bf16.msra.mxu0 %v9033_v47 }
 0x3c1   :  { %4537 = vmatprep.subr.bf16.mxu0 %v9038_v49 }
 0x3c4   :  { %4538 = vmatpush1.bf16.msra.mxu0 %v9036_v51  ;;  %v9119_v51 = vld [vmem:[#allocation7 + $0xa64] ss:$24 sps:$4 sm:$0xff]  }
 0x3c5   :  { %4539 = vmatprep.subr.bf16.mxu0 %v9041_v53 }
 0x3c8   :  { %4540 = vmatpush1.bf16.msra.mxu0 %v9039_v55 }
 0x3c9   :  { %4541 = vmatprep.subr.bf16.mxu0 %v9044_v56  ;;  %v9117_v56 = vld [vmem:[#allocation7 + $0xa60] ss:$24 sps:$4 sm:$0xff]  }
 0x3cc   :  { %4542 = vmatpush1.bf16.msra.mxu0 %v9042_v58  ;;  %v9122_v58 = vld [vmem:[#allocation7 + $0xa94] ss:$24 sps:$4 sm:$0xff]  }
 0x3cd   :  { %4543 = vmatprep.subr.bf16.mxu0 %v9047_v59  ;;  %v9120_v59 = vld [vmem:[#allocation7 + $0xa90] ss:$24 sps:$4 sm:$0xff]  }
 0x3d0   :  { %4544 = vmatpush1.bf16.msra.mxu0 %v9045_v60  ;;  %v9125_v60 = vld [vmem:[#allocation7 + $0xac4] ss:$24 sps:$4 sm:$0xff]  }
 0x3d1   :  { %4556 = vmatprep.subr.bf16.mxu0 %v9050_v61  ;;  %v9123_v61 = vld [vmem:[#allocation7 + $0xac0] ss:$24 sps:$4 sm:$0xff]  }
 0x3d3   :  { %4546 = vmatmul.mubr.bf16.vlgmr.msra.gmra.mrb[4].mxu0 %v10576_v29  ;;  %v9063_v29 = vld [vmem:[#allocation7 + $0x700] ss:$24 sps:$4 sm:$0xff]  }
 0x3d4   :  { %4557 = vmatpush1.bf16.msra.mxu0 %v9048_v62  ;;  %4588 = vmatprep.mubr.bf16.mxu0 %v10581_v44  ;;  %v9066_v44 = vld [vmem:[#allocation7 + $0x730] ss:$24 sps:$4 sm:$0xff]   ;;  %v9128_v62 = vld [vmem:[#allocation7 + $0xaf4] ss:$24 sps:$4 sm:$0xff]  }
 0x3d5   :  { %4558 = vmatprep.subr.bf16.mxu0 %v9053_v63  ;;  %v9126_v63 = vld [vmem:[#allocation7 + $0xaf0] ss:$24 sps:$4 sm:$0xff]  }
 0x3d8   :  { %4559 = vmatpush1.bf16.msra.mxu0 %v9051_v0  ;;  %v9131_v0 = vld [vmem:[#allocation7 + $0xb24] ss:$24 sps:$4 sm:$0xff]  }
 0x3d9   :  { %4560 = vmatprep.subr.bf16.mxu0 %v9056_v57  ;;  %v9129_v57 = vld [vmem:[#allocation7 + $0xb20] ss:$24 sps:$4 sm:$0xff]  }
 0x3dc   :  { %4561 = vmatpush1.bf16.msra.mxu0 %v9054_v1  ;;  %v9134_v1 = vld [vmem:[#allocation7 + $0xb54] ss:$24 sps:$4 sm:$0xff]  }
 0x3dd   :  { %4562 = vmatprep.subr.bf16.mxu0 %v9059_v2  ;;  %v9132_v2 = vld [vmem:[#allocation7 + $0xb50] ss:$24 sps:$4 sm:$0xff]  }
 0x3e0   :  { %4563 = vmatpush1.bf16.msra.mxu0 %v9057_v3  ;;  %v9137_v3 = vld [vmem:[#allocation7 + $0xb84] ss:$24 sps:$4 sm:$0xff]  }
 0x3e1   :  { %4564 = vmatprep.subr.bf16.mxu0 %v9062_v4  ;;  %v9135_v4 = vld [vmem:[#allocation7 + $0xb80] ss:$24 sps:$4 sm:$0xff]  }
 0x3e4   :  { %4565 = vmatpush1.bf16.msra.mxu0 %v9060_v5  ;;  %v9140_v5 = vld [vmem:[#allocation7 + $0xbb4] ss:$24 sps:$4 sm:$0xff]  }
 0x3e5   :  { %4566 = vmatprep.subr.bf16.mxu0 %v9065_v6  ;;  %v9138_v6 = vld [vmem:[#allocation7 + $0xbb0] ss:$24 sps:$4 sm:$0xff]  }
 0x3e8   :  { %4567 = vmatpush1.bf16.msra.mxu0 %v9063_v29  ;;  %v9143_v29 = vld [vmem:[#allocation7 + $0xbe4] ss:$24 sps:$4 sm:$0xff]  }
 0x3e9   :  { %4568 = vmatprep.subr.bf16.mxu0 %v9068_v7  ;;  %v9141_v7 = vld [vmem:[#allocation7 + $0xbe0] ss:$24 sps:$4 sm:$0xff]  }
 0x3ec   :  { %4569 = vmatpush1.bf16.msra.mxu0 %v9066_v44  ;;  %v9146_v44 = vld [vmem:[#allocation7 + $0xc14] ss:$24 sps:$4 sm:$0xff]  }
 0x3ed   :  { %4570 = vmatprep.subr.bf16.mxu0 %v9071_v9  ;;  %v9144_v9 = vld [vmem:[#allocation7 + $0xc10] ss:$24 sps:$4 sm:$0xff]  }
 0x3f0   :  { %4571 = vmatpush1.bf16.msra.mxu0 %v9069_v11  ;;  %v9149_v11 = vld [vmem:[#allocation7 + $0xc44] ss:$24 sps:$4 sm:$0xff]  }
 0x3f1   :  { %4572 = vmatprep.subr.bf16.mxu0 %v9074_v12  ;;  %v9147_v12 = vld [vmem:[#allocation7 + $0xc40] ss:$24 sps:$4 sm:$0xff]  }
 0x3f4   :  { %4573 = vmatpush1.bf16.msra.mxu0 %v9072_v13  ;;  %v9152_v13 = vld [vmem:[#allocation7 + $0xc74] ss:$24 sps:$4 sm:$0xff]  }
 0x3f5   :  { %4574 = vmatprep.subr.bf16.mxu0 %v9077_v14  ;;  %v9150_v14 = vld [vmem:[#allocation7 + $0xc70] ss:$24 sps:$4 sm:$0xff]  }
 0x3f8   :  { %4575 = vmatpush1.bf16.msra.mxu0 %v9075_v16  ;;  %v9155_v16 = vld [vmem:[#allocation7 + $0xca4] ss:$24 sps:$4 sm:$0xff]  }
 0x3f9   :  { %4576 = vmatprep.subr.bf16.mxu0 %v9080_v17  ;;  %v9153_v17 = vld [vmem:[#allocation7 + $0xca0] ss:$24 sps:$4 sm:$0xff]  }
 0x3fc   :  { %4577 = vmatpush1.bf16.msra.mxu0 %v9078_v18  ;;  %v9158_v18 = vld [vmem:[#allocation7 + $0xcd4] ss:$24 sps:$4 sm:$0xff]  }
 0x3fd   :  { %4578 = vmatprep.subr.bf16.mxu0 %v9083_v19  ;;  %v9156_v19 = vld [vmem:[#allocation7 + $0xcd0] ss:$24 sps:$4 sm:$0xff]  }
 0x400   :  { %4579 = vmatpush1.bf16.msra.mxu0 %v9081_v20  ;;  %v9161_v20 = vld [vmem:[#allocation7 + $0xd04] ss:$24 sps:$4 sm:$0xff]  }
 0x401   :  { %4580 = vmatprep.subr.bf16.mxu0 %v9086_v21  ;;  %v9164_v21 = vld [vmem:[#allocation7 + $0xd34] ss:$24 sps:$4 sm:$0xff]  }
 0x404   :  { %4581 = vmatpush1.bf16.msra.mxu0 %v9084_v22  ;;  %v9167_v22 = vld [vmem:[#allocation7 + $0xd64] ss:$24 sps:$4 sm:$0xff]  }
 0x405   :  { %4582 = vmatprep.subr.bf16.mxu0 %v9089_v23  ;;  %v9165_v23 = vld [vmem:[#allocation7 + $0xd60] ss:$24 sps:$4 sm:$0xff]  }
 0x408   :  { %4583 = vmatpush1.bf16.msra.mxu0 %v9087_v24  ;;  %v9170_v24 = vld [vmem:[#allocation7 + $0xd94] ss:$24 sps:$4 sm:$0xff]  }
 0x409   :  { %4584 = vmatprep.subr.bf16.mxu0 %v9092_v25  ;;  %v9168_v25 = vld [vmem:[#allocation7 + $0xd90] ss:$24 sps:$4 sm:$0xff]  }
 0x40c   :  { %4585 = vmatpush1.bf16.msra.mxu0 %v9090_v26  ;;  %v9173_v26 = vld [vmem:[#allocation7 + $0xdc4] ss:$24 sps:$4 sm:$0xff]  }
 0x40d   :  { %4586 = vmatprep.subr.bf16.mxu0 %v9095_v27  ;;  %v9171_v27 = vld [vmem:[#allocation7 + $0xdc0] ss:$24 sps:$4 sm:$0xff]  }
 0x410   :  { %4587 = vmatpush1.bf16.msra.mxu0 %v9093_v28  ;;  %v9176_v28 = vld [vmem:[#allocation7 + $0xdf4] ss:$24 sps:$4 sm:$0xff]  }
 0x411   :  { %4599 = vmatprep.subr.bf16.mxu0 %v9098_v30  ;;  %v9174_v30 = vld [vmem:[#allocation7 + $0xdf0] ss:$24 sps:$4 sm:$0xff]  }
 0x413   :  { %4589 = vmatmul.mubr.bf16.vlgmr.msra.gmra.mrb[4].mxu0 %v10586_v52  ;;  %v9111_v52 = vld [vmem:[#allocation7 + $0xa00] ss:$24 sps:$4 sm:$0xff]  }
 0x414   :  { %4600 = vmatpush1.bf16.msra.mxu0 %v9096_v32  ;;  %4631 = vmatprep.mubr.bf16.mxu0 %v10589_v54  ;;  %v9179_v32 = vld [vmem:[#allocation7 + $0xe24] ss:$24 sps:$4 sm:$0xff]  }
 0x415   :  { %4601 = vmatprep.subr.bf16.mxu0 %v9101_v33  ;;  %v9177_v33 = vld [vmem:[#allocation7 + $0xe20] ss:$24 sps:$4 sm:$0xff]  }
 0x418   :  { %4602 = vmatpush1.bf16.msra.mxu0 %v9099_v34  ;;  %v9182_v34 = vld [vmem:[#allocation7 + $0xe54] ss:$24 sps:$4 sm:$0xff]  }
 0x419   :  { %4603 = vmatprep.subr.bf16.mxu0 %v9104_v15  ;;  %v9180_v15 = vld [vmem:[#allocation7 + $0xe50] ss:$24 sps:$4 sm:$0xff]  }
 0x41c   :  { %4604 = vmatpush1.bf16.msra.mxu0 %v9102_v36  ;;  %v9185_v36 = vld [vmem:[#allocation7 + $0xe84] ss:$24 sps:$4 sm:$0xff]  }
 0x41d   :  { %4605 = vmatprep.subr.bf16.mxu0 %v9107_v37  ;;  %v9183_v37 = vld [vmem:[#allocation7 + $0xe80] ss:$24 sps:$4 sm:$0xff]  }
 0x420   :  { %4606 = vmatpush1.bf16.msra.mxu0 %v9105_v50  ;;  %v9188_v50 = vld [vmem:[#allocation7 + $0xeb4] ss:$24 sps:$4 sm:$0xff]  }
 0x421   :  { %4607 = vmatprep.subr.bf16.mxu0 %v9110_v38  ;;  %v9186_v38 = vld [vmem:[#allocation7 + $0xeb0] ss:$24 sps:$4 sm:$0xff]  }
 0x424   :  { %4608 = vmatpush1.bf16.msra.mxu0 %v9108_v39  ;;  %v9191_v39 = vld [vmem:[#allocation7 + $0xee4] ss:$24 sps:$4 sm:$0xff]  }
 0x425   :  { %4609 = vmatprep.subr.bf16.mxu0 %v9113_v40  ;;  %v9189_v40 = vld [vmem:[#allocation7 + $0xee0] ss:$24 sps:$4 sm:$0xff]  }
 0x426   :  { %v10627_v42 = vpop.f32.mrb[0].mxu0 }
 0x427   :  { %v10629_v54 = vpop.f32.mrb[1].mxu0 }
 0x428   :  { %v10631_v43 = vpop.f32.mrb[2].mxu0  ;;  %4610 = vmatpush1.bf16.msra.mxu0 %v9111_v52  ;;  %v10633_v45 = vpop.f32.mrb[0].mxu1  ;;  %v9194_v52 = vld [vmem:[#allocation7 + $0xf14] ss:$24 sps:$4 sm:$0xff]  }
 0x429   :  { %v10635_v47 = vpop.f32.mrb[3].mxu0  ;;  %v10637_v49 = vpop.f32.mrb[1].mxu1  ;;  %4611 = vmatprep.subr.bf16.mxu0 %v9116_v41  ;;  %v9192_v41 = vld [vmem:[#allocation7 + $0xf10] ss:$24 sps:$4 sm:$0xff]  }
 0x42a   :  { %v10639_v53 = vpop.f32.mrb[2].mxu1 }
 0x42b   :  { %v10641_v55 = vpop.f32.mrb[3].mxu1 }
 0x42c   :  { %4612 = vmatpush1.bf16.msra.mxu0 %v9114_v46  ;;  %v9197_v46 = vld [vmem:[#allocation7 + $0xf44] ss:$24 sps:$4 sm:$0xff]  }
 0x42d   :  { %4613 = vmatprep.subr.bf16.mxu0 %v9119_v51  ;;  %v9195_v51 = vld [vmem:[#allocation7 + $0xf40] ss:$24 sps:$4 sm:$0xff]  }
 0x430   :  { %4614 = vmatpush1.bf16.msra.mxu0 %v9117_v56  ;;  %v9200_v56 = vld [vmem:[#allocation7 + $0xf74] ss:$24 sps:$4 sm:$0xff]  }
 0x431   :  { %4615 = vmatprep.subr.bf16.mxu0 %v9122_v58  ;;  %v9198_v58 = vld [vmem:[#allocation7 + $0xf70] ss:$24 sps:$4 sm:$0xff]  }
 0x434   :  { %4616 = vmatpush1.bf16.msra.mxu0 %v9120_v59  ;;  %v9203_v59 = vld [vmem:[#allocation7 + $0xfa4] ss:$24 sps:$4 sm:$0xff]  }
 0x435   :  { %4617 = vmatprep.subr.bf16.mxu0 %v9125_v60  ;;  %v9201_v60 = vld [vmem:[#allocation7 + $0xfa0] ss:$24 sps:$4 sm:$0xff]  }
 0x438   :  { %4618 = vmatpush1.bf16.msra.mxu0 %v9123_v61  ;;  %v9206_v61 = vld [vmem:[#allocation7 + $0xfd4] ss:$24 sps:$4 sm:$0xff]  }
 0x439   :  { %4619 = vmatprep.subr.bf16.mxu0 %v9128_v62  ;;  %v9204_v62 = vld [vmem:[#allocation7 + $0xfd0] ss:$24 sps:$4 sm:$0xff]  }
 0x43c   :  { %4620 = vmatpush1.bf16.msra.mxu0 %v9126_v63  ;;  %v9209_v63 = vld [vmem:[#allocation7 + $0x1004] ss:$24 sps:$4 sm:$0xff]  }
 0x43d   :  { %4621 = vmatprep.subr.bf16.mxu0 %v9131_v0  ;;  %v9212_v0 = vld [vmem:[#allocation7 + $0x1034] ss:$24 sps:$4 sm:$0xff]  }
 0x440   :  { %4622 = vmatpush1.bf16.msra.mxu0 %v9129_v57  ;;  %v9215_v57 = vld [vmem:[#allocation7 + $0x1064] ss:$24 sps:$4 sm:$0xff]  }
 0x441   :  { %4623 = vmatprep.subr.bf16.mxu0 %v9134_v1  ;;  %v9213_v1 = vld [vmem:[#allocation7 + $0x1060] ss:$24 sps:$4 sm:$0xff]  }
 0x444   :  { %4624 = vmatpush1.bf16.msra.mxu0 %v9132_v2  ;;  %v9218_v2 = vld [vmem:[#allocation7 + $0x1094] ss:$24 sps:$4 sm:$0xff]  }
 0x445   :  { %4625 = vmatprep.subr.bf16.mxu0 %v9137_v3  ;;  %v9216_v3 = vld [vmem:[#allocation7 + $0x1090] ss:$24 sps:$4 sm:$0xff]  }
 0x448   :  { %4626 = vmatpush1.bf16.msra.mxu0 %v9135_v4  ;;  %v9221_v4 = vld [vmem:[#allocation7 + $0x10c4] ss:$24 sps:$4 sm:$0xff]  }
 0x449   :  { %4627 = vmatprep.subr.bf16.mxu0 %v9140_v5  ;;  %v9219_v5 = vld [vmem:[#allocation7 + $0x10c0] ss:$24 sps:$4 sm:$0xff]  }
 0x44c   :  { %4628 = vmatpush1.bf16.msra.mxu0 %v9138_v6  ;;  %v9224_v6 = vld [vmem:[#allocation7 + $0x10f4] ss:$24 sps:$4 sm:$0xff]  }
 0x44d   :  { %4629 = vmatprep.subr.bf16.mxu0 %v9143_v29  ;;  %v9222_v29 = vld [vmem:[#allocation7 + $0x10f0] ss:$24 sps:$4 sm:$0xff]  }
 0x450   :  { %4630 = vmatpush1.bf16.msra.mxu0 %v9141_v7  ;;  %v9227_v7 = vld [vmem:[#allocation7 + $0x1124] ss:$24 sps:$4 sm:$0xff]  }
 0x451   :  { %4642 = vmatprep.subr.bf16.mxu0 %v9146_v44  ;;  %v9225_v44 = vld [vmem:[#allocation7 + $0x1120] ss:$24 sps:$4 sm:$0xff]  }
 0x453   :  { %4632 = vmatmul.mubr.bf16.vlgmr.msra.gmra.mrb[4].mxu0 %v10596_v8  ;;  %v9159_v8 = vld [vmem:[#allocation7 + $0xd00] ss:$24 sps:$4 sm:$0xff]  }
 0x454   :  { %4643 = vmatpush1.bf16.msra.mxu0 %v9144_v9  ;;  %4674 = vmatprep.mubr.bf16.mxu0 %v10599_v10  ;;  %v9162_v10 = vld [vmem:[#allocation7 + $0xd30] ss:$24 sps:$4 sm:$0xff]   ;;  %v9230_v9 = vld [vmem:[#allocation7 + $0x1154] ss:$24 sps:$4 sm:$0xff]  }
 0x455   :  { %4644 = vmatprep.subr.bf16.mxu0 %v9149_v11  ;;  %v9228_v11 = vld [vmem:[#allocation7 + $0x1150] ss:$24 sps:$4 sm:$0xff]  }
 0x458   :  { %4645 = vmatpush1.bf16.msra.mxu0 %v9147_v12  ;;  %v9233_v12 = vld [vmem:[#allocation7 + $0x1184] ss:$24 sps:$4 sm:$0xff]  }
 0x459   :  { %4646 = vmatprep.subr.bf16.mxu0 %v9152_v13  ;;  %v9231_v13 = vld [vmem:[#allocation7 + $0x1180] ss:$24 sps:$4 sm:$0xff]  }
 0x45c   :  { %4647 = vmatpush1.bf16.msra.mxu0 %v9150_v14  ;;  %v9236_v14 = vld [vmem:[#allocation7 + $0x11b4] ss:$24 sps:$4 sm:$0xff]  }
 0x45d   :  { %4648 = vmatprep.subr.bf16.mxu0 %v9155_v16  ;;  %v9234_v16 = vld [vmem:[#allocation7 + $0x11b0] ss:$24 sps:$4 sm:$0xff]  }
 0x460   :  { %4649 = vmatpush1.bf16.msra.mxu0 %v9153_v17  ;;  %v9239_v17 = vld [vmem:[#allocation7 + $0x11e4] ss:$24 sps:$4 sm:$0xff]  }
 0x461   :  { %4650 = vmatprep.subr.bf16.mxu0 %v9158_v18  ;;  %v9237_v18 = vld [vmem:[#allocation7 + $0x11e0] ss:$24 sps:$4 sm:$0xff]  }
 0x464   :  { %4651 = vmatpush1.bf16.msra.mxu0 %v9156_v19  ;;  %v1044_v19 = vlaneseq }
 0x465   :  { %4652 = vmatprep.subr.bf16.mxu0 %v9161_v20 }
 0x466   :  { %v1045_v20 = vshrl.u32 %v1044_v19, 7 }
 0x468   :  { %4653 = vmatpush1.bf16.msra.mxu0 %v9159_v8  ;;  %v10648_v8 = vsub.s32 0, %v1045_v20 }
 0x469   :  { %4654 = vmatprep.subr.bf16.mxu0 %v9164_v21  ;;  %v10650_v21 = vsub.s32 1, %v1045_v20 }
 0x46c   :  { %4655 = vmatpush1.bf16.msra.mxu0 %v9162_v10  ;;  %v1042_v10 = vld [vmem:[#allocation8] sm:$0x3f] }
 0x46d   :  { %4656 = vmatprep.subr.bf16.mxu0 %v9167_v22  ;;  %v1047_v22 = vrot.slane %v1042_v10, %v10648_v8 }
 0x470   :  { %4657 = vmatpush1.bf16.msra.mxu0 %v9165_v23  ;;  %v1051_v23 = vrot.slane %v1042_v10, %v10650_v21 }
 0x471   :  { %4658 = vmatprep.subr.bf16.mxu0 %v9170_v24  ;;  %v10654_v24 = vsub.s32 2, %v1045_v20 }
 0x474   :  { %4659 = vmatpush1.bf16.msra.mxu0 %v9168_v25  ;;  %v10657_v25 = vadd.f32 %v10627_v42, %v1047_v22 }
 0x475   :  { %4660 = vmatprep.subr.bf16.mxu0 %v9173_v26  ;;  %v10660_v26 = vadd.f32 %v10629_v54, %v1051_v23  ;;  %v10677_v54 = vsub.s32 4, %v1045_v20 }
 0x478   :  { %4661 = vmatpush1.bf16.msra.mxu0 %v9171_v27  ;;  %v10663_v27 = vsub.s32 3, %v1045_v20 }
 0x479   :  { %4662 = vmatprep.subr.bf16.mxu0 %v9176_v28  ;;  %v10666_v28 = vadd.f32 %v10631_v43, %v1047_v22 }
 0x47a   :  { %v1059_v42 = vrot.slane %v1042_v10, %v10663_v27 }
 0x47c   :  { %4663 = vmatpush1.bf16.msra.mxu0 %v9174_v30  ;;  %v10669_v30 = vadd.f32 %v10635_v47, %v1051_v23 }
 0x47d   :  { %4664 = vmatprep.subr.bf16.mxu0 %v9179_v32  ;;  %v4730_v32 = vadd.f32 %v10660_v26, %v10657_v25 }
 0x480   :  { %4665 = vmatpush1.bf16.msra.mxu0 %v9177_v33 }
 0x481   :  { %4666 = vmatprep.subr.bf16.mxu0 %v9182_v34  ;;  %v10679_v34 = vsub.s32 5, %v1045_v20 }
 0x484   :  { %4667 = vmatpush1.bf16.msra.mxu0 %v9180_v15  ;;  %v4737_v15 = vadd.f32 %v10669_v30, %v10666_v28 }
 0x485   :  { %4668 = vmatprep.subr.bf16.mxu0 %v9185_v36  ;;  %v10688_v36 = vadd.f32 %v10637_v49, %v1059_v42 }
 0x488   :  { %4669 = vmatpush1.bf16.msra.mxu0 %v9183_v37  ;;  %v1067_v37 = vrot.slane %v1042_v10, %v10679_v34 }
 0x489   :  { %4670 = vmatprep.subr.bf16.mxu0 %v9188_v50 }
 0x48c   :  { %4671 = vmatpush1.bf16.msra.mxu0 %v9186_v38  ;;  %v10694_v38 = vadd.f32 %v10641_v55, %v1059_v42 }
 0x48d   :  { %4672 = vmatprep.subr.bf16.mxu0 %v9191_v39 }
 0x490   :  { %4673 = vmatpush1.bf16.msra.mxu0 %v9189_v40 }
 0x491   :  { %4685 = vmatprep.subr.bf16.mxu0 %v9194_v52 }
 0x493   :  { %4675 = vmatmul.mubr.bf16.vlgmr.msra.gmra.mrb[4].mxu0 %v10606_v31  ;;  %v9207_v31 = vld [vmem:[#allocation7 + $0x1000] ss:$24 sps:$4 sm:$0xff]  }
 0x494   :  { %4686 = vmatpush1.bf16.msra.mxu0 %v9192_v41  ;;  %4717 = vmatprep.mubr.bf16.mxu0 %v10609_v35  ;;  %v9210_v35 = vld [vmem:[#allocation7 + $0x1030] ss:$24 sps:$4 sm:$0xff]  }
 0x495   :  { %4687 = vmatprep.subr.bf16.mxu0 %v9197_v46 }
 0x498   :  { %4688 = vmatpush1.bf16.msra.mxu0 %v9195_v51 }
 0x499   :  { %4689 = vmatprep.subr.bf16.mxu0 %v9200_v56 }
 0x49c   :  { %4690 = vmatpush1.bf16.msra.mxu0 %v9198_v58 }
 0x49d   :  { %4691 = vmatprep.subr.bf16.mxu0 %v9203_v59 }
 0x4a0   :  { %4692 = vmatpush1.bf16.msra.mxu0 %v9201_v60 }
 0x4a1   :  { %4693 = vmatprep.subr.bf16.mxu0 %v9206_v61 }
 0x4a4   :  { %4694 = vmatpush1.bf16.msra.mxu0 %v9204_v62  ;;  %v9240_v62 = vld [vmem:[#allocation13] ss:$12 sps:$4 sm:$0xff]  }
 0x4a5   :  { %4695 = vmatprep.subr.bf16.mxu0 %v9209_v63  ;;  %v9242_v63 = vld [vmem:[#allocation13 + $0x4] ss:$12 sps:$4 sm:$0xff]  }
 0x4a6   :  { %5884 = vmatprep.subr.bf16.mxu1 %v9242_v63  ;;  %v9270_v63 = vld [vmem:[#allocation13 + $0xf0] ss:$12 sps:$4 sm:$0xff]  }
 0x4a7   :  { %5885 = vmatpush1.bf16.msra.mxu1 %v9240_v62  ;;  %v9267_v62 = vld [vmem:[#allocation13 + $0xd8] ss:$12 sps:$4 sm:$0xff]  }
 0x4a8   :  { %4696 = vmatpush1.bf16.msra.mxu0 %v9207_v31  ;;  %v9245_v31 = vld [vmem:[#allocation13 + $0x1c] ss:$12 sps:$4 sm:$0xff]  }
 0x4a9   :  { %4697 = vmatprep.subr.bf16.mxu0 %v9212_v0  ;;  %v9243_v0 = vld [vmem:[#allocation13 + $0x18] ss:$12 sps:$4 sm:$0xff]   ;;  %5886 = vmatprep.subr.bf16.mxu1 %v9245_v31  ;;  %v9273_v31 = vld [vmem:[#allocation13 + $0x108] ss:$12 sps:$4 sm:$0xff]  }
 0x4ab   :  { %5887 = vmatpush1.bf16.msra.mxu1 %v9243_v0  ;;  %v9275_v0 = vld [vmem:[#allocation13 + $0x10c] ss:$12 sps:$4 sm:$0xff]  }
 0x4ac   :  { %4698 = vmatpush1.bf16.msra.mxu0 %v9210_v35  ;;  %v9248_v35 = vld [vmem:[#allocation13 + $0x34] ss:$12 sps:$4 sm:$0xff]  }
 0x4ad   :  { %4699 = vmatprep.subr.bf16.mxu0 %v9215_v57  ;;  %v9246_v57 = vld [vmem:[#allocation13 + $0x30] ss:$12 sps:$4 sm:$0xff]   ;;  %5888 = vmatprep.subr.bf16.mxu1 %v9248_v35 }
 0x4ae   :  { %v9278_v35 = vld [vmem:[#allocation13 + $0x124] ss:$12 sps:$4 sm:$0xff]  }
 0x4af   :  { %5889 = vmatpush1.bf16.msra.mxu1 %v9246_v57  ;;  %v9276_v57 = vld [vmem:[#allocation13 + $0x120] ss:$12 sps:$4 sm:$0xff]  }
 0x4b0   :  { %4700 = vmatpush1.bf16.msra.mxu0 %v9213_v1  ;;  %v9251_v1 = vld [vmem:[#allocation13 + $0x4c] ss:$12 sps:$4 sm:$0xff]  }
 0x4b1   :  { %4701 = vmatprep.subr.bf16.mxu0 %v9218_v2  ;;  %v9249_v2 = vld [vmem:[#allocation13 + $0x48] ss:$12 sps:$4 sm:$0xff]   ;;  %5890 = vmatprep.subr.bf16.mxu1 %v9251_v1 }
 0x4b2   :  { %v9281_v1 = vld [vmem:[#allocation13 + $0x13c] ss:$12 sps:$4 sm:$0xff]  }
 0x4b3   :  { %5891 = vmatpush1.bf16.msra.mxu1 %v9249_v2  ;;  %v9279_v2 = vld [vmem:[#allocation13 + $0x138] ss:$12 sps:$4 sm:$0xff]  }
 0x4b4   :  { %4702 = vmatpush1.bf16.msra.mxu0 %v9216_v3  ;;  %v9254_v3 = vld [vmem:[#allocation13 + $0x64] ss:$12 sps:$4 sm:$0xff]  }
 0x4b5   :  { %4703 = vmatprep.subr.bf16.mxu0 %v9221_v4  ;;  %v9252_v4 = vld [vmem:[#allocation13 + $0x60] ss:$12 sps:$4 sm:$0xff]   ;;  %5892 = vmatprep.subr.bf16.mxu1 %v9254_v3 }
 0x4b6   :  { %v9284_v3 = vld [vmem:[#allocation13 + $0x154] ss:$12 sps:$4 sm:$0xff]  }
 0x4b7   :  { %5893 = vmatpush1.bf16.msra.mxu1 %v9252_v4  ;;  %v9282_v4 = vld [vmem:[#allocation13 + $0x150] ss:$12 sps:$4 sm:$0xff]  }
 0x4b8   :  { %4704 = vmatpush1.bf16.msra.mxu0 %v9219_v5  ;;  %v9257_v5 = vld [vmem:[#allocation13 + $0x7c] ss:$12 sps:$4 sm:$0xff]  }
 0x4b9   :  { %4705 = vmatprep.subr.bf16.mxu0 %v9224_v6  ;;  %v9255_v6 = vld [vmem:[#allocation13 + $0x78] ss:$12 sps:$4 sm:$0xff]   ;;  %5894 = vmatprep.subr.bf16.mxu1 %v9257_v5 }
 0x4ba   :  { %v9287_v5 = vld [vmem:[#allocation13 + $0x16c] ss:$12 sps:$4 sm:$0xff]  }
 0x4bb   :  { %5895 = vmatpush1.bf16.msra.mxu1 %v9255_v6  ;;  %v9285_v6 = vld [vmem:[#allocation13 + $0x168] ss:$12 sps:$4 sm:$0xff]  }
 0x4bc   :  { %4706 = vmatpush1.bf16.msra.mxu0 %v9222_v29  ;;  %v9260_v29 = vld [vmem:[#allocation13 + $0x94] ss:$12 sps:$4 sm:$0xff]  }
 0x4bd   :  { %4707 = vmatprep.subr.bf16.mxu0 %v9227_v7  ;;  %v9258_v7 = vld [vmem:[#allocation13 + $0x90] ss:$12 sps:$4 sm:$0xff]   ;;  %5896 = vmatprep.subr.bf16.mxu1 %v9260_v29 }
 0x4be   :  { %v9290_v29 = vld [vmem:[#allocation13 + $0x184] ss:$12 sps:$4 sm:$0xff]  }
 0x4bf   :  { %5897 = vmatpush1.bf16.msra.mxu1 %v9258_v7 }
 0x4c0   :  { %4708 = vmatpush1.bf16.msra.mxu0 %v9225_v44  ;;  %v9263_v44 = vld [vmem:[#allocation13 + $0xac] ss:$12 sps:$4 sm:$0xff]  }
 0x4c1   :  { %4709 = vmatprep.subr.bf16.mxu0 %v9230_v9  ;;  %v9261_v9 = vld [vmem:[#allocation13 + $0xa8] ss:$12 sps:$4 sm:$0xff]   ;;  %5898 = vmatprep.subr.bf16.mxu1 %v9263_v44 }
 0x4c3   :  { %5899 = vmatpush1.bf16.msra.mxu1 %v9261_v9 }
 0x4c4   :  { %4710 = vmatpush1.bf16.msra.mxu0 %v9228_v11  ;;  %v9266_v11 = vld [vmem:[#allocation13 + $0xc4] ss:$12 sps:$4 sm:$0xff]  }
 0x4c5   :  { %4711 = vmatprep.subr.bf16.mxu0 %v9233_v12  ;;  %v9264_v12 = vld [vmem:[#allocation13 + $0xc0] ss:$12 sps:$4 sm:$0xff]   ;;  %5900 = vmatprep.subr.bf16.mxu1 %v9266_v11 }
 0x4c7   :  { %5901 = vmatpush1.bf16.msra.mxu1 %v9264_v12 }
 0x4c8   :  { %4712 = vmatpush1.bf16.msra.mxu0 %v9231_v13 }
 0x4c9   :  { %4713 = vmatprep.subr.bf16.mxu0 %v9236_v14 }
 0x4cc   :  { %4714 = vmatpush1.bf16.msra.mxu0 %v9234_v16 }
 0x4cd   :  { %4715 = vmatprep.subr.bf16.mxu0 %v9239_v17 }
 0x4d0   :  { %4716 = vmatpush1.bf16.msra.mxu0 %v9237_v18 }
 0x4d3   :  { %4718 = vmatmul.mubr.bf16.vlgmr.msra.gmra.mrb[4].mxu0 %v10616_v48  ;;  %v1055_v48 = vrot.slane %v1042_v10, %v10654_v24 }
 0x4d5   :  { %v10674_v33 = vadd.f32 %v10633_v45, %v1055_v48  ;;  %v10684_v43 = vadd.f32 %v10639_v53, %v1055_v48  ;;  %v1063_v45 = vrot.slane %v1042_v10, %v10677_v54 }
 0x4d7   :  { %v4731_v47 = vadd.f32 %v10674_v33, %v4730_v32  ;;  %v4738_v50 = vadd.f32 %v10684_v43, %v4737_v15 }
 0x4d9   :  { %v4732_v40 = vadd.f32 %v10688_v36, %v4731_v47  ;;  %v4739_v49 = vadd.f32 %v10694_v38, %v4738_v50 }
 0x5a6   :  { %v4719_v39 = vpop.f32.mrb[4].mxu0 }
 0x5a7   :  { %v8263_v52 = vadd.f32 %v4719_v39, %v1063_v45  ;;  %v4721_v53 = vpop.f32.mrb[5].mxu0 }
 0x5a8   :  { %v10697_v41 = vadd.f32 %v4721_v53, %v1067_v37  ;;  %v4723_v46 = vpop.f32.mrb[6].mxu0 }
 0x5a9   :  { %v10700_v51 = vadd.f32 %v4723_v46, %v1063_v45  ;;  %v4725_v56 = vpop.f32.mrb[7].mxu0  ;;  %v4733_v58 = vadd.f32 %v8263_v52, %v4732_v40 }
 0x5aa   :  { %v10703_v60 = vadd.f32 %v4725_v56, %v1067_v37 }
 0x5ab   :  { %v4740_v59 = vadd.f32 %v10700_v51, %v4739_v49  ;;  %v4734_v55 = vadd.f32 %v10697_v41, %v4733_v58 }
 0x5ad   :  { %4735 = vadd.xlane.f32.xlu0 %v4734_v55  ;;  %v4741_v61 = vadd.f32 %v10703_v60, %v4740_v59 }
 0x5b1   :  { %4742 = vadd.xlane.f32.xlu0 %v4741_v61  ;;  %v9269_v61 = vld [vmem:[#allocation13 + $0xdc] ss:$12 sps:$4 sm:$0xff]  }
 0x5b2   :  { %5902 = vmatprep.subr.bf16.mxu1 %v9269_v61 }
 0x5b3   :  { %5903 = vmatpush1.bf16.msra.mxu1 %v9267_v62 }
 0x63a   :  { %v4736_v13 = vpop.xlane.xlu0 %4735 }
 0x63b   :  { %v4745_v14 = vmul.f32 0.0013020834, %v4736_v13 }
 0x63d   :  { %v10708_v16 = vsub.f32 %v10657_v25, %v4745_v14  ;;  %v10711_v17 = vsub.f32 %v10660_v26, %v4745_v14  ;;  %v10714_v18 = vsub.f32 %v10674_v33, %v4745_v14  ;;  %v10717_v20 = vsub.f32 %v10688_v36, %v4745_v14 }
 0x63e   :  { %v4743_v19 = vpop.xlane.xlu0 %4742  ;;  %v10723_v48 = vsub.f32 %v8263_v52, %v4745_v14  ;;  %v10737_v15 = vsub.f32 %v10697_v41, %v4745_v14  ;;  %v4728_v14 = vld [vmem:[#allocation10] sm:$0x3f] }
 0x63f   :  { %v4746_v10 = vmul.f32 0.0013020834, %v4743_v19  ;;  %v4759_v22 = vmul.f32 %v10708_v16, %v10708_v16  ;;  %v4760_v23 = vmul.f32 %v10711_v17, %v10711_v17  ;;  %v4761_v25 = vmul.f32 %v10714_v18, %v10714_v18  ;;  %v4729_v19 = vld [vmem:[#allocation11] sm:$0x3f] }
 0x640   :  { %v4762_v47 = vmul.f32 %v10717_v20, %v10717_v20 }
 0x641   :  { %v4771_v26 = vadd.f32 %v4760_v23, %v4759_v22  ;;  %v10728_v32 = vsub.f32 %v10666_v28, %v4746_v10  ;;  %v10731_v33 = vsub.f32 %v10669_v30, %v4746_v10  ;;  %v10734_v42 = vsub.f32 %v10684_v43, %v4746_v10 }
 0x642   :  { %v10742_v45 = vsub.f32 %v10694_v38, %v4746_v10  ;;  %v4763_v43 = vmul.f32 %v10723_v48, %v10723_v48  ;;  %v10751_v50 = vsub.f32 %v10700_v51, %v4746_v10  ;;  %v4764_v38 = vmul.f32 %v10737_v15, %v10737_v15 }
 0x643   :  { %v4772_v36 = vadd.f32 %v4771_v26, %v4761_v25  ;;  %v4765_v28 = vmul.f32 %v10728_v32, %v10728_v32  ;;  %v4766_v30 = vmul.f32 %v10731_v33, %v10731_v33  ;;  %v4767_v39 = vmul.f32 %v10734_v42, %v10734_v42 }
 0x644   :  { %v10758_v53 = vsub.f32 %v10703_v60, %v4746_v10  ;;  %v4768_v41 = vmul.f32 %v10742_v45, %v10742_v45  ;;  %v4769_v51 = vmul.f32 %v10751_v50, %v10751_v50  ;;  %v9272_v60 = vld [vmem:[#allocation13 + $0xf4] ss:$12 sps:$4 sm:$0xff]   ;;  %v4811_v10 = vrot.slane %v4728_v14, %v10650_v21 }
 0x645   :  { %v4773_v37 = vadd.f32 %v4772_v36, %v4762_v47  ;;  %v4778_v40 = vadd.f32 %v4766_v30, %v4765_v28  ;;  %5904 = vmatprep.subr.bf16.mxu1 %v9272_v60  ;;  %v4807_v22 = vrot.slane %v4728_v14, %v10648_v8  ;;  %v4815_v23 = vrot.slane %v4728_v14, %v10654_v24 }
 0x646   :  { %v4770_v58 = vmul.f32 %v10758_v53, %v10758_v53  ;;  %5905 = vmatpush1.bf16.msra.mxu1 %v9270_v63  ;;  %v4854_v26 = vrot.slane %v4729_v19, %v10650_v21  ;;  %v4850_v47 = vrot.slane %v4729_v19, %v10648_v8  ;;  %v4819_v36 = vrot.slane %v4728_v14, %v10663_v27 }
 0x647   :  { %v4774_v52 = vadd.f32 %v4773_v37, %v4763_v43  ;;  %v4779_v46 = vadd.f32 %v4778_v40, %v4767_v39  ;;  %5906 = vmatprep.subr.bf16.mxu1 %v9275_v0  ;;  %v4823_v39 = vrot.slane %v4728_v14, %v10677_v54  ;;  %v4858_v40 = vrot.slane %v4729_v19, %v10654_v24 }
 0x648   :  { %v4870_v60 = vrot.slane %v4729_v19, %v10679_v34 }
 0x649   :  { %v4775_v49 = vadd.f32 %v4774_v52, %v4764_v38  ;;  %v4780_v56 = vadd.f32 %v4779_v46, %v4768_v41  ;;  %v4827_v52 = vrot.slane %v4728_v14, %v10679_v34 }
 0x64a   :  { %5907 = vmatpush1.bf16.msra.mxu1 %v9273_v31 }
 0x64b   :  { %4776 = vadd.xlane.f32.xlu1 %v4775_v49  ;;  %v4781_v59 = vadd.f32 %v4780_v56, %v4769_v51  ;;  %5908 = vmatprep.subr.bf16.mxu1 %v9278_v35 }
 0x64d   :  { %v4782_v55 = vadd.f32 %v4781_v59, %v4770_v58 }
 0x64e   :  { %5909 = vmatpush1.bf16.msra.mxu1 %v9276_v57 }
 0x64f   :  { %4783 = vadd.xlane.f32.xlu1 %v4782_v55  ;;  %5910 = vmatprep.subr.bf16.mxu1 %v9281_v1 }
 0x652   :  { %5911 = vmatpush1.bf16.msra.mxu1 %v9279_v2 }
 0x653   :  { %5912 = vmatprep.subr.bf16.mxu1 %v9284_v3 }
 0x656   :  { %5913 = vmatpush1.bf16.msra.mxu1 %v9282_v4 }
 0x657   :  { %5914 = vmatprep.subr.bf16.mxu1 %v9287_v5 }
 0x65a   :  { %5915 = vmatpush1.bf16.msra.mxu1 %v9285_v6 }
 0x65b   :  { %5927 = vmatprep.subr.bf16.mxu1 %v9290_v29 }
 0x6d8   :  { %v4777_v7 = vpop.xlane.xlu1 %4776 }
 0x6d9   :  { %v4785_v44 = vmul.f32 0.0013020834, %v4777_v7 }
 0x6db   :  { %v4787_v9 = vadd.f32 1e-05, %v4785_v44 }
 0x6dc   :  { %v4784_v11 = vpop.xlane.xlu1 %4783 }
 0x6dd   :  { %9588 = vrsqrt.f32 %v4787_v9  ;;  %v4786_v12 = vmul.f32 0.0013020834, %v4784_v11 }
 0x6df   :  { %v4788_v13 = vadd.f32 1e-05, %v4786_v12 }
 0x6e1   :  { %9590 = vrsqrt.f32 %v4788_v13  ;;  %v9288_v13 = vld [vmem:[#allocation13 + $0x180] ss:$12 sps:$4 sm:$0xff]  }
 0x6e7   :  { %v9589_v25 = vpop.eup %9588 }
 0x6e8   :  { %v4792_v28 = vmul.f32 %v9589_v25, %v10711_v17  ;;  %v4791_v30 = vmul.f32 %v9589_v25, %v10708_v16  ;;  %v4794_v43 = vmul.f32 %v9589_v25, %v10717_v20  ;;  %v4793_v37 = vmul.f32 %v9589_v25, %v10714_v18 }
 0x6e9   :  { %v4796_v38 = vmul.f32 %v9589_v25, %v10737_v15  ;;  %v4795_v51 = vmul.f32 %v9589_v25, %v10723_v48  ;;  %v4866_v16 = vrot.slane %v4729_v19, %v10677_v54  ;;  %v4862_v20 = vrot.slane %v4729_v19, %v10663_v27 }
 0x6ea   :  { %v4835_v41 = vmul.f32 %v4811_v10, %v4792_v28  ;;  %v4834_v46 = vmul.f32 %v4807_v22, %v4791_v30  ;;  %v4836_v49 = vmul.f32 %v4815_v23, %v4793_v37  ;;  %v4837_v56 = vmul.f32 %v4819_v36, %v4794_v43  ;;  %v9291_v28 = vld [vmem:[#allocation13 + $0x198] ss:$12 sps:$4 sm:$0xff]   ;;  %v9296_v43 = vld [vmem:[#allocation13 + $0x1b4] ss:$12 sps:$4 sm:$0xff]  }
 0x6eb   :  { %v9591_v17 = vpop.eup %9590  ;;  %v4839_v31 = vmul.f32 %v4827_v52, %v4796_v38  ;;  %v4838_v54 = vmul.f32 %v4823_v39, %v4795_v51  ;;  %v9297_v38 = vld [vmem:[#allocation13 + $0x1c8] ss:$12 sps:$4 sm:$0xff]  }
 0x6ec   :  { %v4798_v18 = vmul.f32 %v9591_v17, %v10731_v33  ;;  %v4878_v58 = vadd.f32 %v4854_v26, %v4835_v41  ;;  %v4797_v59 = vmul.f32 %v9591_v17, %v10728_v32  ;;  %v4877_v55 = vadd.f32 %v4850_v47, %v4834_v46  ;;  %v9300_v41 = vld [vmem:[#allocation13 + $0x1e0] ss:$12 sps:$4 sm:$0xff]   ;;  %v9305_v46 = vld [vmem:[#allocation13 + $0x1fc] ss:$12 sps:$4 sm:$0xff]  }
 0x6ed   :  { %v4800_v15 = vmul.f32 %v9591_v17, %v10742_v45  ;;  %v4799_v61 = vmul.f32 %v9591_v17, %v10734_v42  ;;  %v4879_v62 = vadd.f32 %v4858_v40, %v4836_v49  ;;  %v4880_v27 = vadd.f32 %v4862_v20, %v4837_v56  ;;  %v9303_v49 = vld [vmem:[#allocation13 + $0x1f8] ss:$12 sps:$4 sm:$0xff]   ;;  %v9308_v51 = vld [vmem:[#allocation13 + $0x214] ss:$12 sps:$4 sm:$0xff]  }
 0x6ee   :  { %v4841_v48 = vmul.f32 %v4811_v10, %v4798_v18  ;;  %v4840_v63 = vmul.f32 %v4807_v22, %v4797_v59  ;;  %v4890_v0 = vmax.f32 %v4878_v58, 0.0  ;;  %v4889_v2 = vmax.f32 %v4877_v55, 0.0  ;;  %v9293_v10 = vld [vmem:[#allocation13 + $0x19c] ss:$12 sps:$4 sm:$0xff]   ;;  %v9312_v18 = vld [vmem:[#allocation13 + $0x240] ss:$12 sps:$4 sm:$0xff]  }
 0x6ef   :  { %v4843_v35 = vmul.f32 %v4819_v36, %v4800_v15  ;;  %v4842_v57 = vmul.f32 %v4815_v23, %v4799_v61  ;;  %v4802_v32 = vmul.f32 %v9591_v17, %v10758_v53  ;;  %v4891_v4 = vmax.f32 %v4879_v62, 0.0  ;;  %v9309_v56 = vld [vmem:[#allocation13 + $0x228] ss:$12 sps:$4 sm:$0xff]   ;;  %v9315_v59 = vld [vmem:[#allocation13 + $0x258] ss:$12 sps:$4 sm:$0xff]  }
 0x6f0   :  { %v4884_v33 = vadd.f32 %v4854_v26, %v4841_v48  ;;  %v4883_v1 = vadd.f32 %v4850_v47, %v4840_v63  ;;  %v4801_v42 = vmul.f32 %v9591_v17, %v10751_v50  ;;  %v4882_v29 = vadd.f32 %v4870_v60, %v4839_v31  ;;  %v9306_v17 = vld [vmem:[#allocation13 + $0x210] ss:$12 sps:$4 sm:$0xff]   ;;  %v9320_v55 = vld [vmem:[#allocation13 + $0x274] ss:$12 sps:$4 sm:$0xff]   ;;  %v9323_v61 = vld [vmem:[#allocation13 + $0x28c] ss:$12 sps:$4 sm:$0xff]  }
 0x6f1   :  { %v4886_v3 = vadd.f32 %v4862_v20, %v4843_v35  ;;  %v4885_v45 = vadd.f32 %v4858_v40, %v4842_v57  ;;  %v4845_v6 = vmul.f32 %v4827_v52, %v4802_v32  ;;  %v4881_v11 = vadd.f32 %v4866_v16, %v4838_v54  ;;  %v9299_v40 = vld [vmem:[#allocation13 + $0x1cc] ss:$12 sps:$4 sm:$0xff]   ;;  %v9302_v52 = vld [vmem:[#allocation13 + $0x1e4] ss:$12 sps:$4 sm:$0xff]   ;;  %v9317_v58 = vld [vmem:[#allocation13 + $0x25c] ss:$12 sps:$4 sm:$0xff]  }
 0x6f2   :  { %v4896_v5 = vmax.f32 %v4884_v33, 0.0  ;;  %v4895_v34 = vmax.f32 %v4883_v1, 0.0  ;;  %v4844_v9 = vmul.f32 %v4823_v39, %v4801_v42  ;;  %v4892_v19 = vmax.f32 %v4880_v27, 0.0  ;;  %v9294_v39 = vld [vmem:[#allocation13 + $0x1b0] ss:$12 sps:$4 sm:$0xff]  }
 0x6f3   :  { %v4898_v7 = vmax.f32 %v4886_v3, 0.0  ;;  %v4897_v44 = vmax.f32 %v4885_v45, 0.0  ;;  %v4888_v53 = vadd.f32 %v4870_v60, %v4845_v6  ;;  %v4894_v25 = vmax.f32 %v4882_v29, 0.0  ;;  %v9314_v20 = vld [vmem:[#allocation13 + $0x244] ss:$12 sps:$4 sm:$0xff]  }
 0x6f4   :  { %v10790_v12 = vpack.c.bf16 %v4896_v5, %v4890_v0  ;;  %v10792_v14 = vpack.c.bf16 %v4895_v34, %v4889_v2  ;;  %v4887_v23 = vadd.f32 %v4866_v16, %v4844_v9  ;;  %v4893_v47 = vmax.f32 %v4881_v11, 0.0  ;;  %v9311_v16 = vld [vmem:[#allocation13 + $0x22c] ss:$12 sps:$4 sm:$0xff]   ;;  %v9318_v15 = vld [vmem:[#allocation13 + $0x270] ss:$12 sps:$4 sm:$0xff]  }
 0x6f5   :  { %v10794_v22 = vpack.c.bf16 %v4897_v44, %v4891_v4  ;;  %v10797_v50 = vpack.c.bf16 %v4898_v7, %v4892_v19  ;;  %v4900_v26 = vmax.f32 %v4888_v53, 0.0  ;;  %v9321_v62 = vld [vmem:[#allocation13 + $0x288] ss:$12 sps:$4 sm:$0xff]   ;;  %v9326_v60 = vld [vmem:[#allocation13 + $0x2a4] ss:$12 sps:$4 sm:$0xff]  }
 0x6f6   :  { %5916 = vmatprep.mubr.bf16.mxu1 %v10790_v12  ;;  %v4899_v36 = vmax.f32 %v4887_v23, 0.0  ;;  %v9324_v48 = vld [vmem:[#allocation13 + $0x2a0] ss:$12 sps:$4 sm:$0xff]   ;;  %v9329_v63 = vld [vmem:[#allocation13 + $0x2bc] ss:$12 sps:$4 sm:$0xff]  }
 0x6f7   :  { %5917 = vmatmul.mubr.bf16.vlgmr.msra.gmra.mrb[4].mxu1 %v10792_v14  ;;  %v10801_v30 = vpack.c.bf16 %v4900_v26, %v4894_v25  ;;  %v9327_v31 = vld [vmem:[#allocation13 + $0x2b8] ss:$12 sps:$4 sm:$0xff]   ;;  %v9332_v54 = vld [vmem:[#allocation13 + $0x2d4] ss:$12 sps:$4 sm:$0xff]   ;;  %v9330_v0 = vld [vmem:[#allocation13 + $0x2d0] ss:$12 sps:$4 sm:$0xff]  }
 0x6f8   :  { %5928 = vmatpush1.bf16.msra.mxu1 %v9288_v13  ;;  %5959 = vmatprep.mubr.bf16.mxu1 %v10797_v50  ;;  %v10803_v37 = vpack.c.bf16 %v4899_v36, %v4893_v47  ;;  %v9335_v35 = vld [vmem:[#allocation13 + $0x2ec] ss:$12 sps:$4 sm:$0xff]   ;;  %v9333_v27 = vld [vmem:[#allocation13 + $0x2e8] ss:$12 sps:$4 sm:$0xff]   ;;  %v9338_v57 = vld [vmem:[#allocation13 + $0x304] ss:$12 sps:$4 sm:$0xff]  }
 0x6f9   :  { %5929 = vmatprep.subr.bf16.mxu1 %v9293_v10  ;;  %v9336_v33 = vld [vmem:[#allocation13 + $0x300] ss:$12 sps:$4 sm:$0xff]   ;;  %v9341_v1 = vld [vmem:[#allocation13 + $0x31c] ss:$12 sps:$4 sm:$0xff]   ;;  %v9339_v2 = vld [vmem:[#allocation13 + $0x318] ss:$12 sps:$4 sm:$0xff]  }
 0x6fa   :  { %v9344_v32 = vld [vmem:[#allocation13 + $0x334] ss:$12 sps:$4 sm:$0xff]   ;;  %v9342_v3 = vld [vmem:[#allocation13 + $0x330] ss:$12 sps:$4 sm:$0xff]   ;;  %v9347_v45 = vld [vmem:[#allocation13 + $0x34c] ss:$12 sps:$4 sm:$0xff]  }
 0x6fb   :  { %v9345_v4 = vld [vmem:[#allocation13 + $0x348] ss:$12 sps:$4 sm:$0xff]   ;;  %v9350_v42 = vld [vmem:[#allocation13 + $0x364] ss:$12 sps:$4 sm:$0xff]   ;;  %v9348_v5 = vld [vmem:[#allocation13 + $0x360] ss:$12 sps:$4 sm:$0xff]  }
 0x6fc   :  { %5930 = vmatpush1.bf16.msra.mxu1 %v9291_v28  ;;  %v9353_v34 = vld [vmem:[#allocation13 + $0x37c] ss:$12 sps:$4 sm:$0xff]   ;;  %v9351_v6 = vld [vmem:[#allocation13 + $0x378] ss:$12 sps:$4 sm:$0xff]   ;;  %v9356_v29 = vld [vmem:[#allocation13 + $0x394] ss:$12 sps:$4 sm:$0xff]  }
 0x6fd   :  { %5931 = vmatprep.subr.bf16.mxu1 %v9296_v43  ;;  %v9354_v7 = vld [vmem:[#allocation13 + $0x390] ss:$12 sps:$4 sm:$0xff]   ;;  %v9359_v44 = vld [vmem:[#allocation13 + $0x3ac] ss:$12 sps:$4 sm:$0xff]   ;;  %v9357_v9 = vld [vmem:[#allocation13 + $0x3a8] ss:$12 sps:$4 sm:$0xff]  }
 0x6fe   :  { %v9362_v11 = vld [vmem:[#allocation13 + $0x3c4] ss:$12 sps:$4 sm:$0xff]   ;;  %v9360_v13 = vld [vmem:[#allocation13 + $0x3c0] ss:$12 sps:$4 sm:$0xff]   ;;  %v9365_v19 = vld [vmem:[#allocation13 + $0x3dc] ss:$12 sps:$4 sm:$0xff]  }
 0x6ff   :  { %v9363_v53 = vld [vmem:[#allocation13 + $0x3d8] ss:$12 sps:$4 sm:$0xff]   ;;  %v9368_v10 = vld [vmem:[#allocation13 + $0x3f4] ss:$12 sps:$4 sm:$0xff]   ;;  %v9366_v23 = vld [vmem:[#allocation13 + $0x3f0] ss:$12 sps:$4 sm:$0xff]  }
 0x700   :  { %5932 = vmatpush1.bf16.msra.mxu1 %v9294_v39  ;;  %v9371_v25 = vld [vmem:[#allocation13 + $0x40c] ss:$12 sps:$4 sm:$0xff]   ;;  %v9369_v26 = vld [vmem:[#allocation13 + $0x408] ss:$12 sps:$4 sm:$0xff]   ;;  %v9374_v47 = vld [vmem:[#allocation13 + $0x424] ss:$12 sps:$4 sm:$0xff]  }
 0x701   :  { %5933 = vmatprep.subr.bf16.mxu1 %v9299_v40  ;;  %v9372_v36 = vld [vmem:[#allocation13 + $0x420] ss:$12 sps:$4 sm:$0xff]   ;;  %v9377_v28 = vld [vmem:[#allocation13 + $0x43c] ss:$12 sps:$4 sm:$0xff]   ;;  %v9375_v43 = vld [vmem:[#allocation13 + $0x438] ss:$12 sps:$4 sm:$0xff]  }
 0x702   :  { %v9380_v39 = vld [vmem:[#allocation13 + $0x454] ss:$12 sps:$4 sm:$0xff]   ;;  %v9378_v40 = vld [vmem:[#allocation13 + $0x450] ss:$12 sps:$4 sm:$0xff]  }
 0x704   :  { %5934 = vmatpush1.bf16.msra.mxu1 %v9297_v38  ;;  %v9383_v38 = vld [vmem:[#allocation13 + $0x46c] ss:$12 sps:$4 sm:$0xff]  }
 0x705   :  { %5935 = vmatprep.subr.bf16.mxu1 %v9302_v52  ;;  %v9381_v52 = vld [vmem:[#allocation13 + $0x468] ss:$12 sps:$4 sm:$0xff]  }
 0x708   :  { %5936 = vmatpush1.bf16.msra.mxu1 %v9300_v41  ;;  %v9384_v41 = vld [vmem:[#allocation13 + $0xc8] ss:$12 sps:$4 sm:$0xff]  }
 0x709   :  { %5937 = vmatprep.subr.bf16.mxu1 %v9305_v46  ;;  %v9385_v46 = vld [vmem:[#allocation13 + $0x8] ss:$12 sps:$4 sm:$0xff]  }
 0x70c   :  { %5938 = vmatpush1.bf16.msra.mxu1 %v9303_v49  ;;  %v9386_v49 = vld [vmem:[#allocation13 + $0xe0] ss:$12 sps:$4 sm:$0xff]  }
 0x70d   :  { %5939 = vmatprep.subr.bf16.mxu1 %v9308_v51  ;;  %v9387_v51 = vld [vmem:[#allocation13 + $0x20] ss:$12 sps:$4 sm:$0xff]  }
 0x710   :  { %5940 = vmatpush1.bf16.msra.mxu1 %v9306_v17  ;;  %v9388_v17 = vld [vmem:[#allocation13 + $0xf8] ss:$12 sps:$4 sm:$0xff]  }
 0x711   :  { %5941 = vmatprep.subr.bf16.mxu1 %v9311_v16  ;;  %v9389_v16 = vld [vmem:[#allocation13 + $0x38] ss:$12 sps:$4 sm:$0xff]  }
 0x714   :  { %5942 = vmatpush1.bf16.msra.mxu1 %v9309_v56  ;;  %v9390_v56 = vld [vmem:[#allocation13 + $0x110] ss:$12 sps:$4 sm:$0xff]  }
 0x715   :  { %5943 = vmatprep.subr.bf16.mxu1 %v9314_v20  ;;  %v9391_v20 = vld [vmem:[#allocation13 + $0x50] ss:$12 sps:$4 sm:$0xff]  }
 0x718   :  { %5944 = vmatpush1.bf16.msra.mxu1 %v9312_v18  ;;  %v9392_v18 = vld [vmem:[#allocation13 + $0x128] ss:$12 sps:$4 sm:$0xff]  }
 0x719   :  { %5945 = vmatprep.subr.bf16.mxu1 %v9317_v58  ;;  %v9393_v58 = vld [vmem:[#allocation13 + $0x68] ss:$12 sps:$4 sm:$0xff]  }
 0x71c   :  { %5946 = vmatpush1.bf16.msra.mxu1 %v9315_v59  ;;  %v9394_v59 = vld [vmem:[#allocation13 + $0x140] ss:$12 sps:$4 sm:$0xff]  }
 0x71d   :  { %5947 = vmatprep.subr.bf16.mxu1 %v9320_v55  ;;  %v9395_v55 = vld [vmem:[#allocation13 + $0x80] ss:$12 sps:$4 sm:$0xff]  }
 0x720   :  { %5948 = vmatpush1.bf16.msra.mxu1 %v9318_v15  ;;  %v9396_v15 = vld [vmem:[#allocation13 + $0x158] ss:$12 sps:$4 sm:$0xff]  }
 0x721   :  { %5949 = vmatprep.subr.bf16.mxu1 %v9323_v61  ;;  %v9398_v61 = vld [vmem:[#allocation13 + $0x170] ss:$12 sps:$4 sm:$0xff]  }
 0x724   :  { %5950 = vmatpush1.bf16.msra.mxu1 %v9321_v62  ;;  %v9399_v62 = vld [vmem:[#allocation13 + $0xb0] ss:$12 sps:$4 sm:$0xff]  }
 0x725   :  { %5951 = vmatprep.subr.bf16.mxu1 %v9326_v60  ;;  %v9400_v60 = vld [vmem:[#allocation13 + $0x248] ss:$12 sps:$4 sm:$0xff]  }
 0x728   :  { %5952 = vmatpush1.bf16.msra.mxu1 %v9324_v48  ;;  %v9401_v48 = vld [vmem:[#allocation13 + $0x188] ss:$12 sps:$4 sm:$0xff]  }
 0x729   :  { %5953 = vmatprep.subr.bf16.mxu1 %v9329_v63  ;;  %v9402_v63 = vld [vmem:[#allocation13 + $0x260] ss:$12 sps:$4 sm:$0xff]  }
 0x72c   :  { %5954 = vmatpush1.bf16.msra.mxu1 %v9327_v31  ;;  %v9403_v31 = vld [vmem:[#allocation13 + $0x1a0] ss:$12 sps:$4 sm:$0xff]  }
 0x72d   :  { %5955 = vmatprep.subr.bf16.mxu1 %v9332_v54  ;;  %v9404_v54 = vld [vmem:[#allocation13 + $0x278] ss:$12 sps:$4 sm:$0xff]  }
 0x730   :  { %5956 = vmatpush1.bf16.msra.mxu1 %v9330_v0  ;;  %v9405_v0 = vld [vmem:[#allocation13 + $0x1b8] ss:$12 sps:$4 sm:$0xff]  }
 0x731   :  { %5957 = vmatprep.subr.bf16.mxu1 %v9335_v35  ;;  %v9406_v35 = vld [vmem:[#allocation13 + $0x290] ss:$12 sps:$4 sm:$0xff]  }
 0x734   :  { %5958 = vmatpush1.bf16.msra.mxu1 %v9333_v27  ;;  %v9407_v27 = vld [vmem:[#allocation13 + $0x1d0] ss:$12 sps:$4 sm:$0xff]  }
 0x735   :  { %5970 = vmatprep.subr.bf16.mxu1 %v9338_v57  ;;  %v9408_v57 = vld [vmem:[#allocation13 + $0x2a8] ss:$12 sps:$4 sm:$0xff]  }
 0x737   :  { %5960 = vmatmul.mubr.bf16.vlgmr.msra.gmra.mrb[4].mxu1 %v10794_v22 }
 0x738   :  { %5971 = vmatpush1.bf16.msra.mxu1 %v9336_v33  ;;  %6002 = vmatprep.mubr.bf16.mxu1 %v10801_v30  ;;  %v9409_v33 = vld [vmem:[#allocation13 + $0x1e8] ss:$12 sps:$4 sm:$0xff]  }
 0x739   :  { %5972 = vmatprep.subr.bf16.mxu1 %v9341_v1  ;;  %v9410_v1 = vld [vmem:[#allocation13 + $0x2c0] ss:$12 sps:$4 sm:$0xff]  }
 0x73c   :  { %5973 = vmatpush1.bf16.msra.mxu1 %v9339_v2  ;;  %v9412_v2 = vld [vmem:[#allocation13 + $0x2d8] ss:$12 sps:$4 sm:$0xff]  }
 0x73d   :  { %5974 = vmatprep.subr.bf16.mxu1 %v9344_v32  ;;  %v9414_v32 = vld [vmem:[#allocation13 + $0x2f0] ss:$12 sps:$4 sm:$0xff]  }
 0x740   :  { %5975 = vmatpush1.bf16.msra.mxu1 %v9342_v3  ;;  %v9415_v3 = vld [vmem:[#allocation13 + $0x230] ss:$12 sps:$4 sm:$0xff]  }
 0x741   :  { %5976 = vmatprep.subr.bf16.mxu1 %v9347_v45  ;;  %v9416_v45 = vld [vmem:[#allocation13 + $0x3c8] ss:$12 sps:$4 sm:$0xff]  }
 0x744   :  { %5977 = vmatpush1.bf16.msra.mxu1 %v9345_v4  ;;  %v9417_v4 = vld [vmem:[#allocation13 + $0x308] ss:$12 sps:$4 sm:$0xff]  }
 0x745   :  { %5978 = vmatprep.subr.bf16.mxu1 %v9350_v42  ;;  %v9418_v42 = vld [vmem:[#allocation13 + $0x3e0] ss:$12 sps:$4 sm:$0xff]  }
 0x748   :  { %5979 = vmatpush1.bf16.msra.mxu1 %v9348_v5  ;;  %v9419_v5 = vld [vmem:[#allocation13 + $0x320] ss:$12 sps:$4 sm:$0xff]  }
 0x749   :  { %5980 = vmatprep.subr.bf16.mxu1 %v9353_v34  ;;  %v9420_v34 = vld [vmem:[#allocation13 + $0x3f8] ss:$12 sps:$4 sm:$0xff]  }
 0x74c   :  { %5981 = vmatpush1.bf16.msra.mxu1 %v9351_v6  ;;  %v9421_v6 = vld [vmem:[#allocation13 + $0x338] ss:$12 sps:$4 sm:$0xff]  }
 0x74d   :  { %5982 = vmatprep.subr.bf16.mxu1 %v9356_v29  ;;  %v9422_v29 = vld [vmem:[#allocation13 + $0x410] ss:$12 sps:$4 sm:$0xff]  }
 0x750   :  { %5983 = vmatpush1.bf16.msra.mxu1 %v9354_v7  ;;  %v9423_v7 = vld [vmem:[#allocation13 + $0x350] ss:$12 sps:$4 sm:$0xff]  }
 0x751   :  { %5984 = vmatprep.subr.bf16.mxu1 %v9359_v44  ;;  %v9424_v44 = vld [vmem:[#allocation13 + $0x428] ss:$12 sps:$4 sm:$0xff]  }
 0x754   :  { %5985 = vmatpush1.bf16.msra.mxu1 %v9357_v9  ;;  %v9425_v9 = vld [vmem:[#allocation13 + $0x368] ss:$12 sps:$4 sm:$0xff]  }
 0x755   :  { %5986 = vmatprep.subr.bf16.mxu1 %v9362_v11  ;;  %v9426_v11 = vld [vmem:[#allocation13 + $0x440] ss:$12 sps:$4 sm:$0xff]  }
 0x758   :  { %5987 = vmatpush1.bf16.msra.mxu1 %v9360_v13  ;;  %v9428_v13 = vld [vmem:[#allocation13 + $0x458] ss:$12 sps:$4 sm:$0xff]  }
 0x759   :  { %5988 = vmatprep.subr.bf16.mxu1 %v9365_v19  ;;  %v9430_v19 = vld [vmem:[#allocation13 + $0x470] ss:$12 sps:$4 sm:$0xff]  }
 0x75c   :  { %5989 = vmatpush1.bf16.msra.mxu1 %v9363_v53  ;;  %v9431_v53 = vld [vmem:[#allocation13 + $0x3b0] ss:$12 sps:$4 sm:$0xff]  }
 0x75d   :  { %5990 = vmatprep.subr.bf16.mxu1 %v9368_v10 }
 0x760   :  { %5991 = vmatpush1.bf16.msra.mxu1 %v9366_v23 }
 0x761   :  { %5992 = vmatprep.subr.bf16.mxu1 %v9371_v25 }
 0x764   :  { %5993 = vmatpush1.bf16.msra.mxu1 %v9369_v26 }
 0x765   :  { %5994 = vmatprep.subr.bf16.mxu1 %v9374_v47 }
 0x768   :  { %5995 = vmatpush1.bf16.msra.mxu1 %v9372_v36 }
 0x769   :  { %5996 = vmatprep.subr.bf16.mxu1 %v9377_v28 }
 0x76c   :  { %5997 = vmatpush1.bf16.msra.mxu1 %v9375_v43 }
 0x76d   :  { %5998 = vmatprep.subr.bf16.mxu1 %v9380_v39 }
 0x770   :  { %5999 = vmatpush1.bf16.msra.mxu1 %v9378_v40 }
 0x771   :  { %6000 = vmatprep.subr.bf16.mxu1 %v9383_v38  ;;  %v5099_v38 = vld [vmem:[#allocation14] sm:$0x7] }
 0x774   :  { %6001 = vmatpush1.bf16.msra.mxu1 %v9381_v52  ;;  %v5112_v52 = vrot.slane %v5099_v38, %v10654_v24 }
 0x775   :  { %8189 = vmatprep.subr.bf16.mxu1 %v9384_v41 }
 0x777   :  { %6003 = vmatmul.mubr.bf16.vlgmr.msra.gmra.mrb[4].mxu1 %v10803_v37 }
 0x778   :  { %8190 = vmatpush3.bf16.msra.mxu1 %v9385_v46  ;;  %6045 = vmatprep.mubr.bf16.mxu1 %v10790_v12  ;;  %v9397_v12 = vld [vmem:[#allocation13 + $0x98] ss:$12 sps:$4 sm:$0xff]  }
 0x779   :  { %8191 = vmatprep.subr.bf16.mxu1 %v9386_v49 }
 0x77c   :  { %8192 = vmatpush3.bf16.msra.mxu1 %v9387_v51 }
 0x77d   :  { %8193 = vmatprep.subr.bf16.mxu1 %v9388_v17 }
 0x780   :  { %8194 = vmatpush3.bf16.msra.mxu1 %v9389_v16 }
 0x781   :  { %8195 = vmatprep.subr.bf16.mxu1 %v9390_v56 }
 0x784   :  { %8196 = vmatpush3.bf16.msra.mxu1 %v9391_v20 }
 0x785   :  { %8197 = vmatprep.subr.bf16.mxu1 %v9392_v18 }
 0x788   :  { %8198 = vmatpush3.bf16.msra.mxu1 %v9393_v58  ;;  %v5104_v58 = vrot.slane %v5099_v38, %v10648_v8 }
 0x789   :  { %8199 = vmatprep.subr.bf16.mxu1 %v9394_v59  ;;  %v5108_v59 = vrot.slane %v5099_v38, %v10650_v21 }
 0x78c   :  { %8200 = vmatpush3.bf16.msra.mxu1 %v9395_v55 }
 0x78d   :  { %8201 = vmatprep.subr.bf16.mxu1 %v9396_v15 }
 0x790   :  { %8202 = vmatpush3.bf16.msra.mxu1 %v9397_v12 }
 0x791   :  { %8203 = vmatprep.subr.bf16.mxu1 %v9398_v61 }
 0x794   :  { %8204 = vmatpush3.bf16.msra.mxu1 %v9399_v62 }
 0x795   :  { %8211 = vmatprep.subr.bf16.mxu1 %v9400_v60 }
 0x797   :  { %6046 = vmatmul.mubr.bf16.vlgmr.msra.gmra.mrb[8].mxu1 %v10792_v14  ;;  %v9411_v14 = vld [vmem:[#allocation13 + $0x200] ss:$12 sps:$4 sm:$0xff]  }
 0x798   :  { %8212 = vmatpush3.bf16.msra.mxu1 %v9401_v48  ;;  %6086 = vmatprep.mubr.bf16.mxu1 %v10797_v50  ;;  %v9413_v50 = vld [vmem:[#allocation13 + $0x218] ss:$12 sps:$4 sm:$0xff]  }
 0x799   :  { %8213 = vmatprep.subr.bf16.mxu1 %v9402_v63 }
 0x79c   :  { %8214 = vmatpush3.bf16.msra.mxu1 %v9403_v31 }
 0x79d   :  { %8215 = vmatprep.subr.bf16.mxu1 %v9404_v54 }
 0x7a0   :  { %8216 = vmatpush3.bf16.msra.mxu1 %v9405_v0 }
 0x7a1   :  { %8217 = vmatprep.subr.bf16.mxu1 %v9406_v35 }
 0x7a4   :  { %8218 = vmatpush3.bf16.msra.mxu1 %v9407_v27 }
 0x7a5   :  { %8219 = vmatprep.subr.bf16.mxu1 %v9408_v57 }
 0x7a8   :  { %8220 = vmatpush3.bf16.msra.mxu1 %v9409_v33 }
 0x7a9   :  { %8221 = vmatprep.subr.bf16.mxu1 %v9410_v1 }
 0x7ac   :  { %8222 = vmatpush3.bf16.msra.mxu1 %v9411_v14  ;;  %v9432_v14 = vld [vmem:[%s11083_s10] ss:$8 sps:$4 sm:$0xff]  }
 0x7ad   :  { %8223 = vmatprep.subr.bf16.mxu1 %v9412_v2  ;;  %v9434_v2 = vld [vmem:[%s11083_s10 + $0x4] ss:$8 sps:$4 sm:$0xff]  }
 0x7b0   :  { %8224 = vmatpush3.bf16.msra.mxu1 %v9413_v50  ;;  %v9437_v50 = vld [vmem:[%s11083_s10 + $0x14] ss:$8 sps:$4 sm:$0xff]  }
 0x7b1   :  { %8225 = vmatprep.subr.bf16.mxu1 %v9414_v32  ;;  %v9435_v32 = vld [vmem:[%s11083_s10 + $0x10] ss:$8 sps:$4 sm:$0xff]  }
 0x7b4   :  { %8226 = vmatpush3.bf16.msra.mxu1 %v9415_v3  ;;  %v9440_v3 = vld [vmem:[%s11083_s10 + $0x24] ss:$8 sps:$4 sm:$0xff]  }
 0x7b5   :  { %8233 = vmatprep.subr.bf16.mxu1 %v9416_v45  ;;  %v9438_v45 = vld [vmem:[%s11083_s10 + $0x20] ss:$8 sps:$4 sm:$0xff]  }
 0x7b7   :  { %6087 = vmatmul.mubr.bf16.vlgmr.msra.gmra.mrb[12].mxu1 %v10794_v22  ;;  %v9427_v22 = vld [vmem:[#allocation13 + $0x380] ss:$12 sps:$4 sm:$0xff]  }
 0x7b8   :  { %8234 = vmatpush3.bf16.msra.mxu1 %v9417_v4  ;;  %6127 = vmatprep.mubr.bf16.mxu1 %v10801_v30  ;;  %v9429_v30 = vld [vmem:[#allocation13 + $0x398] ss:$12 sps:$4 sm:$0xff]  }
 0x7b9   :  { %8235 = vmatprep.subr.bf16.mxu1 %v9418_v42  ;;  %v9443_v4 = vld [vmem:[%s11083_s10 + $0x34] ss:$8 sps:$4 sm:$0xff]   ;;  %v9441_v42 = vld [vmem:[%s11083_s10 + $0x30] ss:$8 sps:$4 sm:$0xff]  }
 0x7bc   :  { %8236 = vmatpush3.bf16.msra.mxu1 %v9419_v5  ;;  %v9446_v5 = vld [vmem:[%s11083_s10 + $0x44] ss:$8 sps:$4 sm:$0xff]  }
 0x7bd   :  { %8237 = vmatprep.subr.bf16.mxu1 %v9420_v34  ;;  %v9444_v34 = vld [vmem:[%s11083_s10 + $0x40] ss:$8 sps:$4 sm:$0xff]  }
 0x7c0   :  { %8238 = vmatpush3.bf16.msra.mxu1 %v9421_v6  ;;  %v9449_v6 = vld [vmem:[%s11083_s10 + $0x54] ss:$8 sps:$4 sm:$0xff]  }
 0x7c1   :  { %8239 = vmatprep.subr.bf16.mxu1 %v9422_v29  ;;  %v9447_v29 = vld [vmem:[%s11083_s10 + $0x50] ss:$8 sps:$4 sm:$0xff]  }
 0x7c4   :  { %8240 = vmatpush3.bf16.msra.mxu1 %v9423_v7  ;;  %v9452_v7 = vld [vmem:[%s11083_s10 + $0x64] ss:$8 sps:$4 sm:$0xff]  }
 0x7c5   :  { %8241 = vmatprep.subr.bf16.mxu1 %v9424_v44  ;;  %v9450_v44 = vld [vmem:[%s11083_s10 + $0x60] ss:$8 sps:$4 sm:$0xff]  }
 0x7c8   :  { %8242 = vmatpush3.bf16.msra.mxu1 %v9425_v9  ;;  %v9455_v9 = vld [vmem:[%s11083_s10 + $0x74] ss:$8 sps:$4 sm:$0xff]  }
 0x7c9   :  { %8243 = vmatprep.subr.bf16.mxu1 %v9426_v11  ;;  %v9453_v11 = vld [vmem:[%s11083_s10 + $0x70] ss:$8 sps:$4 sm:$0xff]  }
 0x7cc   :  { %8244 = vmatpush3.bf16.msra.mxu1 %v9427_v22  ;;  %v9458_v22 = vld [vmem:[%s11083_s10 + $0x84] ss:$8 sps:$4 sm:$0xff]  }
 0x7cd   :  { %8245 = vmatprep.subr.bf16.mxu1 %v9428_v13  ;;  %v9456_v13 = vld [vmem:[%s11083_s10 + $0x80] ss:$8 sps:$4 sm:$0xff]  }
 0x7d0   :  { %8246 = vmatpush3.bf16.msra.mxu1 %v9429_v30  ;;  %v9461_v30 = vld [vmem:[%s11083_s10 + $0x94] ss:$8 sps:$4 sm:$0xff]  }
 0x7d1   :  { %8247 = vmatprep.subr.bf16.mxu1 %v9430_v19  ;;  %v9459_v19 = vld [vmem:[%s11083_s10 + $0x90] ss:$8 sps:$4 sm:$0xff]  }
 0x7d4   :  { %8248 = vmatpush3.bf16.msra.mxu1 %v9431_v53 }
 0x7d5   :  { %6534 = vmatprep.subr.bf16.mxu1 %v9434_v2 }
 0x7d7   :  { %6128 = vmatmul.mubr.bf16.vlgmr.msra.gmra.mrb[16].mxu1 %v10803_v37 }
 0x7d8   :  { %6535 = vmatpush1.bf16.msra.mxu1 %v9432_v14 }
 0x7d9   :  { %6536 = vmatprep.subr.bf16.mxu1 %v9437_v50 }
 0x7dc   :  { %6537 = vmatpush1.bf16.msra.mxu1 %v9435_v32 }
 0x7dd   :  { %6538 = vmatprep.subr.bf16.mxu1 %v9440_v3 }
 0x7e0   :  { %6539 = vmatpush1.bf16.msra.mxu1 %v9438_v45 }
 0x7e1   :  { %6540 = vmatprep.subr.bf16.mxu1 %v9443_v4 }
 0x7e4   :  { %6541 = vmatpush1.bf16.msra.mxu1 %v9441_v42 }
 0x7e5   :  { %6542 = vmatprep.subr.bf16.mxu1 %v9446_v5 }
 0x7e8   :  { %6543 = vmatpush1.bf16.msra.mxu1 %v9444_v34 }
 0x7e9   :  { %6544 = vmatprep.subr.bf16.mxu1 %v9449_v6 }
 0x7ec   :  { %6545 = vmatpush1.bf16.msra.mxu1 %v9447_v29 }
 0x7ed   :  { %6546 = vmatprep.subr.bf16.mxu1 %v9452_v7 }
 0x7f0   :  { %6547 = vmatpush1.bf16.msra.mxu1 %v9450_v44 }
 0x7f1   :  { %6548 = vmatprep.subr.bf16.mxu1 %v9455_v9 }
 0x7f4   :  { %6549 = vmatpush1.bf16.msra.mxu1 %v9453_v11 }
 0x7f5   :  { %6550 = vmatprep.subr.bf16.mxu1 %v9458_v22 }
 0x7f8   :  { %6551 = vmatpush1.bf16.msra.mxu1 %v9456_v13 }
 0x7f9   :  { %6552 = vmatprep.subr.bf16.mxu1 %v9461_v30 }
 0x7fc   :  { %6553 = vmatpush1.bf16.msra.mxu1 %v9459_v19 }
 0x84a   :  { %v6004_v10 = vpop.f32.mrb[4].mxu1 }
 0x84b   :  { %v6006_v23 = vpop.f32.mrb[5].mxu1  ;;  %v8267_v55 = vadd.f32 %v6004_v10, %v5104_v58 }
 0x84c   :  { %v6008_v25 = vpop.f32.mrb[6].mxu1  ;;  %v8268_v15 = vadd.f32 %v6006_v23, %v5108_v59 }
 0x84d   :  { %v6010_v26 = vpop.f32.mrb[7].mxu1  ;;  %v8269_v62 = vadd.f32 %v6008_v25, %v5104_v58  ;;  %v9465_v58 = vld [vmem:[%s11083_s10 + $0xb0] ss:$8 sps:$4 sm:$0xff]  }
 0x84e   :  { %v8270_v60 = vadd.f32 %v6010_v26, %v5108_v59  ;;  %v6138_v54 = vadd.f32 %v8268_v15, %v8267_v55  ;;  %v9470_v59 = vld [vmem:[%s11083_s10 + $0xc4] ss:$8 sps:$4 sm:$0xff]  }
 0x850   :  { %v6142_v27 = vadd.f32 %v8270_v60, %v8269_v62 }
 0x86a   :  { %v8205_v47 = vpop.f32.mrb[8].mxu1 }
 0x86b   :  { %v8206_v36 = vpop.f32.mrb[9].mxu1 }
 0x86c   :  { %v8207_v28 = vadd.f32 %v8206_v36, %v8205_v47  ;;  %v8208_v43 = vpop.f32.mrb[10].mxu1 }
 0x86d   :  { %v8209_v39 = vpop.f32.mrb[11].mxu1 }
 0x86e   :  { %v8210_v40 = vadd.f32 %v8209_v39, %v8208_v43  ;;  %v6048_v49 = vadd.f32 %v8207_v28, %v5112_v52 }
 0x870   :  { %v6051_v37 = vadd.f32 %v8210_v40, %v5112_v52 }
 0x88a   :  { %v8227_v41 = vpop.f32.mrb[12].mxu1 }
 0x88b   :  { %v8228_v46 = vpop.f32.mrb[13].mxu1 }
 0x88c   :  { %v8229_v51 = vadd.f32 %v8228_v46, %v8227_v41  ;;  %v8230_v17 = vpop.f32.mrb[14].mxu1 }
 0x88d   :  { %v8231_v16 = vpop.f32.mrb[15].mxu1 }
 0x88e   :  { %v6089_v56 = vadd.f32 %v8229_v51, %v6048_v49  ;;  %v8232_v20 = vadd.f32 %v8231_v16, %v8230_v17 }
 0x890   :  { %v6092_v18 = vadd.f32 %v8232_v20, %v6051_v37  ;;  %v9462_v20 = vld [vmem:[%s11083_s10 + $0xa0] ss:$8 sps:$4 sm:$0xff]  }
 0x8aa   :  { %v8249_v12 = vpop.f32.mrb[16].mxu1 }
 0x8ab   :  { %v8250_v61 = vpop.f32.mrb[17].mxu1 }
 0x8ac   :  { %v8251_v48 = vadd.f32 %v8250_v61, %v8249_v12  ;;  %v8252_v63 = vpop.f32.mrb[18].mxu1  ;;  %v9471_v12 = vld [vmem:[%s11083_s10 + $0xd0] ss:$8 sps:$4 sm:$0xff]   ;;  %v9476_v61 = vld [vmem:[%s11083_s10 + $0xe4] ss:$8 sps:$4 sm:$0xff]  }
 0x8ad   :  { %v8253_v31 = vpop.f32.mrb[19].mxu1 }
 0x8ae   :  { %v6130_v0 = vadd.f32 %v8251_v48, %v6089_v56  ;;  %v8254_v35 = vadd.f32 %v8253_v31, %v8252_v63  ;;  %v9464_v56 = vld [vmem:[%s11083_s10 + $0xa4] ss:$8 sps:$4 sm:$0xff]   ;;  %v9477_v48 = vld [vmem:[%s11083_s10 + $0xf0] ss:$8 sps:$4 sm:$0xff]  }
 0x8af   :  { %6554 = vmatprep.subr.bf16.mxu1 %v9464_v56  ;;  %v9482_v63 = vld [vmem:[%s11083_s10 + $0x104] ss:$8 sps:$4 sm:$0xff]   ;;  %v9495_v56 = vld [vmem:[%s11083_s10 + $0x150] ss:$8 sps:$4 sm:$0xff]  }
 0x8b0   :  { %v6133_v57 = vadd.f32 %v8254_v35, %v6092_v18  ;;  %v6139_v33 = vadd.f32 %v6138_v54, %v6130_v0  ;;  %v9467_v18 = vld [vmem:[%s11083_s10 + $0xb4] ss:$8 sps:$4 sm:$0xff]   ;;  %6555 = vmatpush1.bf16.msra.mxu1 %v9462_v20  ;;  %v9500_v20 = vld [vmem:[%s11083_s10 + $0x164] ss:$8 sps:$4 sm:$0xff]  }
 0x8b1   :  { %6556 = vmatprep.subr.bf16.mxu1 %v9467_v18 }
 0x8b2   :  { %6140 = vadd.xlane.f32.xlu0 %v6139_v33  ;;  %v6143_v1 = vadd.f32 %v6142_v27, %v6133_v57  ;;  %v6136_v33 = vld [vmem:[#allocation16] sm:$0x7] }
 0x8b3   :  { %v6189_v14 = vrot.slane %v6136_v33, %v10650_v21  ;;  %v6185_v2 = vrot.slane %v6136_v33, %v10648_v8 }
 0x8b4   :  { %6144 = vadd.xlane.f32.xlu1 %v6143_v1  ;;  %6557 = vmatpush1.bf16.msra.mxu1 %v9465_v58  ;;  %v6137_v1 = vld [vmem:[#allocation17] sm:$0x7] }
 0x8b5   :  { %6558 = vmatprep.subr.bf16.mxu1 %v9470_v59  ;;  %v6211_v45 = vrot.slane %v6137_v1, %v10650_v21  ;;  %v6207_v42 = vrot.slane %v6137_v1, %v10648_v8  ;;  %v6215_v59 = vrot.slane %v6137_v1, %v10654_v24 }
 0x93f   :  { %v6141_v53 = vpop.xlane.xlu0 %6140 }
 0x940   :  { %v6147_v10 = vmul.f32 0.0026041667, %v6141_v53 }
 0x941   :  { %v6145_v23 = vpop.xlane.xlu1 %6144 }
 0x942   :  { %v6149_v25 = vsub.f32 %v8267_v55, %v6147_v10  ;;  %v6150_v26 = vsub.f32 %v8268_v15, %v6147_v10  ;;  %v6148_v47 = vmul.f32 0.0026041667, %v6145_v23  ;;  %v10877_v36 = vsub.f32 %v6130_v0, %v6147_v10  ;;  %v9468_v55 = vld [vmem:[%s11083_s10 + $0xc0] ss:$8 sps:$4 sm:$0xff]   ;;  %v9473_v15 = vld [vmem:[%s11083_s10 + $0xd4] ss:$8 sps:$4 sm:$0xff]  }
 0x943   :  { %6559 = vmatpush1.bf16.msra.mxu1 %v9468_v55 }
 0x944   :  { %v6152_v28 = vsub.f32 %v8269_v62, %v6148_v47  ;;  %v6153_v43 = vsub.f32 %v8270_v60, %v6148_v47  ;;  %v10879_v39 = vsub.f32 %v6133_v57, %v6148_v47  ;;  %v6155_v40 = vmul.f32 %v6149_v25, %v6149_v25  ;;  %6560 = vmatprep.subr.bf16.mxu1 %v9473_v15  ;;  %v9474_v62 = vld [vmem:[%s11083_s10 + $0xe0] ss:$8 sps:$4 sm:$0xff]   ;;  %v9479_v60 = vld [vmem:[%s11083_s10 + $0xf4] ss:$8 sps:$4 sm:$0xff]  }
 0x945   :  { %v6156_v38 = vmul.f32 %v6150_v26, %v6150_v26  ;;  %v6157_v46 = vmul.f32 %v10877_v36, %v10877_v36  ;;  %v9485_v47 = vld [vmem:[%s11083_s10 + $0x114] ss:$8 sps:$4 sm:$0xff]  }
 0x946   :  { %v6158_v52 = vmul.f32 %v6152_v28, %v6152_v28  ;;  %v6159_v41 = vmul.f32 %v6153_v43, %v6153_v43  ;;  %v6160_v51 = vmul.f32 %v10879_v39, %v10879_v39 }
 0x947   :  { %v6161_v49 = vadd.f32 %v6156_v38, %v6155_v40  ;;  %6561 = vmatpush1.bf16.msra.mxu1 %v9471_v12  ;;  %v9488_v40 = vld [vmem:[%s11083_s10 + $0x124] ss:$8 sps:$4 sm:$0xff]   ;;  %v9486_v38 = vld [vmem:[%s11083_s10 + $0x120] ss:$8 sps:$4 sm:$0xff]   ;;  %v9501_v12 = vld [vmem:[%s11083_s10 + $0x170] ss:$8 sps:$4 sm:$0xff]  }
 0x948   :  { %v6165_v17 = vadd.f32 %v6159_v41, %v6158_v52  ;;  %6562 = vmatprep.subr.bf16.mxu1 %v9476_v61  ;;  %v9491_v52 = vld [vmem:[%s11083_s10 + $0x134] ss:$8 sps:$4 sm:$0xff]   ;;  %v9489_v41 = vld [vmem:[%s11083_s10 + $0x130] ss:$8 sps:$4 sm:$0xff]  }
 0x949   :  { %v6162_v16 = vadd.f32 %v6161_v49, %v6157_v46  ;;  %v9494_v46 = vld [vmem:[%s11083_s10 + $0x144] ss:$8 sps:$4 sm:$0xff]   ;;  %v9492_v49 = vld [vmem:[%s11083_s10 + $0x140] ss:$8 sps:$4 sm:$0xff]  }
 0x94a   :  { %v6166_v37 = vadd.f32 %v6165_v17, %v6160_v51  ;;  %v9497_v51 = vld [vmem:[%s11083_s10 + $0x154] ss:$8 sps:$4 sm:$0xff]  }
 0x94b   :  { %6163 = vadd.xlane.f32.xlu0 %v6162_v16  ;;  %6563 = vmatpush1.bf16.msra.mxu1 %v9474_v62 }
 0x94c   :  { %6167 = vadd.xlane.f32.xlu1 %v6166_v37  ;;  %6564 = vmatprep.subr.bf16.mxu1 %v9479_v60  ;;  %v6193_v37 = vrot.slane %v6136_v33, %v10654_v24  ;;  %v6282_v60 = vld [vmem:[#allocation19] sm:$0x3] }
 0x94f   :  { %6565 = vmatpush1.bf16.msra.mxu1 %v9477_v48  ;;  %v6291_v48 = vrot.slane %v6282_v60, %v10650_v21 }
 0x950   :  { %6577 = vmatprep.subr.bf16.mxu1 %v9482_v63  ;;  %v6287_v63 = vrot.slane %v6282_v60, %v10648_v8  ;;  %v9551_v60 = vld [vmem:[#allocation25 + $0x74] ss:$8 sps:$4 sm:$0xff]  }
 0x9d8   :  { %v6164_v31 = vpop.xlane.xlu0 %6163 }
 0x9d9   :  { %v6169_v54 = vmul.f32 0.0026041667, %v6164_v31  ;;  %v6168_v0 = vpop.xlane.xlu1 %6167 }
 0x9da   :  { %v6170_v35 = vmul.f32 0.0026041667, %v6168_v0 }
 0x9db   :  { %v6171_v27 = vadd.f32 1e-05, %v6169_v54 }
 0x9dc   :  { %v6172_v57 = vadd.f32 1e-05, %v6170_v35 }
 0x9dd   :  { %9592 = vrsqrt.f32 %v6171_v27 }
 0x9de   :  { %9594 = vrsqrt.f32 %v6172_v57 }
 0x9e7   :  { %v9593_v50 = vpop.eup %9592 }
 0x9e8   :  { %v9595_v32 = vpop.eup %9594  ;;  %v6176_v3 = vmul.f32 %v9593_v50, %v6150_v26  ;;  %v6175_v4 = vmul.f32 %v9593_v50, %v6149_v25  ;;  %v9480_v25 = vld [vmem:[%s11083_s10 + $0x100] ss:$8 sps:$4 sm:$0xff]   ;;  %v6177_v16 = vmul.f32 %v9593_v50, %v10877_v36 }
 0x9e9   :  { %v6179_v5 = vmul.f32 %v9595_v32, %v6153_v43  ;;  %v6178_v34 = vmul.f32 %v9595_v32, %v6152_v28  ;;  %v9483_v28 = vld [vmem:[%s11083_s10 + $0x110] ss:$8 sps:$4 sm:$0xff]   ;;  %v10142_v43 = vmov 0   ;;  %v6180_v17 = vmul.f32 %v9595_v32, %v10879_v39  ;;  %v9498_v36 = vld [vmem:[%s11083_s10 + $0x160] ss:$8 sps:$4 sm:$0xff]  }
 0x9ea   :  { %v6198_v6 = vmul.f32 %v6189_v14, %v6176_v3  ;;  %v6197_v29 = vmul.f32 %v6185_v2, %v6175_v4  ;;  %v6199_v58 = vmul.f32 %v6193_v37, %v6177_v16  ;;  %v9503_v39 = vld [vmem:[%s11083_s10 + $0x174] ss:$8 sps:$4 sm:$0xff]   ;;  %v9504_v3 = vld [vmem:[#allocation23] ss:$8 sps:$4 sm:$0xff]  }
 0x9eb   :  { %v6201_v7 = vmul.f32 %v6189_v14, %v6179_v5  ;;  %v6200_v44 = vmul.f32 %v6185_v2, %v6178_v34  ;;  %v6202_v18 = vmul.f32 %v6193_v37, %v6180_v17  ;;  %v9507_v4 = vld [vmem:[#allocation25] ss:$8 sps:$4 sm:$0xff]   ;;  %v9512_v5 = vld [vmem:[#allocation23 + $0x14] ss:$8 sps:$4 sm:$0xff]  }
 0x9ec   :  { %v6220_v9 = vadd.f32 %v6211_v45, %v6198_v6  ;;  %v6219_v11 = vadd.f32 %v6207_v42, %v6197_v29  ;;  %v6221_v15 = vadd.f32 %v6215_v59, %v6199_v58  ;;  %v9515_v34 = vld [vmem:[#allocation25 + $0x14] ss:$8 sps:$4 sm:$0xff]   ;;  %v9510_v6 = vld [vmem:[#allocation23 + $0x10] ss:$8 sps:$4 sm:$0xff]  }
 0x9ed   :  { %v6223_v22 = vadd.f32 %v6211_v45, %v6201_v7  ;;  %v6222_v13 = vadd.f32 %v6207_v42, %v6200_v44  ;;  %v6224_v55 = vadd.f32 %v6215_v59, %v6202_v18  ;;  %v9506_v45 = vld [vmem:[#allocation23 + $0x4] ss:$8 sps:$4 sm:$0xff]   ;;  %v9513_v29 = vld [vmem:[#allocation25 + $0x10] ss:$8 sps:$4 sm:$0xff]  }
 0x9ee   :  { %v6226_v30 = vmax.f32 %v6220_v9, 0.0  ;;  %v6225_v53 = vmax.f32 %v6219_v11, 0.0  ;;  %v6227_v24 = vmax.f32 %v6221_v15, 0.0  ;;  %v9509_v42 = vld [vmem:[#allocation25 + $0x4] ss:$8 sps:$4 sm:$0xff]  }
 0x9ef   :  { %v6229_v19 = vmax.f32 %v6223_v22, 0.0  ;;  %v6228_v10 = vmax.f32 %v6222_v13, 0.0  ;;  %v6230_v61 = vmax.f32 %v6224_v55, 0.0  ;;  %6869 = vmatprep.subr.bf16.mxu0 %v9509_v42  ;;  %v9518_v7 = vld [vmem:[#allocation23 + $0x24] ss:$8 sps:$4 sm:$0xff]  }
 0x9f0   :  { %6870 = vmatpush1.bf16.msra.mxu0 %v9507_v4  ;;  %v9521_v44 = vld [vmem:[#allocation25 + $0x24] ss:$8 sps:$4 sm:$0xff]   ;;  %v9516_v9 = vld [vmem:[#allocation23 + $0x20] ss:$8 sps:$4 sm:$0xff]   ;;  %v9524_v22 = vld [vmem:[#allocation23 + $0x34] ss:$8 sps:$4 sm:$0xff]  }
 0x9f1   :  { %v6232_v23 = vpack.c.bf16 %v6229_v19, %v6226_v30  ;;  %v6231_v26 = vpack.c.bf16 %v6228_v10, %v6225_v53  ;;  %v6233_v62 = vpack.c.bf16 %v6230_v61, %v6227_v24  ;;  %6871 = vmatprep.subr.bf16.mxu0 %v9515_v34  ;;  %v9519_v11 = vld [vmem:[#allocation25 + $0x20] ss:$8 sps:$4 sm:$0xff]   ;;  %v9527_v13 = vld [vmem:[#allocation25 + $0x34] ss:$8 sps:$4 sm:$0xff]   ;;  %v9522_v30 = vld [vmem:[#allocation23 + $0x30] ss:$8 sps:$4 sm:$0xff]  }
 0x9f2   :  { %v9525_v19 = vld [vmem:[#allocation25 + $0x30] ss:$8 sps:$4 sm:$0xff]   ;;  %v9530_v53 = vld [vmem:[#allocation23 + $0x44] ss:$8 sps:$4 sm:$0xff]   ;;  %v9540_v15 = vld [vmem:[#allocation23 + $0x60] ss:$8 sps:$4 sm:$0xff]  }
 0x9f3   :  { %6566 = vmatprep.mubr.bf16.mxu1 %v6232_v23  ;;  %v9533_v10 = vld [vmem:[#allocation25 + $0x44] ss:$8 sps:$4 sm:$0xff]   ;;  %v9528_v23 = vld [vmem:[#allocation23 + $0x40] ss:$8 sps:$4 sm:$0xff]   ;;  %v9546_v24 = vld [vmem:[#allocation23 + $0x70] ss:$8 sps:$4 sm:$0xff]  }
 0x9f4   :  { %6567 = vmatmul.mubr.bf16.vlgmr.msra.gmra.mrb[20].mxu1 %v6231_v26  ;;  %6872 = vmatpush1.bf16.msra.mxu0 %v9513_v29  ;;  %v9536_v26 = vld [vmem:[#allocation23 + $0x54] ss:$8 sps:$4 sm:$0xff]   ;;  %v9542_v55 = vld [vmem:[#allocation23 + $0x64] ss:$8 sps:$4 sm:$0xff]   ;;  %v9543_v61 = vld [vmem:[#allocation25 + $0x60] ss:$8 sps:$4 sm:$0xff]  }
 0x9f5   :  { %6578 = vmatpush1.bf16.msra.mxu1 %v9480_v25  ;;  %6609 = vmatprep.mubr.bf16.mxu1 %v10142_v43  ;;  %v9531_v25 = vld [vmem:[#allocation25 + $0x40] ss:$8 sps:$4 sm:$0xff]   ;;  %v9573_v4 = vld [vmem:[#allocation25 + $0xb0] ss:$8 sps:$4 sm:$0xff]  }
 0x9f6   :  { %6579 = vmatprep.subr.bf16.mxu1 %v9485_v47  ;;  %6873 = vmatprep.subr.bf16.mxu0 %v9521_v44  ;;  %v9534_v47 = vld [vmem:[#allocation23 + $0x50] ss:$8 sps:$4 sm:$0xff]   ;;  %v6620_v44 = vld [vmem:[#allocation20] sm:$0x3] }
 0x9f8   :  { %6874 = vmatpush1.bf16.msra.mxu0 %v9519_v11  ;;  %v6668_v11 = vrot.slane %v6620_v44, %v10650_v21 }
 0x9f9   :  { %6580 = vmatpush1.bf16.msra.mxu1 %v9483_v28  ;;  %6875 = vmatprep.subr.bf16.mxu0 %v9527_v13 }
 0x9fa   :  { %6581 = vmatprep.subr.bf16.mxu1 %v9488_v40 }
 0x9fc   :  { %6876 = vmatpush1.bf16.msra.mxu0 %v9525_v19 }
 0x9fd   :  { %6582 = vmatpush1.bf16.msra.mxu1 %v9486_v38  ;;  %6877 = vmatprep.subr.bf16.mxu0 %v9533_v10 }
 0x9fe   :  { %6583 = vmatprep.subr.bf16.mxu1 %v9491_v52 }
 0xa00   :  { %6878 = vmatpush1.bf16.msra.mxu0 %v9531_v25 }
 0xa01   :  { %6584 = vmatpush1.bf16.msra.mxu1 %v9489_v41 }
 0xa02   :  { %6585 = vmatprep.subr.bf16.mxu1 %v9494_v46 }
 0xa05   :  { %6586 = vmatpush1.bf16.msra.mxu1 %v9492_v49 }
 0xa06   :  { %6587 = vmatprep.subr.bf16.mxu1 %v9497_v51 }
 0xa09   :  { %6588 = vmatpush1.bf16.msra.mxu1 %v9495_v56 }
 0xa0a   :  { %6589 = vmatprep.subr.bf16.mxu1 %v9500_v20 }
 0xa0d   :  { %6590 = vmatpush1.bf16.msra.mxu1 %v9498_v36  ;;  %v9539_v36 = vld [vmem:[#allocation25 + $0x54] ss:$8 sps:$4 sm:$0xff]  }
 0xa0e   :  { %6591 = vmatprep.subr.bf16.mxu1 %v9503_v39  ;;  %v9537_v39 = vld [vmem:[#allocation25 + $0x50] ss:$8 sps:$4 sm:$0xff]   ;;  %6879 = vmatprep.subr.bf16.mxu0 %v9539_v36 }
 0xa0f   :  { %6880 = vmatpush1.bf16.msra.mxu0 %v9537_v39 }
 0xa11   :  { %6592 = vmatpush1.bf16.msra.mxu1 %v9501_v12  ;;  %v9545_v12 = vld [vmem:[#allocation25 + $0x64] ss:$8 sps:$4 sm:$0xff]  }
 0xa12   :  { %7033 = vmatprep.subr.bf16.mxu1 %v9506_v45  ;;  %6881 = vmatprep.subr.bf16.mxu0 %v9545_v12  ;;  %v9570_v45 = vld [vmem:[#allocation23 + $0xb0] ss:$8 sps:$4 sm:$0xff]  }
 0xa13   :  { %6882 = vmatpush1.bf16.msra.mxu0 %v9543_v61 }
 0xa14   :  { %6610 = vmatmul.mubr.bf16.vlgmr.msra.gmra.mrb[20].mxu1 %v6233_v62  ;;  %v9548_v62 = vld [vmem:[#allocation23 + $0x74] ss:$8 sps:$4 sm:$0xff]   ;;  %6883 = vmatprep.subr.bf16.mxu0 %v9551_v60 }
 0xa15   :  { %7034 = vmatpush1.bf16.msra.mxu1 %v9504_v3  ;;  %v9575_v3 = vld [vmem:[#allocation25 + $0xb4] ss:$8 sps:$4 sm:$0xff]  }
 0xa16   :  { %7035 = vmatprep.subr.bf16.mxu1 %v9512_v5 }
 0xa19   :  { %7036 = vmatpush1.bf16.msra.mxu1 %v9510_v6 }
 0xa1a   :  { %7037 = vmatprep.subr.bf16.mxu1 %v9518_v7 }
 0xa1d   :  { %7038 = vmatpush1.bf16.msra.mxu1 %v9516_v9  ;;  %v6621_v9 = vld [vmem:[#allocation22] sm:$0x3] }
 0xa1e   :  { %7039 = vmatprep.subr.bf16.mxu1 %v9524_v22  ;;  %v6664_v22 = vrot.slane %v6620_v44, %v10648_v8  ;;  %v6683_v19 = vrot.slane %v6621_v9, %v10650_v21  ;;  %v6679_v10 = vrot.slane %v6621_v9, %v10648_v8  ;;  %v9584_v44 = vld [vmem:[%s11092_s19 + $0x40] sm:$0xff]   ;;  %v9585_v9 = vld [vmem:[%s11092_s19 + $0x48] sm:$0xff]  }
 0xa21   :  { %7040 = vmatpush1.bf16.msra.mxu1 %v9522_v30 }
 0xa22   :  { %7041 = vmatprep.subr.bf16.mxu1 %v9530_v53 }
 0xa25   :  { %7042 = vmatpush1.bf16.msra.mxu1 %v9528_v23 }
 0xa26   :  { %7043 = vmatprep.subr.bf16.mxu1 %v9536_v26 }
 0xa29   :  { %7044 = vmatpush1.bf16.msra.mxu1 %v9534_v47 }
 0xa2a   :  { %7045 = vmatprep.subr.bf16.mxu1 %v9542_v55 }
 0xa2d   :  { %7046 = vmatpush1.bf16.msra.mxu1 %v9540_v15 }
 0xa2e   :  { %7047 = vmatprep.subr.bf16.mxu1 %v9548_v62 }
 0xa31   :  { %7048 = vmatpush1.bf16.msra.mxu1 %v9546_v24 }
 0xae7   :  { %v6611_v31 = vpop.f32.mrb[20].mxu1 }
 0xae8   :  { %v6613_v54 = vpop.f32.mrb[21].mxu1  ;;  %v8271_v27 = vadd.f32 %v6611_v31, %v6287_v63  ;;  %v9557_v31 = vld [vmem:[#allocation25 + $0x84] ss:$8 sps:$4 sm:$0xff]  }
 0xae9   :  { %v8272_v0 = vadd.f32 %v6613_v54, %v6291_v48  ;;  %v6615_v35 = vpop.f32.mrb[22].mxu1  ;;  %v9552_v54 = vld [vmem:[#allocation23 + $0x80] ss:$8 sps:$4 sm:$0xff]  }
 0xaea   :  { %v6617_v57 = vpop.f32.mrb[23].mxu1  ;;  %v8273_v14 = vadd.f32 %v6615_v35, %v6287_v63  ;;  %v9554_v63 = vld [vmem:[#allocation23 + $0x84] ss:$8 sps:$4 sm:$0xff]   ;;  %v9555_v35 = vld [vmem:[#allocation25 + $0x80] ss:$8 sps:$4 sm:$0xff]  }
 0xaeb   :  { %v8274_v33 = vadd.f32 %v6617_v57, %v6291_v48  ;;  %v6623_v1 = vsel %vm6622_vm1, %v8272_v0, 0.0  ;;  %v9549_v48 = vld [vmem:[#allocation25 + $0x70] ss:$8 sps:$4 sm:$0xff]   ;;  %7049 = vmatprep.subr.bf16.mxu1 %v9554_v63 }
 0xaec   :  { %v6624_v2 = vadd.f32 %v8271_v27, %v6623_v1  ;;  %6884 = vmatpush1.bf16.msra.mxu0 %v9549_v48  ;;  %7050 = vmatpush1.bf16.msra.mxu1 %v9552_v54  ;;  %v9558_v57 = vld [vmem:[#allocation23 + $0x90] ss:$8 sps:$4 sm:$0xff]  }
 0xaed   :  { %v6627_v50 = vsel %vm6622_vm1, %v8274_v33, 0.0  ;;  %6885 = vmatprep.subr.bf16.mxu0 %v9557_v31  ;;  %v9561_v1 = vld [vmem:[#allocation25 + $0x90] ss:$8 sps:$4 sm:$0xff]  }
 0xaee   :  { %6625 = vadd.xlane.f32.xlu0 %v6624_v2  ;;  %v6628_v32 = vadd.f32 %v8273_v14, %v6627_v50  ;;  %v9564_v2 = vld [vmem:[#allocation23 + $0xa0] ss:$8 sps:$4 sm:$0xff]   ;;  %v9572_v50 = vld [vmem:[#allocation23 + $0xb4] ss:$8 sps:$4 sm:$0xff]  }
 0xaf0   :  { %6629 = vadd.xlane.f32.xlu1 %v6628_v32  ;;  %6886 = vmatpush1.bf16.msra.mxu0 %v9555_v35  ;;  %v9567_v32 = vld [vmem:[#allocation25 + $0xa0] ss:$8 sps:$4 sm:$0xff]  }
 0xb7b   :  { %v6626_v28 = vpop.xlane.xlu0 %6625 }
 0xb7c   :  { %v6632_v40 = vmul.f32 0.0052083335, %v6626_v28 }
 0xb7d   :  { %v6630_v38 = vpop.xlane.xlu1 %6629 }
 0xb7e   :  { %v10982_v52 = vsub.f32 %v8271_v27, %v6632_v40  ;;  %v10984_v41 = vsub.f32 %v8272_v0, %v6632_v40  ;;  %v6633_v46 = vmul.f32 0.0052083335, %v6630_v38  ;;  %v9560_v0 = vld [vmem:[#allocation23 + $0x94] ss:$8 sps:$4 sm:$0xff]  }
 0xb7f   :  { %v9563_v27 = vld [vmem:[#allocation25 + $0x94] ss:$8 sps:$4 sm:$0xff]   ;;  %7051 = vmatprep.subr.bf16.mxu1 %v9560_v0 }
 0xb80   :  { %v10986_v49 = vsub.f32 %v8273_v14, %v6633_v46  ;;  %v10988_v51 = vsub.f32 %v8274_v33, %v6633_v46  ;;  %v6638_v17 = vmul.f32 %v10982_v52, %v10982_v52  ;;  %v6639_v16 = vmul.f32 %v10984_v41, %v10984_v41  ;;  %v9566_v33 = vld [vmem:[#allocation23 + $0xa4] ss:$8 sps:$4 sm:$0xff]   ;;  %6887 = vmatprep.subr.bf16.mxu0 %v9563_v27 }
 0xb81   :  { %v9569_v14 = vld [vmem:[#allocation25 + $0xa4] ss:$8 sps:$4 sm:$0xff]   ;;  %7052 = vmatpush1.bf16.msra.mxu1 %v9558_v57  ;;  %6888 = vmatpush1.bf16.msra.mxu0 %v9561_v1  ;;  %v9576_v57 = vld [vmem:[%s11092_s19] sm:$0xff]  }
 0xb82   :  { %v6642_v37 = vsel %vm6622_vm1, %v6639_v16, 0.0  ;;  %v6640_v56 = vmul.f32 %v10986_v49, %v10986_v49  ;;  %v6641_v20 = vmul.f32 %v10988_v51, %v10988_v51  ;;  %7053 = vmatprep.subr.bf16.mxu1 %v9566_v33  ;;  %6889 = vmatprep.subr.bf16.mxu0 %v9569_v14  ;;  %v9577_v33 = vld [vmem:[%s11092_s19 + $0x8] sm:$0xff]   ;;  %v9578_v1 = vld [vmem:[%s11092_s19 + $0x10] sm:$0xff]   ;;  %v9579_v14 = vld [vmem:[%s11092_s19 + $0x18] sm:$0xff]  }
 0xb83   :  { %v6643_v18 = vadd.f32 %v6642_v37, %v6638_v17 }
 0xb84   :  { %v6646_v58 = vsel %vm6622_vm1, %v6641_v20, 0.0 }
 0xb85   :  { %6644 = vadd.xlane.f32.xlu0 %v6643_v18  ;;  %v6647_v59 = vadd.f32 %v6646_v58, %v6640_v56  ;;  %7054 = vmatpush1.bf16.msra.mxu1 %v9564_v2  ;;  %v9580_v2 = vld [vmem:[%s11092_s19 + $0x20] sm:$0xff]  }
 0xb86   :  { %7055 = vmatprep.subr.bf16.mxu1 %v9572_v50  ;;  %6890 = vmatpush1.bf16.msra.mxu0 %v9567_v32  ;;  %v9581_v50 = vld [vmem:[%s11092_s19 + $0x28] sm:$0xff]  }
 0xb87   :  { %6648 = vadd.xlane.f32.xlu1 %v6647_v59  ;;  %6891 = vmatprep.subr.bf16.mxu0 %v9575_v3 }
 0xb89   :  { %7056 = vmatpush1.bf16.msra.mxu1 %v9570_v45 }
 0xb8a   :  { %6892 = vmatpush1.bf16.msra.mxu0 %v9573_v4 }
 0xb8b   :  { %7244 = vmatprep.subr.bf16.mxu0 %v10142_v43 }
 0xc12   :  { %v6645_v42 = vpop.xlane.xlu0 %6644 }
 0xc13   :  { %v6650_v5 = vmul.f32 0.0052083335, %v6645_v42 }
 0xc14   :  { %v6649_v34 = vpop.xlane.xlu1 %6648 }
 0xc15   :  { %v6652_v6 = vadd.f32 1e-05, %v6650_v5  ;;  %v6651_v29 = vmul.f32 0.0052083335, %v6649_v34 }
 0xc17   :  { %9596 = vrsqrt.f32 %v6652_v6  ;;  %v6653_v7 = vadd.f32 1e-05, %v6651_v29  ;;  %v9582_v29 = vld [vmem:[%s11092_s19 + $0x30] sm:$0xff]  }
 0xc19   :  { %9598 = vrsqrt.f32 %v6653_v7  ;;  %v9583_v7 = vld [vmem:[%s11092_s19 + $0x38] sm:$0xff]  }
 0xc21   :  { %v9597_v13 = vpop.eup %9596 }
 0xc22   :  { %v6657_v30 = vmul.f32 %v9597_v13, %v10984_v41  ;;  %v6656_v53 = vmul.f32 %v9597_v13, %v10982_v52 }
 0xc23   :  { %v9599_v23 = vpop.eup %9598 }
 0xc24   :  { %v6672_v25 = vmul.f32 %v6668_v11, %v6657_v30  ;;  %v6671_v26 = vmul.f32 %v6664_v22, %v6656_v53  ;;  %v6659_v47 = vmul.f32 %v9599_v23, %v10988_v51  ;;  %v6658_v28 = vmul.f32 %v9599_v23, %v10986_v49  ;;  %v7074_v49 = vld [vmem:[#allocation26] sm:$0x3]  ;;  %v7088_v53 = vld [vmem:[#allocation28] sm:$0x3] }
 0xc25   :  { %v7083_v12 = vrot.slane %v7074_v49, %v10650_v21  ;;  %v7079_v24 = vrot.slane %v7074_v49, %v10648_v8  ;;  %v7116_v23 = vrot.slane %v7088_v53, %v10650_v21 }
 0xc26   :  { %v6687_v40 = vadd.f32 %v6683_v19, %v6672_v25  ;;  %v6686_v38 = vadd.f32 %v6679_v10, %v6671_v26  ;;  %v6674_v46 = vmul.f32 %v6668_v11, %v6659_v47  ;;  %v6673_v17 = vmul.f32 %v6664_v22, %v6658_v28  ;;  %v9586_v11 = vld [vmem:[%s11092_s19 + $0x50] sm:$0xff]   ;;  %v9587_v22 = vld [vmem:[%s11092_s19 + $0x58] sm:$0xff]  }
 0xc27   :  { %v7112_v25 = vrot.slane %v7088_v53, %v10648_v8 }
 0xc28   :  { %v6691_v16 = vmax.f32 %v6687_v40, 0.0  ;;  %v6690_v37 = vmax.f32 %v6686_v38, 0.0  ;;  %v6689_v41 = vadd.f32 %v6683_v19, %v6674_v46  ;;  %v6688_v56 = vadd.f32 %v6679_v10, %v6673_v17  ;;  %v7089_v10 = vld [vmem:[#allocation29] sm:$0x3] }
 0xc29   :  { %v7129_v28 = vrot.slane %v7089_v10, %v10650_v21  ;;  %v7125_v38 = vrot.slane %v7089_v10, %v10648_v8 }
 0xc2a   :  { %v6695_v20 = vpack.c.bf16 %v6691_v16, %v6691_v16  ;;  %v6694_v18 = vpack.c.bf16 %v6690_v37, %v6690_v37  ;;  %v6693_v52 = vmax.f32 %v6689_v41, 0.0  ;;  %v6692_v58 = vmax.f32 %v6688_v56, 0.0 }
 0xc2c   :  { %8170 = vmatprep.mubr.msk.bf16.mxu1 %vm6622_vm1, %v6695_v20  ;;  %v6721_v59 = vpack.c.bf16 %v6693_v52, %v6693_v52  ;;  %v6720_v36 = vpack.c.bf16 %v6692_v58, %v6692_v58 }
 0xc2d   :  { %7066 = vmatmul.mubr.bf16.vlgmr.msra.gmra.mrb[24].mxu1 %v6694_v18  ;;  %v8171_v18 = vld [vmem:[#allocation31] ss:$0 sm:$0xff] }
 0xc2e   :  { %8145 = vmatprep.mubr.msk.bf16.mxu0 %vm6622_vm1, %v6721_v59 }
 0xc2f   :  { %6902 = vmatmul.mubr.bf16.vlgmr.msra.gmra.mrb[8].mxu0 %v6720_v36 }
 0xc30   :  { %7245 = vmatpush1.bf16.msra.mxu0 %v9576_v57 }
 0xc31   :  { %7246 = vmatprep.subr.bf16.mxu0 %v10142_v43 }
 0xc34   :  { %7247 = vmatpush1.bf16.msra.mxu0 %v9577_v33  ;;  %v8188_v33 = vld [vmem:[#allocation2] ss:$0 sm:$0xff] }
 0xc35   :  { %7248 = vmatprep.subr.bf16.mxu0 %v10142_v43 }
 0xc38   :  { %7249 = vmatpush1.bf16.msra.mxu0 %v9578_v1 }
 0xc39   :  { %7250 = vmatprep.subr.bf16.mxu0 %v10142_v43 }
 0xc3c   :  { %7251 = vmatpush1.bf16.msra.mxu0 %v9579_v14 }
 0xc3d   :  { %7252 = vmatprep.subr.bf16.mxu0 %v10142_v43 }
 0xc40   :  { %7253 = vmatpush1.bf16.msra.mxu0 %v9580_v2 }
 0xc41   :  { %7254 = vmatprep.subr.bf16.mxu0 %v10142_v43 }
 0xc44   :  { %7255 = vmatpush1.bf16.msra.mxu0 %v9581_v50 }
 0xc45   :  { %7256 = vmatprep.subr.bf16.mxu0 %v10142_v43 }
 0xc48   :  { %7257 = vmatpush1.bf16.msra.mxu0 %v9582_v29 }
 0xc49   :  { %7258 = vmatprep.subr.bf16.mxu0 %v10142_v43 }
 0xc4c   :  { %7259 = vmatpush1.bf16.msra.mxu0 %v9583_v7 }
 0xc4d   :  { %7260 = vmatprep.subr.bf16.mxu0 %v10142_v43 }
 0xc50   :  { %7261 = vmatpush1.bf16.msra.mxu0 %v9584_v44 }
 0xc51   :  { %7262 = vmatprep.subr.bf16.mxu0 %v10142_v43 }
 0xc54   :  { %7263 = vmatpush1.bf16.msra.mxu0 %v9585_v9 }
 0xc55   :  { %7264 = vmatprep.subr.bf16.mxu0 %v10142_v43 }
 0xc58   :  { %7265 = vmatpush1.bf16.msra.mxu0 %v9586_v11 }
 0xc59   :  { %7266 = vmatprep.subr.bf16.mxu0 %v10142_v43 }
 0xc5c   :  { %7267 = vmatpush1.bf16.msra.mxu0 %v9587_v22 }
 0xd00   :  { %v7067_v51 = vpop.f32.mrb[24].mxu1 }
 0xd01   :  { %v7069_v39 = vpop.f32.mrb[25].mxu1 }
 0xd02   :  { %v6903_v55 = vpop.f32.mrb[8].mxu0  ;;  %v7071_v15 = vpop.f32.mrb[26].mxu1 }
 0xd03   :  { %v7068_v61 = vadd.f32 %v7067_v51, %v6903_v55  ;;  %v6905_v62 = vpop.f32.mrb[9].mxu0  ;;  %v7072_v60 = vpop.f32.mrb[27].mxu1 }
 0xd04   :  { %v7070_v48 = vadd.f32 %v7069_v39, %v6905_v62  ;;  %v6907_v63 = vpop.f32.mrb[10].mxu0  ;;  %v8185_v60 = vld [vmem:[#allocation32] ss:$0 sm:$0xff] }
 0xd05   :  { %v6908_v31 = vpop.f32.mrb[11].mxu0  ;;  %v7086_v0 = vadd.f32 %v7079_v24, %v7068_v61  ;;  %v8186_v63 = vld [vmem:[#allocation34] ss:$0 sm:$0xff] }
 0xd06   :  { %v7087_v54 = vadd.f32 %v7083_v12, %v7070_v48 }
 0xd08   :  { %v7090_v35 = vsel %vm6622_vm1, %v7087_v54, 0.0 }
 0xd09   :  { %v7091_v27 = vadd.f32 %v7090_v35, %v7086_v0 }
 0xd0b   :  { %7092 = vadd.xlane.f32.xlu0 %v7091_v27 }
 0xd98   :  { %v7093_v32 = vpop.xlane.xlu0 %7092 }
 0xd99   :  { %v7094_v3 = vmul.f32 0.0052083335, %v7093_v32 }
 0xd9b   :  { %v7095_v45 = vsub.f32 %v7086_v0, %v7094_v3  ;;  %v7096_v4 = vsub.f32 %v7087_v54, %v7094_v3  ;;  %v8187_v0 = vld [vmem:[#allocation35] ss:$0 sm:$0xff] }
 0xd9d   :  { %v7097_v42 = vmul.f32 %v7095_v45, %v7095_v45  ;;  %v7098_v5 = vmul.f32 %v7096_v4, %v7096_v4 }
 0xd9f   :  { %v7099_v34 = vsel %vm6622_vm1, %v7098_v5, 0.0 }
 0xda0   :  { %v7100_v6 = vadd.f32 %v7099_v34, %v7097_v42 }
 0xda2   :  { %7101 = vadd.xlane.f32.xlu1 %v7100_v6 }
 0xe2f   :  { %v7102_v13 = vpop.xlane.xlu1 %7101 }
 0xe30   :  { %v7103_v30 = vmul.f32 0.0052083335, %v7102_v13 }
 0xe32   :  { %v7104_v19 = vadd.f32 1e-05, %v7103_v30 }
 0xe34   :  { %9600 = vrsqrt.f32 %v7104_v19 }
 0xe3e   :  { %v9601_v26 = vpop.eup %9600 }
 0xe3f   :  { %v7107_v47 = vmul.f32 %v9601_v26, %v7096_v4  ;;  %v7106_v40 = vmul.f32 %v9601_v26, %v7095_v45 }
 0xe41   :  { %v7120_v46 = vmul.f32 %v7116_v23, %v7107_v47  ;;  %v7119_v43 = vmul.f32 %v7112_v25, %v7106_v40 }
 0xe43   :  { %v7133_v17 = vadd.f32 %v7129_v28, %v7120_v46  ;;  %v7132_v16 = vadd.f32 %v7125_v38, %v7119_v43 }
 0xe45   :  { %v7135_v37 = vmax.f32 %v7133_v17, 0.0  ;;  %v7134_v41 = vmax.f32 %v7132_v16, 0.0 }
 0xe47   :  { %v7137_v56 = vpack.c.bf16 %v7135_v37, %v7135_v37  ;;  %v7136_v20 = vpack.c.bf16 %v7134_v41, %v7134_v41 }
 0xe49   :  { %8184 = vmatprep.mubr.msk.bf16.mxu0 %vm6622_vm1, %v7137_v56 }
 0xe4a   :  { %7277 = vmatmul.mubr.bf16.vlgmr.msra.gmra.mrb[12].mxu0 %v7136_v20 }
 0xf1d   :  { %v7278_v52 = vpop.f32.mrb[12].mxu0 }
 0xf1e   :  { %v7279_v58 = vadd.f32 %v8171_v18, %v7278_v52  ;;  %v7280_v59 = vpop.f32.mrb[13].mxu0 }
 0xf1f   :  { %v7281_v36 = vpop.f32.mrb[14].mxu0 }
 0xf20   :  { %v7282_v21 = vpop.f32.mrb[15].mxu0  ;;  %v7286_v49 = vsel %vm6622_vm1, %v7279_v58, 0.0 }
 0xf21   :  { %7287 = vadd.xlane.f32.xlu0 %v7286_v49 }
 0xfae   :  { %v7288_v8 = vpop.xlane.xlu0 %7287 }
 0xfaf   :  { %v7290_v51 = vmul.f32 0.015625, %v7288_v8 }
 0xfb1   :  { %v7291_v39 = vsub.f32 %v7279_v58, %v7290_v51 }
 0xfb3   :  { %v7292_v55 = vmul.f32 %v7291_v39, %v7291_v39 }
 0xfb5   :  { %v7293_v15 = vsel %vm6622_vm1, %v7292_v55, 0.0 }
 0xfb6   :  { %7294 = vadd.xlane.f32.xlu1 %v7293_v15 }
0x1043   :  { %v7295_v12 = vpop.xlane.xlu1 %7294 }
0x1044   :  { %v7296_v61 = vmul.f32 0.015625, %v7295_v12 }
0x1046   :  { %v7297_v24 = vadd.f32 1e-05, %v7296_v61 }
0x1048   :  { %9602 = vrsqrt.f32 %v7297_v24 }
0x1052   :  { %v9603_v62 = vpop.eup %9602 }
0x1053   :  { %v7299_v48 = vmul.f32 %v9603_v62, %v7291_v39 }
0x1055   :  { %v7306_v31 = vmul.f32 %v8185_v60, %v7299_v48 }
0x1057   :  { %v7313_v54 = vadd.f32 %v8186_v63, %v7306_v31 }
0x1059   :  { %v7314_v35 = vmax.f32 %v7313_v54, 0.0 }
0x105b   :  { %v7322_v27 = vmul.f32 %v8187_v0, %v7314_v35 }
0x105d   :  { %v7323_v57 = vsel %vm6622_vm1, %v7322_v27, 0.0 }
0x105e   :  { %7324 = vadd.xlane.f32.xlu0 %v7323_v57 }
0x10eb   :  { %v7325_v1 = vpop.xlane.xlu0 %7324 }
0x10ec   :  { %v7333_v14 = vadd.f32 %v8188_v33, %v7325_v1 }
0x10ee   :  { %9604 = vtanh.f32 %v7333_v14 }
0x10f8   :  { %v9605_v2 = vpop.eup %9604 }
0x10f9   :  { %7336 = vst.msk [vmem:[%s11098_s25] sm:$0xff] %vm7335_vm2, %v9605_v2 }
0x10fa   :  { %7341 = vsyncpa [#allocation4], 1 }
0x10fb   :  { %7342 = vsyncpa [#allocation6], 1 }
0x10fc   :  { %7343 = vsyncpa [#allocation9], 1 }
0x10fd   :  { %7344 = vsyncpa [#allocation12], 1 }
0x10fe   :  { %7345 = vsyncpa [#allocation15], 1 }
0x10ff   :  { %7346 = vsyncpa [#allocation18], 1 }
0x1100   :  { %7347 = vsyncpa [#allocation21], 1 }
0x1101   :  { %7348 = vsyncpa [#allocation24], 1 }
0x1102   :  { %7349 = vsyncpa [#allocation27], 1 }
0x1103   :  { %7350 = vsyncpa [#allocation30], 1 }
0x1104   :  { %7351 = vsyncpa [#allocation33], 1 }
0x1105   :  { %7352 = vsyncpa [#allocation36], 1 }

// kernel: tpu_custom_call.1
= control target key start
LH: loop header
LB: loop body
LE: loop exit
PB: predicated region body
PF: predicated region fallthrough
CT: control target
= control target key end

     0   :  { %s11073_s0 = inlined_call_operand.hbm [shape: f32[8,1536], index: 0, kind: input, shape index: {}]   ;;  %s11074_s1 = inlined_call_operand.hbm [shape: f32[8,1536], index: 1, kind: input, shape index: {}]   ;;  %s11075_s2 = inlined_call_operand.hbm [shape: bf16[1536,768], index: 2, kind: input, shape index: {}]   ;;  %s11076_s3 = inlined_call_operand.hbm [shape: f32[1,768], index: 3, kind: input, shape index: {}]   ;;  %s11077_s4 = inlined_call_operand.hbm [shape: f32[1,768], index: 4, kind: input, shape index: {}]   ;;  %s11078_s5 = inlined_call_operand.hbm [shape: f32[1,768], index: 5, kind: input, shape index: {}]   ;;  %s11079_s6 = inlined_call_operand.hbm [shape: bf16[768,384], index: 6, kind: input, shape index: {}]   ;;  %s11080_s7 = inlined_call_operand.hbm [shape: f32[1,384], index: 7, kind: input, shape index: {}]   ;;  %s11081_s8 = inlined_call_operand.hbm [shape: f32[1,384], index: 8, kind: input, shape index: {}]   ;;  %s11082_s9 = inlined_call_operand.hbm [shape: f32[1,384], index: 9, kind: input, shape index: {}]   ;;  %s11083_s10 = inlined_call_operand.vmem [shape: bf16[384,192], index: 10, kind: input, shape index: {}]   ;;  %s11084_s11 = inlined_call_operand.hbm [shape: f32[1,192], index: 11, kind: input, shape index: {}]   ;;  %s11085_s12 = inlined_call_operand.hbm [shape: f32[1,192], index: 12, kind: input, shape index: {}]   ;;  %s11086_s13 = inlined_call_operand.hbm [shape: f32[1,192], index: 13, kind: input, shape index: {}]   ;;  %s11087_s14 = inlined_call_operand.hbm [shape: bf16[192,192], index: 14, kind: input, shape index: {}]   ;;  %s11088_s15 = inlined_call_operand.hbm [shape: bf16[192,192], index: 15, kind: input, shape index: {}]   ;;  %s11089_s16 = inlined_call_operand.hbm [shape: f32[1,192], index: 16, kind: input, shape index: {}]   ;;  %s11090_s17 = inlined_call_operand.hbm [shape: f32[1,192], index: 17, kind: input, shape index: {}]   ;;  %s11091_s18 = inlined_call_operand.hbm [shape: f32[1,192], index: 18, kind: input, shape index: {}]   ;;  %s11092_s19 = inlined_call_operand.vmem [shape: bf16[192,64], index: 19, kind: input, shape index: {}]   ;;  %s11093_s20 = inlined_call_operand.hbm [shape: f32[1,64], index: 20, kind: input, shape index: {}]   ;;  %s11094_s21 = inlined_call_operand.hbm [shape: f32[1,64], index: 21, kind: input, shape index: {}]   ;;  %s11095_s22 = inlined_call_operand.hbm [shape: f32[1,64], index: 22, kind: input, shape index: {}]   ;;  %s11096_s23 = inlined_call_operand.hbm [shape: f32[1,64], index: 23, kind: input, shape index: {}]   ;;  %s11097_s24 = inlined_call_operand.<no memory space> [shape: f32[1,1], index: 24, kind: input, shape index: {}]   ;;  %s11098_s25 = inlined_call_operand.vmem [shape: f32[8,1], index: 25, kind: output, shape index: {}]  }
   0x1   :  { %11109 = sst [smem:[#allocation49_spill]] %s11073_s0  ;;  %v30_v0 = vstv %s11097_s24 }
   0x2   :  { %11110 = sst [smem:[#allocation50_spill]] %s11074_s1  ;;  %31 = vst [vmem:[#allocation2] sm:$0x1] %v30_v0 }
   0x3   :  { %11111 = sst [smem:[#allocation51_spill]] %s11075_s2 }
   0x4   :  { %11112 = sst [smem:[#allocation52_spill]] %s11076_s3 }
   0x5   :  { %11113 = sst [smem:[#allocation53_spill]] %s11077_s4 }
   0x6   :  { %11114 = sst [smem:[#allocation54_spill]] %s11078_s5 }
   0x7   :  { %11115 = sst [smem:[#allocation55_spill]] %s11079_s6 }
   0x8   :  { %11116 = sst [smem:[#allocation56_spill]] %s11080_s7 }
   0x9   :  { %11117 = sst [smem:[#allocation57_spill]] %s11081_s8 }
   0xa   :  { %11118 = sst [smem:[#allocation58_spill]] %s11082_s9 }
   0xb   :  { %32 = vsyncpa [#allocation4], 0 }
   0xc   :  { %33 = vsyncpa [#allocation6], 0 }
   0xd   :  { %34 = vsyncpa [#allocation9], 0 }
   0xe   :  { %35 = vsyncpa [#allocation12], 0 }
   0xf   :  { %36 = vsyncpa [#allocation15], 0 }
  0x10   :  { %37 = vsyncpa [#allocation18], 0 }
  0x11   :  { %38 = vsyncpa [#allocation21], 0 }
  0x12   :  { %39 = vsyncpa [#allocation24], 0 }
  0x13   :  { %40 = vsyncpa [#allocation27], 0 }
  0x14   :  { %41 = vsyncpa [#allocation30], 0 }
  0x15   :  { %42 = vsyncpa [#allocation33], 0 }
  0x16   :  { %43 = vsyncpa [#allocation36], 0  ;;  %s10114_s6 = smov [#allocation5]   ;;  %s10115_s7 = smov [#allocation8]  }
  0x17   :  { %s60_s30 = sshll.u32 %s10114_s6, 4  ;;  %s82_s3 = sshll.u32 %s10115_s7, 4  ;;  %s61_s30 = int_to_ptr.vmem [resolvable:$true] %s60_s30  ;;  %s83_s3 = int_to_ptr.vmem [resolvable:$true] %s82_s3 }
  0x18   :  { %s11119_s1 = sld [smem:[#allocation50_spill]] }
  0x1e   :  { %s9606_s8 = scalar_lea.hbm %s11119_s1, 1536 }
  0x1f   :  { %p9607_p0 = scmp.ne.s32.totalorder %s11119_s1, %s9606_s8  ;;  %p9610_p1 = scmp.lt.u32.totalorder %s9606_s8, %s11119_s1 }
  0x21   :  { %p9612_p2 = pnand %p9610_p1, %p9607_p0 }
  0x23   :  { %9615 = shalt.err (!%p9612_p2)
}
  0x24   :  { %s9616_s5 = scalar_lea.vmem %s61_s30, 1536  ;;  %p9621_p4 = scmp.lt.s32.totalorder %s61_s30, %s61_s30 }
  0x25   :  { %p9617_p3 = scmp.ne.s32.totalorder %s61_s30, %s9616_s5  ;;  %p9622_p5 = scmp.lt.s32.totalorder %s9616_s5, %s9616_s5 }
  0x27   :  { %p9623_p6 = por %p9622_p5, %p9621_p4 }
  0x29   :  { %p9624_p7 = pnand %p9623_p6, %p9617_p3 }
  0x2b   :  { %9627 = shalt.err (!%p9624_p7)
}
  0x2c   :  { %63 = dma.hbm_to_vmem [thread:$0]  %s11119_s1, 1536, %s61_s30, [#allocation6]  }
  0x2d   :  { %s11120_s7 = sld [smem:[#allocation52_spill]] }
  0x33   :  { %s9628_s24 = scalar_lea.hbm %s11120_s7, 96 }
  0x34   :  { %p9629_p8 = scmp.ne.s32.totalorder %s11120_s7, %s9628_s24  ;;  %p9632_p9 = scmp.lt.u32.totalorder %s9628_s24, %s11120_s7 }
  0x36   :  { %p9634_p10 = pnand %p9632_p9, %p9629_p8 }
  0x38   :  { %9637 = shalt.err (!%p9634_p10)
}
  0x39   :  { %s9638_s28 = scalar_lea.vmem %s83_s3, 96  ;;  %p9643_p12 = scmp.lt.s32.totalorder %s83_s3, %s83_s3 }
  0x3a   :  { %p9639_p11 = scmp.ne.s32.totalorder %s83_s3, %s9638_s28  ;;  %p9644_p13 = scmp.lt.s32.totalorder %s9638_s28, %s9638_s28 }
  0x3c   :  { %p9645_p0 = por %p9644_p13, %p9643_p12 }
  0x3e   :  { %p9646_p1 = pnand %p9645_p0, %p9639_p11 }
  0x40   :  { %9649 = shalt.err (!%p9646_p1)
}
  0x41   :  { %85 = dma.hbm_to_vmem [thread:$0]  %s11120_s7, 96, %s83_s3, [#allocation9]  }
  0x42   :  { %s10116_s9 = smov [#allocation11]   ;;  %s10117_s0 = smov [#allocation14]  }
  0x43   :  { %s102_s5 = sshll.u32 %s10116_s9, 4  ;;  %s124_s29 = sshll.u32 %s10117_s0, 4  ;;  %s103_s5 = int_to_ptr.vmem [resolvable:$true] %s102_s5  ;;  %s125_s29 = int_to_ptr.vmem [resolvable:$true] %s124_s29 }
  0x44   :  { %s11121_s24 = sld [smem:[#allocation54_spill]] }
  0x4a   :  { %s9650_s26 = scalar_lea.hbm %s11121_s24, 96 }
  0x4b   :  { %p9651_p2 = scmp.ne.s32.totalorder %s11121_s24, %s9650_s26  ;;  %p9654_p3 = scmp.lt.u32.totalorder %s9650_s26, %s11121_s24 }
  0x4d   :  { %p9656_p4 = pnand %p9654_p3, %p9651_p2 }
  0x4f   :  { %9659 = shalt.err (!%p9656_p4)
}
  0x50   :  { %s9660_s3 = scalar_lea.vmem %s103_s5, 96  ;;  %p9665_p6 = scmp.lt.s32.totalorder %s103_s5, %s103_s5 }
  0x51   :  { %p9661_p5 = scmp.ne.s32.totalorder %s103_s5, %s9660_s3  ;;  %p9666_p7 = scmp.lt.s32.totalorder %s9660_s3, %s9660_s3 }
  0x53   :  { %p9667_p8 = por %p9666_p7, %p9665_p6 }
  0x55   :  { %p9668_p9 = pnand %p9667_p8, %p9661_p5 }
  0x57   :  { %9671 = shalt.err (!%p9668_p9)
}
  0x58   :  { %105 = dma.hbm_to_vmem [thread:$0]  %s11121_s24, 96, %s103_s5, [#allocation12]  }
  0x59   :  { %s11122_s0 = sld [smem:[#allocation56_spill]] }
  0x5f   :  { %s9672_s2 = scalar_lea.hbm %s11122_s0, 48 }
  0x60   :  { %p9673_p10 = scmp.ne.s32.totalorder %s11122_s0, %s9672_s2  ;;  %p9676_p11 = scmp.lt.u32.totalorder %s9672_s2, %s11122_s0 }
  0x62   :  { %p9678_p12 = pnand %p9676_p11, %p9673_p10 }
  0x64   :  { %9681 = shalt.err (!%p9678_p12)
}
  0x65   :  { %s9682_s4 = scalar_lea.vmem %s125_s29, 48  ;;  %s9686_s28 = scalar_lea.vmem %s125_s29, 64 }
  0x66   :  { %p9683_p13 = scmp.ne.s32.totalorder %s125_s29, %s9682_s4  ;;  %p9687_p0 = scmp.lt.s32.totalorder %s125_s29, %s125_s29 }
  0x67   :  { %p9688_p1 = scmp.lt.s32.totalorder %s9686_s28, %s9682_s4 }
  0x69   :  { %p9689_p2 = por %p9688_p1, %p9687_p0 }
  0x6b   :  { %p9690_p3 = pnand %p9689_p2, %p9683_p13 }
  0x6d   :  { %9693 = shalt.err (!%p9690_p3)
}
  0x6e   :  { %127 = dma.hbm_to_vmem [thread:$0]  %s11122_s0, 48, %s125_s29, [#allocation15]  }
  0x6f   :  { %s10118_s3 = smov [#allocation17]   ;;  %s10119_s30 = smov [#allocation20]  }
  0x70   :  { %s144_s7 = sshll.u32 %s10118_s3, 4  ;;  %s166_s1 = sshll.u32 %s10119_s30, 4  ;;  %s145_s7 = int_to_ptr.vmem [resolvable:$true] %s144_s7  ;;  %s167_s1 = int_to_ptr.vmem [resolvable:$true] %s166_s1 }
  0x71   :  { %s11123_s6 = sld [smem:[#allocation58_spill]] }
  0x77   :  { %s9694_s27 = scalar_lea.hbm %s11123_s6, 48 }
  0x78   :  { %p9695_p4 = scmp.ne.s32.totalorder %s11123_s6, %s9694_s27  ;;  %p9698_p5 = scmp.lt.u32.totalorder %s9694_s27, %s11123_s6 }
  0x7a   :  { %p9700_p6 = pnand %p9698_p5, %p9695_p4 }
  0x7c   :  { %9703 = shalt.err (!%p9700_p6)
}
  0x7d   :  { %s9704_s29 = scalar_lea.vmem %s145_s7, 48  ;;  %s9708_s0 = scalar_lea.vmem %s145_s7, 64 }
  0x7e   :  { %p9705_p7 = scmp.ne.s32.totalorder %s145_s7, %s9704_s29  ;;  %p9709_p8 = scmp.lt.s32.totalorder %s145_s7, %s145_s7 }
  0x7f   :  { %p9710_p9 = scmp.lt.s32.totalorder %s9708_s0, %s9704_s29 }
  0x81   :  { %p9711_p10 = por %p9710_p9, %p9709_p8 }
  0x83   :  { %p9712_p11 = pnand %p9711_p10, %p9705_p7 }
  0x85   :  { %9715 = shalt.err (!%p9712_p11)
}
  0x86   :  { %147 = dma.hbm_to_vmem [thread:$0]  %s11123_s6, 48, %s145_s7, [#allocation18]  }
  0x87   :  { %s9716_s9 = scalar_lea.hbm %s11085_s12, 32 }
  0x88   :  { %p9717_p12 = scmp.ne.s32.totalorder %s11085_s12, %s9716_s9  ;;  %p9720_p13 = scmp.lt.u32.totalorder %s9716_s9, %s11085_s12 }
  0x8a   :  { %p9722_p0 = pnand %p9720_p13, %p9717_p12 }
  0x8c   :  { %9725 = shalt.err (!%p9722_p0)
}
  0x8d   :  { %s9726_s4 = scalar_lea.vmem %s167_s1, 32  ;;  %p9731_p2 = scmp.lt.s32.totalorder %s167_s1, %s167_s1 }
  0x8e   :  { %p9727_p1 = scmp.ne.s32.totalorder %s167_s1, %s9726_s4  ;;  %p9732_p3 = scmp.lt.s32.totalorder %s9726_s4, %s9726_s4 }
  0x90   :  { %p9733_p4 = por %p9732_p3, %p9731_p2 }
  0x92   :  { %p9734_p5 = pnand %p9733_p4, %p9727_p1 }
  0x94   :  { %9737 = shalt.err (!%p9734_p5)
}
  0x95   :  { %169 = dma.hbm_to_vmem [thread:$0]  %s11085_s12, 32, %s167_s1, [#allocation21]  }
  0x96   :  { %s10120_s28 = smov [#allocation23]   ;;  %s9738_s24 = scalar_lea.hbm %s11087_s14, 3072 }
  0x97   :  { %s185_s29 = sshll.u32 %s10120_s28, 4  ;;  %p9739_p6 = scmp.ne.s32.totalorder %s11087_s14, %s9738_s24  ;;  %s186_s29 = int_to_ptr.vmem [resolvable:$true] %s185_s29 }
  0x98   :  { %p9742_p7 = scmp.lt.u32.totalorder %s9738_s24, %s11087_s14 }
  0x9a   :  { %p9744_p8 = pnand %p9742_p7, %p9739_p6 }
  0x9c   :  { %9747 = shalt.err (!%p9744_p8)
}
  0x9d   :  { %s9748_s27 = scalar_lea.vmem %s186_s29, 3072  ;;  %p9753_p10 = scmp.lt.s32.totalorder %s186_s29, %s186_s29 }
  0x9e   :  { %p9749_p9 = scmp.ne.s32.totalorder %s186_s29, %s9748_s27  ;;  %p9754_p11 = scmp.lt.s32.totalorder %s9748_s27, %s9748_s27 }
  0xa0   :  { %p9755_p12 = por %p9754_p11, %p9753_p10 }
  0xa2   :  { %p9756_p13 = pnand %p9755_p12, %p9749_p9 }
  0xa4   :  { %9759 = shalt.err (!%p9756_p13)
}
  0xa5   :  { %s10121_s12 = smov 128   ;;  %s10122_s1 = smov 8  }
  0xa6   :  { %191 = dma.hbm_to_vmem [thread:$0]  %s11087_s14, 3072, %s186_s29, [#allocation24], %s10121_s12, %s10121_s12, %s10122_s1  }
  0xa7   :  { %s10123_s4 = smov [#allocation26]   ;;  %s10124_s6 = smov [#allocation29]  }
  0xa8   :  { %s210_s7 = sshll.u32 %s10123_s4, 4  ;;  %s230_s28 = sshll.u32 %s10124_s6, 4  ;;  %s211_s7 = int_to_ptr.vmem [resolvable:$true] %s210_s7  ;;  %s231_s28 = int_to_ptr.vmem [resolvable:$true] %s230_s28 }
  0xa9   :  { %s9760_s24 = scalar_lea.hbm %s11089_s16, 32 }
  0xaa   :  { %p9761_p0 = scmp.ne.s32.totalorder %s11089_s16, %s9760_s24  ;;  %p9764_p1 = scmp.lt.u32.totalorder %s9760_s24, %s11089_s16 }
  0xac   :  { %p9766_p2 = pnand %p9764_p1, %p9761_p0 }
  0xae   :  { %9769 = shalt.err (!%p9766_p2)
}
  0xaf   :  { %s9770_s14 = scalar_lea.vmem %s211_s7, 32  ;;  %p9775_p4 = scmp.lt.s32.totalorder %s211_s7, %s211_s7 }
  0xb0   :  { %p9771_p3 = scmp.ne.s32.totalorder %s211_s7, %s9770_s14  ;;  %p9776_p5 = scmp.lt.s32.totalorder %s9770_s14, %s9770_s14 }
  0xb2   :  { %p9777_p6 = por %p9776_p5, %p9775_p4 }
  0xb4   :  { %p9778_p7 = pnand %p9777_p6, %p9771_p3 }
  0xb6   :  { %9781 = shalt.err (!%p9778_p7)
}
  0xb7   :  { %213 = dma.hbm_to_vmem [thread:$0]  %s11089_s16, 32, %s211_s7, [#allocation27]  }
  0xb8   :  { %s9782_s4 = scalar_lea.hbm %s11091_s18, 32 }
  0xb9   :  { %p9783_p8 = scmp.ne.s32.totalorder %s11091_s18, %s9782_s4  ;;  %p9786_p9 = scmp.lt.u32.totalorder %s9782_s4, %s11091_s18 }
  0xbb   :  { %p9788_p10 = pnand %p9786_p9, %p9783_p8 }
  0xbd   :  { %9791 = shalt.err (!%p9788_p10)
}
  0xbe   :  { %s9792_s3 = scalar_lea.vmem %s231_s28, 32  ;;  %p9797_p12 = scmp.lt.s32.totalorder %s231_s28, %s231_s28 }
  0xbf   :  { %p9793_p11 = scmp.ne.s32.totalorder %s231_s28, %s9792_s3  ;;  %p9798_p13 = scmp.lt.s32.totalorder %s9792_s3, %s9792_s3 }
  0xc1   :  { %p9799_p0 = por %p9798_p13, %p9797_p12 }
  0xc3   :  { %p9800_p1 = pnand %p9799_p0, %p9793_p11 }
  0xc5   :  { %9803 = shalt.err (!%p9800_p1)
}
  0xc6   :  { %233 = dma.hbm_to_vmem [thread:$0]  %s11091_s18, 32, %s231_s28, [#allocation30]  }
  0xc7   :  { %s10125_s30 = smov [#allocation32]   ;;  %s10126_s2 = smov [#allocation3]  }
  0xc8   :  { %s252_s9 = sshll.u32 %s10125_s30, 4  ;;  %s50_s14 = sshll.u32 %s10126_s2, 4  ;;  %s253_s9 = int_to_ptr.vmem [resolvable:$true] %s252_s9  ;;  %s51_s14 = int_to_ptr.vmem [resolvable:$true] %s50_s14 }
  0xc9   :  { %s9804_s26 = scalar_lea.hbm %s11094_s21, 16 }
  0xca   :  { %p9805_p2 = scmp.ne.s32.totalorder %s11094_s21, %s9804_s26  ;;  %p9808_p3 = scmp.lt.u32.totalorder %s9804_s26, %s11094_s21 }
  0xcc   :  { %p9810_p4 = pnand %p9808_p3, %p9805_p2 }
  0xce   :  { %9813 = shalt.err (!%p9810_p4)
}
  0xcf   :  { %s9814_s18 = scalar_lea.vmem %s253_s9, 16  ;;  %s9818_s28 = scalar_lea.vmem %s253_s9, 32 }
  0xd0   :  { %p9815_p5 = scmp.ne.s32.totalorder %s253_s9, %s9814_s18  ;;  %p9819_p6 = scmp.lt.s32.totalorder %s253_s9, %s253_s9 }
  0xd1   :  { %p9820_p7 = scmp.lt.s32.totalorder %s9818_s28, %s9814_s18 }
  0xd3   :  { %p9821_p8 = por %p9820_p7, %p9819_p6 }
  0xd5   :  { %p9822_p9 = pnand %p9821_p8, %p9815_p5 }
  0xd7   :  { %9825 = shalt.err (!%p9822_p9)
}
  0xd8   :  { %255 = dma.hbm_to_vmem [thread:$0]  %s11094_s21, 16, %s253_s9, [#allocation33]  }
  0xd9   :  { %s11124_s7 = sld [smem:[#allocation49_spill]] }
  0xdf   :  { %s9826_s30 = scalar_lea.hbm %s11124_s7, 1536 }
  0xe0   :  { %p9827_p10 = scmp.ne.s32.totalorder %s11124_s7, %s9826_s30  ;;  %p9830_p11 = scmp.lt.u32.totalorder %s9826_s30, %s11124_s7 }
  0xe2   :  { %p9832_p12 = pnand %p9830_p11, %p9827_p10 }
  0xe4   :  { %9835 = shalt.err (!%p9832_p12)
}
  0xe5   :  { %s9836_s8 = scalar_lea.vmem %s51_s14, 1536  ;;  %p9841_p0 = scmp.lt.s32.totalorder %s51_s14, %s51_s14 }
  0xe6   :  { %p9837_p13 = scmp.ne.s32.totalorder %s51_s14, %s9836_s8  ;;  %p9842_p1 = scmp.lt.s32.totalorder %s9836_s8, %s9836_s8 }
  0xe8   :  { %p9843_p2 = por %p9842_p1, %p9841_p0 }
  0xea   :  { %p9844_p3 = pnand %p9843_p2, %p9837_p13 }
  0xec   :  { %9847 = shalt.err (!%p9844_p3)
}
  0xed   :  { %53 = dma.hbm_to_vmem [thread:$0]  %s11124_s7, 1536, %s51_s14, [#allocation4]  }
  0xee   :  { %s10127_s4 = smov [#allocation7]   ;;  %s11125_s28 = sld [smem:[#allocation51_spill]] }
  0xef   :  { %s69_s6 = sshll.u32 %s10127_s4, 4  ;;  %s70_s6 = int_to_ptr.vmem [resolvable:$true] %s69_s6 }
  0xf4   :  { %s9848_s5 = scalar_lea.hbm %s11125_s28, 73728 }
  0xf5   :  { %p9849_p4 = scmp.ne.s32.totalorder %s11125_s28, %s9848_s5  ;;  %p9852_p5 = scmp.lt.u32.totalorder %s9848_s5, %s11125_s28 }
  0xf7   :  { %p9854_p6 = pnand %p9852_p5, %p9849_p4 }
  0xf9   :  { %9857 = shalt.err (!%p9854_p6)
}
  0xfa   :  { %s9858_s2 = scalar_lea.vmem %s70_s6, 73728  ;;  %p9863_p8 = scmp.lt.s32.totalorder %s70_s6, %s70_s6 }
  0xfb   :  { %p9859_p7 = scmp.ne.s32.totalorder %s70_s6, %s9858_s2  ;;  %p9864_p9 = scmp.lt.s32.totalorder %s9858_s2, %s9858_s2 }
  0xfd   :  { %p9865_p10 = por %p9864_p9, %p9863_p8 }
  0xff   :  { %p9866_p11 = pnand %p9865_p10, %p9859_p7 }
 0x101   :  { %9869 = shalt.err (!%p9866_p11)
}
 0x102   :  { %s10128_s14 = smov 384   ;;  %s10129_s7 = smov 24  }
 0x103   :  { %75 = dma.hbm_to_vmem [thread:$0]  %s11125_s28, 73728, %s70_s6, [#allocation6], %s10128_s14, %s10128_s14, %s10129_s7  }
 0x104   :  { %s10130_s26 = smov [#allocation10]   ;;  %s10131_s21 = smov [#allocation13]  }
 0x105   :  { %s92_s8 = sshll.u32 %s10130_s26, 4  ;;  %s111_s9 = sshll.u32 %s10131_s21, 4  ;;  %s93_s8 = int_to_ptr.vmem [resolvable:$true] %s92_s8  ;;  %s10423_s9 = int_to_ptr.vmem [resolvable:$true] %s111_s9 }
 0x106   :  { %s11126_s18 = sld [smem:[#allocation53_spill]] }
 0x10c   :  { %s9870_s5 = scalar_lea.hbm %s11126_s18, 96 }
 0x10d   :  { %p9871_p12 = scmp.ne.s32.totalorder %s11126_s18, %s9870_s5  ;;  %p9874_p13 = scmp.lt.u32.totalorder %s9870_s5, %s11126_s18 }
 0x10f   :  { %p9876_p0 = pnand %p9874_p13, %p9871_p12 }
 0x111   :  { %9879 = shalt.err (!%p9876_p0)
}
 0x112   :  { %s9880_s6 = scalar_lea.vmem %s93_s8, 96  ;;  %p9885_p2 = scmp.lt.s32.totalorder %s93_s8, %s93_s8 }
 0x113   :  { %p9881_p1 = scmp.ne.s32.totalorder %s93_s8, %s9880_s6  ;;  %p9886_p3 = scmp.lt.s32.totalorder %s9880_s6, %s9880_s6 }
 0x115   :  { %p9887_p4 = por %p9886_p3, %p9885_p2 }
 0x117   :  { %p9888_p5 = pnand %p9887_p4, %p9881_p1 }
 0x119   :  { %9891 = shalt.err (!%p9888_p5)
}
 0x11a   :  { %95 = dma.hbm_to_vmem [thread:$0]  %s11126_s18, 96, %s93_s8, [#allocation9]  }
 0x11b   :  { %s11127_s29 = sld [smem:[#allocation55_spill]] }
 0x121   :  { %s9892_s27 = scalar_lea.hbm %s11127_s29, 18432 }
 0x122   :  { %p9893_p6 = scmp.ne.s32.totalorder %s11127_s29, %s9892_s27  ;;  %p9896_p7 = scmp.lt.u32.totalorder %s9892_s27, %s11127_s29 }
 0x124   :  { %p9898_p8 = pnand %p9896_p7, %p9893_p6 }
 0x126   :  { %9901 = shalt.err (!%p9898_p8)
}
 0x127   :  { %s9902_s5 = scalar_lea.vmem %s10423_s9, 18432  ;;  %p9907_p10 = scmp.lt.s32.totalorder %s10423_s9, %s10423_s9 }
 0x128   :  { %p9903_p9 = scmp.ne.s32.totalorder %s10423_s9, %s9902_s5  ;;  %p9908_p11 = scmp.lt.s32.totalorder %s9902_s5, %s9902_s5 }
 0x12a   :  { %p9909_p12 = por %p9908_p11, %p9907_p10 }
 0x12c   :  { %p9910_p13 = pnand %p9909_p12, %p9903_p9 }
 0x12e   :  { %9913 = shalt.err (!%p9910_p13)
}
 0x12f   :  { %s10132_s8 = smov 192   ;;  %s10133_s18 = smov 12  }
 0x130   :  { %117 = dma.hbm_to_vmem [thread:$0]  %s11127_s29, 18432, %s10423_s9, [#allocation12], %s10132_s8, %s10132_s8, %s10133_s18  }
 0x131   :  { %s10134_s16 = smov [#allocation16]   ;;  %s10135_s6 = smov [#allocation19]  }
 0x132   :  { %s134_s30 = sshll.u32 %s10134_s16, 4  ;;  %s156_s28 = sshll.u32 %s10135_s6, 4  ;;  %s135_s30 = int_to_ptr.vmem [resolvable:$true] %s134_s30  ;;  %s157_s28 = int_to_ptr.vmem [resolvable:$true] %s156_s28 }
 0x133   :  { %s11128_s7 = sld [smem:[#allocation57_spill]] }
 0x139   :  { %s9914_s27 = scalar_lea.hbm %s11128_s7, 48 }
 0x13a   :  { %p9915_p0 = scmp.ne.s32.totalorder %s11128_s7, %s9914_s27  ;;  %p9918_p1 = scmp.lt.u32.totalorder %s9914_s27, %s11128_s7 }
 0x13c   :  { %p9920_p2 = pnand %p9918_p1, %p9915_p0 }
 0x13e   :  { %9923 = shalt.err (!%p9920_p2)
}
 0x13f   :  { %s9924_s9 = scalar_lea.vmem %s135_s30, 48  ;;  %s9928_s29 = scalar_lea.vmem %s135_s30, 64 }
 0x140   :  { %p9925_p3 = scmp.ne.s32.totalorder %s135_s30, %s9924_s9  ;;  %p9929_p4 = scmp.lt.s32.totalorder %s135_s30, %s135_s30 }
 0x141   :  { %p9930_p5 = scmp.lt.s32.totalorder %s9928_s29, %s9924_s9 }
 0x143   :  { %p9931_p6 = por %p9930_p5, %p9929_p4 }
 0x145   :  { %p9932_p7 = pnand %p9931_p6, %p9925_p3 }
 0x147   :  { %9935 = shalt.err (!%p9932_p7)
}
 0x148   :  { %137 = dma.hbm_to_vmem [thread:$0]  %s11128_s7, 48, %s135_s30, [#allocation15]  }
 0x149   :  { %s9936_s3 = scalar_lea.hbm %s11084_s11, 32 }
 0x14a   :  { %p9937_p8 = scmp.ne.s32.totalorder %s11084_s11, %s9936_s3  ;;  %p9940_p9 = scmp.lt.u32.totalorder %s9936_s3, %s11084_s11 }
 0x14c   :  { %p9942_p10 = pnand %p9940_p9, %p9937_p8 }
 0x14e   :  { %9945 = shalt.err (!%p9942_p10)
}
 0x14f   :  { %s9946_s27 = scalar_lea.vmem %s157_s28, 32  ;;  %p9951_p12 = scmp.lt.s32.totalorder %s157_s28, %s157_s28 }
 0x150   :  { %p9947_p11 = scmp.ne.s32.totalorder %s157_s28, %s9946_s27  ;;  %p9952_p13 = scmp.lt.s32.totalorder %s9946_s27, %s9946_s27 }
 0x152   :  { %p9953_p0 = por %p9952_p13, %p9951_p12 }
 0x154   :  { %p9954_p1 = pnand %p9953_p0, %p9947_p11 }
 0x156   :  { %9957 = shalt.err (!%p9954_p1)
}
 0x157   :  { %159 = dma.hbm_to_vmem [thread:$0]  %s11084_s11, 32, %s157_s28, [#allocation18]  }
 0x158   :  { %s10136_s26 = smov [#allocation22]   ;;  %s10137_s4 = smov [#allocation25]  }
 0x159   :  { %s176_s21 = sshll.u32 %s10136_s26, 4  ;;  %s197_s0 = sshll.u32 %s10137_s4, 4  ;;  %s177_s21 = int_to_ptr.vmem [resolvable:$true] %s176_s21  ;;  %s10478_s0 = int_to_ptr.vmem [resolvable:$true] %s197_s0 }
 0x15a   :  { %s9958_s5 = scalar_lea.hbm %s11086_s13, 32 }
 0x15b   :  { %p9959_p2 = scmp.ne.s32.totalorder %s11086_s13, %s9958_s5  ;;  %p9962_p3 = scmp.lt.u32.totalorder %s9958_s5, %s11086_s13 }
 0x15d   :  { %p9964_p4 = pnand %p9962_p3, %p9959_p2 }
 0x15f   :  { %9967 = shalt.err (!%p9964_p4)
}
 0x160   :  { %s9968_s11 = scalar_lea.vmem %s177_s21, 32  ;;  %p9973_p6 = scmp.lt.s32.totalorder %s177_s21, %s177_s21 }
 0x161   :  { %p9969_p5 = scmp.ne.s32.totalorder %s177_s21, %s9968_s11  ;;  %p9974_p7 = scmp.lt.s32.totalorder %s9968_s11, %s9968_s11 }
 0x163   :  { %p9975_p8 = por %p9974_p7, %p9973_p6 }
 0x165   :  { %p9976_p9 = pnand %p9975_p8, %p9969_p5 }
 0x167   :  { %9979 = shalt.err (!%p9976_p9)
}
 0x168   :  { %179 = dma.hbm_to_vmem [thread:$0]  %s11086_s13, 32, %s177_s21, [#allocation21]  }
 0x169   :  { %s9980_s14 = scalar_lea.hbm %s11088_s15, 3072 }
 0x16a   :  { %p9981_p10 = scmp.ne.s32.totalorder %s11088_s15, %s9980_s14  ;;  %p9984_p11 = scmp.lt.u32.totalorder %s9980_s14, %s11088_s15 }
 0x16c   :  { %p9986_p12 = pnand %p9984_p11, %p9981_p10 }
 0x16e   :  { %9989 = shalt.err (!%p9986_p12)
}
 0x16f   :  { %s9990_s4 = scalar_lea.vmem %s10478_s0, 3072  ;;  %p9995_p0 = scmp.lt.s32.totalorder %s10478_s0, %s10478_s0 }
 0x170   :  { %p9991_p13 = scmp.ne.s32.totalorder %s10478_s0, %s9990_s4  ;;  %p9996_p1 = scmp.lt.s32.totalorder %s9990_s4, %s9990_s4 }
 0x172   :  { %p9997_p2 = por %p9996_p1, %p9995_p0 }
 0x174   :  { %p9998_p3 = pnand %p9997_p2, %p9991_p13 }
 0x176   :  { %10001 = shalt.err (!%p9998_p3)
}
 0x177   :  { %203 = dma.hbm_to_vmem [thread:$0]  %s11088_s15, 3072, %s10478_s0, [#allocation24], %s10121_s12, %s10121_s12, %s10122_s1  }
 0x178   :  { %s10138_s9 = smov [#allocation28]   ;;  %s10139_s5 = smov [#allocation31]  }
 0x179   :  { %s220_s29 = sshll.u32 %s10138_s9, 4  ;;  %s242_s8 = sshll.u32 %s10139_s5, 4  ;;  %s221_s29 = int_to_ptr.vmem [resolvable:$true] %s220_s29  ;;  %s243_s8 = int_to_ptr.vmem [resolvable:$true] %s242_s8 }
 0x17a   :  { %s10002_s3 = scalar_lea.hbm %s11090_s17, 32 }
 0x17b   :  { %p10003_p4 = scmp.ne.s32.totalorder %s11090_s17, %s10002_s3  ;;  %p10006_p5 = scmp.lt.u32.totalorder %s10002_s3, %s11090_s17 }
 0x17d   :  { %p10008_p6 = pnand %p10006_p5, %p10003_p4 }
 0x17f   :  { %10011 = shalt.err (!%p10008_p6)
}
 0x180   :  { %s10012_s15 = scalar_lea.vmem %s221_s29, 32  ;;  %p10017_p8 = scmp.lt.s32.totalorder %s221_s29, %s221_s29 }
 0x181   :  { %p10013_p7 = scmp.ne.s32.totalorder %s221_s29, %s10012_s15  ;;  %p10018_p9 = scmp.lt.s32.totalorder %s10012_s15, %s10012_s15 }
 0x183   :  { %p10019_p10 = por %p10018_p9, %p10017_p8 }
 0x185   :  { %p10020_p11 = pnand %p10019_p10, %p10013_p7 }
 0x187   :  { %10023 = shalt.err (!%p10020_p11)
}
 0x188   :  { %223 = dma.hbm_to_vmem [thread:$0]  %s11090_s17, 32, %s221_s29, [#allocation27]  }
 0x189   :  { %s10024_s14 = scalar_lea.hbm %s11093_s20, 16 }
 0x18a   :  { %p10025_p12 = scmp.ne.s32.totalorder %s11093_s20, %s10024_s14  ;;  %p10028_p13 = scmp.lt.u32.totalorder %s10024_s14, %s11093_s20 }
 0x18c   :  { %p10030_p0 = pnand %p10028_p13, %p10025_p12 }
 0x18e   :  { %10033 = shalt.err (!%p10030_p0)
}
 0x18f   :  { %s10034_s4 = scalar_lea.vmem %s243_s8, 16  ;;  %s10038_s13 = scalar_lea.vmem %s243_s8, 32 }
 0x190   :  { %p10035_p1 = scmp.ne.s32.totalorder %s243_s8, %s10034_s4  ;;  %p10039_p2 = scmp.lt.s32.totalorder %s243_s8, %s243_s8 }
 0x191   :  { %p10040_p3 = scmp.lt.s32.totalorder %s10038_s13, %s10034_s4 }
 0x193   :  { %p10041_p4 = por %p10040_p3, %p10039_p2 }
 0x195   :  { %p10042_p5 = pnand %p10041_p4, %p10035_p1 }
 0x197   :  { %10045 = shalt.err (!%p10042_p5)
}
 0x198   :  { %245 = dma.hbm_to_vmem [thread:$0]  %s11093_s20, 16, %s243_s8, [#allocation30]  }
 0x199   :  { %s10140_s9 = smov [#allocation34]   ;;  %s10141_s5 = smov [#allocation35]  }
 0x19a   :  { %s262_s29 = sshll.u32 %s10140_s9, 4  ;;  %s272_s18 = sshll.u32 %s10141_s5, 4  ;;  %s263_s29 = int_to_ptr.vmem [resolvable:$true] %s262_s29  ;;  %s273_s18 = int_to_ptr.vmem [resolvable:$true] %s272_s18 }
 0x19b   :  { %s10046_s11 = scalar_lea.hbm %s11095_s22, 16 }
 0x19c   :  { %p10047_p6 = scmp.ne.s32.totalorder %s11095_s22, %s10046_s11  ;;  %p10050_p7 = scmp.lt.u32.totalorder %s10046_s11, %s11095_s22 }
 0x19e   :  { %p10052_p8 = pnand %p10050_p7, %p10047_p6 }
 0x1a0   :  { %10055 = shalt.err (!%p10052_p8)
}
 0x1a1   :  { %s10056_s20 = scalar_lea.vmem %s263_s29, 16  ;;  %s10060_s8 = scalar_lea.vmem %s263_s29, 32 }
 0x1a2   :  { %p10057_p9 = scmp.ne.s32.totalorder %s263_s29, %s10056_s20  ;;  %p10061_p10 = scmp.lt.s32.totalorder %s263_s29, %s263_s29 }
 0x1a3   :  { %p10062_p11 = scmp.lt.s32.totalorder %s10060_s8, %s10056_s20 }
 0x1a5   :  { %p10063_p12 = por %p10062_p11, %p10061_p10 }
 0x1a7   :  { %p10064_p13 = pnand %p10063_p12, %p10057_p9 }
 0x1a9   :  { %10067 = shalt.err (!%p10064_p13)
}
 0x1aa   :  { %265 = dma.hbm_to_vmem [thread:$0]  %s11095_s22, 16, %s263_s29, [#allocation33]  }
 0x1ab   :  { %s10068_s14 = scalar_lea.hbm %s11096_s23, 16 }
 0x1ac   :  { %p10069_p0 = scmp.ne.s32.totalorder %s11096_s23, %s10068_s14  ;;  %p10072_p1 = scmp.lt.u32.totalorder %s10068_s14, %s11096_s23 }
 0x1ae   :  { %p10074_p2 = pnand %p10072_p1, %p10069_p0 }
 0x1b0   :  { %10077 = shalt.err (!%p10074_p2)
}
 0x1b1   :  { %s10078_s4 = scalar_lea.vmem %s273_s18, 16  ;;  %s10082_s13 = scalar_lea.vmem %s273_s18, 32 }
 0x1b2   :  { %p10079_p3 = scmp.ne.s32.totalorder %s273_s18, %s10078_s4  ;;  %p10083_p4 = scmp.lt.s32.totalorder %s273_s18, %s273_s18 }
 0x1b3   :  { %p10084_p5 = scmp.lt.s32.totalorder %s10082_s13, %s10078_s4 }
 0x1b5   :  { %p10085_p6 = por %p10084_p5, %p10083_p4 }
 0x1b7   :  { %p10086_p7 = pnand %p10085_p6, %p10079_p3 }
 0x1b9   :  { %10089 = shalt.err (!%p10086_p7)
}
 0x1ba   :  { %275 = dma.hbm_to_vmem [thread:$0]  %s11096_s23, 16, %s273_s18, [#allocation36]  }
 0x1bb   :  { %10090 = dma.done.wait [#allocation4], 1536  }
 0x1bc   :  { %10091 = vsyncadd [#allocation4], 4294965760 }
 0x1bd   :  { %10092 = dma.done.wait [#allocation6], 75264  }
 0x1be   :  { %10093 = vsyncadd [#allocation6], 4294892032 }
 0x1bf   :  { %10094 = dma.done.wait [#allocation9], 192  }
 0x1c0   :  { %10095 = vsyncadd [#allocation9], 4294967104 }
 0x1c1   :  { %10096 = dma.done.wait [#allocation12], 18528  }
 0x1c2   :  { %10097 = vsyncadd [#allocation12], 4294948768 }
 0x1c3   :  { %10098 = dma.done.wait [#allocation15], 96  }
 0x1c4   :  { %10099 = vsyncadd [#allocation15], 4294967200 }
 0x1c5   :  { %10100 = dma.done.wait [#allocation18], 80  }
 0x1c6   :  { %10101 = vsyncadd [#allocation18], 4294967216 }
 0x1c7   :  { %10102 = dma.done.wait [#allocation21], 64  }
 0x1c8   :  { %10103 = vsyncadd [#allocation21], 4294967232 }
 0x1c9   :  { %10104 = dma.done.wait [#allocation24], 6144  }
 0x1ca   :  { %10105 = vsyncadd [#allocation24], 4294961152 }
 0x1cb   :  { %10106 = dma.done.wait [#allocation27], 64  }
 0x1cc   :  { %10107 = vsyncadd [#allocation27], 4294967232 }
 0x1cd   :  { %10108 = dma.done.wait [#allocation30], 48  }
 0x1ce   :  { %10109 = vsyncadd [#allocation30], 4294967248 }
 0x1cf   :  { %10110 = dma.done.wait [#allocation33], 32  }
 0x1d0   :  { %10111 = vsyncadd [#allocation33], 4294967264 }
 0x1d1   :  { %10112 = dma.done.wait [#allocation36], 16  }
 0x1d2   :  { %10113 = vsyncadd [#allocation36], 4294967280  ;;  %v8376_v1 = vld [vmem:[#allocation7 + $0x4] ss:$24 sps:$4 sm:$0xff]   ;;  %v8378_v2 = vld [vmem:[#allocation7] ss:$24 sps:$4 sm:$0xff]  }
 0x1d3   :  { %3954 = vmatprep.subr.bf16.mxu0 %v8376_v1  ;;  %v8379_v3 = vld [vmem:[#allocation7 + $0xc] ss:$24 sps:$4 sm:$0xff]   ;;  %v8383_v5 = vld [vmem:[#allocation7 + $0x8] ss:$24 sps:$4 sm:$0xff]   ;;  %v8385_v7 = vld [vmem:[#allocation7 + $0x3c] ss:$24 sps:$4 sm:$0xff]  }
 0x1d4   :  { %3955 = vmatpush1.bf16.msra.mxu0 %v8378_v2  ;;  %v8381_v4 = vld [vmem:[#allocation7 + $0x34] ss:$24 sps:$4 sm:$0xff]   ;;  %v8384_v6 = vld [vmem:[#allocation7 + $0x30] ss:$24 sps:$4 sm:$0xff]   ;;  %4212 = vmatprep.subr.bf16.mxu1 %v8379_v3  ;;  %v8387_v8 = vld [vmem:[#allocation7 + $0x64] ss:$24 sps:$4 sm:$0xff]  }
 0x1d5   :  { %3956 = vmatprep.subr.bf16.mxu0 %v8381_v4  ;;  %4213 = vmatpush1.bf16.msra.mxu1 %v8383_v5  ;;  %v8389_v9 = vld [vmem:[#allocation7 + $0x38] ss:$24 sps:$4 sm:$0xff]   ;;  %v8391_v11 = vld [vmem:[#allocation7 + $0x6c] ss:$24 sps:$4 sm:$0xff]   ;;  %v8395_v13 = vld [vmem:[#allocation7 + $0x68] ss:$24 sps:$4 sm:$0xff]  }
 0x1d6   :  { %4214 = vmatprep.subr.bf16.mxu1 %v8385_v7  ;;  %v8390_v10 = vld [vmem:[#allocation7 + $0x60] ss:$24 sps:$4 sm:$0xff]   ;;  %v8393_v12 = vld [vmem:[#allocation7 + $0x94] ss:$24 sps:$4 sm:$0xff]   ;;  %v8396_v15 = vld [vmem:[#allocation7 + $0x90] ss:$24 sps:$4 sm:$0xff]  }
 0x1d7   :  { %v8397_v14 = vld [vmem:[#allocation7 + $0x9c] ss:$24 sps:$4 sm:$0xff]   ;;  %v8401_v17 = vld [vmem:[#allocation7 + $0x98] ss:$24 sps:$4 sm:$0xff]   ;;  %v8403_v18 = vld [vmem:[#allocation7 + $0xcc] ss:$24 sps:$4 sm:$0xff]  }
 0x1d8   :  { %3957 = vmatpush1.bf16.msra.mxu0 %v8384_v6  ;;  %v8399_v16 = vld [vmem:[#allocation7 + $0xc4] ss:$24 sps:$4 sm:$0xff]   ;;  %v8402_v19 = vld [vmem:[#allocation7 + $0xc0] ss:$24 sps:$4 sm:$0xff]   ;;  %v8405_v20 = vld [vmem:[#allocation7 + $0xf4] ss:$24 sps:$4 sm:$0xff]  }
 0x1d9   :  { %3958 = vmatprep.subr.bf16.mxu0 %v8387_v8  ;;  %4215 = vmatpush1.bf16.msra.mxu1 %v8389_v9  ;;  %v8407_v21 = vld [vmem:[#allocation7 + $0xc8] ss:$24 sps:$4 sm:$0xff]   ;;  %v8409_v22 = vld [vmem:[#allocation7 + $0xfc] ss:$24 sps:$4 sm:$0xff]   ;;  %v8413_v25 = vld [vmem:[#allocation7 + $0xf8] ss:$24 sps:$4 sm:$0xff]  }
 0x1da   :  { %4216 = vmatprep.subr.bf16.mxu1 %v8391_v11  ;;  %v8408_v23 = vld [vmem:[#allocation7 + $0xf0] ss:$24 sps:$4 sm:$0xff]   ;;  %v8411_v24 = vld [vmem:[#allocation7 + $0x124] ss:$24 sps:$4 sm:$0xff]   ;;  %v8414_v27 = vld [vmem:[#allocation7 + $0x120] ss:$24 sps:$4 sm:$0xff]  }
 0x1db   :  { %v8415_v26 = vld [vmem:[#allocation7 + $0x12c] ss:$24 sps:$4 sm:$0xff]   ;;  %v8419_v29 = vld [vmem:[#allocation7 + $0x128] ss:$24 sps:$4 sm:$0xff]   ;;  %v8421_v30 = vld [vmem:[#allocation7 + $0x15c] ss:$24 sps:$4 sm:$0xff]  }
 0x1dc   :  { %3959 = vmatpush1.bf16.msra.mxu0 %v8390_v10  ;;  %v8417_v28 = vld [vmem:[#allocation7 + $0x154] ss:$24 sps:$4 sm:$0xff]   ;;  %v8420_v31 = vld [vmem:[#allocation7 + $0x150] ss:$24 sps:$4 sm:$0xff]   ;;  %v8423_v32 = vld [vmem:[#allocation7 + $0x184] ss:$24 sps:$4 sm:$0xff]  }
 0x1dd   :  { %3960 = vmatprep.subr.bf16.mxu0 %v8393_v12  ;;  %4217 = vmatpush1.bf16.msra.mxu1 %v8395_v13  ;;  %v8425_v33 = vld [vmem:[#allocation7 + $0x158] ss:$24 sps:$4 sm:$0xff]   ;;  %v8427_v34 = vld [vmem:[#allocation7 + $0x18c] ss:$24 sps:$4 sm:$0xff]   ;;  %v8431_v37 = vld [vmem:[#allocation7 + $0x188] ss:$24 sps:$4 sm:$0xff]  }
 0x1de   :  { %4218 = vmatprep.subr.bf16.mxu1 %v8397_v14  ;;  %v8426_v35 = vld [vmem:[#allocation7 + $0x180] ss:$24 sps:$4 sm:$0xff]   ;;  %v8429_v36 = vld [vmem:[#allocation7 + $0x1b4] ss:$24 sps:$4 sm:$0xff]   ;;  %v8432_v39 = vld [vmem:[#allocation7 + $0x1b0] ss:$24 sps:$4 sm:$0xff]  }
 0x1df   :  { %v8433_v38 = vld [vmem:[#allocation7 + $0x1bc] ss:$24 sps:$4 sm:$0xff]   ;;  %v8437_v41 = vld [vmem:[#allocation7 + $0x1b8] ss:$24 sps:$4 sm:$0xff]   ;;  %v8439_v42 = vld [vmem:[#allocation7 + $0x1ec] ss:$24 sps:$4 sm:$0xff]  }
 0x1e0   :  { %3961 = vmatpush1.bf16.msra.mxu0 %v8396_v15  ;;  %v8435_v40 = vld [vmem:[#allocation7 + $0x1e4] ss:$24 sps:$4 sm:$0xff]   ;;  %v8438_v43 = vld [vmem:[#allocation7 + $0x1e0] ss:$24 sps:$4 sm:$0xff]   ;;  %v8441_v44 = vld [vmem:[#allocation7 + $0x214] ss:$24 sps:$4 sm:$0xff]  }
 0x1e1   :  { %3962 = vmatprep.subr.bf16.mxu0 %v8399_v16  ;;  %4219 = vmatpush1.bf16.msra.mxu1 %v8401_v17  ;;  %v8443_v45 = vld [vmem:[#allocation7 + $0x1e8] ss:$24 sps:$4 sm:$0xff]   ;;  %v8445_v46 = vld [vmem:[#allocation7 + $0x21c] ss:$24 sps:$4 sm:$0xff]   ;;  %vm417_vm0 = vcmask 1043456   ;;  %vm6622_vm1 = vcmask 523264  }
 0x1e2   :  { %4220 = vmatprep.subr.bf16.mxu1 %v8403_v18  ;;  %v346_v47 = vld [vmem:[#allocation3 + $0x8] sm:$0xff]  ;;  %v8447_v52 = vld [vmem:[#allocation7 + $0x244] ss:$24 sps:$4 sm:$0xff]   ;;  %v8449_v53 = vld [vmem:[#allocation7 + $0x218] ss:$24 sps:$4 sm:$0xff]   ;;  %vm7335_vm2 = vcmask 7168  }
 0x1e3   :  { %v370_v48 = vld [vmem:[#allocation5 + $0x8] sm:$0xff]  ;;  %v358_v50 = vpack.c.bf16 %v346_v47, %v346_v47  ;;  %v8450_v56 = vld [vmem:[#allocation7 + $0x240] ss:$24 sps:$4 sm:$0xff]   ;;  %v8457_v60 = vld [vmem:[#allocation7 + $0x27c] ss:$24 sps:$4 sm:$0xff]  }
 0x1e4   :  { %3963 = vmatpush1.bf16.msra.mxu0 %v8402_v19  ;;  %v8444_v49 = vld [vmem:[#allocation7 + $0x210] ss:$24 sps:$4 sm:$0xff]   ;;  %v382_v51 = vpack.c.bf16 %v370_v48, %v370_v48  ;;  %v8451_v55 = vld [vmem:[#allocation7 + $0x24c] ss:$24 sps:$4 sm:$0xff]   ;;  %v8462_v2 = vld [vmem:[#allocation7 + $0x2a0] ss:$24 sps:$4 sm:$0xff]  }
 0x1e5   :  { %3964 = vmatprep.subr.bf16.mxu0 %v8405_v20  ;;  %4221 = vmatpush1.bf16.msra.mxu1 %v8407_v21  ;;  %v8453_v58 = vld [vmem:[#allocation7 + $0x274] ss:$24 sps:$4 sm:$0xff]   ;;  %v8455_v59 = vld [vmem:[#allocation7 + $0x248] ss:$24 sps:$4 sm:$0xff]   ;;  %v8459_v62 = vld [vmem:[#allocation7 + $0x2a4] ss:$24 sps:$4 sm:$0xff]  }
 0x1e6   :  { %4222 = vmatprep.subr.bf16.mxu1 %v8409_v22  ;;  %v406_v54 = vrot.slane %v382_v51, 4  ;;  %v8456_v61 = vld [vmem:[#allocation7 + $0x270] ss:$24 sps:$4 sm:$0xff]   ;;  %v369_v63 = vld [vmem:[#allocation5] sm:$0xff]  ;;  %v8465_v3 = vld [vmem:[#allocation7 + $0x2d4] ss:$24 sps:$4 sm:$0xff]  }
 0x1e7   :  { %v8461_v0 = vld [vmem:[#allocation7 + $0x278] ss:$24 sps:$4 sm:$0xff]   ;;  %v8463_v1 = vld [vmem:[#allocation7 + $0x2ac] ss:$24 sps:$4 sm:$0xff]   ;;  %v381_v4 = vpack.c.bf16 %v369_v63, %v369_v63  ;;  %v8467_v6 = vld [vmem:[#allocation7 + $0x2a8] ss:$24 sps:$4 sm:$0xff]  }
 0x1e8   :  { %3965 = vmatpush1.bf16.msra.mxu0 %v8408_v23  ;;  %v10561_v57 = vsel %vm417_vm0, %v358_v50, %v406_v54  ;;  %v345_v5 = vld [vmem:[#allocation3] sm:$0xff]  ;;  %v8469_v7 = vld [vmem:[#allocation7 + $0x2dc] ss:$24 sps:$4 sm:$0xff]   ;;  %v8468_v8 = vld [vmem:[#allocation7 + $0x2d0] ss:$24 sps:$4 sm:$0xff]  }
 0x1e9   :  { %3966 = vmatprep.subr.bf16.mxu0 %v8411_v24  ;;  %4223 = vmatpush1.bf16.msra.mxu1 %v8413_v25  ;;  %v357_v9 = vpack.c.bf16 %v345_v5, %v345_v5  ;;  %v405_v10 = vrot.slane %v381_v4, 4  ;;  %v8473_v11 = vld [vmem:[#allocation7 + $0x304] ss:$24 sps:$4 sm:$0xff]   ;;  %v8474_v12 = vld [vmem:[#allocation7 + $0x2d8] ss:$24 sps:$4 sm:$0xff]  }
 0x1ea   :  { %4224 = vmatprep.subr.bf16.mxu1 %v8415_v26  ;;  %3986 = vmatprep.mubr.bf16.mxu0 %v10561_v57  ;;  %v8477_v13 = vld [vmem:[#allocation7 + $0x30c] ss:$24 sps:$4 sm:$0xff]   ;;  %v8471_v14 = vld [vmem:[#allocation7 + $0x300] ss:$24 sps:$4 sm:$0xff]   ;;  %v8483_v18 = vld [vmem:[#allocation7 + $0x33c] ss:$24 sps:$4 sm:$0xff]  }
 0x1eb   :  { %4244 = vmatprep.mubr.bf16.mxu1 %v10561_v57  ;;  %v10566_v15 = vsel %vm417_vm0, %v357_v9, %v405_v10  ;;  %v8480_v16 = vld [vmem:[#allocation7 + $0x334] ss:$24 sps:$4 sm:$0xff]   ;;  %v8475_v17 = vld [vmem:[#allocation7 + $0x308] ss:$24 sps:$4 sm:$0xff]   ;;  %v8486_v20 = vld [vmem:[#allocation7 + $0x364] ss:$24 sps:$4 sm:$0xff]  }
 0x1ec   :  { %3967 = vmatpush1.bf16.msra.mxu0 %v8414_v27  ;;  %v8478_v19 = vld [vmem:[#allocation7 + $0x330] ss:$24 sps:$4 sm:$0xff]   ;;  %v8489_v22 = vld [vmem:[#allocation7 + $0x36c] ss:$24 sps:$4 sm:$0xff]   ;;  %v8484_v23 = vld [vmem:[#allocation7 + $0x360] ss:$24 sps:$4 sm:$0xff]  }
 0x1ed   :  { %3968 = vmatprep.subr.bf16.mxu0 %v8417_v28  ;;  %4225 = vmatpush1.bf16.msra.mxu1 %v8419_v29  ;;  %v8481_v21 = vld [vmem:[#allocation7 + $0x338] ss:$24 sps:$4 sm:$0xff]   ;;  %v8492_v24 = vld [vmem:[#allocation7 + $0x394] ss:$24 sps:$4 sm:$0xff]   ;;  %v8487_v25 = vld [vmem:[#allocation7 + $0x368] ss:$24 sps:$4 sm:$0xff]  }
 0x1ee   :  { %4226 = vmatprep.subr.bf16.mxu1 %v8421_v30  ;;  %v8495_v26 = vld [vmem:[#allocation7 + $0x39c] ss:$24 sps:$4 sm:$0xff]   ;;  %v8490_v27 = vld [vmem:[#allocation7 + $0x390] ss:$24 sps:$4 sm:$0xff]   ;;  %v8501_v30 = vld [vmem:[#allocation7 + $0x3cc] ss:$24 sps:$4 sm:$0xff]  }
 0x1ef   :  { %v8498_v28 = vld [vmem:[#allocation7 + $0x3c4] ss:$24 sps:$4 sm:$0xff]   ;;  %v8493_v29 = vld [vmem:[#allocation7 + $0x398] ss:$24 sps:$4 sm:$0xff]   ;;  %v8528_v54 = vld [vmem:[#allocation7 + $0x4b4] ss:$24 sps:$4 sm:$0xff]  }
 0x1f0   :  { %3969 = vmatpush1.bf16.msra.mxu0 %v8420_v31  ;;  %v8496_v31 = vld [vmem:[#allocation7 + $0x3c0] ss:$24 sps:$4 sm:$0xff]   ;;  %v8514_v48 = vld [vmem:[#allocation7 + $0x450] ss:$24 sps:$4 sm:$0xff]   ;;  %v8540_v63 = vld [vmem:[#allocation7 + $0x514] ss:$24 sps:$4 sm:$0xff]  }
 0x1f1   :  { %3970 = vmatprep.subr.bf16.mxu0 %v8423_v32  ;;  %4227 = vmatpush1.bf16.msra.mxu1 %v8425_v33  ;;  %v8504_v32 = vld [vmem:[#allocation7 + $0x3f4] ss:$24 sps:$4 sm:$0xff]   ;;  %v8499_v33 = vld [vmem:[#allocation7 + $0x3c8] ss:$24 sps:$4 sm:$0xff]   ;;  %v8517_v51 = vld [vmem:[#allocation7 + $0x458] ss:$24 sps:$4 sm:$0xff]  }
 0x1f2   :  { %4228 = vmatprep.subr.bf16.mxu1 %v8427_v34  ;;  %v8507_v34 = vld [vmem:[#allocation7 + $0x3fc] ss:$24 sps:$4 sm:$0xff]   ;;  %v8541_v4 = vld [vmem:[#allocation7 + $0x518] ss:$24 sps:$4 sm:$0xff]   ;;  %v8549_v5 = vld [vmem:[#allocation7 + $0x54c] ss:$24 sps:$4 sm:$0xff]  }
 0x1f3   :  { %v8555_v9 = vld [vmem:[#allocation7 + $0x57c] ss:$24 sps:$4 sm:$0xff]   ;;  %v8550_v10 = vld [vmem:[#allocation7 + $0x570] ss:$24 sps:$4 sm:$0xff]  }
 0x1f4   :  { %3971 = vmatpush1.bf16.msra.mxu0 %v8426_v35  ;;  %v8502_v35 = vld [vmem:[#allocation7 + $0x3f0] ss:$24 sps:$4 sm:$0xff]  }
 0x1f5   :  { %3972 = vmatprep.subr.bf16.mxu0 %v8429_v36  ;;  %4229 = vmatpush1.bf16.msra.mxu1 %v8431_v37  ;;  %v8510_v36 = vld [vmem:[#allocation7 + $0x424] ss:$24 sps:$4 sm:$0xff]   ;;  %v8505_v37 = vld [vmem:[#allocation7 + $0x3f8] ss:$24 sps:$4 sm:$0xff]  }
 0x1f6   :  { %4230 = vmatprep.subr.bf16.mxu1 %v8433_v38  ;;  %v8508_v38 = vld [vmem:[#allocation7 + $0x420] ss:$24 sps:$4 sm:$0xff]  }
 0x1f8   :  { %3973 = vmatpush1.bf16.msra.mxu0 %v8432_v39  ;;  %v8513_v39 = vld [vmem:[#allocation7 + $0x42c] ss:$24 sps:$4 sm:$0xff]  }
 0x1f9   :  { %3974 = vmatprep.subr.bf16.mxu0 %v8435_v40  ;;  %4231 = vmatpush1.bf16.msra.mxu1 %v8437_v41  ;;  %v348_v40 = vld [vmem:[#allocation3 + $0x18] sm:$0xff] }
 0x1fa   :  { %4232 = vmatprep.subr.bf16.mxu1 %v8439_v42  ;;  %v372_v41 = vld [vmem:[#allocation5 + $0x18] sm:$0xff]  ;;  %v8516_v42 = vld [vmem:[#allocation7 + $0x454] ss:$24 sps:$4 sm:$0xff]  }
 0x1fc   :  { %3975 = vmatpush1.bf16.msra.mxu0 %v8438_v43  ;;  %v360_v43 = vpack.c.bf16 %v348_v40, %v348_v40  ;;  %v8585_v40 = vld [vmem:[#allocation7 + $0x66c] ss:$24 sps:$4 sm:$0xff]  }
 0x1fd   :  { %3976 = vmatprep.subr.bf16.mxu0 %v8441_v44  ;;  %4233 = vmatpush1.bf16.msra.mxu1 %v8443_v45  ;;  %v384_v44 = vpack.c.bf16 %v372_v41, %v372_v41  ;;  %v8511_v45 = vld [vmem:[#allocation7 + $0x428] ss:$24 sps:$4 sm:$0xff]  }
 0x1fe   :  { %4234 = vmatprep.subr.bf16.mxu1 %v8445_v46  ;;  %v8519_v46 = vld [vmem:[#allocation7 + $0x45c] ss:$24 sps:$4 sm:$0xff]  }
 0x1ff   :  { %v408_v47 = vrot.slane %v384_v44, 4 }
 0x200   :  { %3977 = vmatpush1.bf16.msra.mxu0 %v8444_v49  ;;  %v8522_v49 = vld [vmem:[#allocation7 + $0x484] ss:$24 sps:$4 sm:$0xff]  }
 0x201   :  { %3978 = vmatprep.subr.bf16.mxu0 %v8447_v52  ;;  %4235 = vmatpush1.bf16.msra.mxu1 %v8449_v53  ;;  %v10571_v50 = vsel %vm417_vm0, %v360_v43, %v408_v47  ;;  %v8525_v52 = vld [vmem:[#allocation7 + $0x48c] ss:$24 sps:$4 sm:$0xff]   ;;  %v8520_v53 = vld [vmem:[#allocation7 + $0x480] ss:$24 sps:$4 sm:$0xff]   ;;  %v8586_v47 = vld [vmem:[#allocation7 + $0x690] ss:$24 sps:$4 sm:$0xff]  }
 0x202   :  { %4236 = vmatprep.subr.bf16.mxu1 %v8451_v55  ;;  %v8523_v55 = vld [vmem:[#allocation7 + $0x488] ss:$24 sps:$4 sm:$0xff]   ;;  %v8588_v43 = vld [vmem:[#allocation7 + $0x694] ss:$24 sps:$4 sm:$0xff]  }
 0x204   :  { %3979 = vmatpush1.bf16.msra.mxu0 %v8450_v56  ;;  %v8531_v56 = vld [vmem:[#allocation7 + $0x4bc] ss:$24 sps:$4 sm:$0xff]  }
 0x205   :  { %3980 = vmatprep.subr.bf16.mxu0 %v8453_v58  ;;  %4237 = vmatpush1.bf16.msra.mxu1 %v8455_v59  ;;  %v8526_v58 = vld [vmem:[#allocation7 + $0x4b0] ss:$24 sps:$4 sm:$0xff]   ;;  %v8534_v59 = vld [vmem:[#allocation7 + $0x4e4] ss:$24 sps:$4 sm:$0xff]  }
 0x206   :  { %4238 = vmatprep.subr.bf16.mxu1 %v8457_v60  ;;  %v8529_v60 = vld [vmem:[#allocation7 + $0x4b8] ss:$24 sps:$4 sm:$0xff]  }
 0x208   :  { %3981 = vmatpush1.bf16.msra.mxu0 %v8456_v61  ;;  %v8537_v61 = vld [vmem:[#allocation7 + $0x4ec] ss:$24 sps:$4 sm:$0xff]  }
 0x209   :  { %3982 = vmatprep.subr.bf16.mxu0 %v8459_v62  ;;  %4239 = vmatpush1.bf16.msra.mxu1 %v8461_v0  ;;  %v8532_v62 = vld [vmem:[#allocation7 + $0x4e0] ss:$24 sps:$4 sm:$0xff]  }
 0x20a   :  { %4240 = vmatprep.subr.bf16.mxu1 %v8463_v1  ;;  %v8535_v0 = vld [vmem:[#allocation7 + $0x4e8] ss:$24 sps:$4 sm:$0xff]   ;;  %v8543_v1 = vld [vmem:[#allocation7 + $0x51c] ss:$24 sps:$4 sm:$0xff]  }
 0x20c   :  { %3983 = vmatpush1.bf16.msra.mxu0 %v8462_v2  ;;  %v8538_v2 = vld [vmem:[#allocation7 + $0x510] ss:$24 sps:$4 sm:$0xff]  }
 0x20d   :  { %3984 = vmatprep.subr.bf16.mxu0 %v8465_v3  ;;  %4241 = vmatpush1.bf16.msra.mxu1 %v8467_v6  ;;  %v8546_v3 = vld [vmem:[#allocation7 + $0x544] ss:$24 sps:$4 sm:$0xff]   ;;  %v8544_v6 = vld [vmem:[#allocation7 + $0x540] ss:$24 sps:$4 sm:$0xff]  }
 0x20e   :  { %4242 = vmatprep.subr.bf16.mxu1 %v8469_v7  ;;  %v8552_v7 = vld [vmem:[#allocation7 + $0x574] ss:$24 sps:$4 sm:$0xff]  }
 0x210   :  { %3985 = vmatpush1.bf16.msra.mxu0 %v8468_v8  ;;  %v8547_v8 = vld [vmem:[#allocation7 + $0x548] ss:$24 sps:$4 sm:$0xff]  }
 0x211   :  { %3997 = vmatprep.subr.bf16.mxu0 %v8473_v11  ;;  %4243 = vmatpush1.bf16.msra.mxu1 %v8474_v12  ;;  %v8558_v11 = vld [vmem:[#allocation7 + $0x5a4] ss:$24 sps:$4 sm:$0xff]   ;;  %v371_v12 = vld [vmem:[#allocation5 + $0x10] sm:$0xff] }
 0x212   :  { %4255 = vmatprep.subr.bf16.mxu1 %v8477_v13  ;;  %v8553_v13 = vld [vmem:[#allocation7 + $0x578] ss:$24 sps:$4 sm:$0xff]  }
 0x213   :  { %3987 = vmatmul.mubr.bf16.vlgmr.msra.gmra.mrb[0].mxu0 %v10566_v15 }
 0x214   :  { %3998 = vmatpush1.bf16.msra.mxu0 %v8471_v14  ;;  %4245 = vmatmul.mubr.bf16.vlgmr.msra.gmra.mrb[0].mxu1 %v10566_v15  ;;  %v8561_v14 = vld [vmem:[#allocation7 + $0x5ac] ss:$24 sps:$4 sm:$0xff]  }
 0x215   :  { %3999 = vmatprep.subr.bf16.mxu0 %v8480_v16  ;;  %4256 = vmatpush1.bf16.msra.mxu1 %v8475_v17  ;;  %v8556_v16 = vld [vmem:[#allocation7 + $0x5a0] ss:$24 sps:$4 sm:$0xff]   ;;  %v8564_v17 = vld [vmem:[#allocation7 + $0x5d4] ss:$24 sps:$4 sm:$0xff]  }
 0x216   :  { %4257 = vmatprep.subr.bf16.mxu1 %v8483_v18  ;;  %4029 = vmatprep.mubr.bf16.mxu0 %v10571_v50  ;;  %v383_v18 = vpack.c.bf16 %v371_v12, %v371_v12  ;;  %v8633_v12 = vld [vmem:[#allocation7 + $0x7ec] ss:$24 sps:$4 sm:$0xff]  }
 0x217   :  { %4287 = vmatprep.mubr.bf16.mxu1 %v10571_v50 }
 0x218   :  { %4000 = vmatpush1.bf16.msra.mxu0 %v8478_v19  ;;  %v347_v19 = vld [vmem:[#allocation3 + $0x10] sm:$0xff] }
 0x219   :  { %4001 = vmatprep.subr.bf16.mxu0 %v8486_v20  ;;  %4258 = vmatpush1.bf16.msra.mxu1 %v8481_v21  ;;  %v8559_v20 = vld [vmem:[#allocation7 + $0x5a8] ss:$24 sps:$4 sm:$0xff]   ;;  %v8567_v21 = vld [vmem:[#allocation7 + $0x5dc] ss:$24 sps:$4 sm:$0xff]  }
 0x21a   :  { %4259 = vmatprep.subr.bf16.mxu1 %v8489_v22  ;;  %v8562_v22 = vld [vmem:[#allocation7 + $0x5d0] ss:$24 sps:$4 sm:$0xff]  }
 0x21c   :  { %4002 = vmatpush1.bf16.msra.mxu0 %v8484_v23  ;;  %v359_v23 = vpack.c.bf16 %v347_v19, %v347_v19  ;;  %v8642_v19 = vld [vmem:[#allocation7 + $0x844] ss:$24 sps:$4 sm:$0xff]  }
 0x21d   :  { %4003 = vmatprep.subr.bf16.mxu0 %v8492_v24  ;;  %4260 = vmatpush1.bf16.msra.mxu1 %v8487_v25  ;;  %v407_v24 = vrot.slane %v383_v18, 4  ;;  %v8570_v25 = vld [vmem:[#allocation7 + $0x604] ss:$24 sps:$4 sm:$0xff]   ;;  %v8634_v18 = vld [vmem:[#allocation7 + $0x810] ss:$24 sps:$4 sm:$0xff]  }
 0x21e   :  { %4261 = vmatprep.subr.bf16.mxu1 %v8495_v26  ;;  %v8565_v26 = vld [vmem:[#allocation7 + $0x5d8] ss:$24 sps:$4 sm:$0xff]  }
 0x220   :  { %4004 = vmatpush1.bf16.msra.mxu0 %v8490_v27  ;;  %v8573_v27 = vld [vmem:[#allocation7 + $0x60c] ss:$24 sps:$4 sm:$0xff]  }
 0x221   :  { %4005 = vmatprep.subr.bf16.mxu0 %v8498_v28  ;;  %4262 = vmatpush1.bf16.msra.mxu1 %v8493_v29  ;;  %v8568_v28 = vld [vmem:[#allocation7 + $0x600] ss:$24 sps:$4 sm:$0xff]   ;;  %v10576_v29 = vsel %vm417_vm0, %v359_v23, %v407_v24  ;;  %v8648_v23 = vld [vmem:[#allocation7 + $0x874] ss:$24 sps:$4 sm:$0xff]  }
 0x222   :  { %4263 = vmatprep.subr.bf16.mxu1 %v8501_v30  ;;  %v8576_v30 = vld [vmem:[#allocation7 + $0x634] ss:$24 sps:$4 sm:$0xff]   ;;  %v8643_v24 = vld [vmem:[#allocation7 + $0x848] ss:$24 sps:$4 sm:$0xff]  }
 0x224   :  { %4006 = vmatpush1.bf16.msra.mxu0 %v8496_v31  ;;  %v8571_v31 = vld [vmem:[#allocation7 + $0x608] ss:$24 sps:$4 sm:$0xff]  }
 0x225   :  { %4007 = vmatprep.subr.bf16.mxu0 %v8504_v32  ;;  %4264 = vmatpush1.bf16.msra.mxu1 %v8499_v33  ;;  %v8574_v32 = vld [vmem:[#allocation7 + $0x630] ss:$24 sps:$4 sm:$0xff]   ;;  %v8579_v33 = vld [vmem:[#allocation7 + $0x63c] ss:$24 sps:$4 sm:$0xff]  }
 0x226   :  { %4265 = vmatprep.subr.bf16.mxu1 %v8507_v34  ;;  %v350_v34 = vld [vmem:[#allocation3 + $0x28] sm:$0xff] }
 0x228   :  { %4008 = vmatpush1.bf16.msra.mxu0 %v8502_v35  ;;  %v374_v35 = vld [vmem:[#allocation5 + $0x28] sm:$0xff] }
 0x229   :  { %4009 = vmatprep.subr.bf16.mxu0 %v8510_v36  ;;  %4266 = vmatpush1.bf16.msra.mxu1 %v8505_v37  ;;  %v8582_v36 = vld [vmem:[#allocation7 + $0x664] ss:$24 sps:$4 sm:$0xff]   ;;  %v362_v37 = vpack.c.bf16 %v350_v34, %v350_v34  ;;  %v8655_v34 = vld [vmem:[#allocation7 + $0x8a8] ss:$24 sps:$4 sm:$0xff]  }
 0x22a   :  { %4267 = vmatprep.subr.bf16.mxu1 %v8513_v39  ;;  %v8577_v39 = vld [vmem:[#allocation7 + $0x638] ss:$24 sps:$4 sm:$0xff]  }
 0x22c   :  { %4010 = vmatpush1.bf16.msra.mxu0 %v8508_v38  ;;  %v386_v38 = vpack.c.bf16 %v374_v35, %v374_v35  ;;  %v8660_v35 = vld [vmem:[#allocation7 + $0x8d4] ss:$24 sps:$4 sm:$0xff]  }
 0x22d   :  { %4011 = vmatprep.subr.bf16.mxu0 %v8516_v42  ;;  %4268 = vmatpush1.bf16.msra.mxu1 %v8511_v45  ;;  %v8580_v42 = vld [vmem:[#allocation7 + $0x660] ss:$24 sps:$4 sm:$0xff]  }
 0x22e   :  { %4269 = vmatprep.subr.bf16.mxu1 %v8519_v46  ;;  %v410_v41 = vrot.slane %v386_v38, 4  ;;  %v8583_v45 = vld [vmem:[#allocation7 + $0x668] ss:$24 sps:$4 sm:$0xff]   ;;  %v8591_v46 = vld [vmem:[#allocation7 + $0x69c] ss:$24 sps:$4 sm:$0xff]  }
 0x230   :  { %4012 = vmatpush1.bf16.msra.mxu0 %v8514_v48  ;;  %v10581_v44 = vsel %vm417_vm0, %v362_v37, %v410_v41  ;;  %v8594_v48 = vld [vmem:[#allocation7 + $0x6c4] ss:$24 sps:$4 sm:$0xff]   ;;  %v8658_v41 = vld [vmem:[#allocation7 + $0x8d0] ss:$24 sps:$4 sm:$0xff]  }
 0x231   :  { %4013 = vmatprep.subr.bf16.mxu0 %v8522_v49  ;;  %4270 = vmatpush1.bf16.msra.mxu1 %v8517_v51  ;;  %v8589_v49 = vld [vmem:[#allocation7 + $0x698] ss:$24 sps:$4 sm:$0xff]   ;;  %v8597_v51 = vld [vmem:[#allocation7 + $0x6cc] ss:$24 sps:$4 sm:$0xff]  }
 0x232   :  { %4271 = vmatprep.subr.bf16.mxu1 %v8525_v52  ;;  %v8592_v52 = vld [vmem:[#allocation7 + $0x6c0] ss:$24 sps:$4 sm:$0xff]  }
 0x233   :  { %v349_v37 = vld [vmem:[#allocation3 + $0x20] sm:$0xff] }
 0x234   :  { %4014 = vmatpush1.bf16.msra.mxu0 %v8520_v53  ;;  %v8600_v53 = vld [vmem:[#allocation7 + $0x6f4] ss:$24 sps:$4 sm:$0xff]  }
 0x235   :  { %4015 = vmatprep.subr.bf16.mxu0 %v8528_v54  ;;  %4272 = vmatpush1.bf16.msra.mxu1 %v8523_v55  ;;  %v8595_v54 = vld [vmem:[#allocation7 + $0x6c8] ss:$24 sps:$4 sm:$0xff]   ;;  %v8603_v55 = vld [vmem:[#allocation7 + $0x6fc] ss:$24 sps:$4 sm:$0xff]  }
 0x236   :  { %4273 = vmatprep.subr.bf16.mxu1 %v8531_v56  ;;  %v8598_v56 = vld [vmem:[#allocation7 + $0x6f0] ss:$24 sps:$4 sm:$0xff]  }
 0x238   :  { %4016 = vmatpush1.bf16.msra.mxu0 %v8526_v58  ;;  %v8606_v58 = vld [vmem:[#allocation7 + $0x724] ss:$24 sps:$4 sm:$0xff]  }
 0x239   :  { %4017 = vmatprep.subr.bf16.mxu0 %v8534_v59  ;;  %4274 = vmatpush1.bf16.msra.mxu1 %v8529_v60  ;;  %v8601_v59 = vld [vmem:[#allocation7 + $0x6f8] ss:$24 sps:$4 sm:$0xff]   ;;  %v8609_v60 = vld [vmem:[#allocation7 + $0x72c] ss:$24 sps:$4 sm:$0xff]  }
 0x23a   :  { %4275 = vmatprep.subr.bf16.mxu1 %v8537_v61  ;;  %v8604_v61 = vld [vmem:[#allocation7 + $0x720] ss:$24 sps:$4 sm:$0xff]  }
 0x23c   :  { %4018 = vmatpush1.bf16.msra.mxu0 %v8532_v62  ;;  %v8612_v62 = vld [vmem:[#allocation7 + $0x754] ss:$24 sps:$4 sm:$0xff]  }
 0x23d   :  { %4019 = vmatprep.subr.bf16.mxu0 %v8540_v63  ;;  %4276 = vmatpush1.bf16.msra.mxu1 %v8535_v0  ;;  %v8607_v63 = vld [vmem:[#allocation7 + $0x728] ss:$24 sps:$4 sm:$0xff]   ;;  %v8615_v0 = vld [vmem:[#allocation7 + $0x75c] ss:$24 sps:$4 sm:$0xff]  }
 0x23e   :  { %4277 = vmatprep.subr.bf16.mxu1 %v8543_v1  ;;  %v8610_v1 = vld [vmem:[#allocation7 + $0x750] ss:$24 sps:$4 sm:$0xff]  }
 0x240   :  { %4020 = vmatpush1.bf16.msra.mxu0 %v8538_v2  ;;  %v8618_v2 = vld [vmem:[#allocation7 + $0x784] ss:$24 sps:$4 sm:$0xff]  }
 0x241   :  { %4021 = vmatprep.subr.bf16.mxu0 %v8546_v3  ;;  %4278 = vmatpush1.bf16.msra.mxu1 %v8541_v4  ;;  %v8613_v3 = vld [vmem:[#allocation7 + $0x758] ss:$24 sps:$4 sm:$0xff]   ;;  %v8621_v4 = vld [vmem:[#allocation7 + $0x78c] ss:$24 sps:$4 sm:$0xff]  }
 0x242   :  { %4279 = vmatprep.subr.bf16.mxu1 %v8549_v5  ;;  %v8616_v5 = vld [vmem:[#allocation7 + $0x780] ss:$24 sps:$4 sm:$0xff]  }
 0x244   :  { %4022 = vmatpush1.bf16.msra.mxu0 %v8544_v6  ;;  %v8624_v6 = vld [vmem:[#allocation7 + $0x7b4] ss:$24 sps:$4 sm:$0xff]  }
 0x245   :  { %4023 = vmatprep.subr.bf16.mxu0 %v8552_v7  ;;  %4280 = vmatpush1.bf16.msra.mxu1 %v8547_v8  ;;  %v8619_v7 = vld [vmem:[#allocation7 + $0x788] ss:$24 sps:$4 sm:$0xff]   ;;  %v8627_v8 = vld [vmem:[#allocation7 + $0x7bc] ss:$24 sps:$4 sm:$0xff]  }
 0x246   :  { %4281 = vmatprep.subr.bf16.mxu1 %v8555_v9  ;;  %v8622_v9 = vld [vmem:[#allocation7 + $0x7b0] ss:$24 sps:$4 sm:$0xff]  }
 0x248   :  { %4024 = vmatpush1.bf16.msra.mxu0 %v8550_v10  ;;  %v8630_v10 = vld [vmem:[#allocation7 + $0x7e4] ss:$24 sps:$4 sm:$0xff]  }
 0x249   :  { %4025 = vmatprep.subr.bf16.mxu0 %v8558_v11  ;;  %4282 = vmatpush1.bf16.msra.mxu1 %v8553_v13  ;;  %v8625_v11 = vld [vmem:[#allocation7 + $0x7b8] ss:$24 sps:$4 sm:$0xff]  }
 0x24a   :  { %4283 = vmatprep.subr.bf16.mxu1 %v8561_v14  ;;  %v8628_v13 = vld [vmem:[#allocation7 + $0x7e0] ss:$24 sps:$4 sm:$0xff]   ;;  %v8636_v14 = vld [vmem:[#allocation7 + $0x814] ss:$24 sps:$4 sm:$0xff]  }
 0x24c   :  { %4026 = vmatpush1.bf16.msra.mxu0 %v8556_v16  ;;  %v8631_v16 = vld [vmem:[#allocation7 + $0x7e8] ss:$24 sps:$4 sm:$0xff]  }
 0x24d   :  { %4027 = vmatprep.subr.bf16.mxu0 %v8564_v17  ;;  %4284 = vmatpush1.bf16.msra.mxu1 %v8559_v20  ;;  %v8639_v17 = vld [vmem:[#allocation7 + $0x81c] ss:$24 sps:$4 sm:$0xff]   ;;  %v8637_v20 = vld [vmem:[#allocation7 + $0x818] ss:$24 sps:$4 sm:$0xff]  }
 0x24e   :  { %4285 = vmatprep.subr.bf16.mxu1 %v8567_v21  ;;  %v8645_v21 = vld [vmem:[#allocation7 + $0x84c] ss:$24 sps:$4 sm:$0xff]  }
 0x250   :  { %4028 = vmatpush1.bf16.msra.mxu0 %v8562_v22  ;;  %v8640_v22 = vld [vmem:[#allocation7 + $0x840] ss:$24 sps:$4 sm:$0xff]  }
 0x251   :  { %4040 = vmatprep.subr.bf16.mxu0 %v8570_v25  ;;  %4286 = vmatpush1.bf16.msra.mxu1 %v8565_v26  ;;  %v8646_v25 = vld [vmem:[#allocation7 + $0x870] ss:$24 sps:$4 sm:$0xff]   ;;  %v8651_v26 = vld [vmem:[#allocation7 + $0x87c] ss:$24 sps:$4 sm:$0xff]  }
 0x252   :  { %4298 = vmatprep.subr.bf16.mxu1 %v8573_v27  ;;  %v8649_v27 = vld [vmem:[#allocation7 + $0x878] ss:$24 sps:$4 sm:$0xff]  }
 0x253   :  { %4030 = vmatmul.mubr.bf16.vlgmr.msra.gmra.mrb[0].mxu0 %v10576_v29 }
 0x254   :  { %4041 = vmatpush1.bf16.msra.mxu0 %v8568_v28  ;;  %4288 = vmatmul.mubr.bf16.vlgmr.msra.gmra.mrb[0].mxu1 %v10576_v29  ;;  %v8654_v28 = vld [vmem:[#allocation7 + $0x8a4] ss:$24 sps:$4 sm:$0xff]  }
 0x255   :  { %4042 = vmatprep.subr.bf16.mxu0 %v8576_v30  ;;  %4299 = vmatpush1.bf16.msra.mxu1 %v8571_v31  ;;  %v373_v30 = vld [vmem:[#allocation5 + $0x20] sm:$0xff]  ;;  %v376_v31 = vld [vmem:[#allocation5 + $0x38] sm:$0xff] }
 0x256   :  { %4300 = vmatprep.subr.bf16.mxu1 %v8579_v33  ;;  %4072 = vmatprep.mubr.bf16.mxu0 %v10581_v44  ;;  %v8657_v33 = vld [vmem:[#allocation7 + $0x8ac] ss:$24 sps:$4 sm:$0xff]   ;;  %v388_v38 = vpack.c.bf16 %v376_v31, %v376_v31 }
 0x257   :  { %4330 = vmatprep.mubr.bf16.mxu1 %v10581_v44  ;;  %v8729_v31 = vld [vmem:[#allocation7 + $0xaec] ss:$24 sps:$4 sm:$0xff]  }
 0x258   :  { %4043 = vmatpush1.bf16.msra.mxu0 %v8574_v32  ;;  %v8652_v32 = vld [vmem:[#allocation7 + $0x8a0] ss:$24 sps:$4 sm:$0xff]  }
 0x259   :  { %4044 = vmatprep.subr.bf16.mxu0 %v8582_v36  ;;  %4301 = vmatpush1.bf16.msra.mxu1 %v8577_v39  ;;  %v385_v36 = vpack.c.bf16 %v373_v30, %v373_v30  ;;  %v352_v39 = vld [vmem:[#allocation3 + $0x38] sm:$0xff] }
 0x25a   :  { %4302 = vmatprep.subr.bf16.mxu1 %v8585_v40  ;;  %v8663_v40 = vld [vmem:[#allocation7 + $0x8dc] ss:$24 sps:$4 sm:$0xff]   ;;  %v8721_v30 = vld [vmem:[#allocation7 + $0xab8] ss:$24 sps:$4 sm:$0xff]  }
 0x25c   :  { %4045 = vmatpush1.bf16.msra.mxu0 %v8580_v42  ;;  %v361_v42 = vpack.c.bf16 %v349_v37, %v349_v37  ;;  %v8738_v37 = vld [vmem:[#allocation7 + $0xb44] ss:$24 sps:$4 sm:$0xff]  }
 0x25d   :  { %4046 = vmatprep.subr.bf16.mxu0 %v8588_v43  ;;  %4303 = vmatpush1.bf16.msra.mxu1 %v8583_v45  ;;  %v409_v43 = vrot.slane %v385_v36, 4  ;;  %v8666_v45 = vld [vmem:[#allocation7 + $0x904] ss:$24 sps:$4 sm:$0xff]   ;;  %v8730_v36 = vld [vmem:[#allocation7 + $0xb10] ss:$24 sps:$4 sm:$0xff]  }
 0x25e   :  { %4304 = vmatprep.subr.bf16.mxu1 %v8591_v46  ;;  %v364_v46 = vpack.c.bf16 %v352_v39, %v352_v39  ;;  %v8741_v39 = vld [vmem:[#allocation7 + $0xb4c] ss:$24 sps:$4 sm:$0xff]  }
 0x260   :  { %4047 = vmatpush1.bf16.msra.mxu0 %v8586_v47  ;;  %v412_v47 = vrot.slane %v388_v38, 4  ;;  %v8733_v38 = vld [vmem:[#allocation7 + $0xb18] ss:$24 sps:$4 sm:$0xff]  }
 0x261   :  { %4048 = vmatprep.subr.bf16.mxu0 %v8594_v48  ;;  %4305 = vmatpush1.bf16.msra.mxu1 %v8589_v49  ;;  %v8661_v48 = vld [vmem:[#allocation7 + $0x8d8] ss:$24 sps:$4 sm:$0xff]   ;;  %v8669_v49 = vld [vmem:[#allocation7 + $0x90c] ss:$24 sps:$4 sm:$0xff]  }
 0x262   :  { %4306 = vmatprep.subr.bf16.mxu1 %v8597_v51  ;;  %v8664_v51 = vld [vmem:[#allocation7 + $0x900] ss:$24 sps:$4 sm:$0xff]  }
 0x264   :  { %4049 = vmatpush1.bf16.msra.mxu0 %v8592_v52  ;;  %v10586_v52 = vsel %vm417_vm0, %v361_v42, %v409_v43  ;;  %v8739_v42 = vld [vmem:[#allocation7 + $0xb48] ss:$24 sps:$4 sm:$0xff]  }
 0x265   :  { %4050 = vmatprep.subr.bf16.mxu0 %v8600_v53  ;;  %4307 = vmatpush1.bf16.msra.mxu1 %v8595_v54  ;;  %v8672_v53 = vld [vmem:[#allocation7 + $0x934] ss:$24 sps:$4 sm:$0xff]   ;;  %v10589_v54 = vsel %vm417_vm0, %v364_v46, %v412_v47  ;;  %v8742_v43 = vld [vmem:[#allocation7 + $0xb70] ss:$24 sps:$4 sm:$0xff]   ;;  %v8750_v47 = vld [vmem:[#allocation7 + $0xba4] ss:$24 sps:$4 sm:$0xff]  }
 0x266   :  { %4308 = vmatprep.subr.bf16.mxu1 %v8603_v55  ;;  %v8667_v55 = vld [vmem:[#allocation7 + $0x908] ss:$24 sps:$4 sm:$0xff]   ;;  %v8745_v46 = vld [vmem:[#allocation7 + $0xb78] ss:$24 sps:$4 sm:$0xff]  }
 0x268   :  { %4051 = vmatpush1.bf16.msra.mxu0 %v8598_v56  ;;  %v8675_v56 = vld [vmem:[#allocation7 + $0x93c] ss:$24 sps:$4 sm:$0xff]  }
 0x269   :  { %4052 = vmatprep.subr.bf16.mxu0 %v8606_v58  ;;  %4309 = vmatpush1.bf16.msra.mxu1 %v8601_v59  ;;  %v8670_v58 = vld [vmem:[#allocation7 + $0x930] ss:$24 sps:$4 sm:$0xff]   ;;  %v8678_v59 = vld [vmem:[#allocation7 + $0x964] ss:$24 sps:$4 sm:$0xff]  }
 0x26a   :  { %4310 = vmatprep.subr.bf16.mxu1 %v8609_v60  ;;  %v8673_v60 = vld [vmem:[#allocation7 + $0x938] ss:$24 sps:$4 sm:$0xff]  }
 0x26c   :  { %4053 = vmatpush1.bf16.msra.mxu0 %v8604_v61  ;;  %v8681_v61 = vld [vmem:[#allocation7 + $0x96c] ss:$24 sps:$4 sm:$0xff]  }
 0x26d   :  { %4054 = vmatprep.subr.bf16.mxu0 %v8612_v62  ;;  %4311 = vmatpush1.bf16.msra.mxu1 %v8607_v63  ;;  %v8676_v62 = vld [vmem:[#allocation7 + $0x960] ss:$24 sps:$4 sm:$0xff]   ;;  %v8684_v63 = vld [vmem:[#allocation7 + $0x994] ss:$24 sps:$4 sm:$0xff]  }
 0x26e   :  { %4312 = vmatprep.subr.bf16.mxu1 %v8615_v0  ;;  %v8679_v0 = vld [vmem:[#allocation7 + $0x968] ss:$24 sps:$4 sm:$0xff]  }
 0x270   :  { %4055 = vmatpush1.bf16.msra.mxu0 %v8610_v1  ;;  %v8687_v1 = vld [vmem:[#allocation7 + $0x99c] ss:$24 sps:$4 sm:$0xff]  }
 0x271   :  { %4056 = vmatprep.subr.bf16.mxu0 %v8618_v2  ;;  %4313 = vmatpush1.bf16.msra.mxu1 %v8613_v3  ;;  %v8682_v2 = vld [vmem:[#allocation7 + $0x990] ss:$24 sps:$4 sm:$0xff]   ;;  %v8690_v3 = vld [vmem:[#allocation7 + $0x9c4] ss:$24 sps:$4 sm:$0xff]  }
 0x272   :  { %4314 = vmatprep.subr.bf16.mxu1 %v8621_v4  ;;  %v8685_v4 = vld [vmem:[#allocation7 + $0x998] ss:$24 sps:$4 sm:$0xff]  }
 0x274   :  { %4057 = vmatpush1.bf16.msra.mxu0 %v8616_v5  ;;  %v8693_v5 = vld [vmem:[#allocation7 + $0x9cc] ss:$24 sps:$4 sm:$0xff]  }
 0x275   :  { %4058 = vmatprep.subr.bf16.mxu0 %v8624_v6  ;;  %4315 = vmatpush1.bf16.msra.mxu1 %v8619_v7  ;;  %v8688_v6 = vld [vmem:[#allocation7 + $0x9c0] ss:$24 sps:$4 sm:$0xff]   ;;  %v8696_v7 = vld [vmem:[#allocation7 + $0x9f4] ss:$24 sps:$4 sm:$0xff]  }
 0x276   :  { %4316 = vmatprep.subr.bf16.mxu1 %v8627_v8  ;;  %v8691_v8 = vld [vmem:[#allocation7 + $0x9c8] ss:$24 sps:$4 sm:$0xff]  }
 0x278   :  { %4059 = vmatpush1.bf16.msra.mxu0 %v8622_v9  ;;  %v8699_v9 = vld [vmem:[#allocation7 + $0x9fc] ss:$24 sps:$4 sm:$0xff]  }
 0x279   :  { %4060 = vmatprep.subr.bf16.mxu0 %v8630_v10  ;;  %4317 = vmatpush1.bf16.msra.mxu1 %v8625_v11  ;;  %v8694_v10 = vld [vmem:[#allocation7 + $0x9f0] ss:$24 sps:$4 sm:$0xff]   ;;  %v8702_v11 = vld [vmem:[#allocation7 + $0xa24] ss:$24 sps:$4 sm:$0xff]  }
 0x27a   :  { %4318 = vmatprep.subr.bf16.mxu1 %v8633_v12  ;;  %v8697_v12 = vld [vmem:[#allocation7 + $0x9f8] ss:$24 sps:$4 sm:$0xff]  }
 0x27c   :  { %4061 = vmatpush1.bf16.msra.mxu0 %v8628_v13  ;;  %v8705_v13 = vld [vmem:[#allocation7 + $0xa2c] ss:$24 sps:$4 sm:$0xff]  }
 0x27d   :  { %4062 = vmatprep.subr.bf16.mxu0 %v8636_v14  ;;  %4319 = vmatpush1.bf16.msra.mxu1 %v8631_v16  ;;  %v8700_v14 = vld [vmem:[#allocation7 + $0xa20] ss:$24 sps:$4 sm:$0xff]   ;;  %v8708_v16 = vld [vmem:[#allocation7 + $0xa54] ss:$24 sps:$4 sm:$0xff]  }
 0x27e   :  { %4320 = vmatprep.subr.bf16.mxu1 %v8639_v17  ;;  %v8703_v17 = vld [vmem:[#allocation7 + $0xa28] ss:$24 sps:$4 sm:$0xff]  }
 0x280   :  { %4063 = vmatpush1.bf16.msra.mxu0 %v8634_v18  ;;  %v8711_v18 = vld [vmem:[#allocation7 + $0xa5c] ss:$24 sps:$4 sm:$0xff]  }
 0x281   :  { %4064 = vmatprep.subr.bf16.mxu0 %v8642_v19  ;;  %4321 = vmatpush1.bf16.msra.mxu1 %v8637_v20  ;;  %v8706_v19 = vld [vmem:[#allocation7 + $0xa50] ss:$24 sps:$4 sm:$0xff]   ;;  %v8714_v20 = vld [vmem:[#allocation7 + $0xa84] ss:$24 sps:$4 sm:$0xff]  }
 0x282   :  { %4322 = vmatprep.subr.bf16.mxu1 %v8645_v21  ;;  %v8709_v21 = vld [vmem:[#allocation7 + $0xa58] ss:$24 sps:$4 sm:$0xff]  }
 0x284   :  { %4065 = vmatpush1.bf16.msra.mxu0 %v8640_v22  ;;  %v8717_v22 = vld [vmem:[#allocation7 + $0xa8c] ss:$24 sps:$4 sm:$0xff]  }
 0x285   :  { %4066 = vmatprep.subr.bf16.mxu0 %v8648_v23  ;;  %4323 = vmatpush1.bf16.msra.mxu1 %v8643_v24  ;;  %v8712_v23 = vld [vmem:[#allocation7 + $0xa80] ss:$24 sps:$4 sm:$0xff]   ;;  %v8720_v24 = vld [vmem:[#allocation7 + $0xab4] ss:$24 sps:$4 sm:$0xff]  }
 0x286   :  { %4324 = vmatprep.subr.bf16.mxu1 %v8651_v26  ;;  %v8723_v26 = vld [vmem:[#allocation7 + $0xabc] ss:$24 sps:$4 sm:$0xff]  }
 0x288   :  { %4067 = vmatpush1.bf16.msra.mxu0 %v8646_v25  ;;  %v8715_v25 = vld [vmem:[#allocation7 + $0xa88] ss:$24 sps:$4 sm:$0xff]  }
 0x289   :  { %4068 = vmatprep.subr.bf16.mxu0 %v8654_v28  ;;  %4325 = vmatpush1.bf16.msra.mxu1 %v8649_v27  ;;  %v8718_v27 = vld [vmem:[#allocation7 + $0xab0] ss:$24 sps:$4 sm:$0xff]   ;;  %v8726_v28 = vld [vmem:[#allocation7 + $0xae4] ss:$24 sps:$4 sm:$0xff]  }
 0x28a   :  { %4326 = vmatprep.subr.bf16.mxu1 %v8657_v33  ;;  %v8732_v33 = vld [vmem:[#allocation7 + $0xb14] ss:$24 sps:$4 sm:$0xff]  }
 0x28c   :  { %4069 = vmatpush1.bf16.msra.mxu0 %v8652_v32  ;;  %v8724_v32 = vld [vmem:[#allocation7 + $0xae0] ss:$24 sps:$4 sm:$0xff]  }
 0x28d   :  { %4070 = vmatprep.subr.bf16.mxu0 %v8660_v35  ;;  %4327 = vmatpush1.bf16.msra.mxu1 %v8655_v34  ;;  %v8727_v34 = vld [vmem:[#allocation7 + $0xae8] ss:$24 sps:$4 sm:$0xff]   ;;  %v8735_v35 = vld [vmem:[#allocation7 + $0xb1c] ss:$24 sps:$4 sm:$0xff]  }
 0x28e   :  { %4328 = vmatprep.subr.bf16.mxu1 %v8663_v40  ;;  %v8736_v40 = vld [vmem:[#allocation7 + $0xb40] ss:$24 sps:$4 sm:$0xff]  }
 0x290   :  { %4071 = vmatpush1.bf16.msra.mxu0 %v8658_v41  ;;  %v8744_v41 = vld [vmem:[#allocation7 + $0xb74] ss:$24 sps:$4 sm:$0xff]  }
 0x291   :  { %4083 = vmatprep.subr.bf16.mxu0 %v8666_v45  ;;  %4329 = vmatpush1.bf16.msra.mxu1 %v8661_v48  ;;  %v8747_v45 = vld [vmem:[#allocation7 + $0xb7c] ss:$24 sps:$4 sm:$0xff]  }
 0x292   :  { %4341 = vmatprep.subr.bf16.mxu1 %v8669_v49  ;;  %v375_v48 = vld [vmem:[#allocation5 + $0x30] sm:$0xff]  ;;  %v378_v49 = vld [vmem:[#allocation5 + $0x48] sm:$0xff] }
 0x293   :  { %4073 = vmatmul.mubr.bf16.vlgmr.msra.gmra.mrb[0].mxu0 %v10586_v52 }
 0x294   :  { %4084 = vmatpush1.bf16.msra.mxu0 %v8664_v51  ;;  %4115 = vmatprep.mubr.bf16.mxu0 %v10589_v54  ;;  %v8748_v51 = vld [vmem:[#allocation7 + $0xba0] ss:$24 sps:$4 sm:$0xff]  }
 0x295   :  { %4085 = vmatprep.subr.bf16.mxu0 %v8672_v53  ;;  %4331 = vmatmul.mubr.bf16.vlgmr.msra.gmra.mrb[0].mxu1 %v10586_v52  ;;  %v8753_v53 = vld [vmem:[#allocation7 + $0xbac] ss:$24 sps:$4 sm:$0xff]  }
 0x296   :  { %4342 = vmatpush1.bf16.msra.mxu1 %v8667_v55  ;;  %4373 = vmatprep.mubr.bf16.mxu1 %v10589_v54  ;;  %v8751_v55 = vld [vmem:[#allocation7 + $0xba8] ss:$24 sps:$4 sm:$0xff]  }
 0x297   :  { %4343 = vmatprep.subr.bf16.mxu1 %v8675_v56  ;;  %v8756_v56 = vld [vmem:[#allocation7 + $0xbd4] ss:$24 sps:$4 sm:$0xff]  }
 0x298   :  { %4086 = vmatpush1.bf16.msra.mxu0 %v8670_v58  ;;  %v387_v58 = vpack.c.bf16 %v375_v48, %v375_v48  ;;  %v8814_v48 = vld [vmem:[#allocation7 + $0xdb0] ss:$24 sps:$4 sm:$0xff]  }
 0x299   :  { %4087 = vmatprep.subr.bf16.mxu0 %v8678_v59  ;;  %v351_v59 = vld [vmem:[#allocation3 + $0x30] sm:$0xff] }
 0x29a   :  { %4344 = vmatpush1.bf16.msra.mxu1 %v8673_v60  ;;  %v390_v60 = vpack.c.bf16 %v378_v49, %v378_v49  ;;  %v8817_v49 = vld [vmem:[#allocation7 + $0xdb8] ss:$24 sps:$4 sm:$0xff]  }
 0x29b   :  { %4345 = vmatprep.subr.bf16.mxu1 %v8681_v61  ;;  %v354_v61 = vld [vmem:[#allocation3 + $0x48] sm:$0xff] }
 0x29c   :  { %4088 = vmatpush1.bf16.msra.mxu0 %v8676_v62  ;;  %v8759_v62 = vld [vmem:[#allocation7 + $0xbdc] ss:$24 sps:$4 sm:$0xff]  }
 0x29d   :  { %4089 = vmatprep.subr.bf16.mxu0 %v8684_v63  ;;  %v8754_v63 = vld [vmem:[#allocation7 + $0xbd0] ss:$24 sps:$4 sm:$0xff]  }
 0x29e   :  { %4346 = vmatpush1.bf16.msra.mxu1 %v8679_v0  ;;  %v363_v0 = vpack.c.bf16 %v351_v59, %v351_v59  ;;  %v8831_v59 = vld [vmem:[#allocation7 + $0xe1c] ss:$24 sps:$4 sm:$0xff]  }
 0x29f   :  { %4347 = vmatprep.subr.bf16.mxu1 %v8687_v1  ;;  %v411_v1 = vrot.slane %v387_v58, 4  ;;  %v8828_v58 = vld [vmem:[#allocation7 + $0xe14] ss:$24 sps:$4 sm:$0xff]  }
 0x2a0   :  { %4090 = vmatpush1.bf16.msra.mxu0 %v8682_v2  ;;  %v8762_v2 = vld [vmem:[#allocation7 + $0xc04] ss:$24 sps:$4 sm:$0xff]  }
 0x2a1   :  { %4091 = vmatprep.subr.bf16.mxu0 %v8690_v3  ;;  %v366_v3 = vpack.c.bf16 %v354_v61, %v354_v61  ;;  %v8829_v61 = vld [vmem:[#allocation7 + $0xe18] ss:$24 sps:$4 sm:$0xff]  }
 0x2a2   :  { %4348 = vmatpush1.bf16.msra.mxu1 %v8685_v4  ;;  %v414_v4 = vrot.slane %v390_v60, 4  ;;  %v8826_v60 = vld [vmem:[#allocation7 + $0xe10] ss:$24 sps:$4 sm:$0xff]  }
 0x2a3   :  { %4349 = vmatprep.subr.bf16.mxu1 %v8693_v5  ;;  %v8757_v5 = vld [vmem:[#allocation7 + $0xbd8] ss:$24 sps:$4 sm:$0xff]  }
 0x2a4   :  { %4092 = vmatpush1.bf16.msra.mxu0 %v8688_v6  ;;  %v8765_v6 = vld [vmem:[#allocation7 + $0xc0c] ss:$24 sps:$4 sm:$0xff]  }
 0x2a5   :  { %4093 = vmatprep.subr.bf16.mxu0 %v8696_v7  ;;  %v8760_v7 = vld [vmem:[#allocation7 + $0xc00] ss:$24 sps:$4 sm:$0xff]  }
 0x2a6   :  { %4350 = vmatpush1.bf16.msra.mxu1 %v8691_v8  ;;  %v10596_v8 = vsel %vm417_vm0, %v363_v0, %v411_v1  ;;  %v8832_v0 = vld [vmem:[#allocation7 + $0xe40] ss:$24 sps:$4 sm:$0xff]  }
 0x2a7   :  { %4351 = vmatprep.subr.bf16.mxu1 %v8699_v9  ;;  %v8768_v9 = vld [vmem:[#allocation7 + $0xc34] ss:$24 sps:$4 sm:$0xff]   ;;  %v8835_v1 = vld [vmem:[#allocation7 + $0xe48] ss:$24 sps:$4 sm:$0xff]  }
 0x2a8   :  { %4094 = vmatpush1.bf16.msra.mxu0 %v8694_v10  ;;  %v10599_v10 = vsel %vm417_vm0, %v366_v3, %v414_v4  ;;  %v8843_v3 = vld [vmem:[#allocation7 + $0xe7c] ss:$24 sps:$4 sm:$0xff]   ;;  %v8838_v4 = vld [vmem:[#allocation7 + $0xe70] ss:$24 sps:$4 sm:$0xff]  }
 0x2a9   :  { %4095 = vmatprep.subr.bf16.mxu0 %v8702_v11  ;;  %v8763_v11 = vld [vmem:[#allocation7 + $0xc08] ss:$24 sps:$4 sm:$0xff]  }
 0x2aa   :  { %4352 = vmatpush1.bf16.msra.mxu1 %v8697_v12  ;;  %v8771_v12 = vld [vmem:[#allocation7 + $0xc3c] ss:$24 sps:$4 sm:$0xff]  }
 0x2ab   :  { %4353 = vmatprep.subr.bf16.mxu1 %v8705_v13  ;;  %v8766_v13 = vld [vmem:[#allocation7 + $0xc30] ss:$24 sps:$4 sm:$0xff]  }
 0x2ac   :  { %4096 = vmatpush1.bf16.msra.mxu0 %v8700_v14  ;;  %v8774_v14 = vld [vmem:[#allocation7 + $0xc64] ss:$24 sps:$4 sm:$0xff]  }
 0x2ad   :  { %4097 = vmatprep.subr.bf16.mxu0 %v8708_v16  ;;  %v8769_v16 = vld [vmem:[#allocation7 + $0xc38] ss:$24 sps:$4 sm:$0xff]  }
 0x2ae   :  { %4354 = vmatpush1.bf16.msra.mxu1 %v8703_v17  ;;  %v8777_v17 = vld [vmem:[#allocation7 + $0xc6c] ss:$24 sps:$4 sm:$0xff]  }
 0x2af   :  { %4355 = vmatprep.subr.bf16.mxu1 %v8711_v18  ;;  %v8772_v18 = vld [vmem:[#allocation7 + $0xc60] ss:$24 sps:$4 sm:$0xff]  }
 0x2b0   :  { %4098 = vmatpush1.bf16.msra.mxu0 %v8706_v19  ;;  %v8780_v19 = vld [vmem:[#allocation7 + $0xc94] ss:$24 sps:$4 sm:$0xff]  }
 0x2b1   :  { %4099 = vmatprep.subr.bf16.mxu0 %v8714_v20  ;;  %v8775_v20 = vld [vmem:[#allocation7 + $0xc68] ss:$24 sps:$4 sm:$0xff]  }
 0x2b2   :  { %4356 = vmatpush1.bf16.msra.mxu1 %v8709_v21  ;;  %v8783_v21 = vld [vmem:[#allocation7 + $0xc9c] ss:$24 sps:$4 sm:$0xff]  }
 0x2b3   :  { %4357 = vmatprep.subr.bf16.mxu1 %v8717_v22  ;;  %v8778_v22 = vld [vmem:[#allocation7 + $0xc90] ss:$24 sps:$4 sm:$0xff]  }
 0x2b4   :  { %4100 = vmatpush1.bf16.msra.mxu0 %v8712_v23  ;;  %v8781_v23 = vld [vmem:[#allocation7 + $0xc98] ss:$24 sps:$4 sm:$0xff]  }
 0x2b5   :  { %4101 = vmatprep.subr.bf16.mxu0 %v8720_v24  ;;  %v8786_v24 = vld [vmem:[#allocation7 + $0xcc4] ss:$24 sps:$4 sm:$0xff]  }
 0x2b6   :  { %4358 = vmatpush1.bf16.msra.mxu1 %v8715_v25  ;;  %v8784_v25 = vld [vmem:[#allocation7 + $0xcc0] ss:$24 sps:$4 sm:$0xff]  }
 0x2b7   :  { %4359 = vmatprep.subr.bf16.mxu1 %v8723_v26  ;;  %v8789_v26 = vld [vmem:[#allocation7 + $0xccc] ss:$24 sps:$4 sm:$0xff]  }
 0x2b8   :  { %4102 = vmatpush1.bf16.msra.mxu0 %v8718_v27  ;;  %v8787_v27 = vld [vmem:[#allocation7 + $0xcc8] ss:$24 sps:$4 sm:$0xff]  }
 0x2b9   :  { %4103 = vmatprep.subr.bf16.mxu0 %v8726_v28  ;;  %v8792_v28 = vld [vmem:[#allocation7 + $0xcf4] ss:$24 sps:$4 sm:$0xff]  }
 0x2ba   :  { %4360 = vmatpush1.bf16.msra.mxu1 %v8721_v30  ;;  %v8795_v30 = vld [vmem:[#allocation7 + $0xcfc] ss:$24 sps:$4 sm:$0xff]  }
 0x2bb   :  { %4361 = vmatprep.subr.bf16.mxu1 %v8729_v31  ;;  %v8790_v31 = vld [vmem:[#allocation7 + $0xcf0] ss:$24 sps:$4 sm:$0xff]  }
 0x2bc   :  { %4104 = vmatpush1.bf16.msra.mxu0 %v8724_v32  ;;  %v8793_v32 = vld [vmem:[#allocation7 + $0xcf8] ss:$24 sps:$4 sm:$0xff]  }
 0x2bd   :  { %4105 = vmatprep.subr.bf16.mxu0 %v8732_v33  ;;  %v8798_v33 = vld [vmem:[#allocation7 + $0xd24] ss:$24 sps:$4 sm:$0xff]  }
 0x2be   :  { %4362 = vmatpush1.bf16.msra.mxu1 %v8727_v34  ;;  %v8801_v34 = vld [vmem:[#allocation7 + $0xd2c] ss:$24 sps:$4 sm:$0xff]  }
 0x2bf   :  { %4363 = vmatprep.subr.bf16.mxu1 %v8735_v35  ;;  %v8796_v35 = vld [vmem:[#allocation7 + $0xd20] ss:$24 sps:$4 sm:$0xff]  }
 0x2c0   :  { %4106 = vmatpush1.bf16.msra.mxu0 %v8730_v36  ;;  %v8799_v36 = vld [vmem:[#allocation7 + $0xd28] ss:$24 sps:$4 sm:$0xff]  }
 0x2c1   :  { %4107 = vmatprep.subr.bf16.mxu0 %v8738_v37  ;;  %v8804_v37 = vld [vmem:[#allocation7 + $0xd54] ss:$24 sps:$4 sm:$0xff]  }
 0x2c2   :  { %4364 = vmatpush1.bf16.msra.mxu1 %v8733_v38  ;;  %v8807_v38 = vld [vmem:[#allocation7 + $0xd5c] ss:$24 sps:$4 sm:$0xff]  }
 0x2c3   :  { %4365 = vmatprep.subr.bf16.mxu1 %v8741_v39  ;;  %v8802_v39 = vld [vmem:[#allocation7 + $0xd50] ss:$24 sps:$4 sm:$0xff]  }
 0x2c4   :  { %4108 = vmatpush1.bf16.msra.mxu0 %v8736_v40  ;;  %v8805_v40 = vld [vmem:[#allocation7 + $0xd58] ss:$24 sps:$4 sm:$0xff]  }
 0x2c5   :  { %4109 = vmatprep.subr.bf16.mxu0 %v8744_v41  ;;  %v8810_v41 = vld [vmem:[#allocation7 + $0xd84] ss:$24 sps:$4 sm:$0xff]  }
 0x2c6   :  { %4366 = vmatpush1.bf16.msra.mxu1 %v8739_v42  ;;  %v8813_v42 = vld [vmem:[#allocation7 + $0xd8c] ss:$24 sps:$4 sm:$0xff]  }
 0x2c7   :  { %4367 = vmatprep.subr.bf16.mxu1 %v8747_v45  ;;  %v8811_v45 = vld [vmem:[#allocation7 + $0xd88] ss:$24 sps:$4 sm:$0xff]  }
 0x2c8   :  { %4110 = vmatpush1.bf16.msra.mxu0 %v8742_v43  ;;  %v8808_v43 = vld [vmem:[#allocation7 + $0xd80] ss:$24 sps:$4 sm:$0xff]  }
 0x2c9   :  { %4111 = vmatprep.subr.bf16.mxu0 %v8750_v47  ;;  %v8819_v47 = vld [vmem:[#allocation7 + $0xdbc] ss:$24 sps:$4 sm:$0xff]  }
 0x2ca   :  { %4368 = vmatpush1.bf16.msra.mxu1 %v8745_v46  ;;  %v8816_v46 = vld [vmem:[#allocation7 + $0xdb4] ss:$24 sps:$4 sm:$0xff]  }
 0x2cb   :  { %4369 = vmatprep.subr.bf16.mxu1 %v8753_v53  ;;  %v8825_v53 = vld [vmem:[#allocation7 + $0xdec] ss:$24 sps:$4 sm:$0xff]  }
 0x2cc   :  { %4112 = vmatpush1.bf16.msra.mxu0 %v8748_v51  ;;  %v8822_v51 = vld [vmem:[#allocation7 + $0xde4] ss:$24 sps:$4 sm:$0xff]  }
 0x2cd   :  { %4113 = vmatprep.subr.bf16.mxu0 %v8756_v56  ;;  %v8823_v56 = vld [vmem:[#allocation7 + $0xde8] ss:$24 sps:$4 sm:$0xff]  }
 0x2ce   :  { %4370 = vmatpush1.bf16.msra.mxu1 %v8751_v55  ;;  %v8820_v55 = vld [vmem:[#allocation7 + $0xde0] ss:$24 sps:$4 sm:$0xff]  }
 0x2cf   :  { %4371 = vmatprep.subr.bf16.mxu1 %v8759_v62  ;;  %v8834_v62 = vld [vmem:[#allocation7 + $0xe44] ss:$24 sps:$4 sm:$0xff]  }
 0x2d0   :  { %4114 = vmatpush1.bf16.msra.mxu0 %v8754_v63  ;;  %v8837_v63 = vld [vmem:[#allocation7 + $0xe4c] ss:$24 sps:$4 sm:$0xff]  }
 0x2d1   :  { %4126 = vmatprep.subr.bf16.mxu0 %v8762_v2  ;;  %v8840_v2 = vld [vmem:[#allocation7 + $0xe74] ss:$24 sps:$4 sm:$0xff]  }
 0x2d2   :  { %4372 = vmatpush1.bf16.msra.mxu1 %v8757_v5  ;;  %v8846_v5 = vld [vmem:[#allocation7 + $0xea4] ss:$24 sps:$4 sm:$0xff]  }
 0x2d3   :  { %4116 = vmatmul.mubr.bf16.vlgmr.msra.gmra.mrb[0].mxu0 %v10596_v8  ;;  %4384 = vmatprep.subr.bf16.mxu1 %v8765_v6  ;;  %v8841_v6 = vld [vmem:[#allocation7 + $0xe78] ss:$24 sps:$4 sm:$0xff]  }
 0x2d4   :  { %4127 = vmatpush1.bf16.msra.mxu0 %v8760_v7  ;;  %4158 = vmatprep.mubr.bf16.mxu0 %v10599_v10  ;;  %v377_v7 = vld [vmem:[#allocation5 + $0x40] sm:$0xff] }
 0x2d5   :  { %4128 = vmatprep.subr.bf16.mxu0 %v8768_v9  ;;  %4374 = vmatmul.mubr.bf16.vlgmr.msra.gmra.mrb[0].mxu1 %v10596_v8  ;;  %v380_v9 = vld [vmem:[#allocation5 + $0x58] sm:$0xff] }
 0x2d6   :  { %4385 = vmatpush1.bf16.msra.mxu1 %v8763_v11  ;;  %4416 = vmatprep.mubr.bf16.mxu1 %v10599_v10  ;;  %v8849_v11 = vld [vmem:[#allocation7 + $0xeac] ss:$24 sps:$4 sm:$0xff]  }
 0x2d7   :  { %4386 = vmatprep.subr.bf16.mxu1 %v8771_v12  ;;  %v8844_v12 = vld [vmem:[#allocation7 + $0xea0] ss:$24 sps:$4 sm:$0xff]  }
 0x2d8   :  { %4129 = vmatpush1.bf16.msra.mxu0 %v8766_v13  ;;  %v8852_v13 = vld [vmem:[#allocation7 + $0xed4] ss:$24 sps:$4 sm:$0xff]  }
 0x2d9   :  { %4130 = vmatprep.subr.bf16.mxu0 %v8774_v14  ;;  %v8847_v14 = vld [vmem:[#allocation7 + $0xea8] ss:$24 sps:$4 sm:$0xff]  }
 0x2da   :  { %4387 = vmatpush1.bf16.msra.mxu1 %v8769_v16  ;;  %v353_v16 = vld [vmem:[#allocation3 + $0x40] sm:$0xff] }
 0x2db   :  { %4388 = vmatprep.subr.bf16.mxu1 %v8777_v17  ;;  %v389_v17 = vpack.c.bf16 %v377_v7, %v377_v7  ;;  %v8912_v7 = vld [vmem:[#allocation7 + $0x10b4] ss:$24 sps:$4 sm:$0xff]  }
 0x2dc   :  { %4131 = vmatpush1.bf16.msra.mxu0 %v8772_v18  ;;  %v356_v18 = vld [vmem:[#allocation3 + $0x58] sm:$0xff] }
 0x2dd   :  { %4132 = vmatprep.subr.bf16.mxu0 %v8780_v19  ;;  %v8855_v19 = vld [vmem:[#allocation7 + $0xedc] ss:$24 sps:$4 sm:$0xff]  }
 0x2de   :  { %4389 = vmatpush1.bf16.msra.mxu1 %v8775_v20  ;;  %v392_v20 = vpack.c.bf16 %v380_v9, %v380_v9  ;;  %v8915_v9 = vld [vmem:[#allocation7 + $0x10bc] ss:$24 sps:$4 sm:$0xff]  }
 0x2df   :  { %4390 = vmatprep.subr.bf16.mxu1 %v8783_v21  ;;  %v8850_v21 = vld [vmem:[#allocation7 + $0xed0] ss:$24 sps:$4 sm:$0xff]  }
 0x2e0   :  { %4133 = vmatpush1.bf16.msra.mxu0 %v8778_v22  ;;  %v8853_v22 = vld [vmem:[#allocation7 + $0xed8] ss:$24 sps:$4 sm:$0xff]  }
 0x2e1   :  { %4134 = vmatprep.subr.bf16.mxu0 %v8786_v24  ;;  %v365_v24 = vpack.c.bf16 %v353_v16, %v353_v16  ;;  %v8916_v16 = vld [vmem:[#allocation7 + $0x10e0] ss:$24 sps:$4 sm:$0xff]  }
 0x2e2   :  { %4391 = vmatpush1.bf16.msra.mxu1 %v8781_v23  ;;  %v8858_v23 = vld [vmem:[#allocation7 + $0xf04] ss:$24 sps:$4 sm:$0xff]  }
 0x2e3   :  { %4392 = vmatprep.subr.bf16.mxu1 %v8789_v26  ;;  %v8861_v26 = vld [vmem:[#allocation7 + $0xf0c] ss:$24 sps:$4 sm:$0xff]  }
 0x2e4   :  { %4135 = vmatpush1.bf16.msra.mxu0 %v8784_v25  ;;  %v413_v25 = vrot.slane %v389_v17, 4  ;;  %v8919_v17 = vld [vmem:[#allocation7 + $0x10e8] ss:$24 sps:$4 sm:$0xff]  }
 0x2e5   :  { %4136 = vmatprep.subr.bf16.mxu0 %v8792_v28  ;;  %v416_v28 = vrot.slane %v392_v20, 4  ;;  %v8922_v20 = vld [vmem:[#allocation7 + $0x1110] ss:$24 sps:$4 sm:$0xff]  }
 0x2e6   :  { %4393 = vmatpush1.bf16.msra.mxu1 %v8787_v27  ;;  %v368_v27 = vpack.c.bf16 %v356_v18, %v356_v18  ;;  %v8924_v18 = vld [vmem:[#allocation7 + $0x1114] ss:$24 sps:$4 sm:$0xff]  }
 0x2e7   :  { %4394 = vmatprep.subr.bf16.mxu1 %v8795_v30  ;;  %v8856_v30 = vld [vmem:[#allocation7 + $0xf00] ss:$24 sps:$4 sm:$0xff]  }
 0x2e8   :  { %4137 = vmatpush1.bf16.msra.mxu0 %v8790_v31  ;;  %v10606_v31 = vsel %vm417_vm0, %v365_v24, %v413_v25  ;;  %v8928_v24 = vld [vmem:[#allocation7 + $0x1140] ss:$24 sps:$4 sm:$0xff]  }
 0x2e9   :  { %4138 = vmatprep.subr.bf16.mxu0 %v8798_v33  ;;  %v8864_v33 = vld [vmem:[#allocation7 + $0xf34] ss:$24 sps:$4 sm:$0xff]   ;;  %v8931_v25 = vld [vmem:[#allocation7 + $0x1148] ss:$24 sps:$4 sm:$0xff]  }
 0x2ea   :  { %4395 = vmatpush1.bf16.msra.mxu1 %v8793_v32  ;;  %v8859_v32 = vld [vmem:[#allocation7 + $0xf08] ss:$24 sps:$4 sm:$0xff]  }
 0x2eb   :  { %4396 = vmatprep.subr.bf16.mxu1 %v8801_v34  ;;  %v8867_v34 = vld [vmem:[#allocation7 + $0xf3c] ss:$24 sps:$4 sm:$0xff]  }
 0x2ec   :  { %4139 = vmatpush1.bf16.msra.mxu0 %v8796_v35  ;;  %v10609_v35 = vsel %vm417_vm0, %v368_v27, %v416_v28  ;;  %v8939_v27 = vld [vmem:[#allocation7 + $0x117c] ss:$24 sps:$4 sm:$0xff]   ;;  %v8934_v28 = vld [vmem:[#allocation7 + $0x1170] ss:$24 sps:$4 sm:$0xff]  }
 0x2ed   :  { %4140 = vmatprep.subr.bf16.mxu0 %v8804_v37  ;;  %v8865_v37 = vld [vmem:[#allocation7 + $0xf38] ss:$24 sps:$4 sm:$0xff]  }
 0x2ee   :  { %4397 = vmatpush1.bf16.msra.mxu1 %v8799_v36  ;;  %v8862_v36 = vld [vmem:[#allocation7 + $0xf30] ss:$24 sps:$4 sm:$0xff]  }
 0x2ef   :  { %4398 = vmatprep.subr.bf16.mxu1 %v8807_v38  ;;  %v8870_v38 = vld [vmem:[#allocation7 + $0xf64] ss:$24 sps:$4 sm:$0xff]  }
 0x2f0   :  { %4141 = vmatpush1.bf16.msra.mxu0 %v8802_v39  ;;  %v8873_v39 = vld [vmem:[#allocation7 + $0xf6c] ss:$24 sps:$4 sm:$0xff]  }
 0x2f1   :  { %4142 = vmatprep.subr.bf16.mxu0 %v8810_v41  ;;  %v8871_v41 = vld [vmem:[#allocation7 + $0xf68] ss:$24 sps:$4 sm:$0xff]  }
 0x2f2   :  { %4399 = vmatpush1.bf16.msra.mxu1 %v8805_v40  ;;  %v8868_v40 = vld [vmem:[#allocation7 + $0xf60] ss:$24 sps:$4 sm:$0xff]  }
 0x2f3   :  { %4400 = vmatprep.subr.bf16.mxu1 %v8813_v42  ;;  %v8876_v42 = vld [vmem:[#allocation7 + $0xf94] ss:$24 sps:$4 sm:$0xff]  }
 0x2f4   :  { %4143 = vmatpush1.bf16.msra.mxu0 %v8808_v43  ;;  %v8879_v43 = vld [vmem:[#allocation7 + $0xf9c] ss:$24 sps:$4 sm:$0xff]  }
 0x2f5   :  { %4144 = vmatprep.subr.bf16.mxu0 %v8816_v46  ;;  %v8877_v46 = vld [vmem:[#allocation7 + $0xf98] ss:$24 sps:$4 sm:$0xff]  }
 0x2f6   :  { %4401 = vmatpush1.bf16.msra.mxu1 %v8811_v45  ;;  %v8874_v45 = vld [vmem:[#allocation7 + $0xf90] ss:$24 sps:$4 sm:$0xff]  }
 0x2f7   :  { %4402 = vmatprep.subr.bf16.mxu1 %v8819_v47  ;;  %v8882_v47 = vld [vmem:[#allocation7 + $0xfc4] ss:$24 sps:$4 sm:$0xff]  }
 0x2f8   :  { %4145 = vmatpush1.bf16.msra.mxu0 %v8814_v48  ;;  %v8885_v48 = vld [vmem:[#allocation7 + $0xfcc] ss:$24 sps:$4 sm:$0xff]  }
 0x2f9   :  { %4146 = vmatprep.subr.bf16.mxu0 %v8822_v51  ;;  %v8883_v51 = vld [vmem:[#allocation7 + $0xfc8] ss:$24 sps:$4 sm:$0xff]  }
 0x2fa   :  { %4403 = vmatpush1.bf16.msra.mxu1 %v8817_v49  ;;  %v8880_v49 = vld [vmem:[#allocation7 + $0xfc0] ss:$24 sps:$4 sm:$0xff]  }
 0x2fb   :  { %4404 = vmatprep.subr.bf16.mxu1 %v8825_v53  ;;  %v8888_v53 = vld [vmem:[#allocation7 + $0xff4] ss:$24 sps:$4 sm:$0xff]  }
 0x2fc   :  { %4147 = vmatpush1.bf16.msra.mxu0 %v8820_v55  ;;  %v8891_v55 = vld [vmem:[#allocation7 + $0xffc] ss:$24 sps:$4 sm:$0xff]  }
 0x2fd   :  { %4148 = vmatprep.subr.bf16.mxu0 %v8828_v58  ;;  %v8889_v58 = vld [vmem:[#allocation7 + $0xff8] ss:$24 sps:$4 sm:$0xff]  }
 0x2fe   :  { %4405 = vmatpush1.bf16.msra.mxu1 %v8823_v56  ;;  %v8886_v56 = vld [vmem:[#allocation7 + $0xff0] ss:$24 sps:$4 sm:$0xff]  }
 0x2ff   :  { %4406 = vmatprep.subr.bf16.mxu1 %v8831_v59  ;;  %v8894_v59 = vld [vmem:[#allocation7 + $0x1024] ss:$24 sps:$4 sm:$0xff]  }
 0x300   :  { %4149 = vmatpush1.bf16.msra.mxu0 %v8826_v60  ;;  %v8897_v60 = vld [vmem:[#allocation7 + $0x102c] ss:$24 sps:$4 sm:$0xff]  }
 0x301   :  { %4150 = vmatprep.subr.bf16.mxu0 %v8834_v62  ;;  %v8895_v62 = vld [vmem:[#allocation7 + $0x1028] ss:$24 sps:$4 sm:$0xff]  }
 0x302   :  { %4407 = vmatpush1.bf16.msra.mxu1 %v8829_v61  ;;  %v8892_v61 = vld [vmem:[#allocation7 + $0x1020] ss:$24 sps:$4 sm:$0xff]  }
 0x303   :  { %4408 = vmatprep.subr.bf16.mxu1 %v8837_v63  ;;  %v8900_v63 = vld [vmem:[#allocation7 + $0x1054] ss:$24 sps:$4 sm:$0xff]  }
 0x304   :  { %4151 = vmatpush1.bf16.msra.mxu0 %v8832_v0  ;;  %v8903_v0 = vld [vmem:[#allocation7 + $0x105c] ss:$24 sps:$4 sm:$0xff]  }
 0x305   :  { %4152 = vmatprep.subr.bf16.mxu0 %v8840_v2  ;;  %v8901_v2 = vld [vmem:[#allocation7 + $0x1058] ss:$24 sps:$4 sm:$0xff]  }
 0x306   :  { %4409 = vmatpush1.bf16.msra.mxu1 %v8835_v1  ;;  %v8898_v1 = vld [vmem:[#allocation7 + $0x1050] ss:$24 sps:$4 sm:$0xff]  }
 0x307   :  { %4410 = vmatprep.subr.bf16.mxu1 %v8843_v3  ;;  %v8906_v3 = vld [vmem:[#allocation7 + $0x1084] ss:$24 sps:$4 sm:$0xff]  }
 0x308   :  { %4153 = vmatpush1.bf16.msra.mxu0 %v8838_v4  ;;  %v8909_v4 = vld [vmem:[#allocation7 + $0x108c] ss:$24 sps:$4 sm:$0xff]  }
 0x309   :  { %4154 = vmatprep.subr.bf16.mxu0 %v8846_v5  ;;  %v8904_v5 = vld [vmem:[#allocation7 + $0x1080] ss:$24 sps:$4 sm:$0xff]  }
 0x30a   :  { %4411 = vmatpush1.bf16.msra.mxu1 %v8841_v6  ;;  %v8907_v6 = vld [vmem:[#allocation7 + $0x1088] ss:$24 sps:$4 sm:$0xff]  }
 0x30b   :  { %4412 = vmatprep.subr.bf16.mxu1 %v8849_v11  ;;  %v8910_v11 = vld [vmem:[#allocation7 + $0x10b0] ss:$24 sps:$4 sm:$0xff]  }
 0x30c   :  { %4155 = vmatpush1.bf16.msra.mxu0 %v8844_v12  ;;  %v8913_v12 = vld [vmem:[#allocation7 + $0x10b8] ss:$24 sps:$4 sm:$0xff]  }
 0x30d   :  { %4156 = vmatprep.subr.bf16.mxu0 %v8852_v13  ;;  %v8918_v13 = vld [vmem:[#allocation7 + $0x10e4] ss:$24 sps:$4 sm:$0xff]  }
 0x30e   :  { %4413 = vmatpush1.bf16.msra.mxu1 %v8847_v14  ;;  %v8921_v14 = vld [vmem:[#allocation7 + $0x10ec] ss:$24 sps:$4 sm:$0xff]  }
 0x30f   :  { %4414 = vmatprep.subr.bf16.mxu1 %v8855_v19  ;;  %v8927_v19 = vld [vmem:[#allocation7 + $0x111c] ss:$24 sps:$4 sm:$0xff]  }
 0x310   :  { %4157 = vmatpush1.bf16.msra.mxu0 %v8850_v21  ;;  %v8925_v21 = vld [vmem:[#allocation7 + $0x1118] ss:$24 sps:$4 sm:$0xff]  }
 0x311   :  { %4169 = vmatprep.subr.bf16.mxu0 %v8858_v23  ;;  %v8933_v23 = vld [vmem:[#allocation7 + $0x114c] ss:$24 sps:$4 sm:$0xff]  }
 0x312   :  { %4415 = vmatpush1.bf16.msra.mxu1 %v8853_v22  ;;  %v8930_v22 = vld [vmem:[#allocation7 + $0x1144] ss:$24 sps:$4 sm:$0xff]  }
 0x313   :  { %4159 = vmatmul.mubr.bf16.vlgmr.msra.gmra.mrb[0].mxu0 %v10606_v31  ;;  %4427 = vmatprep.subr.bf16.mxu1 %v8861_v26  ;;  %v8936_v26 = vld [vmem:[#allocation7 + $0x1174] ss:$24 sps:$4 sm:$0xff]  }
 0x314   :  { %4170 = vmatpush1.bf16.msra.mxu0 %v8856_v30  ;;  %4201 = vmatprep.mubr.bf16.mxu0 %v10609_v35  ;;  %v8937_v30 = vld [vmem:[#allocation7 + $0x1178] ss:$24 sps:$4 sm:$0xff]  }
 0x315   :  { %4171 = vmatprep.subr.bf16.mxu0 %v8864_v33  ;;  %4417 = vmatmul.mubr.bf16.vlgmr.msra.gmra.mrb[0].mxu1 %v10606_v31  ;;  %v379_v33 = vld [vmem:[#allocation5 + $0x50] sm:$0xff] }
 0x316   :  { %4428 = vmatpush1.bf16.msra.mxu1 %v8859_v32  ;;  %4459 = vmatprep.mubr.bf16.mxu1 %v10609_v35  ;;  %v8942_v32 = vld [vmem:[#allocation7 + $0x11a4] ss:$24 sps:$4 sm:$0xff]  }
 0x317   :  { %4429 = vmatprep.subr.bf16.mxu1 %v8867_v34  ;;  %v8945_v34 = vld [vmem:[#allocation7 + $0x11ac] ss:$24 sps:$4 sm:$0xff]  }
 0x318   :  { %4172 = vmatpush1.bf16.msra.mxu0 %v8862_v36  ;;  %v8940_v36 = vld [vmem:[#allocation7 + $0x11a0] ss:$24 sps:$4 sm:$0xff]  }
 0x319   :  { %4173 = vmatprep.subr.bf16.mxu0 %v8870_v38  ;;  %v8948_v38 = vld [vmem:[#allocation7 + $0x11d4] ss:$24 sps:$4 sm:$0xff]  }
 0x31a   :  { %4430 = vmatpush1.bf16.msra.mxu1 %v8865_v37  ;;  %v8943_v37 = vld [vmem:[#allocation7 + $0x11a8] ss:$24 sps:$4 sm:$0xff]  }
 0x31b   :  { %4431 = vmatprep.subr.bf16.mxu1 %v8873_v39  ;;  %v355_v39 = vld [vmem:[#allocation3 + $0x50] sm:$0xff] }
 0x31c   :  { %4174 = vmatpush1.bf16.msra.mxu0 %v8868_v40  ;;  %v391_v40 = vpack.c.bf16 %v379_v33, %v379_v33  ;;  %v9012_v33 = vld [vmem:[#allocation7 + $0x3d0] ss:$24 sps:$4 sm:$0xff]  }
 0x31d   :  { %4175 = vmatprep.subr.bf16.mxu0 %v8876_v42  ;;  %v8946_v42 = vld [vmem:[#allocation7 + $0x11d0] ss:$24 sps:$4 sm:$0xff]  }
 0x31e   :  { %4432 = vmatpush1.bf16.msra.mxu1 %v8871_v41  ;;  %v8951_v41 = vld [vmem:[#allocation7 + $0x11dc] ss:$24 sps:$4 sm:$0xff]  }
 0x31f   :  { %4433 = vmatprep.subr.bf16.mxu1 %v8879_v43  ;;  %v8949_v43 = vld [vmem:[#allocation7 + $0x11d8] ss:$24 sps:$4 sm:$0xff]  }
 0x320   :  { %4176 = vmatpush1.bf16.msra.mxu0 %v8874_v45  ;;  %v367_v45 = vpack.c.bf16 %v355_v39, %v355_v39  ;;  %v9026_v39 = vld [vmem:[#allocation7 + $0x494] ss:$24 sps:$4 sm:$0xff]  }
 0x321   :  { %4177 = vmatprep.subr.bf16.mxu0 %v8882_v47  ;;  %v8954_v47 = vld [vmem:[#allocation7 + $0x14] ss:$24 sps:$4 sm:$0xff]  }
 0x322   :  { %4434 = vmatpush1.bf16.msra.mxu1 %v8877_v46  ;;  %v415_v46 = vrot.slane %v391_v40, 4  ;;  %v9024_v40 = vld [vmem:[#allocation7 + $0x490] ss:$24 sps:$4 sm:$0xff]  }
 0x323   :  { %4435 = vmatprep.subr.bf16.mxu1 %v8885_v48 }
 0x324   :  { %4178 = vmatpush1.bf16.msra.mxu0 %v8880_v49  ;;  %v10616_v48 = vsel %vm417_vm0, %v367_v45, %v415_v46  ;;  %v8952_v49 = vld [vmem:[#allocation7 + $0x10] ss:$24 sps:$4 sm:$0xff]   ;;  %v9035_v46 = vld [vmem:[#allocation7 + $0x524] ss:$24 sps:$4 sm:$0xff]  }
 0x325   :  { %4179 = vmatprep.subr.bf16.mxu0 %v8888_v53  ;;  %v8955_v53 = vld [vmem:[#allocation7 + $0x40] ss:$24 sps:$4 sm:$0xff]   ;;  %v9030_v45 = vld [vmem:[#allocation7 + $0x4f0] ss:$24 sps:$4 sm:$0xff]  }
 0x326   :  { %4436 = vmatpush1.bf16.msra.mxu1 %v8883_v51  ;;  %v8957_v51 = vld [vmem:[#allocation7 + $0x44] ss:$24 sps:$4 sm:$0xff]  }
 0x327   :  { %4437 = vmatprep.subr.bf16.mxu1 %v8891_v55  ;;  %v8960_v55 = vld [vmem:[#allocation7 + $0x74] ss:$24 sps:$4 sm:$0xff]  }
 0x328   :  { %4180 = vmatpush1.bf16.msra.mxu0 %v8886_v56  ;;  %v8958_v56 = vld [vmem:[#allocation7 + $0x70] ss:$24 sps:$4 sm:$0xff]  }
 0x329   :  { %4181 = vmatprep.subr.bf16.mxu0 %v8894_v59  ;;  %v8961_v59 = vld [vmem:[#allocation7 + $0xa0] ss:$24 sps:$4 sm:$0xff]  }
 0x32a   :  { %4438 = vmatpush1.bf16.msra.mxu1 %v8889_v58  ;;  %v8963_v58 = vld [vmem:[#allocation7 + $0xa4] ss:$24 sps:$4 sm:$0xff]  }
 0x32b   :  { %4439 = vmatprep.subr.bf16.mxu1 %v8897_v60  ;;  %v8966_v60 = vld [vmem:[#allocation7 + $0xd4] ss:$24 sps:$4 sm:$0xff]  }
 0x32c   :  { %4182 = vmatpush1.bf16.msra.mxu0 %v8892_v61  ;;  %v8964_v61 = vld [vmem:[#allocation7 + $0xd0] ss:$24 sps:$4 sm:$0xff]  }
 0x32d   :  { %4183 = vmatprep.subr.bf16.mxu0 %v8900_v63  ;;  %v8967_v63 = vld [vmem:[#allocation7 + $0x100] ss:$24 sps:$4 sm:$0xff]  }
 0x32e   :  { %4440 = vmatpush1.bf16.msra.mxu1 %v8895_v62  ;;  %v8969_v62 = vld [vmem:[#allocation7 + $0x104] ss:$24 sps:$4 sm:$0xff]  }
 0x32f   :  { %4441 = vmatprep.subr.bf16.mxu1 %v8903_v0  ;;  %v8972_v0 = vld [vmem:[#allocation7 + $0x134] ss:$24 sps:$4 sm:$0xff]  }
 0x330   :  { %4184 = vmatpush1.bf16.msra.mxu0 %v8898_v1  ;;  %v8975_v1 = vld [vmem:[#allocation7 + $0x164] ss:$24 sps:$4 sm:$0xff]  }
 0x331   :  { %4185 = vmatprep.subr.bf16.mxu0 %v8906_v3  ;;  %v8978_v3 = vld [vmem:[#allocation7 + $0x194] ss:$24 sps:$4 sm:$0xff]  }
 0x332   :  { %4442 = vmatpush1.bf16.msra.mxu1 %v8901_v2  ;;  %v8973_v2 = vld [vmem:[#allocation7 + $0x160] ss:$24 sps:$4 sm:$0xff]  }
 0x333   :  { %4443 = vmatprep.subr.bf16.mxu1 %v8909_v4  ;;  %v8976_v4 = vld [vmem:[#allocation7 + $0x190] ss:$24 sps:$4 sm:$0xff]  }
 0x334   :  { %4186 = vmatpush1.bf16.msra.mxu0 %v8904_v5  ;;  %v8981_v5 = vld [vmem:[#allocation7 + $0x1c4] ss:$24 sps:$4 sm:$0xff]  }
 0x335   :  { %4187 = vmatprep.subr.bf16.mxu0 %v8912_v7  ;;  %v8984_v7 = vld [vmem:[#allocation7 + $0x1f4] ss:$24 sps:$4 sm:$0xff]  }
 0x336   :  { %4444 = vmatpush1.bf16.msra.mxu1 %v8907_v6  ;;  %v8979_v6 = vld [vmem:[#allocation7 + $0x1c0] ss:$24 sps:$4 sm:$0xff]  }
 0x337   :  { %4445 = vmatprep.subr.bf16.mxu1 %v8915_v9  ;;  %v8982_v9 = vld [vmem:[#allocation7 + $0x1f0] ss:$24 sps:$4 sm:$0xff]  }
 0x338   :  { %4188 = vmatpush1.bf16.msra.mxu0 %v8910_v11  ;;  %v8987_v11 = vld [vmem:[#allocation7 + $0x224] ss:$24 sps:$4 sm:$0xff]  }
 0x339   :  { %4189 = vmatprep.subr.bf16.mxu0 %v8918_v13  ;;  %v8990_v13 = vld [vmem:[#allocation7 + $0x254] ss:$24 sps:$4 sm:$0xff]  }
 0x33a   :  { %4446 = vmatpush1.bf16.msra.mxu1 %v8913_v12  ;;  %v8985_v12 = vld [vmem:[#allocation7 + $0x220] ss:$24 sps:$4 sm:$0xff]  }
 0x33b   :  { %4447 = vmatprep.subr.bf16.mxu1 %v8921_v14  ;;  %v8988_v14 = vld [vmem:[#allocation7 + $0x250] ss:$24 sps:$4 sm:$0xff]  }
 0x33c   :  { %4190 = vmatpush1.bf16.msra.mxu0 %v8916_v16  ;;  %v8993_v16 = vld [vmem:[#allocation7 + $0x284] ss:$24 sps:$4 sm:$0xff]  }
 0x33d   :  { %4191 = vmatprep.subr.bf16.mxu0 %v8924_v18  ;;  %v8996_v18 = vld [vmem:[#allocation7 + $0x2b4] ss:$24 sps:$4 sm:$0xff]  }
 0x33e   :  { %4448 = vmatpush1.bf16.msra.mxu1 %v8919_v17  ;;  %v8991_v17 = vld [vmem:[#allocation7 + $0x280] ss:$24 sps:$4 sm:$0xff]  }
 0x33f   :  { %4449 = vmatprep.subr.bf16.mxu1 %v8927_v19  ;;  %v8994_v19 = vld [vmem:[#allocation7 + $0x2b0] ss:$24 sps:$4 sm:$0xff]  }
 0x340   :  { %4192 = vmatpush1.bf16.msra.mxu0 %v8922_v20  ;;  %v8999_v20 = vld [vmem:[#allocation7 + $0x2e4] ss:$24 sps:$4 sm:$0xff]  }
 0x341   :  { %4193 = vmatprep.subr.bf16.mxu0 %v8930_v22  ;;  %v9002_v22 = vld [vmem:[#allocation7 + $0x314] ss:$24 sps:$4 sm:$0xff]  }
 0x342   :  { %4450 = vmatpush1.bf16.msra.mxu1 %v8925_v21  ;;  %v8997_v21 = vld [vmem:[#allocation7 + $0x2e0] ss:$24 sps:$4 sm:$0xff]  }
 0x343   :  { %4451 = vmatprep.subr.bf16.mxu1 %v8933_v23  ;;  %v9000_v23 = vld [vmem:[#allocation7 + $0x310] ss:$24 sps:$4 sm:$0xff]  }
 0x344   :  { %4194 = vmatpush1.bf16.msra.mxu0 %v8928_v24  ;;  %v9005_v24 = vld [vmem:[#allocation7 + $0x344] ss:$24 sps:$4 sm:$0xff]  }
 0x345   :  { %4195 = vmatprep.subr.bf16.mxu0 %v8936_v26  ;;  %v9008_v26 = vld [vmem:[#allocation7 + $0x374] ss:$24 sps:$4 sm:$0xff]  }
 0x346   :  { %4452 = vmatpush1.bf16.msra.mxu1 %v8931_v25  ;;  %v9003_v25 = vld [vmem:[#allocation7 + $0x340] ss:$24 sps:$4 sm:$0xff]  }
 0x347   :  { %4453 = vmatprep.subr.bf16.mxu1 %v8939_v27  ;;  %v9006_v27 = vld [vmem:[#allocation7 + $0x370] ss:$24 sps:$4 sm:$0xff]  }
 0x348   :  { %4196 = vmatpush1.bf16.msra.mxu0 %v8934_v28  ;;  %v9011_v28 = vld [vmem:[#allocation7 + $0x3a4] ss:$24 sps:$4 sm:$0xff]  }
 0x349   :  { %4197 = vmatprep.subr.bf16.mxu0 %v8942_v32  ;;  %v9014_v32 = vld [vmem:[#allocation7 + $0x3d4] ss:$24 sps:$4 sm:$0xff]  }
 0x34a   :  { %4454 = vmatpush1.bf16.msra.mxu1 %v8937_v30  ;;  %v9009_v30 = vld [vmem:[#allocation7 + $0x3a0] ss:$24 sps:$4 sm:$0xff]  }
 0x34b   :  { %4455 = vmatprep.subr.bf16.mxu1 %v8945_v34  ;;  %v9017_v34 = vld [vmem:[#allocation7 + $0x404] ss:$24 sps:$4 sm:$0xff]  }
 0x34c   :  { %4198 = vmatpush1.bf16.msra.mxu0 %v8940_v36  ;;  %v9020_v36 = vld [vmem:[#allocation7 + $0x434] ss:$24 sps:$4 sm:$0xff]  }
 0x34d   :  { %4199 = vmatprep.subr.bf16.mxu0 %v8948_v38  ;;  %v9021_v38 = vld [vmem:[#allocation7 + $0x460] ss:$24 sps:$4 sm:$0xff]  }
 0x34e   :  { %4456 = vmatpush1.bf16.msra.mxu1 %v8943_v37  ;;  %v9018_v37 = vld [vmem:[#allocation7 + $0x430] ss:$24 sps:$4 sm:$0xff]  }
 0x34f   :  { %4457 = vmatprep.subr.bf16.mxu1 %v8951_v41  ;;  %v9029_v41 = vld [vmem:[#allocation7 + $0x4c4] ss:$24 sps:$4 sm:$0xff]  }
 0x350   :  { %4200 = vmatpush1.bf16.msra.mxu0 %v8946_v42  ;;  %v9027_v42 = vld [vmem:[#allocation7 + $0x4c0] ss:$24 sps:$4 sm:$0xff]  }
 0x351   :  { %4470 = vmatprep.subr.bf16.mxu0 %v8954_v47  ;;  %v9033_v47 = vld [vmem:[#allocation7 + $0x520] ss:$24 sps:$4 sm:$0xff]  }
 0x352   :  { %4458 = vmatpush1.bf16.msra.mxu1 %v8949_v43  ;;  %v9032_v43 = vld [vmem:[#allocation7 + $0x4f4] ss:$24 sps:$4 sm:$0xff]  }
 0x353   :  { %4202 = vmatmul.mubr.bf16.vlgmr.msra.gmra.mrb[0].mxu0 %v10616_v48 }
 0x354   :  { %4471 = vmatpush1.bf16.msra.mxu0 %v8952_v49  ;;  %4502 = vmatprep.mubr.bf16.mxu0 %v10561_v57  ;;  %v8970_v57 = vld [vmem:[#allocation7 + $0x130] ss:$24 sps:$4 sm:$0xff]   ;;  %v9038_v49 = vld [vmem:[#allocation7 + $0x554] ss:$24 sps:$4 sm:$0xff]  }
 0x355   :  { %4460 = vmatmul.mubr.bf16.vlgmr.msra.gmra.mrb[0].mxu1 %v10616_v48  ;;  %4472 = vmatprep.subr.bf16.mxu0 %v8957_v51  ;;  %v9036_v51 = vld [vmem:[#allocation7 + $0x550] ss:$24 sps:$4 sm:$0xff]  }
 0x358   :  { %4473 = vmatpush1.bf16.msra.mxu0 %v8955_v53  ;;  %v9041_v53 = vld [vmem:[#allocation7 + $0x584] ss:$24 sps:$4 sm:$0xff]  }
 0x359   :  { %4474 = vmatprep.subr.bf16.mxu0 %v8960_v55  ;;  %v9039_v55 = vld [vmem:[#allocation7 + $0x580] ss:$24 sps:$4 sm:$0xff]  }
 0x35c   :  { %4475 = vmatpush1.bf16.msra.mxu0 %v8958_v56  ;;  %v9044_v56 = vld [vmem:[#allocation7 + $0x5b4] ss:$24 sps:$4 sm:$0xff]  }
 0x35d   :  { %4476 = vmatprep.subr.bf16.mxu0 %v8963_v58  ;;  %v9042_v58 = vld [vmem:[#allocation7 + $0x5b0] ss:$24 sps:$4 sm:$0xff]  }
 0x360   :  { %4477 = vmatpush1.bf16.msra.mxu0 %v8961_v59  ;;  %v9047_v59 = vld [vmem:[#allocation7 + $0x5e4] ss:$24 sps:$4 sm:$0xff]  }
 0x361   :  { %4478 = vmatprep.subr.bf16.mxu0 %v8966_v60  ;;  %v9045_v60 = vld [vmem:[#allocation7 + $0x5e0] ss:$24 sps:$4 sm:$0xff]  }
 0x364   :  { %4479 = vmatpush1.bf16.msra.mxu0 %v8964_v61  ;;  %v9050_v61 = vld [vmem:[#allocation7 + $0x614] ss:$24 sps:$4 sm:$0xff]  }
 0x365   :  { %4480 = vmatprep.subr.bf16.mxu0 %v8969_v62  ;;  %v9048_v62 = vld [vmem:[#allocation7 + $0x610] ss:$24 sps:$4 sm:$0xff]  }
 0x368   :  { %4481 = vmatpush1.bf16.msra.mxu0 %v8967_v63  ;;  %v9053_v63 = vld [vmem:[#allocation7 + $0x644] ss:$24 sps:$4 sm:$0xff]  }
 0x369   :  { %4482 = vmatprep.subr.bf16.mxu0 %v8972_v0  ;;  %v9051_v0 = vld [vmem:[#allocation7 + $0x640] ss:$24 sps:$4 sm:$0xff]  }
 0x36c   :  { %4483 = vmatpush1.bf16.msra.mxu0 %v8970_v57  ;;  %v9056_v57 = vld [vmem:[#allocation7 + $0x674] ss:$24 sps:$4 sm:$0xff]  }
 0x36d   :  { %4484 = vmatprep.subr.bf16.mxu0 %v8975_v1  ;;  %v9054_v1 = vld [vmem:[#allocation7 + $0x670] ss:$24 sps:$4 sm:$0xff]  }
 0x370   :  { %4485 = vmatpush1.bf16.msra.mxu0 %v8973_v2  ;;  %v9059_v2 = vld [vmem:[#allocation7 + $0x6a4] ss:$24 sps:$4 sm:$0xff]  }
 0x371   :  { %4486 = vmatprep.subr.bf16.mxu0 %v8978_v3  ;;  %v9057_v3 = vld [vmem:[#allocation7 + $0x6a0] ss:$24 sps:$4 sm:$0xff]  }
 0x374   :  { %4487 = vmatpush1.bf16.msra.mxu0 %v8976_v4  ;;  %v9062_v4 = vld [vmem:[#allocation7 + $0x6d4] ss:$24 sps:$4 sm:$0xff]  }
 0x375   :  { %4488 = vmatprep.subr.bf16.mxu0 %v8981_v5  ;;  %v9060_v5 = vld [vmem:[#allocation7 + $0x6d0] ss:$24 sps:$4 sm:$0xff]  }
 0x378   :  { %4489 = vmatpush1.bf16.msra.mxu0 %v8979_v6  ;;  %v9065_v6 = vld [vmem:[#allocation7 + $0x704] ss:$24 sps:$4 sm:$0xff]  }
 0x379   :  { %4490 = vmatprep.subr.bf16.mxu0 %v8984_v7  ;;  %v9068_v7 = vld [vmem:[#allocation7 + $0x734] ss:$24 sps:$4 sm:$0xff]  }
 0x37c   :  { %4491 = vmatpush1.bf16.msra.mxu0 %v8982_v9  ;;  %v9071_v9 = vld [vmem:[#allocation7 + $0x764] ss:$24 sps:$4 sm:$0xff]  }
 0x37d   :  { %4492 = vmatprep.subr.bf16.mxu0 %v8987_v11  ;;  %v9069_v11 = vld [vmem:[#allocation7 + $0x760] ss:$24 sps:$4 sm:$0xff]  }
 0x380   :  { %4493 = vmatpush1.bf16.msra.mxu0 %v8985_v12  ;;  %v9074_v12 = vld [vmem:[#allocation7 + $0x794] ss:$24 sps:$4 sm:$0xff]  }
 0x381   :  { %4494 = vmatprep.subr.bf16.mxu0 %v8990_v13  ;;  %v9072_v13 = vld [vmem:[#allocation7 + $0x790] ss:$24 sps:$4 sm:$0xff]  }
 0x384   :  { %4495 = vmatpush1.bf16.msra.mxu0 %v8988_v14  ;;  %v9077_v14 = vld [vmem:[#allocation7 + $0x7c4] ss:$24 sps:$4 sm:$0xff]  }
 0x385   :  { %4496 = vmatprep.subr.bf16.mxu0 %v8993_v16  ;;  %v9075_v16 = vld [vmem:[#allocation7 + $0x7c0] ss:$24 sps:$4 sm:$0xff]  }
 0x388   :  { %4497 = vmatpush1.bf16.msra.mxu0 %v8991_v17  ;;  %v9080_v17 = vld [vmem:[#allocation7 + $0x7f4] ss:$24 sps:$4 sm:$0xff]  }
 0x389   :  { %4498 = vmatprep.subr.bf16.mxu0 %v8996_v18  ;;  %v9078_v18 = vld [vmem:[#allocation7 + $0x7f0] ss:$24 sps:$4 sm:$0xff]  }
 0x38c   :  { %4499 = vmatpush1.bf16.msra.mxu0 %v8994_v19  ;;  %v9083_v19 = vld [vmem:[#allocation7 + $0x824] ss:$24 sps:$4 sm:$0xff]  }
 0x38d   :  { %4500 = vmatprep.subr.bf16.mxu0 %v8999_v20  ;;  %v9081_v20 = vld [vmem:[#allocation7 + $0x820] ss:$24 sps:$4 sm:$0xff]  }
 0x390   :  { %4501 = vmatpush1.bf16.msra.mxu0 %v8997_v21  ;;  %v9086_v21 = vld [vmem:[#allocation7 + $0x854] ss:$24 sps:$4 sm:$0xff]  }
 0x391   :  { %4513 = vmatprep.subr.bf16.mxu0 %v9002_v22  ;;  %v9084_v22 = vld [vmem:[#allocation7 + $0x850] ss:$24 sps:$4 sm:$0xff]  }
 0x393   :  { %4503 = vmatmul.mubr.bf16.vlgmr.msra.gmra.mrb[4].mxu0 %v10566_v15  ;;  %v9015_v15 = vld [vmem:[#allocation7 + $0x400] ss:$24 sps:$4 sm:$0xff]  }
 0x394   :  { %4514 = vmatpush1.bf16.msra.mxu0 %v9000_v23  ;;  %4545 = vmatprep.mubr.bf16.mxu0 %v10571_v50  ;;  %v9023_v50 = vld [vmem:[#allocation7 + $0x464] ss:$24 sps:$4 sm:$0xff]  }
 0x395   :  { %4515 = vmatprep.subr.bf16.mxu0 %v9005_v24  ;;  %v9089_v23 = vld [vmem:[#allocation7 + $0x884] ss:$24 sps:$4 sm:$0xff]   ;;  %v9087_v24 = vld [vmem:[#allocation7 + $0x880] ss:$24 sps:$4 sm:$0xff]  }
 0x398   :  { %4516 = vmatpush1.bf16.msra.mxu0 %v9003_v25  ;;  %v9092_v25 = vld [vmem:[#allocation7 + $0x8b4] ss:$24 sps:$4 sm:$0xff]  }
 0x399   :  { %4517 = vmatprep.subr.bf16.mxu0 %v9008_v26  ;;  %v9090_v26 = vld [vmem:[#allocation7 + $0x8b0] ss:$24 sps:$4 sm:$0xff]  }
 0x39c   :  { %4518 = vmatpush1.bf16.msra.mxu0 %v9006_v27  ;;  %v9095_v27 = vld [vmem:[#allocation7 + $0x8e4] ss:$24 sps:$4 sm:$0xff]  }
 0x39d   :  { %4519 = vmatprep.subr.bf16.mxu0 %v9011_v28  ;;  %v9093_v28 = vld [vmem:[#allocation7 + $0x8e0] ss:$24 sps:$4 sm:$0xff]  }
 0x3a0   :  { %4520 = vmatpush1.bf16.msra.mxu0 %v9009_v30  ;;  %v9098_v30 = vld [vmem:[#allocation7 + $0x914] ss:$24 sps:$4 sm:$0xff]  }
 0x3a1   :  { %4521 = vmatprep.subr.bf16.mxu0 %v9014_v32  ;;  %v9096_v32 = vld [vmem:[#allocation7 + $0x910] ss:$24 sps:$4 sm:$0xff]  }
 0x3a4   :  { %4522 = vmatpush1.bf16.msra.mxu0 %v9012_v33  ;;  %v9101_v33 = vld [vmem:[#allocation7 + $0x944] ss:$24 sps:$4 sm:$0xff]  }
 0x3a5   :  { %4523 = vmatprep.subr.bf16.mxu0 %v9017_v34  ;;  %v9099_v34 = vld [vmem:[#allocation7 + $0x940] ss:$24 sps:$4 sm:$0xff]  }
 0x3a8   :  { %4524 = vmatpush1.bf16.msra.mxu0 %v9015_v15  ;;  %v9104_v15 = vld [vmem:[#allocation7 + $0x974] ss:$24 sps:$4 sm:$0xff]  }
 0x3a9   :  { %4525 = vmatprep.subr.bf16.mxu0 %v9020_v36  ;;  %v9102_v36 = vld [vmem:[#allocation7 + $0x970] ss:$24 sps:$4 sm:$0xff]  }
 0x3ac   :  { %4526 = vmatpush1.bf16.msra.mxu0 %v9018_v37  ;;  %v9107_v37 = vld [vmem:[#allocation7 + $0x9a4] ss:$24 sps:$4 sm:$0xff]  }
 0x3ad   :  { %4527 = vmatprep.subr.bf16.mxu0 %v9023_v50  ;;  %v9105_v50 = vld [vmem:[#allocation7 + $0x9a0] ss:$24 sps:$4 sm:$0xff]  }
 0x3b0   :  { %4528 = vmatpush1.bf16.msra.mxu0 %v9021_v38  ;;  %v9110_v38 = vld [vmem:[#allocation7 + $0x9d4] ss:$24 sps:$4 sm:$0xff]  }
 0x3b1   :  { %4529 = vmatprep.subr.bf16.mxu0 %v9026_v39  ;;  %v9108_v39 = vld [vmem:[#allocation7 + $0x9d0] ss:$24 sps:$4 sm:$0xff]  }
 0x3b4   :  { %4530 = vmatpush1.bf16.msra.mxu0 %v9024_v40  ;;  %v9113_v40 = vld [vmem:[#allocation7 + $0xa04] ss:$24 sps:$4 sm:$0xff]  }
 0x3b5   :  { %4531 = vmatprep.subr.bf16.mxu0 %v9029_v41  ;;  %v9116_v41 = vld [vmem:[#allocation7 + $0xa34] ss:$24 sps:$4 sm:$0xff]  }
 0x3b8   :  { %4532 = vmatpush1.bf16.msra.mxu0 %v9027_v42 }
 0x3b9   :  { %4533 = vmatprep.subr.bf16.mxu0 %v9032_v43 }
 0x3bc   :  { %4534 = vmatpush1.bf16.msra.mxu0 %v9030_v45 }
 0x3bd   :  { %4535 = vmatprep.subr.bf16.mxu0 %v9035_v46  ;;  %v9114_v46 = vld [vmem:[#allocation7 + $0xa30] ss:$24 sps:$4 sm:$0xff]  }
 0x3c0   :  { %4536 = vmatpush1.bf16.msra.mxu0 %v9033_v47 }
 0x3c1   :  { %4537 = vmatprep.subr.bf16.mxu0 %v9038_v49 }
 0x3c4   :  { %4538 = vmatpush1.bf16.msra.mxu0 %v9036_v51  ;;  %v9119_v51 = vld [vmem:[#allocation7 + $0xa64] ss:$24 sps:$4 sm:$0xff]  }
 0x3c5   :  { %4539 = vmatprep.subr.bf16.mxu0 %v9041_v53 }
 0x3c8   :  { %4540 = vmatpush1.bf16.msra.mxu0 %v9039_v55 }
 0x3c9   :  { %4541 = vmatprep.subr.bf16.mxu0 %v9044_v56  ;;  %v9117_v56 = vld [vmem:[#allocation7 + $0xa60] ss:$24 sps:$4 sm:$0xff]  }
 0x3cc   :  { %4542 = vmatpush1.bf16.msra.mxu0 %v9042_v58  ;;  %v9122_v58 = vld [vmem:[#allocation7 + $0xa94] ss:$24 sps:$4 sm:$0xff]  }
 0x3cd   :  { %4543 = vmatprep.subr.bf16.mxu0 %v9047_v59  ;;  %v9120_v59 = vld [vmem:[#allocation7 + $0xa90] ss:$24 sps:$4 sm:$0xff]  }
 0x3d0   :  { %4544 = vmatpush1.bf16.msra.mxu0 %v9045_v60  ;;  %v9125_v60 = vld [vmem:[#allocation7 + $0xac4] ss:$24 sps:$4 sm:$0xff]  }
 0x3d1   :  { %4556 = vmatprep.subr.bf16.mxu0 %v9050_v61  ;;  %v9123_v61 = vld [vmem:[#allocation7 + $0xac0] ss:$24 sps:$4 sm:$0xff]  }
 0x3d3   :  { %4546 = vmatmul.mubr.bf16.vlgmr.msra.gmra.mrb[4].mxu0 %v10576_v29  ;;  %v9063_v29 = vld [vmem:[#allocation7 + $0x700] ss:$24 sps:$4 sm:$0xff]  }
 0x3d4   :  { %4557 = vmatpush1.bf16.msra.mxu0 %v9048_v62  ;;  %4588 = vmatprep.mubr.bf16.mxu0 %v10581_v44  ;;  %v9066_v44 = vld [vmem:[#allocation7 + $0x730] ss:$24 sps:$4 sm:$0xff]   ;;  %v9128_v62 = vld [vmem:[#allocation7 + $0xaf4] ss:$24 sps:$4 sm:$0xff]  }
 0x3d5   :  { %4558 = vmatprep.subr.bf16.mxu0 %v9053_v63  ;;  %v9126_v63 = vld [vmem:[#allocation7 + $0xaf0] ss:$24 sps:$4 sm:$0xff]  }
 0x3d8   :  { %4559 = vmatpush1.bf16.msra.mxu0 %v9051_v0  ;;  %v9131_v0 = vld [vmem:[#allocation7 + $0xb24] ss:$24 sps:$4 sm:$0xff]  }
 0x3d9   :  { %4560 = vmatprep.subr.bf16.mxu0 %v9056_v57  ;;  %v9129_v57 = vld [vmem:[#allocation7 + $0xb20] ss:$24 sps:$4 sm:$0xff]  }
 0x3dc   :  { %4561 = vmatpush1.bf16.msra.mxu0 %v9054_v1  ;;  %v9134_v1 = vld [vmem:[#allocation7 + $0xb54] ss:$24 sps:$4 sm:$0xff]  }
 0x3dd   :  { %4562 = vmatprep.subr.bf16.mxu0 %v9059_v2  ;;  %v9132_v2 = vld [vmem:[#allocation7 + $0xb50] ss:$24 sps:$4 sm:$0xff]  }
 0x3e0   :  { %4563 = vmatpush1.bf16.msra.mxu0 %v9057_v3  ;;  %v9137_v3 = vld [vmem:[#allocation7 + $0xb84] ss:$24 sps:$4 sm:$0xff]  }
 0x3e1   :  { %4564 = vmatprep.subr.bf16.mxu0 %v9062_v4  ;;  %v9135_v4 = vld [vmem:[#allocation7 + $0xb80] ss:$24 sps:$4 sm:$0xff]  }
 0x3e4   :  { %4565 = vmatpush1.bf16.msra.mxu0 %v9060_v5  ;;  %v9140_v5 = vld [vmem:[#allocation7 + $0xbb4] ss:$24 sps:$4 sm:$0xff]  }
 0x3e5   :  { %4566 = vmatprep.subr.bf16.mxu0 %v9065_v6  ;;  %v9138_v6 = vld [vmem:[#allocation7 + $0xbb0] ss:$24 sps:$4 sm:$0xff]  }
 0x3e8   :  { %4567 = vmatpush1.bf16.msra.mxu0 %v9063_v29  ;;  %v9143_v29 = vld [vmem:[#allocation7 + $0xbe4] ss:$24 sps:$4 sm:$0xff]  }
 0x3e9   :  { %4568 = vmatprep.subr.bf16.mxu0 %v9068_v7  ;;  %v9141_v7 = vld [vmem:[#allocation7 + $0xbe0] ss:$24 sps:$4 sm:$0xff]  }
 0x3ec   :  { %4569 = vmatpush1.bf16.msra.mxu0 %v9066_v44  ;;  %v9146_v44 = vld [vmem:[#allocation7 + $0xc14] ss:$24 sps:$4 sm:$0xff]  }
 0x3ed   :  { %4570 = vmatprep.subr.bf16.mxu0 %v9071_v9  ;;  %v9144_v9 = vld [vmem:[#allocation7 + $0xc10] ss:$24 sps:$4 sm:$0xff]  }
 0x3f0   :  { %4571 = vmatpush1.bf16.msra.mxu0 %v9069_v11  ;;  %v9149_v11 = vld [vmem:[#allocation7 + $0xc44] ss:$24 sps:$4 sm:$0xff]  }
 0x3f1   :  { %4572 = vmatprep.subr.bf16.mxu0 %v9074_v12  ;;  %v9147_v12 = vld [vmem:[#allocation7 + $0xc40] ss:$24 sps:$4 sm:$0xff]  }
 0x3f4   :  { %4573 = vmatpush1.bf16.msra.mxu0 %v9072_v13  ;;  %v9152_v13 = vld [vmem:[#allocation7 + $0xc74] ss:$24 sps:$4 sm:$0xff]  }
 0x3f5   :  { %4574 = vmatprep.subr.bf16.mxu0 %v9077_v14  ;;  %v9150_v14 = vld [vmem:[#allocation7 + $0xc70] ss:$24 sps:$4 sm:$0xff]  }
 0x3f8   :  { %4575 = vmatpush1.bf16.msra.mxu0 %v9075_v16  ;;  %v9155_v16 = vld [vmem:[#allocation7 + $0xca4] ss:$24 sps:$4 sm:$0xff]  }
 0x3f9   :  { %4576 = vmatprep.subr.bf16.mxu0 %v9080_v17  ;;  %v9153_v17 = vld [vmem:[#allocation7 + $0xca0] ss:$24 sps:$4 sm:$0xff]  }
 0x3fc   :  { %4577 = vmatpush1.bf16.msra.mxu0 %v9078_v18  ;;  %v9158_v18 = vld [vmem:[#allocation7 + $0xcd4] ss:$24 sps:$4 sm:$0xff]  }
 0x3fd   :  { %4578 = vmatprep.subr.bf16.mxu0 %v9083_v19  ;;  %v9156_v19 = vld [vmem:[#allocation7 + $0xcd0] ss:$24 sps:$4 sm:$0xff]  }
 0x400   :  { %4579 = vmatpush1.bf16.msra.mxu0 %v9081_v20  ;;  %v9161_v20 = vld [vmem:[#allocation7 + $0xd04] ss:$24 sps:$4 sm:$0xff]  }
 0x401   :  { %4580 = vmatprep.subr.bf16.mxu0 %v9086_v21  ;;  %v9164_v21 = vld [vmem:[#allocation7 + $0xd34] ss:$24 sps:$4 sm:$0xff]  }
 0x404   :  { %4581 = vmatpush1.bf16.msra.mxu0 %v9084_v22  ;;  %v9167_v22 = vld [vmem:[#allocation7 + $0xd64] ss:$24 sps:$4 sm:$0xff]  }
 0x405   :  { %4582 = vmatprep.subr.bf16.mxu0 %v9089_v23  ;;  %v9165_v23 = vld [vmem:[#allocation7 + $0xd60] ss:$24 sps:$4 sm:$0xff]  }
 0x408   :  { %4583 = vmatpush1.bf16.msra.mxu0 %v9087_v24  ;;  %v9170_v24 = vld [vmem:[#allocation7 + $0xd94] ss:$24 sps:$4 sm:$0xff]  }
 0x409   :  { %4584 = vmatprep.subr.bf16.mxu0 %v9092_v25  ;;  %v9168_v25 = vld [vmem:[#allocation7 + $0xd90] ss:$24 sps:$4 sm:$0xff]  }
 0x40c   :  { %4585 = vmatpush1.bf16.msra.mxu0 %v9090_v26  ;;  %v9173_v26 = vld [vmem:[#allocation7 + $0xdc4] ss:$24 sps:$4 sm:$0xff]  }
 0x40d   :  { %4586 = vmatprep.subr.bf16.mxu0 %v9095_v27  ;;  %v9171_v27 = vld [vmem:[#allocation7 + $0xdc0] ss:$24 sps:$4 sm:$0xff]  }
 0x410   :  { %4587 = vmatpush1.bf16.msra.mxu0 %v9093_v28  ;;  %v9176_v28 = vld [vmem:[#allocation7 + $0xdf4] ss:$24 sps:$4 sm:$0xff]  }
 0x411   :  { %4599 = vmatprep.subr.bf16.mxu0 %v9098_v30  ;;  %v9174_v30 = vld [vmem:[#allocation7 + $0xdf0] ss:$24 sps:$4 sm:$0xff]  }
 0x413   :  { %4589 = vmatmul.mubr.bf16.vlgmr.msra.gmra.mrb[4].mxu0 %v10586_v52  ;;  %v9111_v52 = vld [vmem:[#allocation7 + $0xa00] ss:$24 sps:$4 sm:$0xff]  }
 0x414   :  { %4600 = vmatpush1.bf16.msra.mxu0 %v9096_v32  ;;  %4631 = vmatprep.mubr.bf16.mxu0 %v10589_v54  ;;  %v9179_v32 = vld [vmem:[#allocation7 + $0xe24] ss:$24 sps:$4 sm:$0xff]  }
 0x415   :  { %4601 = vmatprep.subr.bf16.mxu0 %v9101_v33  ;;  %v9177_v33 = vld [vmem:[#allocation7 + $0xe20] ss:$24 sps:$4 sm:$0xff]  }
 0x418   :  { %4602 = vmatpush1.bf16.msra.mxu0 %v9099_v34  ;;  %v9182_v34 = vld [vmem:[#allocation7 + $0xe54] ss:$24 sps:$4 sm:$0xff]  }
 0x419   :  { %4603 = vmatprep.subr.bf16.mxu0 %v9104_v15  ;;  %v9180_v15 = vld [vmem:[#allocation7 + $0xe50] ss:$24 sps:$4 sm:$0xff]  }
 0x41c   :  { %4604 = vmatpush1.bf16.msra.mxu0 %v9102_v36  ;;  %v9185_v36 = vld [vmem:[#allocation7 + $0xe84] ss:$24 sps:$4 sm:$0xff]  }
 0x41d   :  { %4605 = vmatprep.subr.bf16.mxu0 %v9107_v37  ;;  %v9183_v37 = vld [vmem:[#allocation7 + $0xe80] ss:$24 sps:$4 sm:$0xff]  }
 0x420   :  { %4606 = vmatpush1.bf16.msra.mxu0 %v9105_v50  ;;  %v9188_v50 = vld [vmem:[#allocation7 + $0xeb4] ss:$24 sps:$4 sm:$0xff]  }
 0x421   :  { %4607 = vmatprep.subr.bf16.mxu0 %v9110_v38  ;;  %v9186_v38 = vld [vmem:[#allocation7 + $0xeb0] ss:$24 sps:$4 sm:$0xff]  }
 0x424   :  { %4608 = vmatpush1.bf16.msra.mxu0 %v9108_v39  ;;  %v9191_v39 = vld [vmem:[#allocation7 + $0xee4] ss:$24 sps:$4 sm:$0xff]  }
 0x425   :  { %4609 = vmatprep.subr.bf16.mxu0 %v9113_v40  ;;  %v9189_v40 = vld [vmem:[#allocation7 + $0xee0] ss:$24 sps:$4 sm:$0xff]  }
 0x426   :  { %v10627_v42 = vpop.f32.mrb[0].mxu0 }
 0x427   :  { %v10629_v54 = vpop.f32.mrb[1].mxu0 }
 0x428   :  { %v10631_v43 = vpop.f32.mrb[2].mxu0  ;;  %4610 = vmatpush1.bf16.msra.mxu0 %v9111_v52  ;;  %v10633_v45 = vpop.f32.mrb[0].mxu1  ;;  %v9194_v52 = vld [vmem:[#allocation7 + $0xf14] ss:$24 sps:$4 sm:$0xff]  }
 0x429   :  { %v10635_v47 = vpop.f32.mrb[3].mxu0  ;;  %v10637_v49 = vpop.f32.mrb[1].mxu1  ;;  %4611 = vmatprep.subr.bf16.mxu0 %v9116_v41  ;;  %v9192_v41 = vld [vmem:[#allocation7 + $0xf10] ss:$24 sps:$4 sm:$0xff]  }
 0x42a   :  { %v10639_v53 = vpop.f32.mrb[2].mxu1 }
 0x42b   :  { %v10641_v55 = vpop.f32.mrb[3].mxu1 }
 0x42c   :  { %4612 = vmatpush1.bf16.msra.mxu0 %v9114_v46  ;;  %v9197_v46 = vld [vmem:[#allocation7 + $0xf44] ss:$24 sps:$4 sm:$0xff]  }
 0x42d   :  { %4613 = vmatprep.subr.bf16.mxu0 %v9119_v51  ;;  %v9195_v51 = vld [vmem:[#allocation7 + $0xf40] ss:$24 sps:$4 sm:$0xff]  }
 0x430   :  { %4614 = vmatpush1.bf16.msra.mxu0 %v9117_v56  ;;  %v9200_v56 = vld [vmem:[#allocation7 + $0xf74] ss:$24 sps:$4 sm:$0xff]  }
 0x431   :  { %4615 = vmatprep.subr.bf16.mxu0 %v9122_v58  ;;  %v9198_v58 = vld [vmem:[#allocation7 + $0xf70] ss:$24 sps:$4 sm:$0xff]  }
 0x434   :  { %4616 = vmatpush1.bf16.msra.mxu0 %v9120_v59  ;;  %v9203_v59 = vld [vmem:[#allocation7 + $0xfa4] ss:$24 sps:$4 sm:$0xff]  }
 0x435   :  { %4617 = vmatprep.subr.bf16.mxu0 %v9125_v60  ;;  %v9201_v60 = vld [vmem:[#allocation7 + $0xfa0] ss:$24 sps:$4 sm:$0xff]  }
 0x438   :  { %4618 = vmatpush1.bf16.msra.mxu0 %v9123_v61  ;;  %v9206_v61 = vld [vmem:[#allocation7 + $0xfd4] ss:$24 sps:$4 sm:$0xff]  }
 0x439   :  { %4619 = vmatprep.subr.bf16.mxu0 %v9128_v62  ;;  %v9204_v62 = vld [vmem:[#allocation7 + $0xfd0] ss:$24 sps:$4 sm:$0xff]  }
 0x43c   :  { %4620 = vmatpush1.bf16.msra.mxu0 %v9126_v63  ;;  %v9209_v63 = vld [vmem:[#allocation7 + $0x1004] ss:$24 sps:$4 sm:$0xff]  }
 0x43d   :  { %4621 = vmatprep.subr.bf16.mxu0 %v9131_v0  ;;  %v9212_v0 = vld [vmem:[#allocation7 + $0x1034] ss:$24 sps:$4 sm:$0xff]  }
 0x440   :  { %4622 = vmatpush1.bf16.msra.mxu0 %v9129_v57  ;;  %v9215_v57 = vld [vmem:[#allocation7 + $0x1064] ss:$24 sps:$4 sm:$0xff]  }
 0x441   :  { %4623 = vmatprep.subr.bf16.mxu0 %v9134_v1  ;;  %v9213_v1 = vld [vmem:[#allocation7 + $0x1060] ss:$24 sps:$4 sm:$0xff]  }
 0x444   :  { %4624 = vmatpush1.bf16.msra.mxu0 %v9132_v2  ;;  %v9218_v2 = vld [vmem:[#allocation7 + $0x1094] ss:$24 sps:$4 sm:$0xff]  }
 0x445   :  { %4625 = vmatprep.subr.bf16.mxu0 %v9137_v3  ;;  %v9216_v3 = vld [vmem:[#allocation7 + $0x1090] ss:$24 sps:$4 sm:$0xff]  }
 0x448   :  { %4626 = vmatpush1.bf16.msra.mxu0 %v9135_v4  ;;  %v9221_v4 = vld [vmem:[#allocation7 + $0x10c4] ss:$24 sps:$4 sm:$0xff]  }
 0x449   :  { %4627 = vmatprep.subr.bf16.mxu0 %v9140_v5  ;;  %v9219_v5 = vld [vmem:[#allocation7 + $0x10c0] ss:$24 sps:$4 sm:$0xff]  }
 0x44c   :  { %4628 = vmatpush1.bf16.msra.mxu0 %v9138_v6  ;;  %v9224_v6 = vld [vmem:[#allocation7 + $0x10f4] ss:$24 sps:$4 sm:$0xff]  }
 0x44d   :  { %4629 = vmatprep.subr.bf16.mxu0 %v9143_v29  ;;  %v9222_v29 = vld [vmem:[#allocation7 + $0x10f0] ss:$24 sps:$4 sm:$0xff]  }
 0x450   :  { %4630 = vmatpush1.bf16.msra.mxu0 %v9141_v7  ;;  %v9227_v7 = vld [vmem:[#allocation7 + $0x1124] ss:$24 sps:$4 sm:$0xff]  }
 0x451   :  { %4642 = vmatprep.subr.bf16.mxu0 %v9146_v44  ;;  %v9225_v44 = vld [vmem:[#allocation7 + $0x1120] ss:$24 sps:$4 sm:$0xff]  }
 0x453   :  { %4632 = vmatmul.mubr.bf16.vlgmr.msra.gmra.mrb[4].mxu0 %v10596_v8  ;;  %v9159_v8 = vld [vmem:[#allocation7 + $0xd00] ss:$24 sps:$4 sm:$0xff]  }
 0x454   :  { %4643 = vmatpush1.bf16.msra.mxu0 %v9144_v9  ;;  %4674 = vmatprep.mubr.bf16.mxu0 %v10599_v10  ;;  %v9162_v10 = vld [vmem:[#allocation7 + $0xd30] ss:$24 sps:$4 sm:$0xff]   ;;  %v9230_v9 = vld [vmem:[#allocation7 + $0x1154] ss:$24 sps:$4 sm:$0xff]  }
 0x455   :  { %4644 = vmatprep.subr.bf16.mxu0 %v9149_v11  ;;  %v9228_v11 = vld [vmem:[#allocation7 + $0x1150] ss:$24 sps:$4 sm:$0xff]  }
 0x458   :  { %4645 = vmatpush1.bf16.msra.mxu0 %v9147_v12  ;;  %v9233_v12 = vld [vmem:[#allocation7 + $0x1184] ss:$24 sps:$4 sm:$0xff]  }
 0x459   :  { %4646 = vmatprep.subr.bf16.mxu0 %v9152_v13  ;;  %v9231_v13 = vld [vmem:[#allocation7 + $0x1180] ss:$24 sps:$4 sm:$0xff]  }
 0x45c   :  { %4647 = vmatpush1.bf16.msra.mxu0 %v9150_v14  ;;  %v9236_v14 = vld [vmem:[#allocation7 + $0x11b4] ss:$24 sps:$4 sm:$0xff]  }
 0x45d   :  { %4648 = vmatprep.subr.bf16.mxu0 %v9155_v16  ;;  %v9234_v16 = vld [vmem:[#allocation7 + $0x11b0] ss:$24 sps:$4 sm:$0xff]  }
 0x460   :  { %4649 = vmatpush1.bf16.msra.mxu0 %v9153_v17  ;;  %v9239_v17 = vld [vmem:[#allocation7 + $0x11e4] ss:$24 sps:$4 sm:$0xff]  }
 0x461   :  { %4650 = vmatprep.subr.bf16.mxu0 %v9158_v18  ;;  %v9237_v18 = vld [vmem:[#allocation7 + $0x11e0] ss:$24 sps:$4 sm:$0xff]  }
 0x464   :  { %4651 = vmatpush1.bf16.msra.mxu0 %v9156_v19  ;;  %v1044_v19 = vlaneseq }
 0x465   :  { %4652 = vmatprep.subr.bf16.mxu0 %v9161_v20 }
 0x466   :  { %v1045_v20 = vshrl.u32 %v1044_v19, 7 }
 0x468   :  { %4653 = vmatpush1.bf16.msra.mxu0 %v9159_v8  ;;  %v10648_v8 = vsub.s32 0, %v1045_v20 }
 0x469   :  { %4654 = vmatprep.subr.bf16.mxu0 %v9164_v21  ;;  %v10650_v21 = vsub.s32 1, %v1045_v20 }
 0x46c   :  { %4655 = vmatpush1.bf16.msra.mxu0 %v9162_v10  ;;  %v1042_v10 = vld [vmem:[#allocation8] sm:$0x3f] }
 0x46d   :  { %4656 = vmatprep.subr.bf16.mxu0 %v9167_v22  ;;  %v1047_v22 = vrot.slane %v1042_v10, %v10648_v8 }
 0x470   :  { %4657 = vmatpush1.bf16.msra.mxu0 %v9165_v23  ;;  %v1051_v23 = vrot.slane %v1042_v10, %v10650_v21 }
 0x471   :  { %4658 = vmatprep.subr.bf16.mxu0 %v9170_v24  ;;  %v10654_v24 = vsub.s32 2, %v1045_v20 }
 0x474   :  { %4659 = vmatpush1.bf16.msra.mxu0 %v9168_v25  ;;  %v10657_v25 = vadd.f32 %v10627_v42, %v1047_v22 }
 0x475   :  { %4660 = vmatprep.subr.bf16.mxu0 %v9173_v26  ;;  %v10660_v26 = vadd.f32 %v10629_v54, %v1051_v23  ;;  %v10677_v54 = vsub.s32 4, %v1045_v20 }
 0x478   :  { %4661 = vmatpush1.bf16.msra.mxu0 %v9171_v27  ;;  %v10663_v27 = vsub.s32 3, %v1045_v20 }
 0x479   :  { %4662 = vmatprep.subr.bf16.mxu0 %v9176_v28  ;;  %v10666_v28 = vadd.f32 %v10631_v43, %v1047_v22 }
 0x47a   :  { %v1059_v42 = vrot.slane %v1042_v10, %v10663_v27 }
 0x47c   :  { %4663 = vmatpush1.bf16.msra.mxu0 %v9174_v30  ;;  %v10669_v30 = vadd.f32 %v10635_v47, %v1051_v23 }
 0x47d   :  { %4664 = vmatprep.subr.bf16.mxu0 %v9179_v32  ;;  %v4730_v32 = vadd.f32 %v10660_v26, %v10657_v25 }
 0x480   :  { %4665 = vmatpush1.bf16.msra.mxu0 %v9177_v33 }
 0x481   :  { %4666 = vmatprep.subr.bf16.mxu0 %v9182_v34  ;;  %v10679_v34 = vsub.s32 5, %v1045_v20 }
 0x484   :  { %4667 = vmatpush1.bf16.msra.mxu0 %v9180_v15  ;;  %v4737_v15 = vadd.f32 %v10669_v30, %v10666_v28 }
 0x485   :  { %4668 = vmatprep.subr.bf16.mxu0 %v9185_v36  ;;  %v10688_v36 = vadd.f32 %v10637_v49, %v1059_v42 }
 0x488   :  { %4669 = vmatpush1.bf16.msra.mxu0 %v9183_v37  ;;  %v1067_v37 = vrot.slane %v1042_v10, %v10679_v34 }
 0x489   :  { %4670 = vmatprep.subr.bf16.mxu0 %v9188_v50 }
 0x48c   :  { %4671 = vmatpush1.bf16.msra.mxu0 %v9186_v38  ;;  %v10694_v38 = vadd.f32 %v10641_v55, %v1059_v42 }
 0x48d   :  { %4672 = vmatprep.subr.bf16.mxu0 %v9191_v39 }
 0x490   :  { %4673 = vmatpush1.bf16.msra.mxu0 %v9189_v40 }
 0x491   :  { %4685 = vmatprep.subr.bf16.mxu0 %v9194_v52 }
 0x493   :  { %4675 = vmatmul.mubr.bf16.vlgmr.msra.gmra.mrb[4].mxu0 %v10606_v31  ;;  %v9207_v31 = vld [vmem:[#allocation7 + $0x1000] ss:$24 sps:$4 sm:$0xff]  }
 0x494   :  { %4686 = vmatpush1.bf16.msra.mxu0 %v9192_v41  ;;  %4717 = vmatprep.mubr.bf16.mxu0 %v10609_v35  ;;  %v9210_v35 = vld [vmem:[#allocation7 + $0x1030] ss:$24 sps:$4 sm:$0xff]  }
 0x495   :  { %4687 = vmatprep.subr.bf16.mxu0 %v9197_v46 }
 0x498   :  { %4688 = vmatpush1.bf16.msra.mxu0 %v9195_v51 }
 0x499   :  { %4689 = vmatprep.subr.bf16.mxu0 %v9200_v56 }
 0x49c   :  { %4690 = vmatpush1.bf16.msra.mxu0 %v9198_v58 }
 0x49d   :  { %4691 = vmatprep.subr.bf16.mxu0 %v9203_v59 }
 0x4a0   :  { %4692 = vmatpush1.bf16.msra.mxu0 %v9201_v60 }
 0x4a1   :  { %4693 = vmatprep.subr.bf16.mxu0 %v9206_v61 }
 0x4a4   :  { %4694 = vmatpush1.bf16.msra.mxu0 %v9204_v62  ;;  %v9240_v62 = vld [vmem:[#allocation13] ss:$12 sps:$4 sm:$0xff]  }
 0x4a5   :  { %4695 = vmatprep.subr.bf16.mxu0 %v9209_v63  ;;  %v9242_v63 = vld [vmem:[#allocation13 + $0x4] ss:$12 sps:$4 sm:$0xff]  }
 0x4a6   :  { %5884 = vmatprep.subr.bf16.mxu1 %v9242_v63  ;;  %v9270_v63 = vld [vmem:[#allocation13 + $0xf0] ss:$12 sps:$4 sm:$0xff]  }
 0x4a7   :  { %5885 = vmatpush1.bf16.msra.mxu1 %v9240_v62  ;;  %v9267_v62 = vld [vmem:[#allocation13 + $0xd8] ss:$12 sps:$4 sm:$0xff]  }
 0x4a8   :  { %4696 = vmatpush1.bf16.msra.mxu0 %v9207_v31  ;;  %v9245_v31 = vld [vmem:[#allocation13 + $0x1c] ss:$12 sps:$4 sm:$0xff]  }
 0x4a9   :  { %4697 = vmatprep.subr.bf16.mxu0 %v9212_v0  ;;  %v9243_v0 = vld [vmem:[#allocation13 + $0x18] ss:$12 sps:$4 sm:$0xff]   ;;  %5886 = vmatprep.subr.bf16.mxu1 %v9245_v31  ;;  %v9273_v31 = vld [vmem:[#allocation13 + $0x108] ss:$12 sps:$4 sm:$0xff]  }
 0x4ab   :  { %5887 = vmatpush1.bf16.msra.mxu1 %v9243_v0  ;;  %v9275_v0 = vld [vmem:[#allocation13 + $0x10c] ss:$12 sps:$4 sm:$0xff]  }
 0x4ac   :  { %4698 = vmatpush1.bf16.msra.mxu0 %v9210_v35  ;;  %v9248_v35 = vld [vmem:[#allocation13 + $0x34] ss:$12 sps:$4 sm:$0xff]  }
 0x4ad   :  { %4699 = vmatprep.subr.bf16.mxu0 %v9215_v57  ;;  %v9246_v57 = vld [vmem:[#allocation13 + $0x30] ss:$12 sps:$4 sm:$0xff]   ;;  %5888 = vmatprep.subr.bf16.mxu1 %v9248_v35 }
 0x4ae   :  { %v9278_v35 = vld [vmem:[#allocation13 + $0x124] ss:$12 sps:$4 sm:$0xff]  }
 0x4af   :  { %5889 = vmatpush1.bf16.msra.mxu1 %v9246_v57  ;;  %v9276_v57 = vld [vmem:[#allocation13 + $0x120] ss:$12 sps:$4 sm:$0xff]  }
 0x4b0   :  { %4700 = vmatpush1.bf16.msra.mxu0 %v9213_v1  ;;  %v9251_v1 = vld [vmem:[#allocation13 + $0x4c] ss:$12 sps:$4 sm:$0xff]  }
 0x4b1   :  { %4701 = vmatprep.subr.bf16.mxu0 %v9218_v2  ;;  %v9249_v2 = vld [vmem:[#allocation13 + $0x48] ss:$12 sps:$4 sm:$0xff]   ;;  %5890 = vmatprep.subr.bf16.mxu1 %v9251_v1 }
 0x4b2   :  { %v9281_v1 = vld [vmem:[#allocation13 + $0x13c] ss:$12 sps:$4 sm:$0xff]  }
 0x4b3   :  { %5891 = vmatpush1.bf16.msra.mxu1 %v9249_v2  ;;  %v9279_v2 = vld [vmem:[#allocation13 + $0x138] ss:$12 sps:$4 sm:$0xff]  }
 0x4b4   :  { %4702 = vmatpush1.bf16.msra.mxu0 %v9216_v3  ;;  %v9254_v3 = vld [vmem:[#allocation13 + $0x64] ss:$12 sps:$4 sm:$0xff]  }
 0x4b5   :  { %4703 = vmatprep.subr.bf16.mxu0 %v9221_v4  ;;  %v9252_v4 = vld [vmem:[#allocation13 + $0x60] ss:$12 sps:$4 sm:$0xff]   ;;  %5892 = vmatprep.subr.bf16.mxu1 %v9254_v3 }
 0x4b6   :  { %v9284_v3 = vld [vmem:[#allocation13 + $0x154] ss:$12 sps:$4 sm:$0xff]  }
 0x4b7   :  { %5893 = vmatpush1.bf16.msra.mxu1 %v9252_v4  ;;  %v9282_v4 = vld [vmem:[#allocation13 + $0x150] ss:$12 sps:$4 sm:$0xff]  }
 0x4b8   :  { %4704 = vmatpush1.bf16.msra.mxu0 %v9219_v5  ;;  %v9257_v5 = vld [vmem:[#allocation13 + $0x7c] ss:$12 sps:$4 sm:$0xff]  }
 0x4b9   :  { %4705 = vmatprep.subr.bf16.mxu0 %v9224_v6  ;;  %v9255_v6 = vld [vmem:[#allocation13 + $0x78] ss:$12 sps:$4 sm:$0xff]   ;;  %5894 = vmatprep.subr.bf16.mxu1 %v9257_v5 }
 0x4ba   :  { %v9287_v5 = vld [vmem:[#allocation13 + $0x16c] ss:$12 sps:$4 sm:$0xff]  }
 0x4bb   :  { %5895 = vmatpush1.bf16.msra.mxu1 %v9255_v6  ;;  %v9285_v6 = vld [vmem:[#allocation13 + $0x168] ss:$12 sps:$4 sm:$0xff]  }
 0x4bc   :  { %4706 = vmatpush1.bf16.msra.mxu0 %v9222_v29  ;;  %v9260_v29 = vld [vmem:[#allocation13 + $0x94] ss:$12 sps:$4 sm:$0xff]  }
 0x4bd   :  { %4707 = vmatprep.subr.bf16.mxu0 %v9227_v7  ;;  %v9258_v7 = vld [vmem:[#allocation13 + $0x90] ss:$12 sps:$4 sm:$0xff]   ;;  %5896 = vmatprep.subr.bf16.mxu1 %v9260_v29 }
 0x4be   :  { %v9290_v29 = vld [vmem:[#allocation13 + $0x184] ss:$12 sps:$4 sm:$0xff]  }
 0x4bf   :  { %5897 = vmatpush1.bf16.msra.mxu1 %v9258_v7 }
 0x4c0   :  { %4708 = vmatpush1.bf16.msra.mxu0 %v9225_v44  ;;  %v9263_v44 = vld [vmem:[#allocation13 + $0xac] ss:$12 sps:$4 sm:$0xff]  }
 0x4c1   :  { %4709 = vmatprep.subr.bf16.mxu0 %v9230_v9  ;;  %v9261_v9 = vld [vmem:[#allocation13 + $0xa8] ss:$12 sps:$4 sm:$0xff]   ;;  %5898 = vmatprep.subr.bf16.mxu1 %v9263_v44 }
 0x4c3   :  { %5899 = vmatpush1.bf16.msra.mxu1 %v9261_v9 }
 0x4c4   :  { %4710 = vmatpush1.bf16.msra.mxu0 %v9228_v11  ;;  %v9266_v11 = vld [vmem:[#allocation13 + $0xc4] ss:$12 sps:$4 sm:$0xff]  }
 0x4c5   :  { %4711 = vmatprep.subr.bf16.mxu0 %v9233_v12  ;;  %v9264_v12 = vld [vmem:[#allocation13 + $0xc0] ss:$12 sps:$4 sm:$0xff]   ;;  %5900 = vmatprep.subr.bf16.mxu1 %v9266_v11 }
 0x4c7   :  { %5901 = vmatpush1.bf16.msra.mxu1 %v9264_v12 }
 0x4c8   :  { %4712 = vmatpush1.bf16.msra.mxu0 %v9231_v13 }
 0x4c9   :  { %4713 = vmatprep.subr.bf16.mxu0 %v9236_v14 }
 0x4cc   :  { %4714 = vmatpush1.bf16.msra.mxu0 %v9234_v16 }
 0x4cd   :  { %4715 = vmatprep.subr.bf16.mxu0 %v9239_v17 }
 0x4d0   :  { %4716 = vmatpush1.bf16.msra.mxu0 %v9237_v18 }
 0x4d3   :  { %4718 = vmatmul.mubr.bf16.vlgmr.msra.gmra.mrb[4].mxu0 %v10616_v48  ;;  %v1055_v48 = vrot.slane %v1042_v10, %v10654_v24 }
 0x4d5   :  { %v10674_v33 = vadd.f32 %v10633_v45, %v1055_v48  ;;  %v10684_v43 = vadd.f32 %v10639_v53, %v1055_v48  ;;  %v1063_v45 = vrot.slane %v1042_v10, %v10677_v54 }
 0x4d7   :  { %v4731_v47 = vadd.f32 %v10674_v33, %v4730_v32  ;;  %v4738_v50 = vadd.f32 %v10684_v43, %v4737_v15 }
 0x4d9   :  { %v4732_v40 = vadd.f32 %v10688_v36, %v4731_v47  ;;  %v4739_v49 = vadd.f32 %v10694_v38, %v4738_v50 }
 0x5a6   :  { %v4719_v39 = vpop.f32.mrb[4].mxu0 }
 0x5a7   :  { %v8263_v52 = vadd.f32 %v4719_v39, %v1063_v45  ;;  %v4721_v53 = vpop.f32.mrb[5].mxu0 }
 0x5a8   :  { %v10697_v41 = vadd.f32 %v4721_v53, %v1067_v37  ;;  %v4723_v46 = vpop.f32.mrb[6].mxu0 }
 0x5a9   :  { %v10700_v51 = vadd.f32 %v4723_v46, %v1063_v45  ;;  %v4725_v56 = vpop.f32.mrb[7].mxu0  ;;  %v4733_v58 = vadd.f32 %v8263_v52, %v4732_v40 }
 0x5aa   :  { %v10703_v60 = vadd.f32 %v4725_v56, %v1067_v37 }
 0x5ab   :  { %v4740_v59 = vadd.f32 %v10700_v51, %v4739_v49  ;;  %v4734_v55 = vadd.f32 %v10697_v41, %v4733_v58 }
 0x5ad   :  { %4735 = vadd.xlane.f32.xlu0 %v4734_v55  ;;  %v4741_v61 = vadd.f32 %v10703_v60, %v4740_v59 }
 0x5b1   :  { %4742 = vadd.xlane.f32.xlu0 %v4741_v61  ;;  %v9269_v61 = vld [vmem:[#allocation13 + $0xdc] ss:$12 sps:$4 sm:$0xff]  }
 0x5b2   :  { %5902 = vmatprep.subr.bf16.mxu1 %v9269_v61 }
 0x5b3   :  { %5903 = vmatpush1.bf16.msra.mxu1 %v9267_v62 }
 0x63a   :  { %v4736_v13 = vpop.xlane.xlu0 %4735 }
 0x63b   :  { %v4745_v14 = vmul.f32 0.0013020834, %v4736_v13 }
 0x63d   :  { %v10708_v16 = vsub.f32 %v10657_v25, %v4745_v14  ;;  %v10711_v17 = vsub.f32 %v10660_v26, %v4745_v14  ;;  %v10714_v18 = vsub.f32 %v10674_v33, %v4745_v14  ;;  %v10717_v20 = vsub.f32 %v10688_v36, %v4745_v14 }
 0x63e   :  { %v4743_v19 = vpop.xlane.xlu0 %4742  ;;  %v10723_v48 = vsub.f32 %v8263_v52, %v4745_v14  ;;  %v10737_v15 = vsub.f32 %v10697_v41, %v4745_v14  ;;  %v4728_v14 = vld [vmem:[#allocation10] sm:$0x3f] }
 0x63f   :  { %v4746_v10 = vmul.f32 0.0013020834, %v4743_v19  ;;  %v4759_v22 = vmul.f32 %v10708_v16, %v10708_v16  ;;  %v4760_v23 = vmul.f32 %v10711_v17, %v10711_v17  ;;  %v4761_v25 = vmul.f32 %v10714_v18, %v10714_v18  ;;  %v4729_v19 = vld [vmem:[#allocation11] sm:$0x3f] }
 0x640   :  { %v4762_v47 = vmul.f32 %v10717_v20, %v10717_v20 }
 0x641   :  { %v4771_v26 = vadd.f32 %v4760_v23, %v4759_v22  ;;  %v10728_v32 = vsub.f32 %v10666_v28, %v4746_v10  ;;  %v10731_v33 = vsub.f32 %v10669_v30, %v4746_v10  ;;  %v10734_v42 = vsub.f32 %v10684_v43, %v4746_v10 }
 0x642   :  { %v10742_v45 = vsub.f32 %v10694_v38, %v4746_v10  ;;  %v4763_v43 = vmul.f32 %v10723_v48, %v10723_v48  ;;  %v10751_v50 = vsub.f32 %v10700_v51, %v4746_v10  ;;  %v4764_v38 = vmul.f32 %v10737_v15, %v10737_v15 }
 0x643   :  { %v4772_v36 = vadd.f32 %v4771_v26, %v4761_v25  ;;  %v4765_v28 = vmul.f32 %v10728_v32, %v10728_v32  ;;  %v4766_v30 = vmul.f32 %v10731_v33, %v10731_v33  ;;  %v4767_v39 = vmul.f32 %v10734_v42, %v10734_v42 }
 0x644   :  { %v10758_v53 = vsub.f32 %v10703_v60, %v4746_v10  ;;  %v4768_v41 = vmul.f32 %v10742_v45, %v10742_v45  ;;  %v4769_v51 = vmul.f32 %v10751_v50, %v10751_v50  ;;  %v9272_v60 = vld [vmem:[#allocation13 + $0xf4] ss:$12 sps:$4 sm:$0xff]   ;;  %v4811_v10 = vrot.slane %v4728_v14, %v10650_v21 }
 0x645   :  { %v4773_v37 = vadd.f32 %v4772_v36, %v4762_v47  ;;  %v4778_v40 = vadd.f32 %v4766_v30, %v4765_v28  ;;  %5904 = vmatprep.subr.bf16.mxu1 %v9272_v60  ;;  %v4807_v22 = vrot.slane %v4728_v14, %v10648_v8  ;;  %v4815_v23 = vrot.slane %v4728_v14, %v10654_v24 }
 0x646   :  { %v4770_v58 = vmul.f32 %v10758_v53, %v10758_v53  ;;  %5905 = vmatpush1.bf16.msra.mxu1 %v9270_v63  ;;  %v4854_v26 = vrot.slane %v4729_v19, %v10650_v21  ;;  %v4850_v47 = vrot.slane %v4729_v19, %v10648_v8  ;;  %v4819_v36 = vrot.slane %v4728_v14, %v10663_v27 }
 0x647   :  { %v4774_v52 = vadd.f32 %v4773_v37, %v4763_v43  ;;  %v4779_v46 = vadd.f32 %v4778_v40, %v4767_v39  ;;  %5906 = vmatprep.subr.bf16.mxu1 %v9275_v0  ;;  %v4823_v39 = vrot.slane %v4728_v14, %v10677_v54  ;;  %v4858_v40 = vrot.slane %v4729_v19, %v10654_v24 }
 0x648   :  { %v4870_v60 = vrot.slane %v4729_v19, %v10679_v34 }
 0x649   :  { %v4775_v49 = vadd.f32 %v4774_v52, %v4764_v38  ;;  %v4780_v56 = vadd.f32 %v4779_v46, %v4768_v41  ;;  %v4827_v52 = vrot.slane %v4728_v14, %v10679_v34 }
 0x64a   :  { %5907 = vmatpush1.bf16.msra.mxu1 %v9273_v31 }
 0x64b   :  { %4776 = vadd.xlane.f32.xlu1 %v4775_v49  ;;  %v4781_v59 = vadd.f32 %v4780_v56, %v4769_v51  ;;  %5908 = vmatprep.subr.bf16.mxu1 %v9278_v35 }
 0x64d   :  { %v4782_v55 = vadd.f32 %v4781_v59, %v4770_v58 }
 0x64e   :  { %5909 = vmatpush1.bf16.msra.mxu1 %v9276_v57 }
 0x64f   :  { %4783 = vadd.xlane.f32.xlu1 %v4782_v55  ;;  %5910 = vmatprep.subr.bf16.mxu1 %v9281_v1 }
 0x652   :  { %5911 = vmatpush1.bf16.msra.mxu1 %v9279_v2 }
 0x653   :  { %5912 = vmatprep.subr.bf16.mxu1 %v9284_v3 }
 0x656   :  { %5913 = vmatpush1.bf16.msra.mxu1 %v9282_v4 }
 0x657   :  { %5914 = vmatprep.subr.bf16.mxu1 %v9287_v5 }
 0x65a   :  { %5915 = vmatpush1.bf16.msra.mxu1 %v9285_v6 }
 0x65b   :  { %5927 = vmatprep.subr.bf16.mxu1 %v9290_v29 }
 0x6d8   :  { %v4777_v7 = vpop.xlane.xlu1 %4776 }
 0x6d9   :  { %v4785_v44 = vmul.f32 0.0013020834, %v4777_v7 }
 0x6db   :  { %v4787_v9 = vadd.f32 1e-05, %v4785_v44 }
 0x6dc   :  { %v4784_v11 = vpop.xlane.xlu1 %4783 }
 0x6dd   :  { %9588 = vrsqrt.f32 %v4787_v9  ;;  %v4786_v12 = vmul.f32 0.0013020834, %v4784_v11 }
 0x6df   :  { %v4788_v13 = vadd.f32 1e-05, %v4786_v12 }
 0x6e1   :  { %9590 = vrsqrt.f32 %v4788_v13  ;;  %v9288_v13 = vld [vmem:[#allocation13 + $0x180] ss:$12 sps:$4 sm:$0xff]  }
 0x6e7   :  { %v9589_v25 = vpop.eup %9588 }
 0x6e8   :  { %v4792_v28 = vmul.f32 %v9589_v25, %v10711_v17  ;;  %v4791_v30 = vmul.f32 %v9589_v25, %v10708_v16  ;;  %v4794_v43 = vmul.f32 %v9589_v25, %v10717_v20  ;;  %v4793_v37 = vmul.f32 %v9589_v25, %v10714_v18 }
 0x6e9   :  { %v4796_v38 = vmul.f32 %v9589_v25, %v10737_v15  ;;  %v4795_v51 = vmul.f32 %v9589_v25, %v10723_v48  ;;  %v4866_v16 = vrot.slane %v4729_v19, %v10677_v54  ;;  %v4862_v20 = vrot.slane %v4729_v19, %v10663_v27 }
 0x6ea   :  { %v4835_v41 = vmul.f32 %v4811_v10, %v4792_v28  ;;  %v4834_v46 = vmul.f32 %v4807_v22, %v4791_v30  ;;  %v4836_v49 = vmul.f32 %v4815_v23, %v4793_v37  ;;  %v4837_v56 = vmul.f32 %v4819_v36, %v4794_v43  ;;  %v9291_v28 = vld [vmem:[#allocation13 + $0x198] ss:$12 sps:$4 sm:$0xff]   ;;  %v9296_v43 = vld [vmem:[#allocation13 + $0x1b4] ss:$12 sps:$4 sm:$0xff]  }
 0x6eb   :  { %v9591_v17 = vpop.eup %9590  ;;  %v4839_v31 = vmul.f32 %v4827_v52, %v4796_v38  ;;  %v4838_v54 = vmul.f32 %v4823_v39, %v4795_v51  ;;  %v9297_v38 = vld [vmem:[#allocation13 + $0x1c8] ss:$12 sps:$4 sm:$0xff]  }
 0x6ec   :  { %v4798_v18 = vmul.f32 %v9591_v17, %v10731_v33  ;;  %v4878_v58 = vadd.f32 %v4854_v26, %v4835_v41  ;;  %v4797_v59 = vmul.f32 %v9591_v17, %v10728_v32  ;;  %v4877_v55 = vadd.f32 %v4850_v47, %v4834_v46  ;;  %v9300_v41 = vld [vmem:[#allocation13 + $0x1e0] ss:$12 sps:$4 sm:$0xff]   ;;  %v9305_v46 = vld [vmem:[#allocation13 + $0x1fc] ss:$12 sps:$4 sm:$0xff]  }
 0x6ed   :  { %v4800_v15 = vmul.f32 %v9591_v17, %v10742_v45  ;;  %v4799_v61 = vmul.f32 %v9591_v17, %v10734_v42  ;;  %v4879_v62 = vadd.f32 %v4858_v40, %v4836_v49  ;;  %v4880_v27 = vadd.f32 %v4862_v20, %v4837_v56  ;;  %v9303_v49 = vld [vmem:[#allocation13 + $0x1f8] ss:$12 sps:$4 sm:$0xff]   ;;  %v9308_v51 = vld [vmem:[#allocation13 + $0x214] ss:$12 sps:$4 sm:$0xff]  }
 0x6ee   :  { %v4841_v48 = vmul.f32 %v4811_v10, %v4798_v18  ;;  %v4840_v63 = vmul.f32 %v4807_v22, %v4797_v59  ;;  %v4890_v0 = vmax.f32 %v4878_v58, 0.0  ;;  %v4889_v2 = vmax.f32 %v4877_v55, 0.0  ;;  %v9293_v10 = vld [vmem:[#allocation13 + $0x19c] ss:$12 sps:$4 sm:$0xff]   ;;  %v9312_v18 = vld [vmem:[#allocation13 + $0x240] ss:$12 sps:$4 sm:$0xff]  }
 0x6ef   :  { %v4843_v35 = vmul.f32 %v4819_v36, %v4800_v15  ;;  %v4842_v57 = vmul.f32 %v4815_v23, %v4799_v61  ;;  %v4802_v32 = vmul.f32 %v9591_v17, %v10758_v53  ;;  %v4891_v4 = vmax.f32 %v4879_v62, 0.0  ;;  %v9309_v56 = vld [vmem:[#allocation13 + $0x228] ss:$12 sps:$4 sm:$0xff]   ;;  %v9315_v59 = vld [vmem:[#allocation13 + $0x258] ss:$12 sps:$4 sm:$0xff]  }
 0x6f0   :  { %v4884_v33 = vadd.f32 %v4854_v26, %v4841_v48  ;;  %v4883_v1 = vadd.f32 %v4850_v47, %v4840_v63  ;;  %v4801_v42 = vmul.f32 %v9591_v17, %v10751_v50  ;;  %v4882_v29 = vadd.f32 %v4870_v60, %v4839_v31  ;;  %v9306_v17 = vld [vmem:[#allocation13 + $0x210] ss:$12 sps:$4 sm:$0xff]   ;;  %v9320_v55 = vld [vmem:[#allocation13 + $0x274] ss:$12 sps:$4 sm:$0xff]   ;;  %v9323_v61 = vld [vmem:[#allocation13 + $0x28c] ss:$12 sps:$4 sm:$0xff]  }
 0x6f1   :  { %v4886_v3 = vadd.f32 %v4862_v20, %v4843_v35  ;;  %v4885_v45 = vadd.f32 %v4858_v40, %v4842_v57  ;;  %v4845_v6 = vmul.f32 %v4827_v52, %v4802_v32  ;;  %v4881_v11 = vadd.f32 %v4866_v16, %v4838_v54  ;;  %v9299_v40 = vld [vmem:[#allocation13 + $0x1cc] ss:$12 sps:$4 sm:$0xff]   ;;  %v9302_v52 = vld [vmem:[#allocation13 + $0x1e4] ss:$12 sps:$4 sm:$0xff]   ;;  %v9317_v58 = vld [vmem:[#allocation13 + $0x25c] ss:$12 sps:$4 sm:$0xff]  }
 0x6f2   :  { %v4896_v5 = vmax.f32 %v4884_v33, 0.0  ;;  %v4895_v34 = vmax.f32 %v4883_v1, 0.0  ;;  %v4844_v9 = vmul.f32 %v4823_v39, %v4801_v42  ;;  %v4892_v19 = vmax.f32 %v4880_v27, 0.0  ;;  %v9294_v39 = vld [vmem:[#allocation13 + $0x1b0] ss:$12 sps:$4 sm:$0xff]  }
 0x6f3   :  { %v4898_v7 = vmax.f32 %v4886_v3, 0.0  ;;  %v4897_v44 = vmax.f32 %v4885_v45, 0.0  ;;  %v4888_v53 = vadd.f32 %v4870_v60, %v4845_v6  ;;  %v4894_v25 = vmax.f32 %v4882_v29, 0.0  ;;  %v9314_v20 = vld [vmem:[#allocation13 + $0x244] ss:$12 sps:$4 sm:$0xff]  }
 0x6f4   :  { %v10790_v12 = vpack.c.bf16 %v4896_v5, %v4890_v0  ;;  %v10792_v14 = vpack.c.bf16 %v4895_v34, %v4889_v2  ;;  %v4887_v23 = vadd.f32 %v4866_v16, %v4844_v9  ;;  %v4893_v47 = vmax.f32 %v4881_v11, 0.0  ;;  %v9311_v16 = vld [vmem:[#allocation13 + $0x22c] ss:$12 sps:$4 sm:$0xff]   ;;  %v9318_v15 = vld [vmem:[#allocation13 + $0x270] ss:$12 sps:$4 sm:$0xff]  }
 0x6f5   :  { %v10794_v22 = vpack.c.bf16 %v4897_v44, %v4891_v4  ;;  %v10797_v50 = vpack.c.bf16 %v4898_v7, %v4892_v19  ;;  %v4900_v26 = vmax.f32 %v4888_v53, 0.0  ;;  %v9321_v62 = vld [vmem:[#allocation13 + $0x288] ss:$12 sps:$4 sm:$0xff]   ;;  %v9326_v60 = vld [vmem:[#allocation13 + $0x2a4] ss:$12 sps:$4 sm:$0xff]  }
 0x6f6   :  { %5916 = vmatprep.mubr.bf16.mxu1 %v10790_v12  ;;  %v4899_v36 = vmax.f32 %v4887_v23, 0.0  ;;  %v9324_v48 = vld [vmem:[#allocation13 + $0x2a0] ss:$12 sps:$4 sm:$0xff]   ;;  %v9329_v63 = vld [vmem:[#allocation13 + $0x2bc] ss:$12 sps:$4 sm:$0xff]  }
 0x6f7   :  { %5917 = vmatmul.mubr.bf16.vlgmr.msra.gmra.mrb[4].mxu1 %v10792_v14  ;;  %v10801_v30 = vpack.c.bf16 %v4900_v26, %v4894_v25  ;;  %v9327_v31 = vld [vmem:[#allocation13 + $0x2b8] ss:$12 sps:$4 sm:$0xff]   ;;  %v9332_v54 = vld [vmem:[#allocation13 + $0x2d4] ss:$12 sps:$4 sm:$0xff]   ;;  %v9330_v0 = vld [vmem:[#allocation13 + $0x2d0] ss:$12 sps:$4 sm:$0xff]  }
 0x6f8   :  { %5928 = vmatpush1.bf16.msra.mxu1 %v9288_v13  ;;  %5959 = vmatprep.mubr.bf16.mxu1 %v10797_v50  ;;  %v10803_v37 = vpack.c.bf16 %v4899_v36, %v4893_v47  ;;  %v9335_v35 = vld [vmem:[#allocation13 + $0x2ec] ss:$12 sps:$4 sm:$0xff]   ;;  %v9333_v27 = vld [vmem:[#allocation13 + $0x2e8] ss:$12 sps:$4 sm:$0xff]   ;;  %v9338_v57 = vld [vmem:[#allocation13 + $0x304] ss:$12 sps:$4 sm:$0xff]  }
 0x6f9   :  { %5929 = vmatprep.subr.bf16.mxu1 %v9293_v10  ;;  %v9336_v33 = vld [vmem:[#allocation13 + $0x300] ss:$12 sps:$4 sm:$0xff]   ;;  %v9341_v1 = vld [vmem:[#allocation13 + $0x31c] ss:$12 sps:$4 sm:$0xff]   ;;  %v9339_v2 = vld [vmem:[#allocation13 + $0x318] ss:$12 sps:$4 sm:$0xff]  }
 0x6fa   :  { %v9344_v32 = vld [vmem:[#allocation13 + $0x334] ss:$12 sps:$4 sm:$0xff]   ;;  %v9342_v3 = vld [vmem:[#allocation13 + $0x330] ss:$12 sps:$4 sm:$0xff]   ;;  %v9347_v45 = vld [vmem:[#allocation13 + $0x34c] ss:$12 sps:$4 sm:$0xff]  }
 0x6fb   :  { %v9345_v4 = vld [vmem:[#allocation13 + $0x348] ss:$12 sps:$4 sm:$0xff]   ;;  %v9350_v42 = vld [vmem:[#allocation13 + $0x364] ss:$12 sps:$4 sm:$0xff]   ;;  %v9348_v5 = vld [vmem:[#allocation13 + $0x360] ss:$12 sps:$4 sm:$0xff]  }
 0x6fc   :  { %5930 = vmatpush1.bf16.msra.mxu1 %v9291_v28  ;;  %v9353_v34 = vld [vmem:[#allocation13 + $0x37c] ss:$12 sps:$4 sm:$0xff]   ;;  %v9351_v6 = vld [vmem:[#allocation13 + $0x378] ss:$12 sps:$4 sm:$0xff]   ;;  %v9356_v29 = vld [vmem:[#allocation13 + $0x394] ss:$12 sps:$4 sm:$0xff]  }
 0x6fd   :  { %5931 = vmatprep.subr.bf16.mxu1 %v9296_v43  ;;  %v9354_v7 = vld [vmem:[#allocation13 + $0x390] ss:$12 sps:$4 sm:$0xff]   ;;  %v9359_v44 = vld [vmem:[#allocation13 + $0x3ac] ss:$12 sps:$4 sm:$0xff]   ;;  %v9357_v9 = vld [vmem:[#allocation13 + $0x3a8] ss:$12 sps:$4 sm:$0xff]  }
 0x6fe   :  { %v9362_v11 = vld [vmem:[#allocation13 + $0x3c4] ss:$12 sps:$4 sm:$0xff]   ;;  %v9360_v13 = vld [vmem:[#allocation13 + $0x3c0] ss:$12 sps:$4 sm:$0xff]   ;;  %v9365_v19 = vld [vmem:[#allocation13 + $0x3dc] ss:$12 sps:$4 sm:$0xff]  }
 0x6ff   :  { %v9363_v53 = vld [vmem:[#allocation13 + $0x3d8] ss:$12 sps:$4 sm:$0xff]   ;;  %v9368_v10 = vld [vmem:[#allocation13 + $0x3f4] ss:$12 sps:$4 sm:$0xff]   ;;  %v9366_v23 = vld [vmem:[#allocation13 + $0x3f0] ss:$12 sps:$4 sm:$0xff]  }
 0x700   :  { %5932 = vmatpush1.bf16.msra.mxu1 %v9294_v39  ;;  %v9371_v25 = vld [vmem:[#allocation13 + $0x40c] ss:$12 sps:$4 sm:$0xff]   ;;  %v9369_v26 = vld [vmem:[#allocation13 + $0x408] ss:$12 sps:$4 sm:$0xff]   ;;  %v9374_v47 = vld [vmem:[#allocation13 + $0x424] ss:$12 sps:$4 sm:$0xff]  }
 0x701   :  { %5933 = vmatprep.subr.bf16.mxu1 %v9299_v40  ;;  %v9372_v36 = vld [vmem:[#allocation13 + $0x420] ss:$12 sps:$4 sm:$0xff]   ;;  %v9377_v28 = vld [vmem:[#allocation13 + $0x43c] ss:$12 sps:$4 sm:$0xff]   ;;  %v9375_v43 = vld [vmem:[#allocation13 + $0x438] ss:$12 sps:$4 sm:$0xff]  }
 0x702   :  { %v9380_v39 = vld [vmem:[#allocation13 + $0x454] ss:$12 sps:$4 sm:$0xff]   ;;  %v9378_v40 = vld [vmem:[#allocation13 + $0x450] ss:$12 sps:$4 sm:$0xff]  }
 0x704   :  { %5934 = vmatpush1.bf16.msra.mxu1 %v9297_v38  ;;  %v9383_v38 = vld [vmem:[#allocation13 + $0x46c] ss:$12 sps:$4 sm:$0xff]  }
 0x705   :  { %5935 = vmatprep.subr.bf16.mxu1 %v9302_v52  ;;  %v9381_v52 = vld [vmem:[#allocation13 + $0x468] ss:$12 sps:$4 sm:$0xff]  }
 0x708   :  { %5936 = vmatpush1.bf16.msra.mxu1 %v9300_v41  ;;  %v9384_v41 = vld [vmem:[#allocation13 + $0xc8] ss:$12 sps:$4 sm:$0xff]  }
 0x709   :  { %5937 = vmatprep.subr.bf16.mxu1 %v9305_v46  ;;  %v9385_v46 = vld [vmem:[#allocation13 + $0x8] ss:$12 sps:$4 sm:$0xff]  }
 0x70c   :  { %5938 = vmatpush1.bf16.msra.mxu1 %v9303_v49  ;;  %v9386_v49 = vld [vmem:[#allocation13 + $0xe0] ss:$12 sps:$4 sm:$0xff]  }
 0x70d   :  { %5939 = vmatprep.subr.bf16.mxu1 %v9308_v51  ;;  %v9387_v51 = vld [vmem:[#allocation13 + $0x20] ss:$12 sps:$4 sm:$0xff]  }
 0x710   :  { %5940 = vmatpush1.bf16.msra.mxu1 %v9306_v17  ;;  %v9388_v17 = vld [vmem:[#allocation13 + $0xf8] ss:$12 sps:$4 sm:$0xff]  }
 0x711   :  { %5941 = vmatprep.subr.bf16.mxu1 %v9311_v16  ;;  %v9389_v16 = vld [vmem:[#allocation13 + $0x38] ss:$12 sps:$4 sm:$0xff]  }
 0x714   :  { %5942 = vmatpush1.bf16.msra.mxu1 %v9309_v56  ;;  %v9390_v56 = vld [vmem:[#allocation13 + $0x110] ss:$12 sps:$4 sm:$0xff]  }
 0x715   :  { %5943 = vmatprep.subr.bf16.mxu1 %v9314_v20  ;;  %v9391_v20 = vld [vmem:[#allocation13 + $0x50] ss:$12 sps:$4 sm:$0xff]  }
 0x718   :  { %5944 = vmatpush1.bf16.msra.mxu1 %v9312_v18  ;;  %v9392_v18 = vld [vmem:[#allocation13 + $0x128] ss:$12 sps:$4 sm:$0xff]  }
 0x719   :  { %5945 = vmatprep.subr.bf16.mxu1 %v9317_v58  ;;  %v9393_v58 = vld [vmem:[#allocation13 + $0x68] ss:$12 sps:$4 sm:$0xff]  }
 0x71c   :  { %5946 = vmatpush1.bf16.msra.mxu1 %v9315_v59  ;;  %v9394_v59 = vld [vmem:[#allocation13 + $0x140] ss:$12 sps:$4 sm:$0xff]  }
 0x71d   :  { %5947 = vmatprep.subr.bf16.mxu1 %v9320_v55  ;;  %v9395_v55 = vld [vmem:[#allocation13 + $0x80] ss:$12 sps:$4 sm:$0xff]  }
 0x720   :  { %5948 = vmatpush1.bf16.msra.mxu1 %v9318_v15  ;;  %v9396_v15 = vld [vmem:[#allocation13 + $0x158] ss:$12 sps:$4 sm:$0xff]  }
 0x721   :  { %5949 = vmatprep.subr.bf16.mxu1 %v9323_v61  ;;  %v9398_v61 = vld [vmem:[#allocation13 + $0x170] ss:$12 sps:$4 sm:$0xff]  }
 0x724   :  { %5950 = vmatpush1.bf16.msra.mxu1 %v9321_v62  ;;  %v9399_v62 = vld [vmem:[#allocation13 + $0xb0] ss:$12 sps:$4 sm:$0xff]  }
 0x725   :  { %5951 = vmatprep.subr.bf16.mxu1 %v9326_v60  ;;  %v9400_v60 = vld [vmem:[#allocation13 + $0x248] ss:$12 sps:$4 sm:$0xff]  }
 0x728   :  { %5952 = vmatpush1.bf16.msra.mxu1 %v9324_v48  ;;  %v9401_v48 = vld [vmem:[#allocation13 + $0x188] ss:$12 sps:$4 sm:$0xff]  }
 0x729   :  { %5953 = vmatprep.subr.bf16.mxu1 %v9329_v63  ;;  %v9402_v63 = vld [vmem:[#allocation13 + $0x260] ss:$12 sps:$4 sm:$0xff]  }
 0x72c   :  { %5954 = vmatpush1.bf16.msra.mxu1 %v9327_v31  ;;  %v9403_v31 = vld [vmem:[#allocation13 + $0x1a0] ss:$12 sps:$4 sm:$0xff]  }
 0x72d   :  { %5955 = vmatprep.subr.bf16.mxu1 %v9332_v54  ;;  %v9404_v54 = vld [vmem:[#allocation13 + $0x278] ss:$12 sps:$4 sm:$0xff]  }
 0x730   :  { %5956 = vmatpush1.bf16.msra.mxu1 %v9330_v0  ;;  %v9405_v0 = vld [vmem:[#allocation13 + $0x1b8] ss:$12 sps:$4 sm:$0xff]  }
 0x731   :  { %5957 = vmatprep.subr.bf16.mxu1 %v9335_v35  ;;  %v9406_v35 = vld [vmem:[#allocation13 + $0x290] ss:$12 sps:$4 sm:$0xff]  }
 0x734   :  { %5958 = vmatpush1.bf16.msra.mxu1 %v9333_v27  ;;  %v9407_v27 = vld [vmem:[#allocation13 + $0x1d0] ss:$12 sps:$4 sm:$0xff]  }
 0x735   :  { %5970 = vmatprep.subr.bf16.mxu1 %v9338_v57  ;;  %v9408_v57 = vld [vmem:[#allocation13 + $0x2a8] ss:$12 sps:$4 sm:$0xff]  }
 0x737   :  { %5960 = vmatmul.mubr.bf16.vlgmr.msra.gmra.mrb[4].mxu1 %v10794_v22 }
 0x738   :  { %5971 = vmatpush1.bf16.msra.mxu1 %v9336_v33  ;;  %6002 = vmatprep.mubr.bf16.mxu1 %v10801_v30  ;;  %v9409_v33 = vld [vmem:[#allocation13 + $0x1e8] ss:$12 sps:$4 sm:$0xff]  }
 0x739   :  { %5972 = vmatprep.subr.bf16.mxu1 %v9341_v1  ;;  %v9410_v1 = vld [vmem:[#allocation13 + $0x2c0] ss:$12 sps:$4 sm:$0xff]  }
 0x73c   :  { %5973 = vmatpush1.bf16.msra.mxu1 %v9339_v2  ;;  %v9412_v2 = vld [vmem:[#allocation13 + $0x2d8] ss:$12 sps:$4 sm:$0xff]  }
 0x73d   :  { %5974 = vmatprep.subr.bf16.mxu1 %v9344_v32  ;;  %v9414_v32 = vld [vmem:[#allocation13 + $0x2f0] ss:$12 sps:$4 sm:$0xff]  }
 0x740   :  { %5975 = vmatpush1.bf16.msra.mxu1 %v9342_v3  ;;  %v9415_v3 = vld [vmem:[#allocation13 + $0x230] ss:$12 sps:$4 sm:$0xff]  }
 0x741   :  { %5976 = vmatprep.subr.bf16.mxu1 %v9347_v45  ;;  %v9416_v45 = vld [vmem:[#allocation13 + $0x3c8] ss:$12 sps:$4 sm:$0xff]  }
 0x744   :  { %5977 = vmatpush1.bf16.msra.mxu1 %v9345_v4  ;;  %v9417_v4 = vld [vmem:[#allocation13 + $0x308] ss:$12 sps:$4 sm:$0xff]  }
 0x745   :  { %5978 = vmatprep.subr.bf16.mxu1 %v9350_v42  ;;  %v9418_v42 = vld [vmem:[#allocation13 + $0x3e0] ss:$12 sps:$4 sm:$0xff]  }
 0x748   :  { %5979 = vmatpush1.bf16.msra.mxu1 %v9348_v5  ;;  %v9419_v5 = vld [vmem:[#allocation13 + $0x320] ss:$12 sps:$4 sm:$0xff]  }
 0x749   :  { %5980 = vmatprep.subr.bf16.mxu1 %v9353_v34  ;;  %v9420_v34 = vld [vmem:[#allocation13 + $0x3f8] ss:$12 sps:$4 sm:$0xff]  }
 0x74c   :  { %5981 = vmatpush1.bf16.msra.mxu1 %v9351_v6  ;;  %v9421_v6 = vld [vmem:[#allocation13 + $0x338] ss:$12 sps:$4 sm:$0xff]  }
 0x74d   :  { %5982 = vmatprep.subr.bf16.mxu1 %v9356_v29  ;;  %v9422_v29 = vld [vmem:[#allocation13 + $0x410] ss:$12 sps:$4 sm:$0xff]  }
 0x750   :  { %5983 = vmatpush1.bf16.msra.mxu1 %v9354_v7  ;;  %v9423_v7 = vld [vmem:[#allocation13 + $0x350] ss:$12 sps:$4 sm:$0xff]  }
 0x751   :  { %5984 = vmatprep.subr.bf16.mxu1 %v9359_v44  ;;  %v9424_v44 = vld [vmem:[#allocation13 + $0x428] ss:$12 sps:$4 sm:$0xff]  }
 0x754   :  { %5985 = vmatpush1.bf16.msra.mxu1 %v9357_v9  ;;  %v9425_v9 = vld [vmem:[#allocation13 + $0x368] ss:$12 sps:$4 sm:$0xff]  }
 0x755   :  { %5986 = vmatprep.subr.bf16.mxu1 %v9362_v11  ;;  %v9426_v11 = vld [vmem:[#allocation13 + $0x440] ss:$12 sps:$4 sm:$0xff]  }
 0x758   :  { %5987 = vmatpush1.bf16.msra.mxu1 %v9360_v13  ;;  %v9428_v13 = vld [vmem:[#allocation13 + $0x458] ss:$12 sps:$4 sm:$0xff]  }
 0x759   :  { %5988 = vmatprep.subr.bf16.mxu1 %v9365_v19  ;;  %v9430_v19 = vld [vmem:[#allocation13 + $0x470] ss:$12 sps:$4 sm:$0xff]  }
 0x75c   :  { %5989 = vmatpush1.bf16.msra.mxu1 %v9363_v53  ;;  %v9431_v53 = vld [vmem:[#allocation13 + $0x3b0] ss:$12 sps:$4 sm:$0xff]  }
 0x75d   :  { %5990 = vmatprep.subr.bf16.mxu1 %v9368_v10 }
 0x760   :  { %5991 = vmatpush1.bf16.msra.mxu1 %v9366_v23 }
 0x761   :  { %5992 = vmatprep.subr.bf16.mxu1 %v9371_v25 }
 0x764   :  { %5993 = vmatpush1.bf16.msra.mxu1 %v9369_v26 }
 0x765   :  { %5994 = vmatprep.subr.bf16.mxu1 %v9374_v47 }
 0x768   :  { %5995 = vmatpush1.bf16.msra.mxu1 %v9372_v36 }
 0x769   :  { %5996 = vmatprep.subr.bf16.mxu1 %v9377_v28 }
 0x76c   :  { %5997 = vmatpush1.bf16.msra.mxu1 %v9375_v43 }
 0x76d   :  { %5998 = vmatprep.subr.bf16.mxu1 %v9380_v39 }
 0x770   :  { %5999 = vmatpush1.bf16.msra.mxu1 %v9378_v40 }
 0x771   :  { %6000 = vmatprep.subr.bf16.mxu1 %v9383_v38  ;;  %v5099_v38 = vld [vmem:[#allocation14] sm:$0x7] }
 0x774   :  { %6001 = vmatpush1.bf16.msra.mxu1 %v9381_v52  ;;  %v5112_v52 = vrot.slane %v5099_v38, %v10654_v24 }
 0x775   :  { %8189 = vmatprep.subr.bf16.mxu1 %v9384_v41 }
 0x777   :  { %6003 = vmatmul.mubr.bf16.vlgmr.msra.gmra.mrb[4].mxu1 %v10803_v37 }
 0x778   :  { %8190 = vmatpush3.bf16.msra.mxu1 %v9385_v46  ;;  %6045 = vmatprep.mubr.bf16.mxu1 %v10790_v12  ;;  %v9397_v12 = vld [vmem:[#allocation13 + $0x98] ss:$12 sps:$4 sm:$0xff]  }
 0x779   :  { %8191 = vmatprep.subr.bf16.mxu1 %v9386_v49 }
 0x77c   :  { %8192 = vmatpush3.bf16.msra.mxu1 %v9387_v51 }
 0x77d   :  { %8193 = vmatprep.subr.bf16.mxu1 %v9388_v17 }
 0x780   :  { %8194 = vmatpush3.bf16.msra.mxu1 %v9389_v16 }
 0x781   :  { %8195 = vmatprep.subr.bf16.mxu1 %v9390_v56 }
 0x784   :  { %8196 = vmatpush3.bf16.msra.mxu1 %v9391_v20 }
 0x785   :  { %8197 = vmatprep.subr.bf16.mxu1 %v9392_v18 }
 0x788   :  { %8198 = vmatpush3.bf16.msra.mxu1 %v9393_v58  ;;  %v5104_v58 = vrot.slane %v5099_v38, %v10648_v8 }
 0x789   :  { %8199 = vmatprep.subr.bf16.mxu1 %v9394_v59  ;;  %v5108_v59 = vrot.slane %v5099_v38, %v10650_v21 }
 0x78c   :  { %8200 = vmatpush3.bf16.msra.mxu1 %v9395_v55 }
 0x78d   :  { %8201 = vmatprep.subr.bf16.mxu1 %v9396_v15 }
 0x790   :  { %8202 = vmatpush3.bf16.msra.mxu1 %v9397_v12 }
 0x791   :  { %8203 = vmatprep.subr.bf16.mxu1 %v9398_v61 }
 0x794   :  { %8204 = vmatpush3.bf16.msra.mxu1 %v9399_v62 }
 0x795   :  { %8211 = vmatprep.subr.bf16.mxu1 %v9400_v60 }
 0x797   :  { %6046 = vmatmul.mubr.bf16.vlgmr.msra.gmra.mrb[8].mxu1 %v10792_v14  ;;  %v9411_v14 = vld [vmem:[#allocation13 + $0x200] ss:$12 sps:$4 sm:$0xff]  }
 0x798   :  { %8212 = vmatpush3.bf16.msra.mxu1 %v9401_v48  ;;  %6086 = vmatprep.mubr.bf16.mxu1 %v10797_v50  ;;  %v9413_v50 = vld [vmem:[#allocation13 + $0x218] ss:$12 sps:$4 sm:$0xff]  }
 0x799   :  { %8213 = vmatprep.subr.bf16.mxu1 %v9402_v63 }
 0x79c   :  { %8214 = vmatpush3.bf16.msra.mxu1 %v9403_v31 }
 0x79d   :  { %8215 = vmatprep.subr.bf16.mxu1 %v9404_v54 }
 0x7a0   :  { %8216 = vmatpush3.bf16.msra.mxu1 %v9405_v0 }
 0x7a1   :  { %8217 = vmatprep.subr.bf16.mxu1 %v9406_v35 }
 0x7a4   :  { %8218 = vmatpush3.bf16.msra.mxu1 %v9407_v27 }
 0x7a5   :  { %8219 = vmatprep.subr.bf16.mxu1 %v9408_v57 }
 0x7a8   :  { %8220 = vmatpush3.bf16.msra.mxu1 %v9409_v33 }
 0x7a9   :  { %8221 = vmatprep.subr.bf16.mxu1 %v9410_v1 }
 0x7ac   :  { %8222 = vmatpush3.bf16.msra.mxu1 %v9411_v14  ;;  %v9432_v14 = vld [vmem:[%s11083_s10] ss:$8 sps:$4 sm:$0xff]  }
 0x7ad   :  { %8223 = vmatprep.subr.bf16.mxu1 %v9412_v2  ;;  %v9434_v2 = vld [vmem:[%s11083_s10 + $0x4] ss:$8 sps:$4 sm:$0xff]  }
 0x7b0   :  { %8224 = vmatpush3.bf16.msra.mxu1 %v9413_v50  ;;  %v9437_v50 = vld [vmem:[%s11083_s10 + $0x14] ss:$8 sps:$4 sm:$0xff]  }
 0x7b1   :  { %8225 = vmatprep.subr.bf16.mxu1 %v9414_v32  ;;  %v9435_v32 = vld [vmem:[%s11083_s10 + $0x10] ss:$8 sps:$4 sm:$0xff]  }
 0x7b4   :  { %8226 = vmatpush3.bf16.msra.mxu1 %v9415_v3  ;;  %v9440_v3 = vld [vmem:[%s11083_s10 + $0x24] ss:$8 sps:$4 sm:$0xff]  }
 0x7b5   :  { %8233 = vmatprep.subr.bf16.mxu1 %v9416_v45  ;;  %v9438_v45 = vld [vmem:[%s11083_s10 + $0x20] ss:$8 sps:$4 sm:$0xff]  }
 0x7b7   :  { %6087 = vmatmul.mubr.bf16.vlgmr.msra.gmra.mrb[12].mxu1 %v10794_v22  ;;  %v9427_v22 = vld [vmem:[#allocation13 + $0x380] ss:$12 sps:$4 sm:$0xff]  }
 0x7b8   :  { %8234 = vmatpush3.bf16.msra.mxu1 %v9417_v4  ;;  %6127 = vmatprep.mubr.bf16.mxu1 %v10801_v30  ;;  %v9429_v30 = vld [vmem:[#allocation13 + $0x398] ss:$12 sps:$4 sm:$0xff]  }
 0x7b9   :  { %8235 = vmatprep.subr.bf16.mxu1 %v9418_v42  ;;  %v9443_v4 = vld [vmem:[%s11083_s10 + $0x34] ss:$8 sps:$4 sm:$0xff]   ;;  %v9441_v42 = vld [vmem:[%s11083_s10 + $0x30] ss:$8 sps:$4 sm:$0xff]  }
 0x7bc   :  { %8236 = vmatpush3.bf16.msra.mxu1 %v9419_v5  ;;  %v9446_v5 = vld [vmem:[%s11083_s10 + $0x44] ss:$8 sps:$4 sm:$0xff]  }
 0x7bd   :  { %8237 = vmatprep.subr.bf16.mxu1 %v9420_v34  ;;  %v9444_v34 = vld [vmem:[%s11083_s10 + $0x40] ss:$8 sps:$4 sm:$0xff]  }
 0x7c0   :  { %8238 = vmatpush3.bf16.msra.mxu1 %v9421_v6  ;;  %v9449_v6 = vld [vmem:[%s11083_s10 + $0x54] ss:$8 sps:$4 sm:$0xff]  }
 0x7c1   :  { %8239 = vmatprep.subr.bf16.mxu1 %v9422_v29  ;;  %v9447_v29 = vld [vmem:[%s11083_s10 + $0x50] ss:$8 sps:$4 sm:$0xff]  }
 0x7c4   :  { %8240 = vmatpush3.bf16.msra.mxu1 %v9423_v7  ;;  %v9452_v7 = vld [vmem:[%s11083_s10 + $0x64] ss:$8 sps:$4 sm:$0xff]  }
 0x7c5   :  { %8241 = vmatprep.subr.bf16.mxu1 %v9424_v44  ;;  %v9450_v44 = vld [vmem:[%s11083_s10 + $0x60] ss:$8 sps:$4 sm:$0xff]  }
 0x7c8   :  { %8242 = vmatpush3.bf16.msra.mxu1 %v9425_v9  ;;  %v9455_v9 = vld [vmem:[%s11083_s10 + $0x74] ss:$8 sps:$4 sm:$0xff]  }
 0x7c9   :  { %8243 = vmatprep.subr.bf16.mxu1 %v9426_v11  ;;  %v9453_v11 = vld [vmem:[%s11083_s10 + $0x70] ss:$8 sps:$4 sm:$0xff]  }
 0x7cc   :  { %8244 = vmatpush3.bf16.msra.mxu1 %v9427_v22  ;;  %v9458_v22 = vld [vmem:[%s11083_s10 + $0x84] ss:$8 sps:$4 sm:$0xff]  }
 0x7cd   :  { %8245 = vmatprep.subr.bf16.mxu1 %v9428_v13  ;;  %v9456_v13 = vld [vmem:[%s11083_s10 + $0x80] ss:$8 sps:$4 sm:$0xff]  }
 0x7d0   :  { %8246 = vmatpush3.bf16.msra.mxu1 %v9429_v30  ;;  %v9461_v30 = vld [vmem:[%s11083_s10 + $0x94] ss:$8 sps:$4 sm:$0xff]  }
 0x7d1   :  { %8247 = vmatprep.subr.bf16.mxu1 %v9430_v19  ;;  %v9459_v19 = vld [vmem:[%s11083_s10 + $0x90] ss:$8 sps:$4 sm:$0xff]  }
 0x7d4   :  { %8248 = vmatpush3.bf16.msra.mxu1 %v9431_v53 }
 0x7d5   :  { %6534 = vmatprep.subr.bf16.mxu1 %v9434_v2 }
 0x7d7   :  { %6128 = vmatmul.mubr.bf16.vlgmr.msra.gmra.mrb[16].mxu1 %v10803_v37 }
 0x7d8   :  { %6535 = vmatpush1.bf16.msra.mxu1 %v9432_v14 }
 0x7d9   :  { %6536 = vmatprep.subr.bf16.mxu1 %v9437_v50 }
 0x7dc   :  { %6537 = vmatpush1.bf16.msra.mxu1 %v9435_v32 }
 0x7dd   :  { %6538 = vmatprep.subr.bf16.mxu1 %v9440_v3 }
 0x7e0   :  { %6539 = vmatpush1.bf16.msra.mxu1 %v9438_v45 }
 0x7e1   :  { %6540 = vmatprep.subr.bf16.mxu1 %v9443_v4 }
 0x7e4   :  { %6541 = vmatpush1.bf16.msra.mxu1 %v9441_v42 }
 0x7e5   :  { %6542 = vmatprep.subr.bf16.mxu1 %v9446_v5 }
 0x7e8   :  { %6543 = vmatpush1.bf16.msra.mxu1 %v9444_v34 }
 0x7e9   :  { %6544 = vmatprep.subr.bf16.mxu1 %v9449_v6 }
 0x7ec   :  { %6545 = vmatpush1.bf16.msra.mxu1 %v9447_v29 }
 0x7ed   :  { %6546 = vmatprep.subr.bf16.mxu1 %v9452_v7 }
 0x7f0   :  { %6547 = vmatpush1.bf16.msra.mxu1 %v9450_v44 }
 0x7f1   :  { %6548 = vmatprep.subr.bf16.mxu1 %v9455_v9 }
 0x7f4   :  { %6549 = vmatpush1.bf16.msra.mxu1 %v9453_v11 }
 0x7f5   :  { %6550 = vmatprep.subr.bf16.mxu1 %v9458_v22 }
 0x7f8   :  { %6551 = vmatpush1.bf16.msra.mxu1 %v9456_v13 }
 0x7f9   :  { %6552 = vmatprep.subr.bf16.mxu1 %v9461_v30 }
 0x7fc   :  { %6553 = vmatpush1.bf16.msra.mxu1 %v9459_v19 }
 0x84a   :  { %v6004_v10 = vpop.f32.mrb[4].mxu1 }
 0x84b   :  { %v6006_v23 = vpop.f32.mrb[5].mxu1  ;;  %v8267_v55 = vadd.f32 %v6004_v10, %v5104_v58 }
 0x84c   :  { %v6008_v25 = vpop.f32.mrb[6].mxu1  ;;  %v8268_v15 = vadd.f32 %v6006_v23, %v5108_v59 }
 0x84d   :  { %v6010_v26 = vpop.f32.mrb[7].mxu1  ;;  %v8269_v62 = vadd.f32 %v6008_v25, %v5104_v58  ;;  %v9465_v58 = vld [vmem:[%s11083_s10 + $0xb0] ss:$8 sps:$4 sm:$0xff]  }
 0x84e   :  { %v8270_v60 = vadd.f32 %v6010_v26, %v5108_v59  ;;  %v6138_v54 = vadd.f32 %v8268_v15, %v8267_v55  ;;  %v9470_v59 = vld [vmem:[%s11083_s10 + $0xc4] ss:$8 sps:$4 sm:$0xff]  }
 0x850   :  { %v6142_v27 = vadd.f32 %v8270_v60, %v8269_v62 }
 0x86a   :  { %v8205_v47 = vpop.f32.mrb[8].mxu1 }
 0x86b   :  { %v8206_v36 = vpop.f32.mrb[9].mxu1 }
 0x86c   :  { %v8207_v28 = vadd.f32 %v8206_v36, %v8205_v47  ;;  %v8208_v43 = vpop.f32.mrb[10].mxu1 }
 0x86d   :  { %v8209_v39 = vpop.f32.mrb[11].mxu1 }
 0x86e   :  { %v8210_v40 = vadd.f32 %v8209_v39, %v8208_v43  ;;  %v6048_v49 = vadd.f32 %v8207_v28, %v5112_v52 }
 0x870   :  { %v6051_v37 = vadd.f32 %v8210_v40, %v5112_v52 }
 0x88a   :  { %v8227_v41 = vpop.f32.mrb[12].mxu1 }
 0x88b   :  { %v8228_v46 = vpop.f32.mrb[13].mxu1 }
 0x88c   :  { %v8229_v51 = vadd.f32 %v8228_v46, %v8227_v41  ;;  %v8230_v17 = vpop.f32.mrb[14].mxu1 }
 0x88d   :  { %v8231_v16 = vpop.f32.mrb[15].mxu1 }
 0x88e   :  { %v6089_v56 = vadd.f32 %v8229_v51, %v6048_v49  ;;  %v8232_v20 = vadd.f32 %v8231_v16, %v8230_v17 }
 0x890   :  { %v6092_v18 = vadd.f32 %v8232_v20, %v6051_v37  ;;  %v9462_v20 = vld [vmem:[%s11083_s10 + $0xa0] ss:$8 sps:$4 sm:$0xff]  }
 0x8aa   :  { %v8249_v12 = vpop.f32.mrb[16].mxu1 }
 0x8ab   :  { %v8250_v61 = vpop.f32.mrb[17].mxu1 }
 0x8ac   :  { %v8251_v48 = vadd.f32 %v8250_v61, %v8249_v12  ;;  %v8252_v63 = vpop.f32.mrb[18].mxu1  ;;  %v9471_v12 = vld [vmem:[%s11083_s10 + $0xd0] ss:$8 sps:$4 sm:$0xff]   ;;  %v9476_v61 = vld [vmem:[%s11083_s10 + $0xe4] ss:$8 sps:$4 sm:$0xff]  }
 0x8ad   :  { %v8253_v31 = vpop.f32.mrb[19].mxu1 }
 0x8ae   :  { %v6130_v0 = vadd.f32 %v8251_v48, %v6089_v56  ;;  %v8254_v35 = vadd.f32 %v8253_v31, %v8252_v63  ;;  %v9464_v56 = vld [vmem:[%s11083_s10 + $0xa4] ss:$8 sps:$4 sm:$0xff]   ;;  %v9477_v48 = vld [vmem:[%s11083_s10 + $0xf0] ss:$8 sps:$4 sm:$0xff]  }
 0x8af   :  { %6554 = vmatprep.subr.bf16.mxu1 %v9464_v56  ;;  %v9482_v63 = vld [vmem:[%s11083_s10 + $0x104] ss:$8 sps:$4 sm:$0xff]   ;;  %v9495_v56 = vld [vmem:[%s11083_s10 + $0x150] ss:$8 sps:$4 sm:$0xff]  }
 0x8b0   :  { %v6133_v57 = vadd.f32 %v8254_v35, %v6092_v18  ;;  %v6139_v33 = vadd.f32 %v6138_v54, %v6130_v0  ;;  %v9467_v18 = vld [vmem:[%s11083_s10 + $0xb4] ss:$8 sps:$4 sm:$0xff]   ;;  %6555 = vmatpush1.bf16.msra.mxu1 %v9462_v20  ;;  %v9500_v20 = vld [vmem:[%s11083_s10 + $0x164] ss:$8 sps:$4 sm:$0xff]  }
 0x8b1   :  { %6556 = vmatprep.subr.bf16.mxu1 %v9467_v18 }
 0x8b2   :  { %6140 = vadd.xlane.f32.xlu0 %v6139_v33  ;;  %v6143_v1 = vadd.f32 %v6142_v27, %v6133_v57  ;;  %v6136_v33 = vld [vmem:[#allocation16] sm:$0x7] }
 0x8b3   :  { %v6189_v14 = vrot.slane %v6136_v33, %v10650_v21  ;;  %v6185_v2 = vrot.slane %v6136_v33, %v10648_v8 }
 0x8b4   :  { %6144 = vadd.xlane.f32.xlu1 %v6143_v1  ;;  %6557 = vmatpush1.bf16.msra.mxu1 %v9465_v58  ;;  %v6137_v1 = vld [vmem:[#allocation17] sm:$0x7] }
 0x8b5   :  { %6558 = vmatprep.subr.bf16.mxu1 %v9470_v59  ;;  %v6211_v45 = vrot.slane %v6137_v1, %v10650_v21  ;;  %v6207_v42 = vrot.slane %v6137_v1, %v10648_v8  ;;  %v6215_v59 = vrot.slane %v6137_v1, %v10654_v24 }
 0x93f   :  { %v6141_v53 = vpop.xlane.xlu0 %6140 }
 0x940   :  { %v6147_v10 = vmul.f32 0.0026041667, %v6141_v53 }
 0x941   :  { %v6145_v23 = vpop.xlane.xlu1 %6144 }
 0x942   :  { %v6149_v25 = vsub.f32 %v8267_v55, %v6147_v10  ;;  %v6150_v26 = vsub.f32 %v8268_v15, %v6147_v10  ;;  %v6148_v47 = vmul.f32 0.0026041667, %v6145_v23  ;;  %v10877_v36 = vsub.f32 %v6130_v0, %v6147_v10  ;;  %v9468_v55 = vld [vmem:[%s11083_s10 + $0xc0] ss:$8 sps:$4 sm:$0xff]   ;;  %v9473_v15 = vld [vmem:[%s11083_s10 + $0xd4] ss:$8 sps:$4 sm:$0xff]  }
 0x943   :  { %6559 = vmatpush1.bf16.msra.mxu1 %v9468_v55 }
 0x944   :  { %v6152_v28 = vsub.f32 %v8269_v62, %v6148_v47  ;;  %v6153_v43 = vsub.f32 %v8270_v60, %v6148_v47  ;;  %v10879_v39 = vsub.f32 %v6133_v57, %v6148_v47  ;;  %v6155_v40 = vmul.f32 %v6149_v25, %v6149_v25  ;;  %6560 = vmatprep.subr.bf16.mxu1 %v9473_v15  ;;  %v9474_v62 = vld [vmem:[%s11083_s10 + $0xe0] ss:$8 sps:$4 sm:$0xff]   ;;  %v9479_v60 = vld [vmem:[%s11083_s10 + $0xf4] ss:$8 sps:$4 sm:$0xff]  }
 0x945   :  { %v6156_v38 = vmul.f32 %v6150_v26, %v6150_v26  ;;  %v6157_v46 = vmul.f32 %v10877_v36, %v10877_v36  ;;  %v9485_v47 = vld [vmem:[%s11083_s10 + $0x114] ss:$8 sps:$4 sm:$0xff]  }
 0x946   :  { %v6158_v52 = vmul.f32 %v6152_v28, %v6152_v28  ;;  %v6159_v41 = vmul.f32 %v6153_v43, %v6153_v43  ;;  %v6160_v51 = vmul.f32 %v10879_v39, %v10879_v39 }
 0x947   :  { %v6161_v49 = vadd.f32 %v6156_v38, %v6155_v40  ;;  %6561 = vmatpush1.bf16.msra.mxu1 %v9471_v12  ;;  %v9488_v40 = vld [vmem:[%s11083_s10 + $0x124] ss:$8 sps:$4 sm:$0xff]   ;;  %v9486_v38 = vld [vmem:[%s11083_s10 + $0x120] ss:$8 sps:$4 sm:$0xff]   ;;  %v9501_v12 = vld [vmem:[%s11083_s10 + $0x170] ss:$8 sps:$4 sm:$0xff]  }
 0x948   :  { %v6165_v17 = vadd.f32 %v6159_v41, %v6158_v52  ;;  %6562 = vmatprep.subr.bf16.mxu1 %v9476_v61  ;;  %v9491_v52 = vld [vmem:[%s11083_s10 + $0x134] ss:$8 sps:$4 sm:$0xff]   ;;  %v9489_v41 = vld [vmem:[%s11083_s10 + $0x130] ss:$8 sps:$4 sm:$0xff]  }
 0x949   :  { %v6162_v16 = vadd.f32 %v6161_v49, %v6157_v46  ;;  %v9494_v46 = vld [vmem:[%s11083_s10 + $0x144] ss:$8 sps:$4 sm:$0xff]   ;;  %v9492_v49 = vld [vmem:[%s11083_s10 + $0x140] ss:$8 sps:$4 sm:$0xff]  }
 0x94a   :  { %v6166_v37 = vadd.f32 %v6165_v17, %v6160_v51  ;;  %v9497_v51 = vld [vmem:[%s11083_s10 + $0x154] ss:$8 sps:$4 sm:$0xff]  }
 0x94b   :  { %6163 = vadd.xlane.f32.xlu0 %v6162_v16  ;;  %6563 = vmatpush1.bf16.msra.mxu1 %v9474_v62 }
 0x94c   :  { %6167 = vadd.xlane.f32.xlu1 %v6166_v37  ;;  %6564 = vmatprep.subr.bf16.mxu1 %v9479_v60  ;;  %v6193_v37 = vrot.slane %v6136_v33, %v10654_v24  ;;  %v6282_v60 = vld [vmem:[#allocation19] sm:$0x3] }
 0x94f   :  { %6565 = vmatpush1.bf16.msra.mxu1 %v9477_v48  ;;  %v6291_v48 = vrot.slane %v6282_v60, %v10650_v21 }
 0x950   :  { %6577 = vmatprep.subr.bf16.mxu1 %v9482_v63  ;;  %v6287_v63 = vrot.slane %v6282_v60, %v10648_v8  ;;  %v9551_v60 = vld [vmem:[#allocation25 + $0x74] ss:$8 sps:$4 sm:$0xff]  }
 0x9d8   :  { %v6164_v31 = vpop.xlane.xlu0 %6163 }
 0x9d9   :  { %v6169_v54 = vmul.f32 0.0026041667, %v6164_v31  ;;  %v6168_v0 = vpop.xlane.xlu1 %6167 }
 0x9da   :  { %v6170_v35 = vmul.f32 0.0026041667, %v6168_v0 }
 0x9db   :  { %v6171_v27 = vadd.f32 1e-05, %v6169_v54 }
 0x9dc   :  { %v6172_v57 = vadd.f32 1e-05, %v6170_v35 }
 0x9dd   :  { %9592 = vrsqrt.f32 %v6171_v27 }
 0x9de   :  { %9594 = vrsqrt.f32 %v6172_v57 }
 0x9e7   :  { %v9593_v50 = vpop.eup %9592 }
 0x9e8   :  { %v9595_v32 = vpop.eup %9594  ;;  %v6176_v3 = vmul.f32 %v9593_v50, %v6150_v26  ;;  %v6175_v4 = vmul.f32 %v9593_v50, %v6149_v25  ;;  %v9480_v25 = vld [vmem:[%s11083_s10 + $0x100] ss:$8 sps:$4 sm:$0xff]   ;;  %v6177_v16 = vmul.f32 %v9593_v50, %v10877_v36 }
 0x9e9   :  { %v6179_v5 = vmul.f32 %v9595_v32, %v6153_v43  ;;  %v6178_v34 = vmul.f32 %v9595_v32, %v6152_v28  ;;  %v9483_v28 = vld [vmem:[%s11083_s10 + $0x110] ss:$8 sps:$4 sm:$0xff]   ;;  %v10142_v43 = vmov 0   ;;  %v6180_v17 = vmul.f32 %v9595_v32, %v10879_v39  ;;  %v9498_v36 = vld [vmem:[%s11083_s10 + $0x160] ss:$8 sps:$4 sm:$0xff]  }
 0x9ea   :  { %v6198_v6 = vmul.f32 %v6189_v14, %v6176_v3  ;;  %v6197_v29 = vmul.f32 %v6185_v2, %v6175_v4  ;;  %v6199_v58 = vmul.f32 %v6193_v37, %v6177_v16  ;;  %v9503_v39 = vld [vmem:[%s11083_s10 + $0x174] ss:$8 sps:$4 sm:$0xff]   ;;  %v9504_v3 = vld [vmem:[#allocation23] ss:$8 sps:$4 sm:$0xff]  }
 0x9eb   :  { %v6201_v7 = vmul.f32 %v6189_v14, %v6179_v5  ;;  %v6200_v44 = vmul.f32 %v6185_v2, %v6178_v34  ;;  %v6202_v18 = vmul.f32 %v6193_v37, %v6180_v17  ;;  %v9507_v4 = vld [vmem:[#allocation25] ss:$8 sps:$4 sm:$0xff]   ;;  %v9512_v5 = vld [vmem:[#allocation23 + $0x14] ss:$8 sps:$4 sm:$0xff]  }
 0x9ec   :  { %v6220_v9 = vadd.f32 %v6211_v45, %v6198_v6  ;;  %v6219_v11 = vadd.f32 %v6207_v42, %v6197_v29  ;;  %v6221_v15 = vadd.f32 %v6215_v59, %v6199_v58  ;;  %v9515_v34 = vld [vmem:[#allocation25 + $0x14] ss:$8 sps:$4 sm:$0xff]   ;;  %v9510_v6 = vld [vmem:[#allocation23 + $0x10] ss:$8 sps:$4 sm:$0xff]  }
 0x9ed   :  { %v6223_v22 = vadd.f32 %v6211_v45, %v6201_v7  ;;  %v6222_v13 = vadd.f32 %v6207_v42, %v6200_v44  ;;  %v6224_v55 = vadd.f32 %v6215_v59, %v6202_v18  ;;  %v9506_v45 = vld [vmem:[#allocation23 + $0x4] ss:$8 sps:$4 sm:$0xff]   ;;  %v9513_v29 = vld [vmem:[#allocation25 + $0x10] ss:$8 sps:$4 sm:$0xff]  }
 0x9ee   :  { %v6226_v30 = vmax.f32 %v6220_v9, 0.0  ;;  %v6225_v53 = vmax.f32 %v6219_v11, 0.0  ;;  %v6227_v24 = vmax.f32 %v6221_v15, 0.0  ;;  %v9509_v42 = vld [vmem:[#allocation25 + $0x4] ss:$8 sps:$4 sm:$0xff]  }
 0x9ef   :  { %v6229_v19 = vmax.f32 %v6223_v22, 0.0  ;;  %v6228_v10 = vmax.f32 %v6222_v13, 0.0  ;;  %v6230_v61 = vmax.f32 %v6224_v55, 0.0  ;;  %6869 = vmatprep.subr.bf16.mxu0 %v9509_v42  ;;  %v9518_v7 = vld [vmem:[#allocation23 + $0x24] ss:$8 sps:$4 sm:$0xff]  }
 0x9f0   :  { %6870 = vmatpush1.bf16.msra.mxu0 %v9507_v4  ;;  %v9521_v44 = vld [vmem:[#allocation25 + $0x24] ss:$8 sps:$4 sm:$0xff]   ;;  %v9516_v9 = vld [vmem:[#allocation23 + $0x20] ss:$8 sps:$4 sm:$0xff]   ;;  %v9524_v22 = vld [vmem:[#allocation23 + $0x34] ss:$8 sps:$4 sm:$0xff]  }
 0x9f1   :  { %v6232_v23 = vpack.c.bf16 %v6229_v19, %v6226_v30  ;;  %v6231_v26 = vpack.c.bf16 %v6228_v10, %v6225_v53  ;;  %v6233_v62 = vpack.c.bf16 %v6230_v61, %v6227_v24  ;;  %6871 = vmatprep.subr.bf16.mxu0 %v9515_v34  ;;  %v9519_v11 = vld [vmem:[#allocation25 + $0x20] ss:$8 sps:$4 sm:$0xff]   ;;  %v9527_v13 = vld [vmem:[#allocation25 + $0x34] ss:$8 sps:$4 sm:$0xff]   ;;  %v9522_v30 = vld [vmem:[#allocation23 + $0x30] ss:$8 sps:$4 sm:$0xff]  }
 0x9f2   :  { %v9525_v19 = vld [vmem:[#allocation25 + $0x30] ss:$8 sps:$4 sm:$0xff]   ;;  %v9530_v53 = vld [vmem:[#allocation23 + $0x44] ss:$8 sps:$4 sm:$0xff]   ;;  %v9540_v15 = vld [vmem:[#allocation23 + $0x60] ss:$8 sps:$4 sm:$0xff]  }
 0x9f3   :  { %6566 = vmatprep.mubr.bf16.mxu1 %v6232_v23  ;;  %v9533_v10 = vld [vmem:[#allocation25 + $0x44] ss:$8 sps:$4 sm:$0xff]   ;;  %v9528_v23 = vld [vmem:[#allocation23 + $0x40] ss:$8 sps:$4 sm:$0xff]   ;;  %v9546_v24 = vld [vmem:[#allocation23 + $0x70] ss:$8 sps:$4 sm:$0xff]  }
 0x9f4   :  { %6567 = vmatmul.mubr.bf16.vlgmr.msra.gmra.mrb[20].mxu1 %v6231_v26  ;;  %6872 = vmatpush1.bf16.msra.mxu0 %v9513_v29  ;;  %v9536_v26 = vld [vmem:[#allocation23 + $0x54] ss:$8 sps:$4 sm:$0xff]   ;;  %v9542_v55 = vld [vmem:[#allocation23 + $0x64] ss:$8 sps:$4 sm:$0xff]   ;;  %v9543_v61 = vld [vmem:[#allocation25 + $0x60] ss:$8 sps:$4 sm:$0xff]  }
 0x9f5   :  { %6578 = vmatpush1.bf16.msra.mxu1 %v9480_v25  ;;  %6609 = vmatprep.mubr.bf16.mxu1 %v10142_v43  ;;  %v9531_v25 = vld [vmem:[#allocation25 + $0x40] ss:$8 sps:$4 sm:$0xff]   ;;  %v9573_v4 = vld [vmem:[#allocation25 + $0xb0] ss:$8 sps:$4 sm:$0xff]  }
 0x9f6   :  { %6579 = vmatprep.subr.bf16.mxu1 %v9485_v47  ;;  %6873 = vmatprep.subr.bf16.mxu0 %v9521_v44  ;;  %v9534_v47 = vld [vmem:[#allocation23 + $0x50] ss:$8 sps:$4 sm:$0xff]   ;;  %v6620_v44 = vld [vmem:[#allocation20] sm:$0x3] }
 0x9f8   :  { %6874 = vmatpush1.bf16.msra.mxu0 %v9519_v11  ;;  %v6668_v11 = vrot.slane %v6620_v44, %v10650_v21 }
 0x9f9   :  { %6580 = vmatpush1.bf16.msra.mxu1 %v9483_v28  ;;  %6875 = vmatprep.subr.bf16.mxu0 %v9527_v13 }
 0x9fa   :  { %6581 = vmatprep.subr.bf16.mxu1 %v9488_v40 }
 0x9fc   :  { %6876 = vmatpush1.bf16.msra.mxu0 %v9525_v19 }
 0x9fd   :  { %6582 = vmatpush1.bf16.msra.mxu1 %v9486_v38  ;;  %6877 = vmatprep.subr.bf16.mxu0 %v9533_v10 }
 0x9fe   :  { %6583 = vmatprep.subr.bf16.mxu1 %v9491_v52 }
 0xa00   :  { %6878 = vmatpush1.bf16.msra.mxu0 %v9531_v25 }
 0xa01   :  { %6584 = vmatpush1.bf16.msra.mxu1 %v9489_v41 }
 0xa02   :  { %6585 = vmatprep.subr.bf16.mxu1 %v9494_v46 }
 0xa05   :  { %6586 = vmatpush1.bf16.msra.mxu1 %v9492_v49 }
 0xa06   :  { %6587 = vmatprep.subr.bf16.mxu1 %v9497_v51 }
 0xa09   :  { %6588 = vmatpush1.bf16.msra.mxu1 %v9495_v56 }
 0xa0a   :  { %6589 = vmatprep.subr.bf16.mxu1 %v9500_v20 }
 0xa0d   :  { %6590 = vmatpush1.bf16.msra.mxu1 %v9498_v36  ;;  %v9539_v36 = vld [vmem:[#allocation25 + $0x54] ss:$8 sps:$4 sm:$0xff]  }
 0xa0e   :  { %6591 = vmatprep.subr.bf16.mxu1 %v9503_v39  ;;  %v9537_v39 = vld [vmem:[#allocation25 + $0x50] ss:$8 sps:$4 sm:$0xff]   ;;  %6879 = vmatprep.subr.bf16.mxu0 %v9539_v36 }
 0xa0f   :  { %6880 = vmatpush1.bf16.msra.mxu0 %v9537_v39 }
 0xa11   :  { %6592 = vmatpush1.bf16.msra.mxu1 %v9501_v12  ;;  %v9545_v12 = vld [vmem:[#allocation25 + $0x64] ss:$8 sps:$4 sm:$0xff]  }
 0xa12   :  { %7033 = vmatprep.subr.bf16.mxu1 %v9506_v45  ;;  %6881 = vmatprep.subr.bf16.mxu0 %v9545_v12  ;;  %v9570_v45 = vld [vmem:[#allocation23 + $0xb0] ss:$8 sps:$4 sm:$0xff]  }
 0xa13   :  { %6882 = vmatpush1.bf16.msra.mxu0 %v9543_v61 }
 0xa14   :  { %6610 = vmatmul.mubr.bf16.vlgmr.msra.gmra.mrb[20].mxu1 %v6233_v62  ;;  %v9548_v62 = vld [vmem:[#allocation23 + $0x74] ss:$8 sps:$4 sm:$0xff]   ;;  %6883 = vmatprep.subr.bf16.mxu0 %v9551_v60 }
 0xa15   :  { %7034 = vmatpush1.bf16.msra.mxu1 %v9504_v3  ;;  %v9575_v3 = vld [vmem:[#allocation25 + $0xb4] ss:$8 sps:$4 sm:$0xff]  }
 0xa16   :  { %7035 = vmatprep.subr.bf16.mxu1 %v9512_v5 }
 0xa19   :  { %7036 = vmatpush1.bf16.msra.mxu1 %v9510_v6 }
 0xa1a   :  { %7037 = vmatprep.subr.bf16.mxu1 %v9518_v7 }
 0xa1d   :  { %7038 = vmatpush1.bf16.msra.mxu1 %v9516_v9  ;;  %v6621_v9 = vld [vmem:[#allocation22] sm:$0x3] }
 0xa1e   :  { %7039 = vmatprep.subr.bf16.mxu1 %v9524_v22  ;;  %v6664_v22 = vrot.slane %v6620_v44, %v10648_v8  ;;  %v6683_v19 = vrot.slane %v6621_v9, %v10650_v21  ;;  %v6679_v10 = vrot.slane %v6621_v9, %v10648_v8  ;;  %v9584_v44 = vld [vmem:[%s11092_s19 + $0x40] sm:$0xff]   ;;  %v9585_v9 = vld [vmem:[%s11092_s19 + $0x48] sm:$0xff]  }
 0xa21   :  { %7040 = vmatpush1.bf16.msra.mxu1 %v9522_v30 }
 0xa22   :  { %7041 = vmatprep.subr.bf16.mxu1 %v9530_v53 }
 0xa25   :  { %7042 = vmatpush1.bf16.msra.mxu1 %v9528_v23 }
 0xa26   :  { %7043 = vmatprep.subr.bf16.mxu1 %v9536_v26 }
 0xa29   :  { %7044 = vmatpush1.bf16.msra.mxu1 %v9534_v47 }
 0xa2a   :  { %7045 = vmatprep.subr.bf16.mxu1 %v9542_v55 }
 0xa2d   :  { %7046 = vmatpush1.bf16.msra.mxu1 %v9540_v15 }
 0xa2e   :  { %7047 = vmatprep.subr.bf16.mxu1 %v9548_v62 }
 0xa31   :  { %7048 = vmatpush1.bf16.msra.mxu1 %v9546_v24 }
 0xae7   :  { %v6611_v31 = vpop.f32.mrb[20].mxu1 }
 0xae8   :  { %v6613_v54 = vpop.f32.mrb[21].mxu1  ;;  %v8271_v27 = vadd.f32 %v6611_v31, %v6287_v63  ;;  %v9557_v31 = vld [vmem:[#allocation25 + $0x84] ss:$8 sps:$4 sm:$0xff]  }
 0xae9   :  { %v8272_v0 = vadd.f32 %v6613_v54, %v6291_v48  ;;  %v6615_v35 = vpop.f32.mrb[22].mxu1  ;;  %v9552_v54 = vld [vmem:[#allocation23 + $0x80] ss:$8 sps:$4 sm:$0xff]  }
 0xaea   :  { %v6617_v57 = vpop.f32.mrb[23].mxu1  ;;  %v8273_v14 = vadd.f32 %v6615_v35, %v6287_v63  ;;  %v9554_v63 = vld [vmem:[#allocation23 + $0x84] ss:$8 sps:$4 sm:$0xff]   ;;  %v9555_v35 = vld [vmem:[#allocation25 + $0x80] ss:$8 sps:$4 sm:$0xff]  }
 0xaeb   :  { %v8274_v33 = vadd.f32 %v6617_v57, %v6291_v48  ;;  %v6623_v1 = vsel %vm6622_vm1, %v8272_v0, 0.0  ;;  %v9549_v48 = vld [vmem:[#allocation25 + $0x70] ss:$8 sps:$4 sm:$0xff]   ;;  %7049 = vmatprep.subr.bf16.mxu1 %v9554_v63 }
 0xaec   :  { %v6624_v2 = vadd.f32 %v8271_v27, %v6623_v1  ;;  %6884 = vmatpush1.bf16.msra.mxu0 %v9549_v48  ;;  %7050 = vmatpush1.bf16.msra.mxu1 %v9552_v54  ;;  %v9558_v57 = vld [vmem:[#allocation23 + $0x90] ss:$8 sps:$4 sm:$0xff]  }
 0xaed   :  { %v6627_v50 = vsel %vm6622_vm1, %v8274_v33, 0.0  ;;  %6885 = vmatprep.subr.bf16.mxu0 %v9557_v31  ;;  %v9561_v1 = vld [vmem:[#allocation25 + $0x90] ss:$8 sps:$4 sm:$0xff]  }
 0xaee   :  { %6625 = vadd.xlane.f32.xlu0 %v6624_v2  ;;  %v6628_v32 = vadd.f32 %v8273_v14, %v6627_v50  ;;  %v9564_v2 = vld [vmem:[#allocation23 + $0xa0] ss:$8 sps:$4 sm:$0xff]   ;;  %v9572_v50 = vld [vmem:[#allocation23 + $0xb4] ss:$8 sps:$4 sm:$0xff]  }
 0xaf0   :  { %6629 = vadd.xlane.f32.xlu1 %v6628_v32  ;;  %6886 = vmatpush1.bf16.msra.mxu0 %v9555_v35  ;;  %v9567_v32 = vld [vmem:[#allocation25 + $0xa0] ss:$8 sps:$4 sm:$0xff]  }
 0xb7b   :  { %v6626_v28 = vpop.xlane.xlu0 %6625 }
 0xb7c   :  { %v6632_v40 = vmul.f32 0.0052083335, %v6626_v28 }
 0xb7d   :  { %v6630_v38 = vpop.xlane.xlu1 %6629 }
 0xb7e   :  { %v10982_v52 = vsub.f32 %v8271_v27, %v6632_v40  ;;  %v10984_v41 = vsub.f32 %v8272_v0, %v6632_v40  ;;  %v6633_v46 = vmul.f32 0.0052083335, %v6630_v38  ;;  %v9560_v0 = vld [vmem:[#allocation23 + $0x94] ss:$8 sps:$4 sm:$0xff]  }
 0xb7f   :  { %v9563_v27 = vld [vmem:[#allocation25 + $0x94] ss:$8 sps:$4 sm:$0xff]   ;;  %7051 = vmatprep.subr.bf16.mxu1 %v9560_v0 }
 0xb80   :  { %v10986_v49 = vsub.f32 %v8273_v14, %v6633_v46  ;;  %v10988_v51 = vsub.f32 %v8274_v33, %v6633_v46  ;;  %v6638_v17 = vmul.f32 %v10982_v52, %v10982_v52  ;;  %v6639_v16 = vmul.f32 %v10984_v41, %v10984_v41  ;;  %v9566_v33 = vld [vmem:[#allocation23 + $0xa4] ss:$8 sps:$4 sm:$0xff]   ;;  %6887 = vmatprep.subr.bf16.mxu0 %v9563_v27 }
 0xb81   :  { %v9569_v14 = vld [vmem:[#allocation25 + $0xa4] ss:$8 sps:$4 sm:$0xff]   ;;  %7052 = vmatpush1.bf16.msra.mxu1 %v9558_v57  ;;  %6888 = vmatpush1.bf16.msra.mxu0 %v9561_v1  ;;  %v9576_v57 = vld [vmem:[%s11092_s19] sm:$0xff]  }
 0xb82   :  { %v6642_v37 = vsel %vm6622_vm1, %v6639_v16, 0.0  ;;  %v6640_v56 = vmul.f32 %v10986_v49, %v10986_v49  ;;  %v6641_v20 = vmul.f32 %v10988_v51, %v10988_v51  ;;  %7053 = vmatprep.subr.bf16.mxu1 %v9566_v33  ;;  %6889 = vmatprep.subr.bf16.mxu0 %v9569_v14  ;;  %v9577_v33 = vld [vmem:[%s11092_s19 + $0x8] sm:$0xff]   ;;  %v9578_v1 = vld [vmem:[%s11092_s19 + $0x10] sm:$0xff]   ;;  %v9579_v14 = vld [vmem:[%s11092_s19 + $0x18] sm:$0xff]  }
 0xb83   :  { %v6643_v18 = vadd.f32 %v6642_v37, %v6638_v17 }
 0xb84   :  { %v6646_v58 = vsel %vm6622_vm1, %v6641_v20, 0.0 }
 0xb85   :  { %6644 = vadd.xlane.f32.xlu0 %v6643_v18  ;;  %v6647_v59 = vadd.f32 %v6646_v58, %v6640_v56  ;;  %7054 = vmatpush1.bf16.msra.mxu1 %v9564_v2  ;;  %v9580_v2 = vld [vmem:[%s11092_s19 + $0x20] sm:$0xff]  }
 0xb86   :  { %7055 = vmatprep.subr.bf16.mxu1 %v9572_v50  ;;  %6890 = vmatpush1.bf16.msra.mxu0 %v9567_v32  ;;  %v9581_v50 = vld [vmem:[%s11092_s19 + $0x28] sm:$0xff]  }
 0xb87   :  { %6648 = vadd.xlane.f32.xlu1 %v6647_v59  ;;  %6891 = vmatprep.subr.bf16.mxu0 %v9575_v3 }
 0xb89   :  { %7056 = vmatpush1.bf16.msra.mxu1 %v9570_v45 }
 0xb8a   :  { %6892 = vmatpush1.bf16.msra.mxu0 %v9573_v4 }
 0xb8b   :  { %7244 = vmatprep.subr.bf16.mxu0 %v10142_v43 }
 0xc12   :  { %v6645_v42 = vpop.xlane.xlu0 %6644 }
 0xc13   :  { %v6650_v5 = vmul.f32 0.0052083335, %v6645_v42 }
 0xc14   :  { %v6649_v34 = vpop.xlane.xlu1 %6648 }
 0xc15   :  { %v6652_v6 = vadd.f32 1e-05, %v6650_v5  ;;  %v6651_v29 = vmul.f32 0.0052083335, %v6649_v34 }
 0xc17   :  { %9596 = vrsqrt.f32 %v6652_v6  ;;  %v6653_v7 = vadd.f32 1e-05, %v6651_v29  ;;  %v9582_v29 = vld [vmem:[%s11092_s19 + $0x30] sm:$0xff]  }
 0xc19   :  { %9598 = vrsqrt.f32 %v6653_v7  ;;  %v9583_v7 = vld [vmem:[%s11092_s19 + $0x38] sm:$0xff]  }
 0xc21   :  { %v9597_v13 = vpop.eup %9596 }
 0xc22   :  { %v6657_v30 = vmul.f32 %v9597_v13, %v10984_v41  ;;  %v6656_v53 = vmul.f32 %v9597_v13, %v10982_v52 }
 0xc23   :  { %v9599_v23 = vpop.eup %9598 }
 0xc24   :  { %v6672_v25 = vmul.f32 %v6668_v11, %v6657_v30  ;;  %v6671_v26 = vmul.f32 %v6664_v22, %v6656_v53  ;;  %v6659_v47 = vmul.f32 %v9599_v23, %v10988_v51  ;;  %v6658_v28 = vmul.f32 %v9599_v23, %v10986_v49  ;;  %v7074_v49 = vld [vmem:[#allocation26] sm:$0x3]  ;;  %v7088_v53 = vld [vmem:[#allocation28] sm:$0x3] }
 0xc25   :  { %v7083_v12 = vrot.slane %v7074_v49, %v10650_v21  ;;  %v7079_v24 = vrot.slane %v7074_v49, %v10648_v8  ;;  %v7116_v23 = vrot.slane %v7088_v53, %v10650_v21 }
 0xc26   :  { %v6687_v40 = vadd.f32 %v6683_v19, %v6672_v25  ;;  %v6686_v38 = vadd.f32 %v6679_v10, %v6671_v26  ;;  %v6674_v46 = vmul.f32 %v6668_v11, %v6659_v47  ;;  %v6673_v17 = vmul.f32 %v6664_v22, %v6658_v28  ;;  %v9586_v11 = vld [vmem:[%s11092_s19 + $0x50] sm:$0xff]   ;;  %v9587_v22 = vld [vmem:[%s11092_s19 + $0x58] sm:$0xff]  }
 0xc27   :  { %v7112_v25 = vrot.slane %v7088_v53, %v10648_v8 }
 0xc28   :  { %v6691_v16 = vmax.f32 %v6687_v40, 0.0  ;;  %v6690_v37 = vmax.f32 %v6686_v38, 0.0  ;;  %v6689_v41 = vadd.f32 %v6683_v19, %v6674_v46  ;;  %v6688_v56 = vadd.f32 %v6679_v10, %v6673_v17  ;;  %v7089_v10 = vld [vmem:[#allocation29] sm:$0x3] }
 0xc29   :  { %v7129_v28 = vrot.slane %v7089_v10, %v10650_v21  ;;  %v7125_v38 = vrot.slane %v7089_v10, %v10648_v8 }
 0xc2a   :  { %v6695_v20 = vpack.c.bf16 %v6691_v16, %v6691_v16  ;;  %v6694_v18 = vpack.c.bf16 %v6690_v37, %v6690_v37  ;;  %v6693_v52 = vmax.f32 %v6689_v41, 0.0  ;;  %v6692_v58 = vmax.f32 %v6688_v56, 0.0 }
 0xc2c   :  { %8170 = vmatprep.mubr.msk.bf16.mxu1 %vm6622_vm1, %v6695_v20  ;;  %v6721_v59 = vpack.c.bf16 %v6693_v52, %v6693_v52  ;;  %v6720_v36 = vpack.c.bf16 %v6692_v58, %v6692_v58 }
 0xc2d   :  { %7066 = vmatmul.mubr.bf16.vlgmr.msra.gmra.mrb[24].mxu1 %v6694_v18  ;;  %v8171_v18 = vld [vmem:[#allocation31] ss:$0 sm:$0xff] }
 0xc2e   :  { %8145 = vmatprep.mubr.msk.bf16.mxu0 %vm6622_vm1, %v6721_v59 }
 0xc2f   :  { %6902 = vmatmul.mubr.bf16.vlgmr.msra.gmra.mrb[8].mxu0 %v6720_v36 }
 0xc30   :  { %7245 = vmatpush1.bf16.msra.mxu0 %v9576_v57 }
 0xc31   :  { %7246 = vmatprep.subr.bf16.mxu0 %v10142_v43 }
 0xc34   :  { %7247 = vmatpush1.bf16.msra.mxu0 %v9577_v33  ;;  %v8188_v33 = vld [vmem:[#allocation2] ss:$0 sm:$0xff] }
 0xc35   :  { %7248 = vmatprep.subr.bf16.mxu0 %v10142_v43 }
 0xc38   :  { %7249 = vmatpush1.bf16.msra.mxu0 %v9578_v1 }
 0xc39   :  { %7250 = vmatprep.subr.bf16.mxu0 %v10142_v43 }
 0xc3c   :  { %7251 = vmatpush1.bf16.msra.mxu0 %v9579_v14 }
 0xc3d   :  { %7252 = vmatprep.subr.bf16.mxu0 %v10142_v43 }
 0xc40   :  { %7253 = vmatpush1.bf16.msra.mxu0 %v9580_v2 }
 0xc41   :  { %7254 = vmatprep.subr.bf16.mxu0 %v10142_v43 }
 0xc44   :  { %7255 = vmatpush1.bf16.msra.mxu0 %v9581_v50 }
 0xc45   :  { %7256 = vmatprep.subr.bf16.mxu0 %v10142_v43 }
 0xc48   :  { %7257 = vmatpush1.bf16.msra.mxu0 %v9582_v29 }
 0xc49   :  { %7258 = vmatprep.subr.bf16.mxu0 %v10142_v43 }
 0xc4c   :  { %7259 = vmatpush1.bf16.msra.mxu0 %v9583_v7 }
 0xc4d   :  { %7260 = vmatprep.subr.bf16.mxu0 %v10142_v43 }
 0xc50   :  { %7261 = vmatpush1.bf16.msra.mxu0 %v9584_v44 }
 0xc51   :  { %7262 = vmatprep.subr.bf16.mxu0 %v10142_v43 }
 0xc54   :  { %7263 = vmatpush1.bf16.msra.mxu0 %v9585_v9 }
 0xc55   :  { %7264 = vmatprep.subr.bf16.mxu0 %v10142_v43 }
 0xc58   :  { %7265 = vmatpush1.bf16.msra.mxu0 %v9586_v11 }
 0xc59   :  { %7266 = vmatprep.subr.bf16.mxu0 %v10142_v43 }
 0xc5c   :  { %7267 = vmatpush1.bf16.msra.mxu0 %v9587_v22 }
 0xd00   :  { %v7067_v51 = vpop.f32.mrb[24].mxu1 }
 0xd01   :  { %v7069_v39 = vpop.f32.mrb[25].mxu1 }
 0xd02   :  { %v6903_v55 = vpop.f32.mrb[8].mxu0  ;;  %v7071_v15 = vpop.f32.mrb[26].mxu1 }
 0xd03   :  { %v7068_v61 = vadd.f32 %v7067_v51, %v6903_v55  ;;  %v6905_v62 = vpop.f32.mrb[9].mxu0  ;;  %v7072_v60 = vpop.f32.mrb[27].mxu1 }
 0xd04   :  { %v7070_v48 = vadd.f32 %v7069_v39, %v6905_v62  ;;  %v6907_v63 = vpop.f32.mrb[10].mxu0  ;;  %v8185_v60 = vld [vmem:[#allocation32] ss:$0 sm:$0xff] }
 0xd05   :  { %v6908_v31 = vpop.f32.mrb[11].mxu0  ;;  %v7086_v0 = vadd.f32 %v7079_v24, %v7068_v61  ;;  %v8186_v63 = vld [vmem:[#allocation34] ss:$0 sm:$0xff] }
 0xd06   :  { %v7087_v54 = vadd.f32 %v7083_v12, %v7070_v48 }
 0xd08   :  { %v7090_v35 = vsel %vm6622_vm1, %v7087_v54, 0.0 }
 0xd09   :  { %v7091_v27 = vadd.f32 %v7090_v35, %v7086_v0 }
 0xd0b   :  { %7092 = vadd.xlane.f32.xlu0 %v7091_v27 }
 0xd98   :  { %v7093_v32 = vpop.xlane.xlu0 %7092 }
 0xd99   :  { %v7094_v3 = vmul.f32 0.0052083335, %v7093_v32 }
 0xd9b   :  { %v7095_v45 = vsub.f32 %v7086_v0, %v7094_v3  ;;  %v7096_v4 = vsub.f32 %v7087_v54, %v7094_v3  ;;  %v8187_v0 = vld [vmem:[#allocation35] ss:$0 sm:$0xff] }
 0xd9d   :  { %v7097_v42 = vmul.f32 %v7095_v45, %v7095_v45  ;;  %v7098_v5 = vmul.f32 %v7096_v4, %v7096_v4 }
 0xd9f   :  { %v7099_v34 = vsel %vm6622_vm1, %v7098_v5, 0.0 }
 0xda0   :  { %v7100_v6 = vadd.f32 %v7099_v34, %v7097_v42 }
 0xda2   :  { %7101 = vadd.xlane.f32.xlu1 %v7100_v6 }
 0xe2f   :  { %v7102_v13 = vpop.xlane.xlu1 %7101 }
 0xe30   :  { %v7103_v30 = vmul.f32 0.0052083335, %v7102_v13 }
 0xe32   :  { %v7104_v19 = vadd.f32 1e-05, %v7103_v30 }
 0xe34   :  { %9600 = vrsqrt.f32 %v7104_v19 }
 0xe3e   :  { %v9601_v26 = vpop.eup %9600 }
 0xe3f   :  { %v7107_v47 = vmul.f32 %v9601_v26, %v7096_v4  ;;  %v7106_v40 = vmul.f32 %v9601_v26, %v7095_v45 }
 0xe41   :  { %v7120_v46 = vmul.f32 %v7116_v23, %v7107_v47  ;;  %v7119_v43 = vmul.f32 %v7112_v25, %v7106_v40 }
 0xe43   :  { %v7133_v17 = vadd.f32 %v7129_v28, %v7120_v46  ;;  %v7132_v16 = vadd.f32 %v7125_v38, %v7119_v43 }
 0xe45   :  { %v7135_v37 = vmax.f32 %v7133_v17, 0.0  ;;  %v7134_v41 = vmax.f32 %v7132_v16, 0.0 }
 0xe47   :  { %v7137_v56 = vpack.c.bf16 %v7135_v37, %v7135_v37  ;;  %v7136_v20 = vpack.c.bf16 %v7134_v41, %v7134_v41 }
 0xe49   :  { %8184 = vmatprep.mubr.msk.bf16.mxu0 %vm6622_vm1, %v7137_v56 }
 0xe4a   :  { %7277 = vmatmul.mubr.bf16.vlgmr.msra.gmra.mrb[12].mxu0 %v7136_v20 }
 0xf1d   :  { %v7278_v52 = vpop.f32.mrb[12].mxu0 }
 0xf1e   :  { %v7279_v58 = vadd.f32 %v8171_v18, %v7278_v52  ;;  %v7280_v59 = vpop.f32.mrb[13].mxu0 }
 0xf1f   :  { %v7281_v36 = vpop.f32.mrb[14].mxu0 }
 0xf20   :  { %v7282_v21 = vpop.f32.mrb[15].mxu0  ;;  %v7286_v49 = vsel %vm6622_vm1, %v7279_v58, 0.0 }
 0xf21   :  { %7287 = vadd.xlane.f32.xlu0 %v7286_v49 }
 0xfae   :  { %v7288_v8 = vpop.xlane.xlu0 %7287 }
 0xfaf   :  { %v7290_v51 = vmul.f32 0.015625, %v7288_v8 }
 0xfb1   :  { %v7291_v39 = vsub.f32 %v7279_v58, %v7290_v51 }
 0xfb3   :  { %v7292_v55 = vmul.f32 %v7291_v39, %v7291_v39 }
 0xfb5   :  { %v7293_v15 = vsel %vm6622_vm1, %v7292_v55, 0.0 }
 0xfb6   :  { %7294 = vadd.xlane.f32.xlu1 %v7293_v15 }
0x1043   :  { %v7295_v12 = vpop.xlane.xlu1 %7294 }
0x1044   :  { %v7296_v61 = vmul.f32 0.015625, %v7295_v12 }
0x1046   :  { %v7297_v24 = vadd.f32 1e-05, %v7296_v61 }
0x1048   :  { %9602 = vrsqrt.f32 %v7297_v24 }
0x1052   :  { %v9603_v62 = vpop.eup %9602 }
0x1053   :  { %v7299_v48 = vmul.f32 %v9603_v62, %v7291_v39 }
0x1055   :  { %v7306_v31 = vmul.f32 %v8185_v60, %v7299_v48 }
0x1057   :  { %v7313_v54 = vadd.f32 %v8186_v63, %v7306_v31 }
0x1059   :  { %v7314_v35 = vmax.f32 %v7313_v54, 0.0 }
0x105b   :  { %v7322_v27 = vmul.f32 %v8187_v0, %v7314_v35 }
0x105d   :  { %v7323_v57 = vsel %vm6622_vm1, %v7322_v27, 0.0 }
0x105e   :  { %7324 = vadd.xlane.f32.xlu0 %v7323_v57 }
0x10eb   :  { %v7325_v1 = vpop.xlane.xlu0 %7324 }
0x10ec   :  { %v7333_v14 = vadd.f32 %v8188_v33, %v7325_v1 }
0x10ee   :  { %9604 = vtanh.f32 %v7333_v14 }
0x10f8   :  { %v9605_v2 = vpop.eup %9604 }
0x10f9   :  { %7336 = vst.msk [vmem:[%s11098_s25] sm:$0xff] %vm7335_vm2, %v9605_v2 }
0x10fa   :  { %7341 = vsyncpa [#allocation4], 1 }
0x10fb   :  { %7342 = vsyncpa [#allocation6], 1 }
0x10fc   :  { %7343 = vsyncpa [#allocation9], 1 }
0x10fd   :  { %7344 = vsyncpa [#allocation12], 1 }
0x10fe   :  { %7345 = vsyncpa [#allocation15], 1 }
0x10ff   :  { %7346 = vsyncpa [#allocation18], 1 }
0x1100   :  { %7347 = vsyncpa [#allocation21], 1 }
0x1101   :  { %7348 = vsyncpa [#allocation24], 1 }
0x1102   :  { %7349 = vsyncpa [#allocation27], 1 }
0x1103   :  { %7350 = vsyncpa [#allocation30], 1 }
0x1104   :  { %7351 = vsyncpa [#allocation33], 1 }
0x1105   :  { %7352 = vsyncpa [#allocation36], 1 }

</bundles_post_ra>
